<compile_context>
chip_gen: v6e
topology: v6e:2x2x1
jax: 0.10.0
libtpu: 0.0.40
codegen_flags: <defaults>
</compile_context>

<pallas_src>
import jax
import jax.numpy as jnp
import numpy as np
from jax.experimental import pallas as pl
from jax.experimental.pallas import tpu as pltpu

# Fixed geometry implied by the module for a 3x16x16 input:
#   conv1 4x4/s2 : 16 -> 7  (C=32) ;  conv2 2x2/s1 : 7 -> 6 (C=64)
#   conv3 1x1/s1 :  6 -> 6  (C=64) ;  flatten 64*6*6=2304 -> fc1 256 -> fc2
H_IN, W_IN, C_IN = 16, 16, 3
S1, C1 = 7, 32
S2, C2 = 6, 64
L_IN = W_IN * C_IN            # 48   input row lane width (w, c)
L_INP = 128                   # input lanes padded to one dense 128-lane tile
L1 = S1 * C1                  # 224  conv1 output row lane width (wo, co)
L1P = 256                     # conv1 lanes padded to 256 (conv2 K tile)
L2 = S2 * C2                  # 384  conv2/conv3 output row lane width
FC1_OUT = 256
FC2_PAD = 128                 # fc2 columns padded to 128 for a lane-dense store


def _round_up(n, m):
    return ((n + m - 1) // m) * m


# ----------------------------- fused Pallas kernel ----------------------------- #
def cnn_fused_kernel(x_ref, w1_ref, b1_ref, w2_ref, b2_ref, w3_ref, b3_ref,
                     wf1_ref, bf1_ref, wf2_ref, bf2_ref, o_ref):
    """TB samples per grid step.  Activation layout: one (TB, lanes) tile per
    image row, lanes = (width, channel) with channel minor.  All matmuls are
    bf16 x bf16 with f32 accumulation (M = TB); every intermediate stays in
    VMEM/registers."""
    tb = o_ref.shape[0]

    # conv1: 4x4 stride 2 -> 7 output rows of (TB, 256).  Stride-2 in H is the
    # static row index 2*ho + i; stride-2 in W lives inside the banded weights.
    b1b = jnp.broadcast_to(b1_ref[...], (tb, L1P))
    a1 = []
    for ho in range(S1):
        acc = b1b
        for i in range(4):
            acc = acc + jnp.dot(x_ref[2 * ho + i], w1_ref[i],
                                preferred_element_type=jnp.float32)
        a1.append(jnp.maximum(acc, 0.0).astype(jnp.bfloat16))

    # conv2: 2x2 stride 1 (BatchNorm1 folded into w2/b2) -> 6 rows of (TB, 384)
    b2b = jnp.broadcast_to(b2_ref[...], (tb, L2))
    a2 = []
    for ho in range(S2):
        acc = b2b
        for j in range(2):
            acc = acc + jnp.dot(a1[ho + j], w2_ref[j],
                                preferred_element_type=jnp.float32)
        a2.append(jnp.maximum(acc, 0.0).astype(jnp.bfloat16))

    # conv3: 1x1 (BatchNorm2 folded), block-diagonal weight over width
    b3b = jnp.broadcast_to(b3_ref[...], (tb, L2))
    a3 = []
    for h in range(S2):
        z = b3b + jnp.dot(a2[h], w3_ref[...], preferred_element_type=jnp.float32)
        a3.append(jnp.maximum(z, 0.0).astype(jnp.bfloat16))

    # dropout(p=0.1): eval mode -> identity
    # TODO(synk): training-mode dropout (PRNG masking) not implemented.

    # fc1 + ReLU: fc1 weights re-ordered to (h, w*C, out) at setup, so the NCHW
    # flatten is just an accumulation over the 6 image rows (never materialized).
    acc = jnp.broadcast_to(bf1_ref[...], (tb, FC1_OUT))
    for h in range(S2):
        acc = acc + jnp.dot(a3[h], wf1_ref[h], preferred_element_type=jnp.float32)
    f1 = jnp.maximum(acc, 0.0).astype(jnp.bfloat16)

    # fc2 (output columns padded to 128 lanes -> one unmasked lane-dense store)
    z = jnp.dot(f1, wf2_ref[...], preferred_element_type=jnp.float32) + bf2_ref[...]
    o_ref[...] = z


# --------------------------- weight lowering (setup) --------------------------- #
def _conv_as_row_matmuls(w, w_in, stride):
    """Lower a torch-layout conv weight (C_out, C_in, kh, kw) acting on
    channels-last rows (lane index = w*C_in + c) to kh banded matmul weights:
        out[i, w*C_in + ci, wo*C_out + co] = w[co, ci, i, w - stride*wo]."""
    c_out, c_in, kh, kw = w.shape
    wo_n = (w_in - kw) // stride + 1
    m = np.zeros((kh, w_in * c_in, wo_n * c_out), np.float32)
    for i in range(kh):
        for wo in range(wo_n):
            for j in range(kw):
                wp = stride * wo + j
                m[i, wp * c_in:(wp + 1) * c_in,
                  wo * c_out:(wo + 1) * c_out] = w[:, :, i, j].T
    return m


def build_packed_params(raw):
    """Fold eval-mode BN into the downstream layer and lower every layer to the
    lane-dense, lane-padded matmul form the fused kernel consumes.  Runs once."""
    f = lambda a: np.asarray(a, np.float32)
    w1, b1 = f(raw["w1"]), f(raw["b1"])
    s1, t1 = f(raw["bn1_scale"]), f(raw["bn1_shift"])
    w2, b2 = f(raw["w2"]), f(raw["b2"])
    s2, t2 = f(raw["bn2_scale"]), f(raw["bn2_shift"])
    w3, b3 = f(raw["w3"]), f(raw["b3"])
    fc1_w, fc1_b = f(raw["fc1_w"]), f(raw["fc1_b"])
    fc2_w, fc2_b = f(raw["fc2_w"]), f(raw["fc2_b"])

    # BN(eval) comes AFTER ReLU in the module -> fold into the next conv:
    #   conv_w(relu*s + t) + b = conv_{w*s}(relu) + (b + conv_w(t))
    w2f = w2 * s1[None, :, None, None]
    b2f = b2 + np.einsum("ocij,c->o", w2, t1)
    w3m = w3[:, :, 0, 0]
    w3f = w3m * s2[None, :]
    b3f = b3 + w3m @ t2

    # conv1: pad input lanes 48 -> 128 and output lanes 224 -> 256
    W1 = _conv_as_row_matmuls(w1, W_IN, stride=2)                        # (4, 48, 224)
    W1p = np.zeros((4, L_INP, L1P), np.float32)
    W1p[:, :L_IN, :L1] = W1
    b1r = np.zeros((1, L1P), np.float32)
    b1r[0, :L1] = np.tile(b1, S1)

    # conv2: pad K rows 224 -> 256 to match conv1's padded output lanes
    W2 = _conv_as_row_matmuls(w2f, S1, stride=1)                         # (2, 224, 384)
    W2p = np.zeros((2, L1P, L2), np.float32)
    W2p[:, :L1, :] = W2
    b2r = np.tile(b2f, S2)[None, :]                                      # (1, 384)

    # conv3: 1x1 -> block-diagonal (384, 384)
    W3 = _conv_as_row_matmuls(w3f[:, :, None, None], S2, stride=1)[0]    # (384, 384)
    b3r = np.tile(b3f, S2)[None, :]                                      # (1, 384)

    # fc1: torch flattens NCHW -> feature index c*36 + h*6 + w.  Re-order rows
    # to our (h, w, c) activation layout and split per image row h.
    Wf1 = fc1_w.reshape(C2, S2, S2, FC1_OUT).transpose(1, 2, 0, 3) \
               .reshape(S2, L2, FC1_OUT)                                 # (6, 384, 256)
    bf1 = fc1_b[None, :]

    d_out = fc2_w.shape[1]
    Wf2 = np.zeros((FC1_OUT, FC2_PAD), np.float32)
    Wf2[:, :d_out] = fc2_w
    bf2 = np.zeros((1, FC2_PAD), np.float32)
    bf2[0, :d_out] = fc2_b

    bf16 = lambda a: jnp.asarray(a, jnp.bfloat16)
    f32 = lambda a: jnp.asarray(a, jnp.float32)
    return dict(w1=bf16(W1p), b1=f32(b1r), w2=bf16(W2p), b2=f32(b2r),
                w3=bf16(W3), b3=f32(b3r), wf1=bf16(Wf1), bf1=f32(bf1),
                wf2=bf16(Wf2), bf2=f32(bf2))


# ------------------------------- forward wrapper ------------------------------- #
def build_forward(packed, batch, out_dim, tb=None):
    # Batch tile: multiple of 8 sublanes; 128 is a good default (matches the
    # v5e MXU M; use 256 for v6e/v7x when batch is large).  Small batches are
    # padded up to one tile.
    if tb is None:
        tb = min(128, _round_up(batch, 8))
    padded_batch = _round_up(batch, tb)
    grid = (padded_batch // tb,)

    in_specs = [
        pl.BlockSpec((H_IN, tb, L_INP), lambda n: (0, n, 0)),     # x rows (H, TB, 128)
        pl.BlockSpec((4, L_INP, L1P), lambda n: (0, 0, 0)),       # W1
        pl.BlockSpec((1, L1P), lambda n: (0, 0)),                 # b1
        pl.BlockSpec((2, L1P, L2), lambda n: (0, 0, 0)),          # W2
        pl.BlockSpec((1, L2), lambda n: (0, 0)),                  # b2
        pl.BlockSpec((L2, L2), lambda n: (0, 0)),                 # W3
        pl.BlockSpec((1, L2), lambda n: (0, 0)),                  # b3
        pl.BlockSpec((S2, L2, FC1_OUT), lambda n: (0, 0, 0)),     # Wfc1
        pl.BlockSpec((1, FC1_OUT), lambda n: (0, 0)),             # bfc1
        pl.BlockSpec((FC1_OUT, FC2_PAD), lambda n: (0, 0)),       # Wfc2
        pl.BlockSpec((1, FC2_PAD), lambda n: (0, 0)),             # bfc2
    ]
    fused = pl.pallas_call(
        cnn_fused_kernel,
        out_shape=jax.ShapeDtypeStruct((padded_batch, FC2_PAD), jnp.float32),
        grid=grid,
        in_specs=in_specs,
        out_specs=pl.BlockSpec((tb, FC2_PAD), lambda n: (n, 0)),
        compiler_params=pltpu.CompilerParams(
            # Batch axis is parallel.  Weights have constant index_maps and stay
            # VMEM-resident across grid steps.
            dimension_semantics=("parallel",),
            vmem_limit_bytes=32 * 1024 * 1024,
        ),
    )

    @jax.jit
    def forward(x):
        # One fused transpose+reshape+pad+cast: NCHW -> (H, batch, W*C) rows,
        # lanes padded 48 -> 128, bf16, batch padded to a multiple of TB.
        xr = jnp.transpose(x, (2, 0, 3, 1)).reshape(H_IN, batch, L_IN)
        xr = jnp.pad(xr, ((0, 0), (0, padded_batch - batch), (0, L_INP - L_IN)))
        xr = xr.astype(jnp.bfloat16)
        out = fused(xr,
                    packed["w1"], packed["b1"], packed["w2"], packed["b2"],
                    packed["w3"], packed["b3"], packed["wf1"], packed["bf1"],
                    packed["wf2"], packed["bf2"])
        return out[:batch, :out_dim]

    return forward


# ----------------------- synthetic parameters & reference ---------------------- #
def conv_params(key, c_out, c_in, kh, kw):
    k1, k2 = jax.random.split(key)
    w = jax.random.normal(k1, (c_out, c_in, kh, kw), jnp.float32) / np.sqrt(c_in * kh * kw)
    b = 0.05 * jax.random.normal(k2, (c_out,), jnp.float32)
    return w, b


def bn_eval_params(key, c, eps=1e-5):
    k1, k2, k3, k4 = jax.random.split(key, 4)
    gamma = 1.0 + 0.1 * jax.random.normal(k1, (c,), jnp.float32)
    beta = 0.1 * jax.random.normal(k2, (c,), jnp.float32)
    mean = 0.1 * jax.random.normal(k3, (c,), jnp.float32)
    var = jax.random.uniform(k4, (c,), jnp.float32, minval=0.5, maxval=1.5)
    scale = gamma / jnp.sqrt(var + eps)
    shift = beta - mean * scale
    return scale, shift


def linear_params(key, d_in, d_out):
    k1, k2 = jax.random.split(key)
    w = jax.random.normal(k1, (d_in, d_out), jnp.float32) / np.sqrt(d_in)
    b = 0.05 * jax.random.normal(k2, (d_out,), jnp.float32)
    return w, b


def reference_forward(x, raw):
    """Pure-JAX f32 reference with PyTorch semantics (eval-mode BN & dropout)."""
    def conv(x, w, b, stride):
        y = jax.lax.conv_general_dilated(
            x, w, window_strides=(stride, stride), padding="VALID",
            dimension_numbers=("NCHW", "OIHW", "NCHW"))
        return y + b[None, :, None, None]

    y = conv(x, raw["w1"], raw["b1"], 2)
    y = jnp.maximum(y, 0.0)
    y = y * raw["bn1_scale"][None, :, None, None] + raw["bn1_shift"][None, :, None, None]
    y = conv(y, raw["w2"], raw["b2"], 1)
    y = jnp.maximum(y, 0.0)
    y = y * raw["bn2_scale"][None, :, None, None] + raw["bn2_shift"][None, :, None, None]
    y = conv(y, raw["w3"], raw["b3"], 1)
    y = jnp.maximum(y, 0.0)
    y = y.reshape(y.shape[0], -1)                      # NCHW flatten: (C,H,W) order
    y = jnp.maximum(y @ raw["fc1_w"] + raw["fc1_b"], 0.0)
    return y @ raw["fc2_w"] + raw["fc2_b"]


# ---------------------------------- main --------------------------------------- #
if __name__ == "__main__":
    key = jax.random.PRNGKey(0)
    keys = jax.random.split(key, 8)

    batch, out_dim = 2, 10
    x = jax.random.normal(keys[0], (batch, C_IN, H_IN, W_IN), jnp.float32)

    w1, b1 = conv_params(keys[1], 32, 3, 4, 4)
    bn1_scale, bn1_shift = bn_eval_params(keys[2], 32)
    w2, b2 = conv_params(keys[3], 64, 32, 2, 2)
    bn2_scale, bn2_shift = bn_eval_params(keys[4], 64)
    w3, b3 = conv_params(keys[5], 64, 64, 1, 1)
    fc1_w, fc1_b = linear_params(keys[6], C2 * S2 * S2, FC1_OUT)
    fc2_w, fc2_b = linear_params(keys[7], FC1_OUT, out_dim)

    raw = dict(w1=w1, b1=b1, bn1_scale=bn1_scale, bn1_shift=bn1_shift,
               w2=w2, b2=b2, bn2_scale=bn2_scale, bn2_shift=bn2_shift,
               w3=w3, b3=b3, fc1_w=fc1_w, fc1_b=fc1_b, fc2_w=fc2_w, fc2_b=fc2_b)

    packed = build_packed_params(raw)
    forward = build_forward(packed, batch, out_dim)

    logits = jax.block_until_ready(forward(x))
    assert logits.shape == (batch, out_dim), logits.shape
    assert bool(jnp.all(jnp.isfinite(logits)))

    # sanity-check the fused bf16 kernel against a pure-JAX f32 reference
    ref = jax.block_until_ready(reference_forward(x, raw))
    err = float(jnp.max(jnp.abs(logits - ref)))
    scale = float(jnp.max(jnp.abs(ref)))
    assert err <= 0.1 * scale + 0.1, (err, scale)

    print("KERNEL_OK")
</pallas_src>

<mosaic_0001>
module attributes {stable_mosaic.version = 11 : i64} {
  func.func @cnn_fused_kernel(%arg0: i32, %arg1: memref<16x8x128xbf16, #tpu.memory_space<vmem>>, %arg2: memref<4x128x256xbf16, #tpu.memory_space<vmem>>, %arg3: memref<1x256xf32, #tpu.memory_space<vmem>>, %arg4: memref<2x256x384xbf16, #tpu.memory_space<vmem>>, %arg5: memref<1x384xf32, #tpu.memory_space<vmem>>, %arg6: memref<384x384xbf16, #tpu.memory_space<vmem>>, %arg7: memref<1x384xf32, #tpu.memory_space<vmem>>, %arg8: memref<6x384x256xbf16, #tpu.memory_space<vmem>>, %arg9: memref<1x256xf32, #tpu.memory_space<vmem>>, %arg10: memref<256x128xbf16, #tpu.memory_space<vmem>>, %arg11: memref<1x128xf32, #tpu.memory_space<vmem>>, %arg12: memref<8x128xf32, #tpu.memory_space<vmem>>) attributes {dimension_semantics = [#tpu.dimension_semantics<parallel>], iteration_bounds = array<i64: 1>, scalar_prefetch = 0 : i64, scratch_operands = 0 : i64, tpu.core_type = #tpu.core_type<tc>, window_params = [{transform_indices = @transform_0, window_bounds = array<i64: 16, 8, 128>}, {pipeline_mode = #tpu.pipeline_mode<synchronous>, transform_indices = @transform_1, window_bounds = array<i64: 4, 128, 256>}, {pipeline_mode = #tpu.pipeline_mode<synchronous>, transform_indices = @transform_2, window_bounds = array<i64: 1, 256>}, {pipeline_mode = #tpu.pipeline_mode<synchronous>, transform_indices = @transform_3, window_bounds = array<i64: 2, 256, 384>}, {pipeline_mode = #tpu.pipeline_mode<synchronous>, transform_indices = @transform_4, window_bounds = array<i64: 1, 384>}, {pipeline_mode = #tpu.pipeline_mode<synchronous>, transform_indices = @transform_5, window_bounds = array<i64: 384, 384>}, {pipeline_mode = #tpu.pipeline_mode<synchronous>, transform_indices = @transform_6, window_bounds = array<i64: 1, 384>}, {pipeline_mode = #tpu.pipeline_mode<synchronous>, transform_indices = @transform_7, window_bounds = array<i64: 6, 384, 256>}, {pipeline_mode = #tpu.pipeline_mode<synchronous>, transform_indices = @transform_8, window_bounds = array<i64: 1, 256>}, {pipeline_mode = #tpu.pipeline_mode<synchronous>, transform_indices = @transform_9, window_bounds = array<i64: 256, 128>}, {pipeline_mode = #tpu.pipeline_mode<synchronous>, transform_indices = @transform_10, window_bounds = array<i64: 1, 128>}, {transform_indices = @transform_11, window_bounds = array<i64: 8, 128>}]} {
    %c0 = arith.constant 0 : index
    %c0_0 = arith.constant 0 : index
    %0 = vector.load %arg3[%c0, %c0_0] : memref<1x256xf32, #tpu.memory_space<vmem>>, vector<1x256xf32>
    %1 = vector.shape_cast %0 : vector<1x256xf32> to vector<1x256xf32>
    %2 = vector.broadcast %1 : vector<1x256xf32> to vector<8x256xf32>
    %c0_1 = arith.constant 0 : index
    %c0_2 = arith.constant 0 : index
    %c0_3 = arith.constant 0 : index
    %3 = vector.load %arg1[%c0_1, %c0_2, %c0_3] : memref<16x8x128xbf16, #tpu.memory_space<vmem>>, vector<1x8x128xbf16>
    %4 = vector.shape_cast %3 : vector<1x8x128xbf16> to vector<8x128xbf16>
    %c0_4 = arith.constant 0 : index
    %c0_5 = arith.constant 0 : index
    %c0_6 = arith.constant 0 : index
    %5 = vector.load %arg2[%c0_4, %c0_5, %c0_6] : memref<4x128x256xbf16, #tpu.memory_space<vmem>>, vector<1x128x256xbf16>
    %6 = vector.shape_cast %5 : vector<1x128x256xbf16> to vector<128x256xbf16>
    %cst = arith.constant dense<0.000000e+00> : vector<8x256xf32>
    %7 = tpu.matmul %4, %6, %cst {dimension_numbers = #tpu.dot_dimension_numbers<[1], [0], [0], [1], [0, 0, 1, 1], [], []>} : vector<8x128xbf16>, vector<128x256xbf16>, vector<8x256xf32> -> vector<8x256xf32>
    %8 = arith.addf %2, %7 : vector<8x256xf32>
    %c1 = arith.constant 1 : index
    %c0_7 = arith.constant 0 : index
    %c0_8 = arith.constant 0 : index
    %9 = vector.load %arg1[%c1, %c0_7, %c0_8] : memref<16x8x128xbf16, #tpu.memory_space<vmem>>, vector<1x8x128xbf16>
    %10 = vector.shape_cast %9 : vector<1x8x128xbf16> to vector<8x128xbf16>
    %c1_9 = arith.constant 1 : index
    %c0_10 = arith.constant 0 : index
    %c0_11 = arith.constant 0 : index
    %11 = vector.load %arg2[%c1_9, %c0_10, %c0_11] : memref<4x128x256xbf16, #tpu.memory_space<vmem>>, vector<1x128x256xbf16>
    %12 = vector.shape_cast %11 : vector<1x128x256xbf16> to vector<128x256xbf16>
    %cst_12 = arith.constant dense<0.000000e+00> : vector<8x256xf32>
    %13 = tpu.matmul %10, %12, %cst_12 {dimension_numbers = #tpu.dot_dimension_numbers<[1], [0], [0], [1], [0, 0, 1, 1], [], []>} : vector<8x128xbf16>, vector<128x256xbf16>, vector<8x256xf32> -> vector<8x256xf32>
    %14 = arith.addf %8, %13 : vector<8x256xf32>
    %c2 = arith.constant 2 : index
    %c0_13 = arith.constant 0 : index
    %c0_14 = arith.constant 0 : index
    %15 = vector.load %arg1[%c2, %c0_13, %c0_14] : memref<16x8x128xbf16, #tpu.memory_space<vmem>>, vector<1x8x128xbf16>
    %16 = vector.shape_cast %15 : vector<1x8x128xbf16> to vector<8x128xbf16>
    %c2_15 = arith.constant 2 : index
    %c0_16 = arith.constant 0 : index
    %c0_17 = arith.constant 0 : index
    %17 = vector.load %arg2[%c2_15, %c0_16, %c0_17] : memref<4x128x256xbf16, #tpu.memory_space<vmem>>, vector<1x128x256xbf16>
    %18 = vector.shape_cast %17 : vector<1x128x256xbf16> to vector<128x256xbf16>
    %cst_18 = arith.constant dense<0.000000e+00> : vector<8x256xf32>
    %19 = tpu.matmul %16, %18, %cst_18 {dimension_numbers = #tpu.dot_dimension_numbers<[1], [0], [0], [1], [0, 0, 1, 1], [], []>} : vector<8x128xbf16>, vector<128x256xbf16>, vector<8x256xf32> -> vector<8x256xf32>
    %20 = arith.addf %14, %19 : vector<8x256xf32>
    %c3 = arith.constant 3 : index
    %c0_19 = arith.constant 0 : index
    %c0_20 = arith.constant 0 : index
    %21 = vector.load %arg1[%c3, %c0_19, %c0_20] : memref<16x8x128xbf16, #tpu.memory_space<vmem>>, vector<1x8x128xbf16>
    %22 = vector.shape_cast %21 : vector<1x8x128xbf16> to vector<8x128xbf16>
    %c3_21 = arith.constant 3 : index
    %c0_22 = arith.constant 0 : index
    %c0_23 = arith.constant 0 : index
    %23 = vector.load %arg2[%c3_21, %c0_22, %c0_23] : memref<4x128x256xbf16, #tpu.memory_space<vmem>>, vector<1x128x256xbf16>
    %24 = vector.shape_cast %23 : vector<1x128x256xbf16> to vector<128x256xbf16>
    %cst_24 = arith.constant dense<0.000000e+00> : vector<8x256xf32>
    %25 = tpu.matmul %22, %24, %cst_24 {dimension_numbers = #tpu.dot_dimension_numbers<[1], [0], [0], [1], [0, 0, 1, 1], [], []>} : vector<8x128xbf16>, vector<128x256xbf16>, vector<8x256xf32> -> vector<8x256xf32>
    %26 = arith.addf %20, %25 : vector<8x256xf32>
    %cst_25 = arith.constant 0.000000e+00 : f32
    %27 = vector.broadcast %cst_25 : f32 to vector<8x256xf32>
    %28 = arith.maximumf %26, %27 : vector<8x256xf32>
    %29 = arith.truncf %28 : vector<8x256xf32> to vector<8x256xbf16>
    %c2_26 = arith.constant 2 : index
    %c0_27 = arith.constant 0 : index
    %c0_28 = arith.constant 0 : index
    %30 = vector.load %arg1[%c2_26, %c0_27, %c0_28] : memref<16x8x128xbf16, #tpu.memory_space<vmem>>, vector<1x8x128xbf16>
    %31 = vector.shape_cast %30 : vector<1x8x128xbf16> to vector<8x128xbf16>
    %c0_29 = arith.constant 0 : index
    %c0_30 = arith.constant 0 : index
    %c0_31 = arith.constant 0 : index
    %32 = vector.load %arg2[%c0_29, %c0_30, %c0_31] : memref<4x128x256xbf16, #tpu.memory_space<vmem>>, vector<1x128x256xbf16>
    %33 = vector.shape_cast %32 : vector<1x128x256xbf16> to vector<128x256xbf16>
    %cst_32 = arith.constant dense<0.000000e+00> : vector<8x256xf32>
    %34 = tpu.matmul %31, %33, %cst_32 {dimension_numbers = #tpu.dot_dimension_numbers<[1], [0], [0], [1], [0, 0, 1, 1], [], []>} : vector<8x128xbf16>, vector<128x256xbf16>, vector<8x256xf32> -> vector<8x256xf32>
    %35 = arith.addf %2, %34 : vector<8x256xf32>
    %c3_33 = arith.constant 3 : index
    %c0_34 = arith.constant 0 : index
    %c0_35 = arith.constant 0 : index
    %36 = vector.load %arg1[%c3_33, %c0_34, %c0_35] : memref<16x8x128xbf16, #tpu.memory_space<vmem>>, vector<1x8x128xbf16>
    %37 = vector.shape_cast %36 : vector<1x8x128xbf16> to vector<8x128xbf16>
    %c1_36 = arith.constant 1 : index
    %c0_37 = arith.constant 0 : index
    %c0_38 = arith.constant 0 : index
    %38 = vector.load %arg2[%c1_36, %c0_37, %c0_38] : memref<4x128x256xbf16, #tpu.memory_space<vmem>>, vector<1x128x256xbf16>
    %39 = vector.shape_cast %38 : vector<1x128x256xbf16> to vector<128x256xbf16>
    %cst_39 = arith.constant dense<0.000000e+00> : vector<8x256xf32>
    %40 = tpu.matmul %37, %39, %cst_39 {dimension_numbers = #tpu.dot_dimension_numbers<[1], [0], [0], [1], [0, 0, 1, 1], [], []>} : vector<8x128xbf16>, vector<128x256xbf16>, vector<8x256xf32> -> vector<8x256xf32>
    %41 = arith.addf %35, %40 : vector<8x256xf32>
    %c4 = arith.constant 4 : index
    %c0_40 = arith.constant 0 : index
    %c0_41 = arith.constant 0 : index
    %42 = vector.load %arg1[%c4, %c0_40, %c0_41] : memref<16x8x128xbf16, #tpu.memory_space<vmem>>, vector<1x8x128xbf16>
    %43 = vector.shape_cast %42 : vector<1x8x128xbf16> to vector<8x128xbf16>
    %c2_42 = arith.constant 2 : index
    %c0_43 = arith.constant 0 : index
    %c0_44 = arith.constant 0 : index
    %44 = vector.load %arg2[%c2_42, %c0_43, %c0_44] : memref<4x128x256xbf16, #tpu.memory_space<vmem>>, vector<1x128x256xbf16>
    %45 = vector.shape_cast %44 : vector<1x128x256xbf16> to vector<128x256xbf16>
    %cst_45 = arith.constant dense<0.000000e+00> : vector<8x256xf32>
    %46 = tpu.matmul %43, %45, %cst_45 {dimension_numbers = #tpu.dot_dimension_numbers<[1], [0], [0], [1], [0, 0, 1, 1], [], []>} : vector<8x128xbf16>, vector<128x256xbf16>, vector<8x256xf32> -> vector<8x256xf32>
    %47 = arith.addf %41, %46 : vector<8x256xf32>
    %c5 = arith.constant 5 : index
    %c0_46 = arith.constant 0 : index
    %c0_47 = arith.constant 0 : index
    %48 = vector.load %arg1[%c5, %c0_46, %c0_47] : memref<16x8x128xbf16, #tpu.memory_space<vmem>>, vector<1x8x128xbf16>
    %49 = vector.shape_cast %48 : vector<1x8x128xbf16> to vector<8x128xbf16>
    %c3_48 = arith.constant 3 : index
    %c0_49 = arith.constant 0 : index
    %c0_50 = arith.constant 0 : index
    %50 = vector.load %arg2[%c3_48, %c0_49, %c0_50] : memref<4x128x256xbf16, #tpu.memory_space<vmem>>, vector<1x128x256xbf16>
    %51 = vector.shape_cast %50 : vector<1x128x256xbf16> to vector<128x256xbf16>
    %cst_51 = arith.constant dense<0.000000e+00> : vector<8x256xf32>
    %52 = tpu.matmul %49, %51, %cst_51 {dimension_numbers = #tpu.dot_dimension_numbers<[1], [0], [0], [1], [0, 0, 1, 1], [], []>} : vector<8x128xbf16>, vector<128x256xbf16>, vector<8x256xf32> -> vector<8x256xf32>
    %53 = arith.addf %47, %52 : vector<8x256xf32>
    %cst_52 = arith.constant 0.000000e+00 : f32
    %54 = vector.broadcast %cst_52 : f32 to vector<8x256xf32>
    %55 = arith.maximumf %53, %54 : vector<8x256xf32>
    %56 = arith.truncf %55 : vector<8x256xf32> to vector<8x256xbf16>
    %c4_53 = arith.constant 4 : index
    %c0_54 = arith.constant 0 : index
    %c0_55 = arith.constant 0 : index
    %57 = vector.load %arg1[%c4_53, %c0_54, %c0_55] : memref<16x8x128xbf16, #tpu.memory_space<vmem>>, vector<1x8x128xbf16>
    %58 = vector.shape_cast %57 : vector<1x8x128xbf16> to vector<8x128xbf16>
    %c0_56 = arith.constant 0 : index
    %c0_57 = arith.constant 0 : index
    %c0_58 = arith.constant 0 : index
    %59 = vector.load %arg2[%c0_56, %c0_57, %c0_58] : memref<4x128x256xbf16, #tpu.memory_space<vmem>>, vector<1x128x256xbf16>
    %60 = vector.shape_cast %59 : vector<1x128x256xbf16> to vector<128x256xbf16>
    %cst_59 = arith.constant dense<0.000000e+00> : vector<8x256xf32>
    %61 = tpu.matmul %58, %60, %cst_59 {dimension_numbers = #tpu.dot_dimension_numbers<[1], [0], [0], [1], [0, 0, 1, 1], [], []>} : vector<8x128xbf16>, vector<128x256xbf16>, vector<8x256xf32> -> vector<8x256xf32>
    %62 = arith.addf %2, %61 : vector<8x256xf32>
    %c5_60 = arith.constant 5 : index
    %c0_61 = arith.constant 0 : index
    %c0_62 = arith.constant 0 : index
    %63 = vector.load %arg1[%c5_60, %c0_61, %c0_62] : memref<16x8x128xbf16, #tpu.memory_space<vmem>>, vector<1x8x128xbf16>
    %64 = vector.shape_cast %63 : vector<1x8x128xbf16> to vector<8x128xbf16>
    %c1_63 = arith.constant 1 : index
    %c0_64 = arith.constant 0 : index
    %c0_65 = arith.constant 0 : index
    %65 = vector.load %arg2[%c1_63, %c0_64, %c0_65] : memref<4x128x256xbf16, #tpu.memory_space<vmem>>, vector<1x128x256xbf16>
    %66 = vector.shape_cast %65 : vector<1x128x256xbf16> to vector<128x256xbf16>
    %cst_66 = arith.constant dense<0.000000e+00> : vector<8x256xf32>
    %67 = tpu.matmul %64, %66, %cst_66 {dimension_numbers = #tpu.dot_dimension_numbers<[1], [0], [0], [1], [0, 0, 1, 1], [], []>} : vector<8x128xbf16>, vector<128x256xbf16>, vector<8x256xf32> -> vector<8x256xf32>
    %68 = arith.addf %62, %67 : vector<8x256xf32>
    %c6 = arith.constant 6 : index
    %c0_67 = arith.constant 0 : index
    %c0_68 = arith.constant 0 : index
    %69 = vector.load %arg1[%c6, %c0_67, %c0_68] : memref<16x8x128xbf16, #tpu.memory_space<vmem>>, vector<1x8x128xbf16>
    %70 = vector.shape_cast %69 : vector<1x8x128xbf16> to vector<8x128xbf16>
    %c2_69 = arith.constant 2 : index
    %c0_70 = arith.constant 0 : index
    %c0_71 = arith.constant 0 : index
    %71 = vector.load %arg2[%c2_69, %c0_70, %c0_71] : memref<4x128x256xbf16, #tpu.memory_space<vmem>>, vector<1x128x256xbf16>
    %72 = vector.shape_cast %71 : vector<1x128x256xbf16> to vector<128x256xbf16>
    %cst_72 = arith.constant dense<0.000000e+00> : vector<8x256xf32>
    %73 = tpu.matmul %70, %72, %cst_72 {dimension_numbers = #tpu.dot_dimension_numbers<[1], [0], [0], [1], [0, 0, 1, 1], [], []>} : vector<8x128xbf16>, vector<128x256xbf16>, vector<8x256xf32> -> vector<8x256xf32>
    %74 = arith.addf %68, %73 : vector<8x256xf32>
    %c7 = arith.constant 7 : index
    %c0_73 = arith.constant 0 : index
    %c0_74 = arith.constant 0 : index
    %75 = vector.load %arg1[%c7, %c0_73, %c0_74] : memref<16x8x128xbf16, #tpu.memory_space<vmem>>, vector<1x8x128xbf16>
    %76 = vector.shape_cast %75 : vector<1x8x128xbf16> to vector<8x128xbf16>
    %c3_75 = arith.constant 3 : index
    %c0_76 = arith.constant 0 : index
    %c0_77 = arith.constant 0 : index
    %77 = vector.load %arg2[%c3_75, %c0_76, %c0_77] : memref<4x128x256xbf16, #tpu.memory_space<vmem>>, vector<1x128x256xbf16>
    %78 = vector.shape_cast %77 : vector<1x128x256xbf16> to vector<128x256xbf16>
    %cst_78 = arith.constant dense<0.000000e+00> : vector<8x256xf32>
    %79 = tpu.matmul %76, %78, %cst_78 {dimension_numbers = #tpu.dot_dimension_numbers<[1], [0], [0], [1], [0, 0, 1, 1], [], []>} : vector<8x128xbf16>, vector<128x256xbf16>, vector<8x256xf32> -> vector<8x256xf32>
    %80 = arith.addf %74, %79 : vector<8x256xf32>
    %cst_79 = arith.constant 0.000000e+00 : f32
    %81 = vector.broadcast %cst_79 : f32 to vector<8x256xf32>
    %82 = arith.maximumf %80, %81 : vector<8x256xf32>
    %83 = arith.truncf %82 : vector<8x256xf32> to vector<8x256xbf16>
    %c6_80 = arith.constant 6 : index
    %c0_81 = arith.constant 0 : index
    %c0_82 = arith.constant 0 : index
    %84 = vector.load %arg1[%c6_80, %c0_81, %c0_82] : memref<16x8x128xbf16, #tpu.memory_space<vmem>>, vector<1x8x128xbf16>
    %85 = vector.shape_cast %84 : vector<1x8x128xbf16> to vector<8x128xbf16>
    %c0_83 = arith.constant 0 : index
    %c0_84 = arith.constant 0 : index
    %c0_85 = arith.constant 0 : index
    %86 = vector.load %arg2[%c0_83, %c0_84, %c0_85] : memref<4x128x256xbf16, #tpu.memory_space<vmem>>, vector<1x128x256xbf16>
    %87 = vector.shape_cast %86 : vector<1x128x256xbf16> to vector<128x256xbf16>
    %cst_86 = arith.constant dense<0.000000e+00> : vector<8x256xf32>
    %88 = tpu.matmul %85, %87, %cst_86 {dimension_numbers = #tpu.dot_dimension_numbers<[1], [0], [0], [1], [0, 0, 1, 1], [], []>} : vector<8x128xbf16>, vector<128x256xbf16>, vector<8x256xf32> -> vector<8x256xf32>
    %89 = arith.addf %2, %88 : vector<8x256xf32>
    %c7_87 = arith.constant 7 : index
    %c0_88 = arith.constant 0 : index
    %c0_89 = arith.constant 0 : index
    %90 = vector.load %arg1[%c7_87, %c0_88, %c0_89] : memref<16x8x128xbf16, #tpu.memory_space<vmem>>, vector<1x8x128xbf16>
    %91 = vector.shape_cast %90 : vector<1x8x128xbf16> to vector<8x128xbf16>
    %c1_90 = arith.constant 1 : index
    %c0_91 = arith.constant 0 : index
    %c0_92 = arith.constant 0 : index
    %92 = vector.load %arg2[%c1_90, %c0_91, %c0_92] : memref<4x128x256xbf16, #tpu.memory_space<vmem>>, vector<1x128x256xbf16>
    %93 = vector.shape_cast %92 : vector<1x128x256xbf16> to vector<128x256xbf16>
    %cst_93 = arith.constant dense<0.000000e+00> : vector<8x256xf32>
    %94 = tpu.matmul %91, %93, %cst_93 {dimension_numbers = #tpu.dot_dimension_numbers<[1], [0], [0], [1], [0, 0, 1, 1], [], []>} : vector<8x128xbf16>, vector<128x256xbf16>, vector<8x256xf32> -> vector<8x256xf32>
    %95 = arith.addf %89, %94 : vector<8x256xf32>
    %c8 = arith.constant 8 : index
    %c0_94 = arith.constant 0 : index
    %c0_95 = arith.constant 0 : index
    %96 = vector.load %arg1[%c8, %c0_94, %c0_95] : memref<16x8x128xbf16, #tpu.memory_space<vmem>>, vector<1x8x128xbf16>
    %97 = vector.shape_cast %96 : vector<1x8x128xbf16> to vector<8x128xbf16>
    %c2_96 = arith.constant 2 : index
    %c0_97 = arith.constant 0 : index
    %c0_98 = arith.constant 0 : index
    %98 = vector.load %arg2[%c2_96, %c0_97, %c0_98] : memref<4x128x256xbf16, #tpu.memory_space<vmem>>, vector<1x128x256xbf16>
    %99 = vector.shape_cast %98 : vector<1x128x256xbf16> to vector<128x256xbf16>
    %cst_99 = arith.constant dense<0.000000e+00> : vector<8x256xf32>
    %100 = tpu.matmul %97, %99, %cst_99 {dimension_numbers = #tpu.dot_dimension_numbers<[1], [0], [0], [1], [0, 0, 1, 1], [], []>} : vector<8x128xbf16>, vector<128x256xbf16>, vector<8x256xf32> -> vector<8x256xf32>
    %101 = arith.addf %95, %100 : vector<8x256xf32>
    %c9 = arith.constant 9 : index
    %c0_100 = arith.constant 0 : index
    %c0_101 = arith.constant 0 : index
    %102 = vector.load %arg1[%c9, %c0_100, %c0_101] : memref<16x8x128xbf16, #tpu.memory_space<vmem>>, vector<1x8x128xbf16>
    %103 = vector.shape_cast %102 : vector<1x8x128xbf16> to vector<8x128xbf16>
    %c3_102 = arith.constant 3 : index
    %c0_103 = arith.constant 0 : index
    %c0_104 = arith.constant 0 : index
    %104 = vector.load %arg2[%c3_102, %c0_103, %c0_104] : memref<4x128x256xbf16, #tpu.memory_space<vmem>>, vector<1x128x256xbf16>
    %105 = vector.shape_cast %104 : vector<1x128x256xbf16> to vector<128x256xbf16>
    %cst_105 = arith.constant dense<0.000000e+00> : vector<8x256xf32>
    %106 = tpu.matmul %103, %105, %cst_105 {dimension_numbers = #tpu.dot_dimension_numbers<[1], [0], [0], [1], [0, 0, 1, 1], [], []>} : vector<8x128xbf16>, vector<128x256xbf16>, vector<8x256xf32> -> vector<8x256xf32>
    %107 = arith.addf %101, %106 : vector<8x256xf32>
    %cst_106 = arith.constant 0.000000e+00 : f32
    %108 = vector.broadcast %cst_106 : f32 to vector<8x256xf32>
    %109 = arith.maximumf %107, %108 : vector<8x256xf32>
    %110 = arith.truncf %109 : vector<8x256xf32> to vector<8x256xbf16>
    %c8_107 = arith.constant 8 : index
    %c0_108 = arith.constant 0 : index
    %c0_109 = arith.constant 0 : index
    %111 = vector.load %arg1[%c8_107, %c0_108, %c0_109] : memref<16x8x128xbf16, #tpu.memory_space<vmem>>, vector<1x8x128xbf16>
    %112 = vector.shape_cast %111 : vector<1x8x128xbf16> to vector<8x128xbf16>
    %c0_110 = arith.constant 0 : index
    %c0_111 = arith.constant 0 : index
    %c0_112 = arith.constant 0 : index
    %113 = vector.load %arg2[%c0_110, %c0_111, %c0_112] : memref<4x128x256xbf16, #tpu.memory_space<vmem>>, vector<1x128x256xbf16>
    %114 = vector.shape_cast %113 : vector<1x128x256xbf16> to vector<128x256xbf16>
    %cst_113 = arith.constant dense<0.000000e+00> : vector<8x256xf32>
    %115 = tpu.matmul %112, %114, %cst_113 {dimension_numbers = #tpu.dot_dimension_numbers<[1], [0], [0], [1], [0, 0, 1, 1], [], []>} : vector<8x128xbf16>, vector<128x256xbf16>, vector<8x256xf32> -> vector<8x256xf32>
    %116 = arith.addf %2, %115 : vector<8x256xf32>
    %c9_114 = arith.constant 9 : index
    %c0_115 = arith.constant 0 : index
    %c0_116 = arith.constant 0 : index
    %117 = vector.load %arg1[%c9_114, %c0_115, %c0_116] : memref<16x8x128xbf16, #tpu.memory_space<vmem>>, vector<1x8x128xbf16>
    %118 = vector.shape_cast %117 : vector<1x8x128xbf16> to vector<8x128xbf16>
    %c1_117 = arith.constant 1 : index
    %c0_118 = arith.constant 0 : index
    %c0_119 = arith.constant 0 : index
    %119 = vector.load %arg2[%c1_117, %c0_118, %c0_119] : memref<4x128x256xbf16, #tpu.memory_space<vmem>>, vector<1x128x256xbf16>
    %120 = vector.shape_cast %119 : vector<1x128x256xbf16> to vector<128x256xbf16>
    %cst_120 = arith.constant dense<0.000000e+00> : vector<8x256xf32>
    %121 = tpu.matmul %118, %120, %cst_120 {dimension_numbers = #tpu.dot_dimension_numbers<[1], [0], [0], [1], [0, 0, 1, 1], [], []>} : vector<8x128xbf16>, vector<128x256xbf16>, vector<8x256xf32> -> vector<8x256xf32>
    %122 = arith.addf %116, %121 : vector<8x256xf32>
    %c10 = arith.constant 10 : index
    %c0_121 = arith.constant 0 : index
    %c0_122 = arith.constant 0 : index
    %123 = vector.load %arg1[%c10, %c0_121, %c0_122] : memref<16x8x128xbf16, #tpu.memory_space<vmem>>, vector<1x8x128xbf16>
    %124 = vector.shape_cast %123 : vector<1x8x128xbf16> to vector<8x128xbf16>
    %c2_123 = arith.constant 2 : index
    %c0_124 = arith.constant 0 : index
    %c0_125 = arith.constant 0 : index
    %125 = vector.load %arg2[%c2_123, %c0_124, %c0_125] : memref<4x128x256xbf16, #tpu.memory_space<vmem>>, vector<1x128x256xbf16>
    %126 = vector.shape_cast %125 : vector<1x128x256xbf16> to vector<128x256xbf16>
    %cst_126 = arith.constant dense<0.000000e+00> : vector<8x256xf32>
    %127 = tpu.matmul %124, %126, %cst_126 {dimension_numbers = #tpu.dot_dimension_numbers<[1], [0], [0], [1], [0, 0, 1, 1], [], []>} : vector<8x128xbf16>, vector<128x256xbf16>, vector<8x256xf32> -> vector<8x256xf32>
    %128 = arith.addf %122, %127 : vector<8x256xf32>
    %c11 = arith.constant 11 : index
    %c0_127 = arith.constant 0 : index
    %c0_128 = arith.constant 0 : index
    %129 = vector.load %arg1[%c11, %c0_127, %c0_128] : memref<16x8x128xbf16, #tpu.memory_space<vmem>>, vector<1x8x128xbf16>
    %130 = vector.shape_cast %129 : vector<1x8x128xbf16> to vector<8x128xbf16>
    %c3_129 = arith.constant 3 : index
    %c0_130 = arith.constant 0 : index
    %c0_131 = arith.constant 0 : index
    %131 = vector.load %arg2[%c3_129, %c0_130, %c0_131] : memref<4x128x256xbf16, #tpu.memory_space<vmem>>, vector<1x128x256xbf16>
    %132 = vector.shape_cast %131 : vector<1x128x256xbf16> to vector<128x256xbf16>
    %cst_132 = arith.constant dense<0.000000e+00> : vector<8x256xf32>
    %133 = tpu.matmul %130, %132, %cst_132 {dimension_numbers = #tpu.dot_dimension_numbers<[1], [0], [0], [1], [0, 0, 1, 1], [], []>} : vector<8x128xbf16>, vector<128x256xbf16>, vector<8x256xf32> -> vector<8x256xf32>
    %134 = arith.addf %128, %133 : vector<8x256xf32>
    %cst_133 = arith.constant 0.000000e+00 : f32
    %135 = vector.broadcast %cst_133 : f32 to vector<8x256xf32>
    %136 = arith.maximumf %134, %135 : vector<8x256xf32>
    %137 = arith.truncf %136 : vector<8x256xf32> to vector<8x256xbf16>
    %c10_134 = arith.constant 10 : index
    %c0_135 = arith.constant 0 : index
    %c0_136 = arith.constant 0 : index
    %138 = vector.load %arg1[%c10_134, %c0_135, %c0_136] : memref<16x8x128xbf16, #tpu.memory_space<vmem>>, vector<1x8x128xbf16>
    %139 = vector.shape_cast %138 : vector<1x8x128xbf16> to vector<8x128xbf16>
    %c0_137 = arith.constant 0 : index
    %c0_138 = arith.constant 0 : index
    %c0_139 = arith.constant 0 : index
    %140 = vector.load %arg2[%c0_137, %c0_138, %c0_139] : memref<4x128x256xbf16, #tpu.memory_space<vmem>>, vector<1x128x256xbf16>
    %141 = vector.shape_cast %140 : vector<1x128x256xbf16> to vector<128x256xbf16>
    %cst_140 = arith.constant dense<0.000000e+00> : vector<8x256xf32>
    %142 = tpu.matmul %139, %141, %cst_140 {dimension_numbers = #tpu.dot_dimension_numbers<[1], [0], [0], [1], [0, 0, 1, 1], [], []>} : vector<8x128xbf16>, vector<128x256xbf16>, vector<8x256xf32> -> vector<8x256xf32>
    %143 = arith.addf %2, %142 : vector<8x256xf32>
    %c11_141 = arith.constant 11 : index
    %c0_142 = arith.constant 0 : index
    %c0_143 = arith.constant 0 : index
    %144 = vector.load %arg1[%c11_141, %c0_142, %c0_143] : memref<16x8x128xbf16, #tpu.memory_space<vmem>>, vector<1x8x128xbf16>
    %145 = vector.shape_cast %144 : vector<1x8x128xbf16> to vector<8x128xbf16>
    %c1_144 = arith.constant 1 : index
    %c0_145 = arith.constant 0 : index
    %c0_146 = arith.constant 0 : index
    %146 = vector.load %arg2[%c1_144, %c0_145, %c0_146] : memref<4x128x256xbf16, #tpu.memory_space<vmem>>, vector<1x128x256xbf16>
    %147 = vector.shape_cast %146 : vector<1x128x256xbf16> to vector<128x256xbf16>
    %cst_147 = arith.constant dense<0.000000e+00> : vector<8x256xf32>
    %148 = tpu.matmul %145, %147, %cst_147 {dimension_numbers = #tpu.dot_dimension_numbers<[1], [0], [0], [1], [0, 0, 1, 1], [], []>} : vector<8x128xbf16>, vector<128x256xbf16>, vector<8x256xf32> -> vector<8x256xf32>
    %149 = arith.addf %143, %148 : vector<8x256xf32>
    %c12 = arith.constant 12 : index
    %c0_148 = arith.constant 0 : index
    %c0_149 = arith.constant 0 : index
    %150 = vector.load %arg1[%c12, %c0_148, %c0_149] : memref<16x8x128xbf16, #tpu.memory_space<vmem>>, vector<1x8x128xbf16>
    %151 = vector.shape_cast %150 : vector<1x8x128xbf16> to vector<8x128xbf16>
    %c2_150 = arith.constant 2 : index
    %c0_151 = arith.constant 0 : index
    %c0_152 = arith.constant 0 : index
    %152 = vector.load %arg2[%c2_150, %c0_151, %c0_152] : memref<4x128x256xbf16, #tpu.memory_space<vmem>>, vector<1x128x256xbf16>
    %153 = vector.shape_cast %152 : vector<1x128x256xbf16> to vector<128x256xbf16>
    %cst_153 = arith.constant dense<0.000000e+00> : vector<8x256xf32>
    %154 = tpu.matmul %151, %153, %cst_153 {dimension_numbers = #tpu.dot_dimension_numbers<[1], [0], [0], [1], [0, 0, 1, 1], [], []>} : vector<8x128xbf16>, vector<128x256xbf16>, vector<8x256xf32> -> vector<8x256xf32>
    %155 = arith.addf %149, %154 : vector<8x256xf32>
    %c13 = arith.constant 13 : index
    %c0_154 = arith.constant 0 : index
    %c0_155 = arith.constant 0 : index
    %156 = vector.load %arg1[%c13, %c0_154, %c0_155] : memref<16x8x128xbf16, #tpu.memory_space<vmem>>, vector<1x8x128xbf16>
    %157 = vector.shape_cast %156 : vector<1x8x128xbf16> to vector<8x128xbf16>
    %c3_156 = arith.constant 3 : index
    %c0_157 = arith.constant 0 : index
    %c0_158 = arith.constant 0 : index
    %158 = vector.load %arg2[%c3_156, %c0_157, %c0_158] : memref<4x128x256xbf16, #tpu.memory_space<vmem>>, vector<1x128x256xbf16>
    %159 = vector.shape_cast %158 : vector<1x128x256xbf16> to vector<128x256xbf16>
    %cst_159 = arith.constant dense<0.000000e+00> : vector<8x256xf32>
    %160 = tpu.matmul %157, %159, %cst_159 {dimension_numbers = #tpu.dot_dimension_numbers<[1], [0], [0], [1], [0, 0, 1, 1], [], []>} : vector<8x128xbf16>, vector<128x256xbf16>, vector<8x256xf32> -> vector<8x256xf32>
    %161 = arith.addf %155, %160 : vector<8x256xf32>
    %cst_160 = arith.constant 0.000000e+00 : f32
    %162 = vector.broadcast %cst_160 : f32 to vector<8x256xf32>
    %163 = arith.maximumf %161, %162 : vector<8x256xf32>
    %164 = arith.truncf %163 : vector<8x256xf32> to vector<8x256xbf16>
    %c12_161 = arith.constant 12 : index
    %c0_162 = arith.constant 0 : index
    %c0_163 = arith.constant 0 : index
    %165 = vector.load %arg1[%c12_161, %c0_162, %c0_163] : memref<16x8x128xbf16, #tpu.memory_space<vmem>>, vector<1x8x128xbf16>
    %166 = vector.shape_cast %165 : vector<1x8x128xbf16> to vector<8x128xbf16>
    %c0_164 = arith.constant 0 : index
    %c0_165 = arith.constant 0 : index
    %c0_166 = arith.constant 0 : index
    %167 = vector.load %arg2[%c0_164, %c0_165, %c0_166] : memref<4x128x256xbf16, #tpu.memory_space<vmem>>, vector<1x128x256xbf16>
    %168 = vector.shape_cast %167 : vector<1x128x256xbf16> to vector<128x256xbf16>
    %cst_167 = arith.constant dense<0.000000e+00> : vector<8x256xf32>
    %169 = tpu.matmul %166, %168, %cst_167 {dimension_numbers = #tpu.dot_dimension_numbers<[1], [0], [0], [1], [0, 0, 1, 1], [], []>} : vector<8x128xbf16>, vector<128x256xbf16>, vector<8x256xf32> -> vector<8x256xf32>
    %170 = arith.addf %2, %169 : vector<8x256xf32>
    %c13_168 = arith.constant 13 : index
    %c0_169 = arith.constant 0 : index
    %c0_170 = arith.constant 0 : index
    %171 = vector.load %arg1[%c13_168, %c0_169, %c0_170] : memref<16x8x128xbf16, #tpu.memory_space<vmem>>, vector<1x8x128xbf16>
    %172 = vector.shape_cast %171 : vector<1x8x128xbf16> to vector<8x128xbf16>
    %c1_171 = arith.constant 1 : index
    %c0_172 = arith.constant 0 : index
    %c0_173 = arith.constant 0 : index
    %173 = vector.load %arg2[%c1_171, %c0_172, %c0_173] : memref<4x128x256xbf16, #tpu.memory_space<vmem>>, vector<1x128x256xbf16>
    %174 = vector.shape_cast %173 : vector<1x128x256xbf16> to vector<128x256xbf16>
    %cst_174 = arith.constant dense<0.000000e+00> : vector<8x256xf32>
    %175 = tpu.matmul %172, %174, %cst_174 {dimension_numbers = #tpu.dot_dimension_numbers<[1], [0], [0], [1], [0, 0, 1, 1], [], []>} : vector<8x128xbf16>, vector<128x256xbf16>, vector<8x256xf32> -> vector<8x256xf32>
    %176 = arith.addf %170, %175 : vector<8x256xf32>
    %c14 = arith.constant 14 : index
    %c0_175 = arith.constant 0 : index
    %c0_176 = arith.constant 0 : index
    %177 = vector.load %arg1[%c14, %c0_175, %c0_176] : memref<16x8x128xbf16, #tpu.memory_space<vmem>>, vector<1x8x128xbf16>
    %178 = vector.shape_cast %177 : vector<1x8x128xbf16> to vector<8x128xbf16>
    %c2_177 = arith.constant 2 : index
    %c0_178 = arith.constant 0 : index
    %c0_179 = arith.constant 0 : index
    %179 = vector.load %arg2[%c2_177, %c0_178, %c0_179] : memref<4x128x256xbf16, #tpu.memory_space<vmem>>, vector<1x128x256xbf16>
    %180 = vector.shape_cast %179 : vector<1x128x256xbf16> to vector<128x256xbf16>
    %cst_180 = arith.constant dense<0.000000e+00> : vector<8x256xf32>
    %181 = tpu.matmul %178, %180, %cst_180 {dimension_numbers = #tpu.dot_dimension_numbers<[1], [0], [0], [1], [0, 0, 1, 1], [], []>} : vector<8x128xbf16>, vector<128x256xbf16>, vector<8x256xf32> -> vector<8x256xf32>
    %182 = arith.addf %176, %181 : vector<8x256xf32>
    %c15 = arith.constant 15 : index
    %c0_181 = arith.constant 0 : index
    %c0_182 = arith.constant 0 : index
    %183 = vector.load %arg1[%c15, %c0_181, %c0_182] : memref<16x8x128xbf16, #tpu.memory_space<vmem>>, vector<1x8x128xbf16>
    %184 = vector.shape_cast %183 : vector<1x8x128xbf16> to vector<8x128xbf16>
    %c3_183 = arith.constant 3 : index
    %c0_184 = arith.constant 0 : index
    %c0_185 = arith.constant 0 : index
    %185 = vector.load %arg2[%c3_183, %c0_184, %c0_185] : memref<4x128x256xbf16, #tpu.memory_space<vmem>>, vector<1x128x256xbf16>
    %186 = vector.shape_cast %185 : vector<1x128x256xbf16> to vector<128x256xbf16>
    %cst_186 = arith.constant dense<0.000000e+00> : vector<8x256xf32>
    %187 = tpu.matmul %184, %186, %cst_186 {dimension_numbers = #tpu.dot_dimension_numbers<[1], [0], [0], [1], [0, 0, 1, 1], [], []>} : vector<8x128xbf16>, vector<128x256xbf16>, vector<8x256xf32> -> vector<8x256xf32>
    %188 = arith.addf %182, %187 : vector<8x256xf32>
    %cst_187 = arith.constant 0.000000e+00 : f32
    %189 = vector.broadcast %cst_187 : f32 to vector<8x256xf32>
    %190 = arith.maximumf %188, %189 : vector<8x256xf32>
    %191 = arith.truncf %190 : vector<8x256xf32> to vector<8x256xbf16>
    %c0_188 = arith.constant 0 : index
    %c0_189 = arith.constant 0 : index
    %192 = vector.load %arg5[%c0_188, %c0_189] : memref<1x384xf32, #tpu.memory_space<vmem>>, vector<1x384xf32>
    %193 = vector.shape_cast %192 : vector<1x384xf32> to vector<1x384xf32>
    %194 = vector.broadcast %193 : vector<1x384xf32> to vector<8x384xf32>
    %c0_190 = arith.constant 0 : index
    %c0_191 = arith.constant 0 : index
    %c0_192 = arith.constant 0 : index
    %195 = vector.load %arg4[%c0_190, %c0_191, %c0_192] : memref<2x256x384xbf16, #tpu.memory_space<vmem>>, vector<1x256x384xbf16>
    %196 = vector.shape_cast %195 : vector<1x256x384xbf16> to vector<256x384xbf16>
    %cst_193 = arith.constant dense<0.000000e+00> : vector<8x384xf32>
    %197 = tpu.matmul %29, %196, %cst_193 {dimension_numbers = #tpu.dot_dimension_numbers<[1], [0], [0], [1], [0, 0, 1, 1], [], []>} : vector<8x256xbf16>, vector<256x384xbf16>, vector<8x384xf32> -> vector<8x384xf32>
    %198 = arith.addf %194, %197 : vector<8x384xf32>
    %c1_194 = arith.constant 1 : index
    %c0_195 = arith.constant 0 : index
    %c0_196 = arith.constant 0 : index
    %199 = vector.load %arg4[%c1_194, %c0_195, %c0_196] : memref<2x256x384xbf16, #tpu.memory_space<vmem>>, vector<1x256x384xbf16>
    %200 = vector.shape_cast %199 : vector<1x256x384xbf16> to vector<256x384xbf16>
    %cst_197 = arith.constant dense<0.000000e+00> : vector<8x384xf32>
    %201 = tpu.matmul %56, %200, %cst_197 {dimension_numbers = #tpu.dot_dimension_numbers<[1], [0], [0], [1], [0, 0, 1, 1], [], []>} : vector<8x256xbf16>, vector<256x384xbf16>, vector<8x384xf32> -> vector<8x384xf32>
    %202 = arith.addf %198, %201 : vector<8x384xf32>
    %cst_198 = arith.constant 0.000000e+00 : f32
    %203 = vector.broadcast %cst_198 : f32 to vector<8x384xf32>
    %204 = arith.maximumf %202, %203 : vector<8x384xf32>
    %205 = arith.truncf %204 : vector<8x384xf32> to vector<8x384xbf16>
    %c0_199 = arith.constant 0 : index
    %c0_200 = arith.constant 0 : index
    %c0_201 = arith.constant 0 : index
    %206 = vector.load %arg4[%c0_199, %c0_200, %c0_201] : memref<2x256x384xbf16, #tpu.memory_space<vmem>>, vector<1x256x384xbf16>
    %207 = vector.shape_cast %206 : vector<1x256x384xbf16> to vector<256x384xbf16>
    %cst_202 = arith.constant dense<0.000000e+00> : vector<8x384xf32>
    %208 = tpu.matmul %56, %207, %cst_202 {dimension_numbers = #tpu.dot_dimension_numbers<[1], [0], [0], [1], [0, 0, 1, 1], [], []>} : vector<8x256xbf16>, vector<256x384xbf16>, vector<8x384xf32> -> vector<8x384xf32>
    %209 = arith.addf %194, %208 : vector<8x384xf32>
    %c1_203 = arith.constant 1 : index
    %c0_204 = arith.constant 0 : index
    %c0_205 = arith.constant 0 : index
    %210 = vector.load %arg4[%c1_203, %c0_204, %c0_205] : memref<2x256x384xbf16, #tpu.memory_space<vmem>>, vector<1x256x384xbf16>
    %211 = vector.shape_cast %210 : vector<1x256x384xbf16> to vector<256x384xbf16>
    %cst_206 = arith.constant dense<0.000000e+00> : vector<8x384xf32>
    %212 = tpu.matmul %83, %211, %cst_206 {dimension_numbers = #tpu.dot_dimension_numbers<[1], [0], [0], [1], [0, 0, 1, 1], [], []>} : vector<8x256xbf16>, vector<256x384xbf16>, vector<8x384xf32> -> vector<8x384xf32>
    %213 = arith.addf %209, %212 : vector<8x384xf32>
    %cst_207 = arith.constant 0.000000e+00 : f32
    %214 = vector.broadcast %cst_207 : f32 to vector<8x384xf32>
    %215 = arith.maximumf %213, %214 : vector<8x384xf32>
    %216 = arith.truncf %215 : vector<8x384xf32> to vector<8x384xbf16>
    %c0_208 = arith.constant 0 : index
    %c0_209 = arith.constant 0 : index
    %c0_210 = arith.constant 0 : index
    %217 = vector.load %arg4[%c0_208, %c0_209, %c0_210] : memref<2x256x384xbf16, #tpu.memory_space<vmem>>, vector<1x256x384xbf16>
    %218 = vector.shape_cast %217 : vector<1x256x384xbf16> to vector<256x384xbf16>
    %cst_211 = arith.constant dense<0.000000e+00> : vector<8x384xf32>
    %219 = tpu.matmul %83, %218, %cst_211 {dimension_numbers = #tpu.dot_dimension_numbers<[1], [0], [0], [1], [0, 0, 1, 1], [], []>} : vector<8x256xbf16>, vector<256x384xbf16>, vector<8x384xf32> -> vector<8x384xf32>
    %220 = arith.addf %194, %219 : vector<8x384xf32>
    %c1_212 = arith.constant 1 : index
    %c0_213 = arith.constant 0 : index
    %c0_214 = arith.constant 0 : index
    %221 = vector.load %arg4[%c1_212, %c0_213, %c0_214] : memref<2x256x384xbf16, #tpu.memory_space<vmem>>, vector<1x256x384xbf16>
    %222 = vector.shape_cast %221 : vector<1x256x384xbf16> to vector<256x384xbf16>
    %cst_215 = arith.constant dense<0.000000e+00> : vector<8x384xf32>
    %223 = tpu.matmul %110, %222, %cst_215 {dimension_numbers = #tpu.dot_dimension_numbers<[1], [0], [0], [1], [0, 0, 1, 1], [], []>} : vector<8x256xbf16>, vector<256x384xbf16>, vector<8x384xf32> -> vector<8x384xf32>
    %224 = arith.addf %220, %223 : vector<8x384xf32>
    %cst_216 = arith.constant 0.000000e+00 : f32
    %225 = vector.broadcast %cst_216 : f32 to vector<8x384xf32>
    %226 = arith.maximumf %224, %225 : vector<8x384xf32>
    %227 = arith.truncf %226 : vector<8x384xf32> to vector<8x384xbf16>
    %c0_217 = arith.constant 0 : index
    %c0_218 = arith.constant 0 : index
    %c0_219 = arith.constant 0 : index
    %228 = vector.load %arg4[%c0_217, %c0_218, %c0_219] : memref<2x256x384xbf16, #tpu.memory_space<vmem>>, vector<1x256x384xbf16>
    %229 = vector.shape_cast %228 : vector<1x256x384xbf16> to vector<256x384xbf16>
    %cst_220 = arith.constant dense<0.000000e+00> : vector<8x384xf32>
    %230 = tpu.matmul %110, %229, %cst_220 {dimension_numbers = #tpu.dot_dimension_numbers<[1], [0], [0], [1], [0, 0, 1, 1], [], []>} : vector<8x256xbf16>, vector<256x384xbf16>, vector<8x384xf32> -> vector<8x384xf32>
    %231 = arith.addf %194, %230 : vector<8x384xf32>
    %c1_221 = arith.constant 1 : index
    %c0_222 = arith.constant 0 : index
    %c0_223 = arith.constant 0 : index
    %232 = vector.load %arg4[%c1_221, %c0_222, %c0_223] : memref<2x256x384xbf16, #tpu.memory_space<vmem>>, vector<1x256x384xbf16>
    %233 = vector.shape_cast %232 : vector<1x256x384xbf16> to vector<256x384xbf16>
    %cst_224 = arith.constant dense<0.000000e+00> : vector<8x384xf32>
    %234 = tpu.matmul %137, %233, %cst_224 {dimension_numbers = #tpu.dot_dimension_numbers<[1], [0], [0], [1], [0, 0, 1, 1], [], []>} : vector<8x256xbf16>, vector<256x384xbf16>, vector<8x384xf32> -> vector<8x384xf32>
    %235 = arith.addf %231, %234 : vector<8x384xf32>
    %cst_225 = arith.constant 0.000000e+00 : f32
    %236 = vector.broadcast %cst_225 : f32 to vector<8x384xf32>
    %237 = arith.maximumf %235, %236 : vector<8x384xf32>
    %238 = arith.truncf %237 : vector<8x384xf32> to vector<8x384xbf16>
    %c0_226 = arith.constant 0 : index
    %c0_227 = arith.constant 0 : index
    %c0_228 = arith.constant 0 : index
    %239 = vector.load %arg4[%c0_226, %c0_227, %c0_228] : memref<2x256x384xbf16, #tpu.memory_space<vmem>>, vector<1x256x384xbf16>
    %240 = vector.shape_cast %239 : vector<1x256x384xbf16> to vector<256x384xbf16>
    %cst_229 = arith.constant dense<0.000000e+00> : vector<8x384xf32>
    %241 = tpu.matmul %137, %240, %cst_229 {dimension_numbers = #tpu.dot_dimension_numbers<[1], [0], [0], [1], [0, 0, 1, 1], [], []>} : vector<8x256xbf16>, vector<256x384xbf16>, vector<8x384xf32> -> vector<8x384xf32>
    %242 = arith.addf %194, %241 : vector<8x384xf32>
    %c1_230 = arith.constant 1 : index
    %c0_231 = arith.constant 0 : index
    %c0_232 = arith.constant 0 : index
    %243 = vector.load %arg4[%c1_230, %c0_231, %c0_232] : memref<2x256x384xbf16, #tpu.memory_space<vmem>>, vector<1x256x384xbf16>
    %244 = vector.shape_cast %243 : vector<1x256x384xbf16> to vector<256x384xbf16>
    %cst_233 = arith.constant dense<0.000000e+00> : vector<8x384xf32>
    %245 = tpu.matmul %164, %244, %cst_233 {dimension_numbers = #tpu.dot_dimension_numbers<[1], [0], [0], [1], [0, 0, 1, 1], [], []>} : vector<8x256xbf16>, vector<256x384xbf16>, vector<8x384xf32> -> vector<8x384xf32>
    %246 = arith.addf %242, %245 : vector<8x384xf32>
    %cst_234 = arith.constant 0.000000e+00 : f32
    %247 = vector.broadcast %cst_234 : f32 to vector<8x384xf32>
    %248 = arith.maximumf %246, %247 : vector<8x384xf32>
    %249 = arith.truncf %248 : vector<8x384xf32> to vector<8x384xbf16>
    %c0_235 = arith.constant 0 : index
    %c0_236 = arith.constant 0 : index
    %c0_237 = arith.constant 0 : index
    %250 = vector.load %arg4[%c0_235, %c0_236, %c0_237] : memref<2x256x384xbf16, #tpu.memory_space<vmem>>, vector<1x256x384xbf16>
    %251 = vector.shape_cast %250 : vector<1x256x384xbf16> to vector<256x384xbf16>
    %cst_238 = arith.constant dense<0.000000e+00> : vector<8x384xf32>
    %252 = tpu.matmul %164, %251, %cst_238 {dimension_numbers = #tpu.dot_dimension_numbers<[1], [0], [0], [1], [0, 0, 1, 1], [], []>} : vector<8x256xbf16>, vector<256x384xbf16>, vector<8x384xf32> -> vector<8x384xf32>
    %253 = arith.addf %194, %252 : vector<8x384xf32>
    %c1_239 = arith.constant 1 : index
    %c0_240 = arith.constant 0 : index
    %c0_241 = arith.constant 0 : index
    %254 = vector.load %arg4[%c1_239, %c0_240, %c0_241] : memref<2x256x384xbf16, #tpu.memory_space<vmem>>, vector<1x256x384xbf16>
    %255 = vector.shape_cast %254 : vector<1x256x384xbf16> to vector<256x384xbf16>
    %cst_242 = arith.constant dense<0.000000e+00> : vector<8x384xf32>
    %256 = tpu.matmul %191, %255, %cst_242 {dimension_numbers = #tpu.dot_dimension_numbers<[1], [0], [0], [1], [0, 0, 1, 1], [], []>} : vector<8x256xbf16>, vector<256x384xbf16>, vector<8x384xf32> -> vector<8x384xf32>
    %257 = arith.addf %253, %256 : vector<8x384xf32>
    %cst_243 = arith.constant 0.000000e+00 : f32
    %258 = vector.broadcast %cst_243 : f32 to vector<8x384xf32>
    %259 = arith.maximumf %257, %258 : vector<8x384xf32>
    %260 = arith.truncf %259 : vector<8x384xf32> to vector<8x384xbf16>
    %c0_244 = arith.constant 0 : index
    %c0_245 = arith.constant 0 : index
    %261 = vector.load %arg7[%c0_244, %c0_245] : memref<1x384xf32, #tpu.memory_space<vmem>>, vector<1x384xf32>
    %262 = vector.shape_cast %261 : vector<1x384xf32> to vector<1x384xf32>
    %263 = vector.broadcast %262 : vector<1x384xf32> to vector<8x384xf32>
    %c0_246 = arith.constant 0 : index
    %c0_247 = arith.constant 0 : index
    %264 = vector.load %arg6[%c0_246, %c0_247] : memref<384x384xbf16, #tpu.memory_space<vmem>>, vector<384x384xbf16>
    %cst_248 = arith.constant dense<0.000000e+00> : vector<8x384xf32>
    %265 = tpu.matmul %205, %264, %cst_248 {dimension_numbers = #tpu.dot_dimension_numbers<[1], [0], [0], [1], [0, 0, 1, 1], [], []>} : vector<8x384xbf16>, vector<384x384xbf16>, vector<8x384xf32> -> vector<8x384xf32>
    %266 = arith.addf %263, %265 : vector<8x384xf32>
    %cst_249 = arith.constant 0.000000e+00 : f32
    %267 = vector.broadcast %cst_249 : f32 to vector<8x384xf32>
    %268 = arith.maximumf %266, %267 : vector<8x384xf32>
    %269 = arith.truncf %268 : vector<8x384xf32> to vector<8x384xbf16>
    %c0_250 = arith.constant 0 : index
    %c0_251 = arith.constant 0 : index
    %270 = vector.load %arg6[%c0_250, %c0_251] : memref<384x384xbf16, #tpu.memory_space<vmem>>, vector<384x384xbf16>
    %cst_252 = arith.constant dense<0.000000e+00> : vector<8x384xf32>
    %271 = tpu.matmul %216, %270, %cst_252 {dimension_numbers = #tpu.dot_dimension_numbers<[1], [0], [0], [1], [0, 0, 1, 1], [], []>} : vector<8x384xbf16>, vector<384x384xbf16>, vector<8x384xf32> -> vector<8x384xf32>
    %272 = arith.addf %263, %271 : vector<8x384xf32>
    %cst_253 = arith.constant 0.000000e+00 : f32
    %273 = vector.broadcast %cst_253 : f32 to vector<8x384xf32>
    %274 = arith.maximumf %272, %273 : vector<8x384xf32>
    %275 = arith.truncf %274 : vector<8x384xf32> to vector<8x384xbf16>
    %c0_254 = arith.constant 0 : index
    %c0_255 = arith.constant 0 : index
    %276 = vector.load %arg6[%c0_254, %c0_255] : memref<384x384xbf16, #tpu.memory_space<vmem>>, vector<384x384xbf16>
    %cst_256 = arith.constant dense<0.000000e+00> : vector<8x384xf32>
    %277 = tpu.matmul %227, %276, %cst_256 {dimension_numbers = #tpu.dot_dimension_numbers<[1], [0], [0], [1], [0, 0, 1, 1], [], []>} : vector<8x384xbf16>, vector<384x384xbf16>, vector<8x384xf32> -> vector<8x384xf32>
    %278 = arith.addf %263, %277 : vector<8x384xf32>
    %cst_257 = arith.constant 0.000000e+00 : f32
    %279 = vector.broadcast %cst_257 : f32 to vector<8x384xf32>
    %280 = arith.maximumf %278, %279 : vector<8x384xf32>
    %281 = arith.truncf %280 : vector<8x384xf32> to vector<8x384xbf16>
    %c0_258 = arith.constant 0 : index
    %c0_259 = arith.constant 0 : index
    %282 = vector.load %arg6[%c0_258, %c0_259] : memref<384x384xbf16, #tpu.memory_space<vmem>>, vector<384x384xbf16>
    %cst_260 = arith.constant dense<0.000000e+00> : vector<8x384xf32>
    %283 = tpu.matmul %238, %282, %cst_260 {dimension_numbers = #tpu.dot_dimension_numbers<[1], [0], [0], [1], [0, 0, 1, 1], [], []>} : vector<8x384xbf16>, vector<384x384xbf16>, vector<8x384xf32> -> vector<8x384xf32>
    %284 = arith.addf %263, %283 : vector<8x384xf32>
    %cst_261 = arith.constant 0.000000e+00 : f32
    %285 = vector.broadcast %cst_261 : f32 to vector<8x384xf32>
    %286 = arith.maximumf %284, %285 : vector<8x384xf32>
    %287 = arith.truncf %286 : vector<8x384xf32> to vector<8x384xbf16>
    %c0_262 = arith.constant 0 : index
    %c0_263 = arith.constant 0 : index
    %288 = vector.load %arg6[%c0_262, %c0_263] : memref<384x384xbf16, #tpu.memory_space<vmem>>, vector<384x384xbf16>
    %cst_264 = arith.constant dense<0.000000e+00> : vector<8x384xf32>
    %289 = tpu.matmul %249, %288, %cst_264 {dimension_numbers = #tpu.dot_dimension_numbers<[1], [0], [0], [1], [0, 0, 1, 1], [], []>} : vector<8x384xbf16>, vector<384x384xbf16>, vector<8x384xf32> -> vector<8x384xf32>
    %290 = arith.addf %263, %289 : vector<8x384xf32>
    %cst_265 = arith.constant 0.000000e+00 : f32
    %291 = vector.broadcast %cst_265 : f32 to vector<8x384xf32>
    %292 = arith.maximumf %290, %291 : vector<8x384xf32>
    %293 = arith.truncf %292 : vector<8x384xf32> to vector<8x384xbf16>
    %c0_266 = arith.constant 0 : index
    %c0_267 = arith.constant 0 : index
    %294 = vector.load %arg6[%c0_266, %c0_267] : memref<384x384xbf16, #tpu.memory_space<vmem>>, vector<384x384xbf16>
    %cst_268 = arith.constant dense<0.000000e+00> : vector<8x384xf32>
    %295 = tpu.matmul %260, %294, %cst_268 {dimension_numbers = #tpu.dot_dimension_numbers<[1], [0], [0], [1], [0, 0, 1, 1], [], []>} : vector<8x384xbf16>, vector<384x384xbf16>, vector<8x384xf32> -> vector<8x384xf32>
    %296 = arith.addf %263, %295 : vector<8x384xf32>
    %cst_269 = arith.constant 0.000000e+00 : f32
    %297 = vector.broadcast %cst_269 : f32 to vector<8x384xf32>
    %298 = arith.maximumf %296, %297 : vector<8x384xf32>
    %299 = arith.truncf %298 : vector<8x384xf32> to vector<8x384xbf16>
    %c0_270 = arith.constant 0 : index
    %c0_271 = arith.constant 0 : index
    %300 = vector.load %arg9[%c0_270, %c0_271] : memref<1x256xf32, #tpu.memory_space<vmem>>, vector<1x256xf32>
    %301 = vector.shape_cast %300 : vector<1x256xf32> to vector<1x256xf32>
    %302 = vector.broadcast %301 : vector<1x256xf32> to vector<8x256xf32>
    %c0_272 = arith.constant 0 : index
    %c0_273 = arith.constant 0 : index
    %c0_274 = arith.constant 0 : index
    %303 = vector.load %arg8[%c0_272, %c0_273, %c0_274] : memref<6x384x256xbf16, #tpu.memory_space<vmem>>, vector<1x384x256xbf16>
    %304 = vector.shape_cast %303 : vector<1x384x256xbf16> to vector<384x256xbf16>
    %cst_275 = arith.constant dense<0.000000e+00> : vector<8x256xf32>
    %305 = tpu.matmul %269, %304, %cst_275 {dimension_numbers = #tpu.dot_dimension_numbers<[1], [0], [0], [1], [0, 0, 1, 1], [], []>} : vector<8x384xbf16>, vector<384x256xbf16>, vector<8x256xf32> -> vector<8x256xf32>
    %306 = arith.addf %302, %305 : vector<8x256xf32>
    %c1_276 = arith.constant 1 : index
    %c0_277 = arith.constant 0 : index
    %c0_278 = arith.constant 0 : index
    %307 = vector.load %arg8[%c1_276, %c0_277, %c0_278] : memref<6x384x256xbf16, #tpu.memory_space<vmem>>, vector<1x384x256xbf16>
    %308 = vector.shape_cast %307 : vector<1x384x256xbf16> to vector<384x256xbf16>
    %cst_279 = arith.constant dense<0.000000e+00> : vector<8x256xf32>
    %309 = tpu.matmul %275, %308, %cst_279 {dimension_numbers = #tpu.dot_dimension_numbers<[1], [0], [0], [1], [0, 0, 1, 1], [], []>} : vector<8x384xbf16>, vector<384x256xbf16>, vector<8x256xf32> -> vector<8x256xf32>
    %310 = arith.addf %306, %309 : vector<8x256xf32>
    %c2_280 = arith.constant 2 : index
    %c0_281 = arith.constant 0 : index
    %c0_282 = arith.constant 0 : index
    %311 = vector.load %arg8[%c2_280, %c0_281, %c0_282] : memref<6x384x256xbf16, #tpu.memory_space<vmem>>, vector<1x384x256xbf16>
    %312 = vector.shape_cast %311 : vector<1x384x256xbf16> to vector<384x256xbf16>
    %cst_283 = arith.constant dense<0.000000e+00> : vector<8x256xf32>
    %313 = tpu.matmul %281, %312, %cst_283 {dimension_numbers = #tpu.dot_dimension_numbers<[1], [0], [0], [1], [0, 0, 1, 1], [], []>} : vector<8x384xbf16>, vector<384x256xbf16>, vector<8x256xf32> -> vector<8x256xf32>
    %314 = arith.addf %310, %313 : vector<8x256xf32>
    %c3_284 = arith.constant 3 : index
    %c0_285 = arith.constant 0 : index
    %c0_286 = arith.constant 0 : index
    %315 = vector.load %arg8[%c3_284, %c0_285, %c0_286] : memref<6x384x256xbf16, #tpu.memory_space<vmem>>, vector<1x384x256xbf16>
    %316 = vector.shape_cast %315 : vector<1x384x256xbf16> to vector<384x256xbf16>
    %cst_287 = arith.constant dense<0.000000e+00> : vector<8x256xf32>
    %317 = tpu.matmul %287, %316, %cst_287 {dimension_numbers = #tpu.dot_dimension_numbers<[1], [0], [0], [1], [0, 0, 1, 1], [], []>} : vector<8x384xbf16>, vector<384x256xbf16>, vector<8x256xf32> -> vector<8x256xf32>
    %318 = arith.addf %314, %317 : vector<8x256xf32>
    %c4_288 = arith.constant 4 : index
    %c0_289 = arith.constant 0 : index
    %c0_290 = arith.constant 0 : index
    %319 = vector.load %arg8[%c4_288, %c0_289, %c0_290] : memref<6x384x256xbf16, #tpu.memory_space<vmem>>, vector<1x384x256xbf16>
    %320 = vector.shape_cast %319 : vector<1x384x256xbf16> to vector<384x256xbf16>
    %cst_291 = arith.constant dense<0.000000e+00> : vector<8x256xf32>
    %321 = tpu.matmul %293, %320, %cst_291 {dimension_numbers = #tpu.dot_dimension_numbers<[1], [0], [0], [1], [0, 0, 1, 1], [], []>} : vector<8x384xbf16>, vector<384x256xbf16>, vector<8x256xf32> -> vector<8x256xf32>
    %322 = arith.addf %318, %321 : vector<8x256xf32>
    %c5_292 = arith.constant 5 : index
    %c0_293 = arith.constant 0 : index
    %c0_294 = arith.constant 0 : index
    %323 = vector.load %arg8[%c5_292, %c0_293, %c0_294] : memref<6x384x256xbf16, #tpu.memory_space<vmem>>, vector<1x384x256xbf16>
    %324 = vector.shape_cast %323 : vector<1x384x256xbf16> to vector<384x256xbf16>
    %cst_295 = arith.constant dense<0.000000e+00> : vector<8x256xf32>
    %325 = tpu.matmul %299, %324, %cst_295 {dimension_numbers = #tpu.dot_dimension_numbers<[1], [0], [0], [1], [0, 0, 1, 1], [], []>} : vector<8x384xbf16>, vector<384x256xbf16>, vector<8x256xf32> -> vector<8x256xf32>
    %326 = arith.addf %322, %325 : vector<8x256xf32>
    %cst_296 = arith.constant 0.000000e+00 : f32
    %327 = vector.broadcast %cst_296 : f32 to vector<8x256xf32>
    %328 = arith.maximumf %326, %327 : vector<8x256xf32>
    %329 = arith.truncf %328 : vector<8x256xf32> to vector<8x256xbf16>
    %c0_297 = arith.constant 0 : index
    %c0_298 = arith.constant 0 : index
    %330 = vector.load %arg10[%c0_297, %c0_298] : memref<256x128xbf16, #tpu.memory_space<vmem>>, vector<256x128xbf16>
    %cst_299 = arith.constant dense<0.000000e+00> : vector<8x128xf32>
    %331 = tpu.matmul %329, %330, %cst_299 {dimension_numbers = #tpu.dot_dimension_numbers<[1], [0], [0], [1], [0, 0, 1, 1], [], []>} : vector<8x256xbf16>, vector<256x128xbf16>, vector<8x128xf32> -> vector<8x128xf32>
    %c0_300 = arith.constant 0 : index
    %c0_301 = arith.constant 0 : index
    %332 = vector.load %arg11[%c0_300, %c0_301] : memref<1x128xf32, #tpu.memory_space<vmem>>, vector<1x128xf32>
    %333 = vector.broadcast %332 : vector<1x128xf32> to vector<8x128xf32>
    %334 = arith.addf %331, %333 : vector<8x128xf32>
    %c0_302 = arith.constant 0 : index
    %c0_303 = arith.constant 0 : index
    %335 = vector.load %arg12[%c0_302, %c0_303] : memref<8x128xf32, #tpu.memory_space<vmem>>, vector<8x128xf32>
    tpu.vector_store %arg12[%c0_302, %c0_303], %334 {strides = array<i32>} : memref<8x128xf32, #tpu.memory_space<vmem>>, vector<8x128xf32>,
    return
  }
  func.func @transform_0(%arg0: i32) -> (i32, i32, i32) {
    %c0_i32 = arith.constant 0 : i32
    %c0_i32_0 = arith.constant 0 : i32
    %c0_i32_1 = arith.constant 0 : i32
    return %c0_i32, %arg0, %c0_i32_0 : i32, i32, i32
  }
  func.func @transform_1(%arg0: i32) -> (i32, i32, i32) {
    %c0_i32 = arith.constant 0 : i32
    %c0_i32_0 = arith.constant 0 : i32
    %c0_i32_1 = arith.constant 0 : i32
    %c0_i32_2 = arith.constant 0 : i32
    return %c0_i32, %c0_i32_0, %c0_i32_1 : i32, i32, i32
  }
  func.func @transform_2(%arg0: i32) -> (i32, i32) {
    %c0_i32 = arith.constant 0 : i32
    %c0_i32_0 = arith.constant 0 : i32
    %c0_i32_1 = arith.constant 0 : i32
    return %c0_i32, %c0_i32_0 : i32, i32
  }
  func.func @transform_3(%arg0: i32) -> (i32, i32, i32) {
    %c0_i32 = arith.constant 0 : i32
    %c0_i32_0 = arith.constant 0 : i32
    %c0_i32_1 = arith.constant 0 : i32
    %c0_i32_2 = arith.constant 0 : i32
    return %c0_i32, %c0_i32_0, %c0_i32_1 : i32, i32, i32
  }
  func.func @transform_4(%arg0: i32) -> (i32, i32) {
    %c0_i32 = arith.constant 0 : i32
    %c0_i32_0 = arith.constant 0 : i32
    %c0_i32_1 = arith.constant 0 : i32
    return %c0_i32, %c0_i32_0 : i32, i32
  }
  func.func @transform_5(%arg0: i32) -> (i32, i32) {
    %c0_i32 = arith.constant 0 : i32
    %c0_i32_0 = arith.constant 0 : i32
    %c0_i32_1 = arith.constant 0 : i32
    return %c0_i32, %c0_i32_0 : i32, i32
  }
  func.func @transform_6(%arg0: i32) -> (i32, i32) {
    %c0_i32 = arith.constant 0 : i32
    %c0_i32_0 = arith.constant 0 : i32
    %c0_i32_1 = arith.constant 0 : i32
    return %c0_i32, %c0_i32_0 : i32, i32
  }
  func.func @transform_7(%arg0: i32) -> (i32, i32, i32) {
    %c0_i32 = arith.constant 0 : i32
    %c0_i32_0 = arith.constant 0 : i32
    %c0_i32_1 = arith.constant 0 : i32
    %c0_i32_2 = arith.constant 0 : i32
    return %c0_i32, %c0_i32_0, %c0_i32_1 : i32, i32, i32
  }
  func.func @transform_8(%arg0: i32) -> (i32, i32) {
    %c0_i32 = arith.constant 0 : i32
    %c0_i32_0 = arith.constant 0 : i32
    %c0_i32_1 = arith.constant 0 : i32
    return %c0_i32, %c0_i32_0 : i32, i32
  }
  func.func @transform_9(%arg0: i32) -> (i32, i32) {
    %c0_i32 = arith.constant 0 : i32
    %c0_i32_0 = arith.constant 0 : i32
    %c0_i32_1 = arith.constant 0 : i32
    return %c0_i32, %c0_i32_0 : i32, i32
  }
  func.func @transform_10(%arg0: i32) -> (i32, i32) {
    %c0_i32 = arith.constant 0 : i32
    %c0_i32_0 = arith.constant 0 : i32
    %c0_i32_1 = arith.constant 0 : i32
    return %c0_i32, %c0_i32_0 : i32, i32
  }
  func.func @transform_11(%arg0: i32) -> (i32, i32) {
    %c0_i32 = arith.constant 0 : i32
    %c0_i32_0 = arith.constant 0 : i32
    return %arg0, %c0_i32 : i32, i32
  }
}

</mosaic_0001>

<bundles_post_ra>
// kernel: forward.1
= control target key start
LH: loop header
LB: loop body
LE: loop exit
PB: predicated region body
PF: predicated region fallthrough
CT: control target
= control target key end

     0   :  { %16 = vsyncpa [#allocation3], 0  ;;  %s12853_s0 = inlined_call_operand.vmem [shape: bf16[16,8,128], index: 0, kind: input, shape index: {}]   ;;  %s12854_s1 = inlined_call_operand.hbm [shape: bf16[4,128,256], index: 1, kind: input, shape index: {}]   ;;  %s12855_s2 = inlined_call_operand.hbm [shape: f32[1,256], index: 2, kind: input, shape index: {}]   ;;  %s12856_s3 = inlined_call_operand.hbm [shape: bf16[2,256,384], index: 3, kind: input, shape index: {}]   ;;  %s12857_s4 = inlined_call_operand.hbm [shape: f32[1,384], index: 4, kind: input, shape index: {}]   ;;  %s12858_s5 = inlined_call_operand.hbm [shape: bf16[384,384], index: 5, kind: input, shape index: {}]   ;;  %s12859_s6 = inlined_call_operand.hbm [shape: f32[1,384], index: 6, kind: input, shape index: {}]   ;;  %s12860_s7 = inlined_call_operand.hbm [shape: bf16[6,384,256], index: 7, kind: input, shape index: {}]   ;;  %s12861_s8 = inlined_call_operand.hbm [shape: f32[1,256], index: 8, kind: input, shape index: {}]   ;;  %s12862_s9 = inlined_call_operand.hbm [shape: bf16[256,128], index: 9, kind: input, shape index: {}]   ;;  %s12863_s10 = inlined_call_operand.hbm [shape: f32[1,128], index: 10, kind: input, shape index: {}]   ;;  %s12864_s11 = inlined_call_operand.vmem [shape: f32[8,128], index: 11, kind: output, shape index: {}]  }
   0x1   :  { %17 = vsyncpa [#allocation5], 0 }
   0x2   :  { %18 = vsyncpa [#allocation8], 0 }
   0x3   :  { %19 = vsyncpa [#allocation11], 0 }
   0x4   :  { %20 = vsyncpa [#allocation14], 0 }
   0x5   :  { %21 = vsyncpa [#allocation17], 0  ;;  %s9924_s17 = smov [#allocation4]   ;;  %s9925_s19 = smov [#allocation7]  }
   0x6   :  { %s42_s18 = sshll.u32 %s9924_s17, 4  ;;  %s64_s20 = sshll.u32 %s9925_s19, 4  ;;  %s43_s18 = int_to_ptr.vmem [resolvable:$true] %s42_s18  ;;  %s65_s20 = int_to_ptr.vmem [resolvable:$true] %s64_s20 }
   0x7   :  { %s9720_s21 = scalar_lea.vmem %s43_s18, 32  ;;  %p9725_p1 = scmp.lt.s32.totalorder %s43_s18, %s43_s18 }
   0x8   :  { %p9721_p0 = scmp.ne.s32.totalorder %s43_s18, %s9720_s21  ;;  %p9726_p2 = scmp.lt.s32.totalorder %s9720_s21, %s9720_s21 }
   0xa   :  { %p9727_p3 = por %p9726_p2, %p9725_p1 }
   0xc   :  { %p9728_p4 = pnand %p9727_p3, %p9721_p0 }
   0xe   :  { %9731 = shalt.err (!%p9728_p4)
}
   0xf   :  { %45 = dma.hbm_to_vmem [thread:$0]  %s12855_s2, 32, %s43_s18, [#allocation5]  }
  0x10   :  { %s9740_s24 = scalar_lea.vmem %s65_s20, 48  ;;  %s9744_s25 = scalar_lea.vmem %s65_s20, 64 }
  0x11   :  { %p9741_p5 = scmp.ne.s32.totalorder %s65_s20, %s9740_s24  ;;  %p9745_p6 = scmp.lt.s32.totalorder %s65_s20, %s65_s20 }
  0x12   :  { %p9746_p7 = scmp.lt.s32.totalorder %s9744_s25, %s9740_s24 }
  0x14   :  { %p9747_p8 = por %p9746_p7, %p9745_p6 }
  0x16   :  { %p9748_p9 = pnand %p9747_p8, %p9741_p5 }
  0x18   :  { %9751 = shalt.err (!%p9748_p9)
}
  0x19   :  { %67 = dma.hbm_to_vmem [thread:$0]  %s12857_s4, 48, %s65_s20, [#allocation8]  }
  0x1a   :  { %s9926_s28 = smov [#allocation10]   ;;  %s9927_s30 = smov [#allocation13]  }
  0x1b   :  { %s86_s29 = sshll.u32 %s9926_s28, 4  ;;  %s108_s12 = sshll.u32 %s9927_s30, 4  ;;  %s87_s29 = int_to_ptr.vmem [resolvable:$true] %s86_s29  ;;  %s109_s12 = int_to_ptr.vmem [resolvable:$true] %s108_s12 }
  0x1c   :  { %s9760_s13 = scalar_lea.vmem %s87_s29, 48  ;;  %s9764_s2 = scalar_lea.vmem %s87_s29, 64 }
  0x1d   :  { %p9761_p10 = scmp.ne.s32.totalorder %s87_s29, %s9760_s13  ;;  %p9765_p11 = scmp.lt.s32.totalorder %s87_s29, %s87_s29 }
  0x1e   :  { %p9766_p12 = scmp.lt.s32.totalorder %s9764_s2, %s9760_s13 }
  0x20   :  { %p9767_p13 = por %p9766_p12, %p9765_p11 }
  0x22   :  { %p9768_p0 = pnand %p9767_p13, %p9761_p10 }
  0x24   :  { %9771 = shalt.err (!%p9768_p0)
}
  0x25   :  { %89 = dma.hbm_to_vmem [thread:$0]  %s12859_s6, 48, %s87_s29, [#allocation11]  }
  0x26   :  { %s9780_s16 = scalar_lea.vmem %s109_s12, 32  ;;  %p9785_p2 = scmp.lt.s32.totalorder %s109_s12, %s109_s12 }
  0x27   :  { %p9781_p1 = scmp.ne.s32.totalorder %s109_s12, %s9780_s16  ;;  %p9786_p3 = scmp.lt.s32.totalorder %s9780_s16, %s9780_s16 }
  0x29   :  { %p9787_p4 = por %p9786_p3, %p9785_p2 }
  0x2b   :  { %p9788_p5 = pnand %p9787_p4, %p9781_p1 }
  0x2d   :  { %9791 = shalt.err (!%p9788_p5)
}
  0x2e   :  { %111 = dma.hbm_to_vmem [thread:$0]  %s12861_s8, 32, %s109_s12, [#allocation14]  }
  0x2f   :  { %s9928_s18 = smov [#allocation2]  }
  0x30   :  { %s29_s19 = sshll.u32 %s9928_s18, 4  ;;  %s30_s19 = int_to_ptr.vmem [resolvable:$true] %s29_s19 }
  0x31   :  { %s9800_s20 = scalar_lea.vmem %s30_s19, 8192  ;;  %p9805_p7 = scmp.lt.s32.totalorder %s30_s19, %s30_s19 }
  0x32   :  { %p9801_p6 = scmp.ne.s32.totalorder %s30_s19, %s9800_s20  ;;  %p9806_p8 = scmp.lt.s32.totalorder %s9800_s20, %s9800_s20 }
  0x34   :  { %p9807_p9 = por %p9806_p8, %p9805_p7 }
  0x36   :  { %p9808_p10 = pnand %p9807_p9, %p9801_p6 }
  0x38   :  { %9811 = shalt.err (!%p9808_p10)
}
  0x39   :  { %s9929_s6 = smov 128   ;;  %s9930_s21 = smov 8  }
  0x3a   :  { %35 = dma.hbm_to_vmem [thread:$0]  %s12854_s1, 8192, %s30_s19, [#allocation3], %s9929_s6, %s9929_s6, %s9930_s21  }
  0x3b   :  { %s9931_s8 = smov [#allocation6]  }
  0x3c   :  { %s51_s24 = sshll.u32 %s9931_s8, 4  ;;  %s52_s24 = int_to_ptr.vmem [resolvable:$true] %s51_s24 }
  0x3d   :  { %s9820_s25 = scalar_lea.vmem %s52_s24, 12288  ;;  %p9825_p12 = scmp.lt.s32.totalorder %s52_s24, %s52_s24 }
  0x3e   :  { %p9821_p11 = scmp.ne.s32.totalorder %s52_s24, %s9820_s25  ;;  %p9826_p13 = scmp.lt.s32.totalorder %s9820_s25, %s9820_s25 }
  0x40   :  { %p9827_p0 = por %p9826_p13, %p9825_p12 }
  0x42   :  { %p9828_p1 = pnand %p9827_p0, %p9821_p11 }
  0x44   :  { %9831 = shalt.err (!%p9828_p1)
}
  0x45   :  { %s9932_s26 = smov 192   ;;  %s9933_s27 = smov 12  }
  0x46   :  { %57 = dma.hbm_to_vmem [thread:$0]  %s12856_s3, 12288, %s52_s24, [#allocation5], %s9932_s26, %s9932_s26, %s9933_s27  }
  0x47   :  { %s9934_s30 = smov [#allocation9]   ;;  %s9935_s13 = smov [#allocation12]  }
  0x48   :  { %s73_s12 = sshll.u32 %s9934_s30, 4  ;;  %s95_s1 = sshll.u32 %s9935_s13, 4  ;;  %s74_s12 = int_to_ptr.vmem [resolvable:$true] %s73_s12  ;;  %s96_s1 = int_to_ptr.vmem [resolvable:$true] %s95_s1 }
  0x49   :  { %s9840_s2 = scalar_lea.vmem %s74_s12, 9216  ;;  %p9845_p3 = scmp.lt.s32.totalorder %s74_s12, %s74_s12 }
  0x4a   :  { %p9841_p2 = scmp.ne.s32.totalorder %s74_s12, %s9840_s2  ;;  %p9846_p4 = scmp.lt.s32.totalorder %s9840_s2, %s9840_s2 }
  0x4c   :  { %p9847_p5 = por %p9846_p4, %p9845_p3 }
  0x4e   :  { %p9848_p6 = pnand %p9847_p5, %p9841_p2 }
  0x50   :  { %9851 = shalt.err (!%p9848_p6)
}
  0x51   :  { %79 = dma.hbm_to_vmem [thread:$0]  %s12858_s5, 9216, %s74_s12, [#allocation8], %s9932_s26, %s9932_s26, %s9933_s27  }
  0x52   :  { %s9860_s16 = scalar_lea.vmem %s96_s1, 36864  ;;  %p9865_p8 = scmp.lt.s32.totalorder %s96_s1, %s96_s1 }
  0x53   :  { %p9861_p7 = scmp.ne.s32.totalorder %s96_s1, %s9860_s16  ;;  %p9866_p9 = scmp.lt.s32.totalorder %s9860_s16, %s9860_s16 }
  0x55   :  { %p9867_p10 = por %p9866_p9, %p9865_p8 }
  0x57   :  { %p9868_p11 = pnand %p9867_p10, %p9861_p7 }
  0x59   :  { %9871 = shalt.err (!%p9868_p11)
}
  0x5a   :  { %101 = dma.hbm_to_vmem [thread:$0]  %s12860_s7, 36864, %s96_s1, [#allocation11], %s9929_s6, %s9929_s6, %s9930_s21  }
  0x5b   :  { %s9936_s17 = smov [#allocation15]  }
  0x5c   :  { %s117_s18 = sshll.u32 %s9936_s17, 4  ;;  %s118_s18 = int_to_ptr.vmem [resolvable:$true] %s117_s18 }
  0x5d   :  { %s9880_s19 = scalar_lea.vmem %s118_s18, 2048  ;;  %p9885_p13 = scmp.lt.s32.totalorder %s118_s18, %s118_s18 }
  0x5e   :  { %p9881_p12 = scmp.ne.s32.totalorder %s118_s18, %s9880_s19  ;;  %p9886_p0 = scmp.lt.s32.totalorder %s9880_s19, %s9880_s19 }
  0x60   :  { %p9887_p1 = por %p9886_p0, %p9885_p13 }
  0x62   :  { %p9888_p2 = pnand %p9887_p1, %p9881_p12 }
  0x64   :  { %9891 = shalt.err (!%p9888_p2)
}
  0x65   :  { %s9937_s5 = smov 64   ;;  %s9938_s20 = smov 4  }
  0x66   :  { %123 = dma.hbm_to_vmem [thread:$0]  %s12862_s9, 2048, %s118_s18, [#allocation14], %s9937_s5, %s9937_s5, %s9938_s20  }
  0x67   :  { %s9939_s8 = smov [#allocation16]  }
  0x68   :  { %s130_s24 = sshll.u32 %s9939_s8, 4  ;;  %s131_s24 = int_to_ptr.vmem [resolvable:$true] %s130_s24 }
  0x69   :  { %s9900_s7 = scalar_lea.vmem %s131_s24, 16  ;;  %s9904_s6 = scalar_lea.vmem %s131_s24, 32 }
  0x6a   :  { %p9901_p3 = scmp.ne.s32.totalorder %s131_s24, %s9900_s7  ;;  %p9905_p4 = scmp.lt.s32.totalorder %s131_s24, %s131_s24 }
  0x6b   :  { %p9906_p5 = scmp.lt.s32.totalorder %s9904_s6, %s9900_s7 }
  0x6d   :  { %p9907_p6 = por %p9906_p5, %p9905_p4 }
  0x6f   :  { %p9908_p7 = pnand %p9907_p6, %p9901_p3 }
  0x71   :  { %9911 = shalt.err (!%p9908_p7)
}
  0x72   :  { %133 = dma.hbm_to_vmem [thread:$0]  %s12863_s10, 16, %s131_s24, [#allocation17]  }
  0x73   :  { %9912 = dma.done.wait [#allocation3], 8192  }
  0x74   :  { %9913 = vsyncadd [#allocation3], 4294959104 }
  0x75   :  { %9914 = dma.done.wait [#allocation5], 12320  }
  0x76   :  { %9915 = vsyncadd [#allocation5], 4294954976 }
  0x77   :  { %9916 = dma.done.wait [#allocation8], 9264  }
  0x78   :  { %9917 = vsyncadd [#allocation8], 4294958032 }
  0x79   :  { %9918 = dma.done.wait [#allocation11], 36912  }
  0x7a   :  { %9919 = vsyncadd [#allocation11], 4294930384 }
  0x7b   :  { %9920 = dma.done.wait [#allocation14], 2080  }
  0x7c   :  { %9921 = vsyncadd [#allocation14], 4294965216 }
  0x7d   :  { %9922 = dma.done.wait [#allocation17], 16  }
  0x7e   :  { %9923 = vsyncadd [#allocation17], 4294967280  ;;  %v12865_v0 = vmov 0   ;;  %v10041_v1 = vld [vmem:[#allocation2 + $0x74] ss:$8 sps:$4 sm:$0xff]   ;;  %vm9942_vm0 = vmmov 0  }
  0x7f   :  { %306 = vmatprep.mubr.bf16.mxu0 %v12865_v0  ;;  %448 = vmatprep.mubr.bf16.mxu1 %v12865_v0  ;;  %v10043_v2 = vld [vmem:[#allocation2 + $0xf4] ss:$8 sps:$4 sm:$0xff]   ;;  %v10046_v3 = vld [vmem:[#allocation2 + $0x70] ss:$8 sps:$4 sm:$0xff]   ;;  %v10051_v5 = vld [vmem:[#allocation2 + $0x64] ss:$8 sps:$4 sm:$0xff]  }
  0x80   :  { %274 = vmatprep.subr.bf16.mxu0 %v10041_v1  ;;  %v10048_v4 = vld [vmem:[#allocation2 + $0xf0] ss:$8 sps:$4 sm:$0xff]   ;;  %416 = vmatprep.subr.bf16.mxu1 %v10043_v2  ;;  %v10055_v6 = vld [vmem:[#allocation2 + $0xe4] ss:$8 sps:$4 sm:$0xff]   ;;  %v10057_v7 = vld [vmem:[#allocation2 + $0x60] ss:$8 sps:$4 sm:$0xff]  }
  0x81   :  { %275 = vmatpush1.bf16.msra.mxu0 %v10046_v3  ;;  %417 = vmatpush1.bf16.msra.mxu1 %v10048_v4  ;;  %v10060_v8 = vld [vmem:[#allocation2 + $0xe0] ss:$8 sps:$4 sm:$0xff]   ;;  %v10063_v9 = vld [vmem:[#allocation2 + $0x54] ss:$8 sps:$4 sm:$0xff]   ;;  %v10067_v11 = vld [vmem:[#allocation2 + $0x50] ss:$8 sps:$4 sm:$0xff]  }
  0x82   :  { %276 = vmatprep.subr.bf16.mxu0 %v10051_v5  ;;  %418 = vmatprep.subr.bf16.mxu1 %v10055_v6  ;;  %v10065_v10 = vld [vmem:[#allocation2 + $0xd4] ss:$8 sps:$4 sm:$0xff]   ;;  %v10069_v12 = vld [vmem:[#allocation2 + $0xd0] ss:$8 sps:$4 sm:$0xff]   ;;  %v10073_v13 = vld [vmem:[#allocation2 + $0x44] ss:$8 sps:$4 sm:$0xff]  }
  0x83   :  { %v10077_v14 = vld [vmem:[#allocation2 + $0xc4] ss:$8 sps:$4 sm:$0xff]   ;;  %v10079_v15 = vld [vmem:[#allocation2 + $0x40] ss:$8 sps:$4 sm:$0xff]   ;;  %v10085_v17 = vld [vmem:[#allocation2 + $0x34] ss:$8 sps:$4 sm:$0xff]  }
  0x84   :  { %v10083_v16 = vld [vmem:[#allocation2 + $0xc0] ss:$8 sps:$4 sm:$0xff]   ;;  %v10089_v18 = vld [vmem:[#allocation2 + $0xb4] ss:$8 sps:$4 sm:$0xff]   ;;  %v10091_v19 = vld [vmem:[#allocation2 + $0x30] ss:$8 sps:$4 sm:$0xff]  }
  0x85   :  { %277 = vmatpush1.bf16.msra.mxu0 %v10057_v7  ;;  %419 = vmatpush1.bf16.msra.mxu1 %v10060_v8  ;;  %v10093_v20 = vld [vmem:[#allocation2 + $0xb0] ss:$8 sps:$4 sm:$0xff]   ;;  %v10097_v21 = vld [vmem:[#allocation2 + $0x24] ss:$8 sps:$4 sm:$0xff]   ;;  %v10105_v23 = vld [vmem:[#allocation2 + $0x20] ss:$8 sps:$4 sm:$0xff]  }
  0x86   :  { %278 = vmatprep.subr.bf16.mxu0 %v10063_v9  ;;  %420 = vmatprep.subr.bf16.mxu1 %v10065_v10  ;;  %v10101_v22 = vld [vmem:[#allocation2 + $0xa4] ss:$8 sps:$4 sm:$0xff]   ;;  %v10107_v24 = vld [vmem:[#allocation2 + $0xa0] ss:$8 sps:$4 sm:$0xff]   ;;  %v10111_v25 = vld [vmem:[#allocation2 + $0x14] ss:$8 sps:$4 sm:$0xff]  }
  0x87   :  { %v10113_v26 = vld [vmem:[#allocation2 + $0x94] ss:$8 sps:$4 sm:$0xff]   ;;  %v10115_v27 = vld [vmem:[#allocation2 + $0x10] ss:$8 sps:$4 sm:$0xff]   ;;  %v10121_v29 = vld [vmem:[#allocation2 + $0x4] ss:$8 sps:$4 sm:$0xff]  }
  0x88   :  { %v10119_v28 = vld [vmem:[#allocation2 + $0x90] ss:$8 sps:$4 sm:$0xff]   ;;  %v10125_v30 = vld [vmem:[#allocation2 + $0x84] ss:$8 sps:$4 sm:$0xff]   ;;  %v10127_v31 = vld [vmem:[#allocation2] ss:$8 sps:$4 sm:$0xff]  }
  0x89   :  { %279 = vmatpush1.bf16.msra.mxu0 %v10067_v11  ;;  %421 = vmatpush1.bf16.msra.mxu1 %v10069_v12  ;;  %v10131_v32 = vld [vmem:[#allocation2 + $0x80] ss:$8 sps:$4 sm:$0xff]   ;;  %v10135_v33 = vld [vmem:[#allocation2 + $0x174] ss:$8 sps:$4 sm:$0xff]   ;;  %v7507_v36 = vld [vmem:[%s12853_s0 + $0x4] sm:$0xf] }
  0x8a   :  { %280 = vmatprep.subr.bf16.mxu0 %v10073_v13  ;;  %422 = vmatprep.subr.bf16.mxu1 %v10077_v14  ;;  %v10137_v34 = vld [vmem:[#allocation2 + $0x1f4] ss:$8 sps:$4 sm:$0xff]   ;;  %v177_v35 = vld [vmem:[%s12853_s0] sm:$0xf]  ;;  %v10145_v37 = vld [vmem:[#allocation2 + $0x170] ss:$8 sps:$4 sm:$0xff]  }
  0x8b   :  { %v10149_v38 = vld [vmem:[#allocation2 + $0x1f0] ss:$8 sps:$4 sm:$0xff]   ;;  %v10151_v39 = vld [vmem:[#allocation2 + $0x164] ss:$8 sps:$4 sm:$0xff]   ;;  %v10157_v41 = vld [vmem:[#allocation2 + $0x160] ss:$8 sps:$4 sm:$0xff]  }
  0x8c   :  { %v10155_v40 = vld [vmem:[#allocation2 + $0x1e4] ss:$8 sps:$4 sm:$0xff]   ;;  %v10161_v42 = vld [vmem:[#allocation2 + $0x1e0] ss:$8 sps:$4 sm:$0xff]   ;;  %v10165_v43 = vld [vmem:[#allocation2 + $0x154] ss:$8 sps:$4 sm:$0xff]  }
  0x8d   :  { %281 = vmatpush1.bf16.msra.mxu0 %v10079_v15  ;;  %423 = vmatpush1.bf16.msra.mxu1 %v10083_v16  ;;  %v10167_v44 = vld [vmem:[#allocation2 + $0x1d4] ss:$8 sps:$4 sm:$0xff]   ;;  %v10171_v45 = vld [vmem:[#allocation2 + $0x150] ss:$8 sps:$4 sm:$0xff]   ;;  %v10177_v47 = vld [vmem:[#allocation2 + $0x144] ss:$8 sps:$4 sm:$0xff]  }
  0x8e   :  { %282 = vmatprep.subr.bf16.mxu0 %v10085_v17  ;;  %424 = vmatprep.subr.bf16.mxu1 %v10089_v18  ;;  %v10175_v46 = vld [vmem:[#allocation2 + $0x1d0] ss:$8 sps:$4 sm:$0xff]   ;;  %v10181_v48 = vld [vmem:[#allocation2 + $0x1c4] ss:$8 sps:$4 sm:$0xff]   ;;  %v10183_v49 = vld [vmem:[#allocation2 + $0x140] ss:$8 sps:$4 sm:$0xff]  }
  0x8f   :  { %v10185_v50 = vld [vmem:[#allocation2 + $0x1c0] ss:$8 sps:$4 sm:$0xff]   ;;  %v10189_v51 = vld [vmem:[#allocation2 + $0x134] ss:$8 sps:$4 sm:$0xff]   ;;  %v10195_v53 = vld [vmem:[#allocation2 + $0x130] ss:$8 sps:$4 sm:$0xff]  }
  0x90   :  { %v10191_v52 = vld [vmem:[#allocation2 + $0x1b4] ss:$8 sps:$4 sm:$0xff]   ;;  %v10197_v54 = vld [vmem:[#allocation2 + $0x1b0] ss:$8 sps:$4 sm:$0xff]   ;;  %v10199_v55 = vld [vmem:[#allocation2 + $0x124] ss:$8 sps:$4 sm:$0xff]  }
  0x91   :  { %283 = vmatpush1.bf16.msra.mxu0 %v10091_v19  ;;  %425 = vmatpush1.bf16.msra.mxu1 %v10093_v20  ;;  %v10201_v56 = vld [vmem:[#allocation2 + $0x1a4] ss:$8 sps:$4 sm:$0xff]   ;;  %v10207_v57 = vld [vmem:[#allocation2 + $0x120] ss:$8 sps:$4 sm:$0xff]   ;;  %v10211_v59 = vld [vmem:[#allocation2 + $0x114] ss:$8 sps:$4 sm:$0xff]  }
  0x92   :  { %284 = vmatprep.subr.bf16.mxu0 %v10097_v21  ;;  %426 = vmatprep.subr.bf16.mxu1 %v10101_v22  ;;  %v10209_v58 = vld [vmem:[#allocation2 + $0x1a0] ss:$8 sps:$4 sm:$0xff]   ;;  %v10213_v60 = vld [vmem:[#allocation2 + $0x194] ss:$8 sps:$4 sm:$0xff]   ;;  %v10219_v61 = vld [vmem:[#allocation2 + $0x110] ss:$8 sps:$4 sm:$0xff]  }
  0x93   :  { %13190 = vst [vmem:[#allocation24_spill] sm:$0xff] %v10209_v58  ;;  %13191 = vst [vmem:[#allocation25_spill] sm:$0xff] %v10213_v60  ;;  %v10221_v62 = vld [vmem:[#allocation2 + $0x190] ss:$8 sps:$4 sm:$0xff]   ;;  %v10223_v63 = vld [vmem:[#allocation2 + $0x104] ss:$8 sps:$4 sm:$0xff]  }
  0x95   :  { %285 = vmatpush1.bf16.msra.mxu0 %v10105_v23  ;;  %427 = vmatpush1.bf16.msra.mxu1 %v10107_v24 }
  0x96   :  { %286 = vmatprep.subr.bf16.mxu0 %v10111_v25  ;;  %428 = vmatprep.subr.bf16.mxu1 %v10113_v26 }
  0x99   :  { %287 = vmatpush1.bf16.msra.mxu0 %v10115_v27  ;;  %429 = vmatpush1.bf16.msra.mxu1 %v10119_v28 }
  0x9a   :  { %288 = vmatprep.subr.bf16.mxu0 %v10121_v29  ;;  %430 = vmatprep.subr.bf16.mxu1 %v10125_v30 }
  0x9d   :  { %289 = vmatpush1.bf16.msra.mxu0 %v10127_v31  ;;  %431 = vmatpush1.bf16.msra.mxu1 %v10131_v32 }
  0x9e   :  { %558 = vmatprep.subr.bf16.mxu0 %v10135_v33  ;;  %700 = vmatprep.subr.bf16.mxu1 %v10137_v34 }
  0xa0   :  { %307 = vmatmul.mubr.bf16.vlgmr.msra.gmra.mxu0 %v177_v35  ;;  %449 = vmatmul.mubr.bf16.vlgmr.msra.gmra.mxu1 %v7507_v36  ;;  %v10225_v35 = vld [vmem:[#allocation2 + $0x184] ss:$8 sps:$4 sm:$0xff]   ;;  %v10231_v36 = vld [vmem:[#allocation2 + $0x100] ss:$8 sps:$4 sm:$0xff]  }
  0xa1   :  { %559 = vmatpush1.bf16.msra.mxu0 %v10145_v37  ;;  %701 = vmatpush1.bf16.msra.mxu1 %v10149_v38  ;;  %13192 = vst [vmem:[#allocation26_spill] sm:$0xff] %v10231_v36 }
  0xa2   :  { %560 = vmatprep.subr.bf16.mxu0 %v10151_v39  ;;  %702 = vmatprep.subr.bf16.mxu1 %v10155_v40 }
  0xa3   :  { %590 = vmatprep.mubr.bf16.mxu0 %v12865_v0  ;;  %732 = vmatprep.mubr.bf16.mxu1 %v12865_v0  ;;  %v10233_v0 = vld [vmem:[#allocation2 + $0x180] ss:$8 sps:$4 sm:$0xff]  }
  0xa5   :  { %561 = vmatpush1.bf16.msra.mxu0 %v10157_v41  ;;  %703 = vmatpush1.bf16.msra.mxu1 %v10161_v42 }
  0xa6   :  { %562 = vmatprep.subr.bf16.mxu0 %v10165_v43  ;;  %704 = vmatprep.subr.bf16.mxu1 %v10167_v44 }
  0xa9   :  { %563 = vmatpush1.bf16.msra.mxu0 %v10171_v45  ;;  %705 = vmatpush1.bf16.msra.mxu1 %v10175_v46 }
  0xaa   :  { %564 = vmatprep.subr.bf16.mxu0 %v10177_v47  ;;  %706 = vmatprep.subr.bf16.mxu1 %v10181_v48 }
  0xad   :  { %565 = vmatpush1.bf16.msra.mxu0 %v10183_v49  ;;  %707 = vmatpush1.bf16.msra.mxu1 %v10185_v50 }
  0xae   :  { %566 = vmatprep.subr.bf16.mxu0 %v10189_v51  ;;  %708 = vmatprep.subr.bf16.mxu1 %v10191_v52 }
  0xb1   :  { %567 = vmatpush1.bf16.msra.mxu0 %v10195_v53  ;;  %709 = vmatpush1.bf16.msra.mxu1 %v10197_v54 }
  0xb2   :  { %568 = vmatprep.subr.bf16.mxu0 %v10199_v55  ;;  %710 = vmatprep.subr.bf16.mxu1 %v10201_v56 }
  0xb5   :  { %569 = vmatpush1.bf16.msra.mxu0 %v10207_v57  ;;  %711 = vmatpush1.bf16.msra.mxu1 %v10209_v58  ;;  %v7524_v58 = vld [vmem:[%s12853_s0 + $0x8] sm:$0xf] }
  0xb6   :  { %570 = vmatprep.subr.bf16.mxu0 %v10211_v59  ;;  %712 = vmatprep.subr.bf16.mxu1 %v10213_v60  ;;  %v7541_v60 = vld [vmem:[%s12853_s0 + $0xc] sm:$0xf] }
  0xb9   :  { %571 = vmatpush1.bf16.msra.mxu0 %v10219_v61  ;;  %713 = vmatpush1.bf16.msra.mxu1 %v10221_v62 }
  0xba   :  { %572 = vmatprep.subr.bf16.mxu0 %v10223_v63  ;;  %714 = vmatprep.subr.bf16.mxu1 %v10225_v35 }
  0xbd   :  { %573 = vmatpush1.bf16.msra.mxu0 %v10231_v36  ;;  %715 = vmatpush1.bf16.msra.mxu1 %v10233_v0  ;;  %v13193_v36 = vmov 0  }
  0xbe   :  { %747 = vmatprep.subr.bf16.mxu0 %v10041_v1  ;;  %790 = vmatprep.subr.bf16.mxu1 %v10043_v2  ;;  %v13194_v1 = vld [vmem:[#allocation24_spill] sm:$0xff]  ;;  %v13195_v2 = vld [vmem:[#allocation25_spill] sm:$0xff] }
  0xc0   :  { %591 = vmatmul.mubr.bf16.vlgmr.msra.gmra.mxu0 %v7524_v58  ;;  %733 = vmatmul.mubr.bf16.vlgmr.msra.gmra.mxu1 %v7541_v60 }
  0xc1   :  { %748 = vmatpush1.bf16.msra.mxu0 %v10046_v3  ;;  %791 = vmatpush1.bf16.msra.mxu1 %v10048_v4  ;;  %v10316_v3 = vld [vmem:[%s12853_s0 + $0x10] sm:$0xf]  ;;  %v10321_v4 = vld [vmem:[%s12853_s0 + $0x14] sm:$0xf] }
  0xc2   :  { %749 = vmatprep.subr.bf16.mxu0 %v10051_v5  ;;  %792 = vmatprep.subr.bf16.mxu1 %v10055_v6  ;;  %v13196_v5 = vld [vmem:[#allocation26_spill] sm:$0xff] }
  0xc3   :  { %779 = vmatprep.mubr.bf16.mxu0 %v13193_v36  ;;  %822 = vmatprep.mubr.bf16.mxu1 %v13193_v36  ;;  %v10325_v6 = vld [vmem:[#allocation2 + $0x74] ss:$8 sps:$4 sm:$0xff]  }
  0xc5   :  { %750 = vmatpush1.bf16.msra.mxu0 %v10057_v7  ;;  %793 = vmatpush1.bf16.msra.mxu1 %v10060_v8  ;;  %v10328_v7 = vld [vmem:[#allocation2 + $0xf4] ss:$8 sps:$4 sm:$0xff]   ;;  %v10333_v8 = vld [vmem:[#allocation2 + $0x70] ss:$8 sps:$4 sm:$0xff]  }
  0xc6   :  { %751 = vmatprep.subr.bf16.mxu0 %v10063_v9  ;;  %794 = vmatprep.subr.bf16.mxu1 %v10065_v10  ;;  %v10336_v9 = vld [vmem:[#allocation2 + $0xf0] ss:$8 sps:$4 sm:$0xff]   ;;  %v10342_v10 = vld [vmem:[#allocation2 + $0xe4] ss:$8 sps:$4 sm:$0xff]  }
  0xc9   :  { %752 = vmatpush1.bf16.msra.mxu0 %v10067_v11  ;;  %795 = vmatpush1.bf16.msra.mxu1 %v10069_v12  ;;  %v10347_v11 = vld [vmem:[#allocation2 + $0x60] ss:$8 sps:$4 sm:$0xff]  }
  0xca   :  { %753 = vmatprep.subr.bf16.mxu0 %v10073_v13  ;;  %796 = vmatprep.subr.bf16.mxu1 %v10077_v14  ;;  %v10350_v12 = vld [vmem:[#allocation2 + $0xe0] ss:$8 sps:$4 sm:$0xff]   ;;  %v10353_v13 = vld [vmem:[#allocation2 + $0x54] ss:$8 sps:$4 sm:$0xff]  }
  0xcb   :  { %13197 = vst [vmem:[#allocation24_spill] sm:$0xff] %v10350_v12  ;;  %v10356_v14 = vld [vmem:[#allocation2 + $0xd4] ss:$8 sps:$4 sm:$0xff]  }
  0xcd   :  { %754 = vmatpush1.bf16.msra.mxu0 %v10079_v15  ;;  %797 = vmatpush1.bf16.msra.mxu1 %v10083_v16  ;;  %v10359_v15 = vld [vmem:[#allocation2 + $0x50] ss:$8 sps:$4 sm:$0xff]  }
  0xce   :  { %755 = vmatprep.subr.bf16.mxu0 %v10085_v17  ;;  %798 = vmatprep.subr.bf16.mxu1 %v10089_v18  ;;  %v10362_v16 = vld [vmem:[#allocation2 + $0xd0] ss:$8 sps:$4 sm:$0xff]   ;;  %v10365_v17 = vld [vmem:[#allocation2 + $0x44] ss:$8 sps:$4 sm:$0xff]  }
  0xcf   :  { %13198 = vst [vmem:[#allocation25_spill] sm:$0xff] %v10365_v17  ;;  %v10368_v18 = vld [vmem:[#allocation2 + $0xc4] ss:$8 sps:$4 sm:$0xff]  }
  0xd1   :  { %756 = vmatpush1.bf16.msra.mxu0 %v10091_v19  ;;  %799 = vmatpush1.bf16.msra.mxu1 %v10093_v20  ;;  %v10371_v19 = vld [vmem:[#allocation2 + $0x40] ss:$8 sps:$4 sm:$0xff]  }
  0xd2   :  { %757 = vmatprep.subr.bf16.mxu0 %v10097_v21  ;;  %800 = vmatprep.subr.bf16.mxu1 %v10101_v22  ;;  %v10374_v20 = vld [vmem:[#allocation2 + $0xc0] ss:$8 sps:$4 sm:$0xff]   ;;  %v10377_v21 = vld [vmem:[#allocation2 + $0x34] ss:$8 sps:$4 sm:$0xff]  }
  0xd3   :  { %v10380_v22 = vld [vmem:[#allocation2 + $0xb4] ss:$8 sps:$4 sm:$0xff]  }
  0xd4   :  { %13199 = vst [vmem:[#allocation26_spill] sm:$0xff] %v10380_v22 }
  0xd5   :  { %758 = vmatpush1.bf16.msra.mxu0 %v10105_v23  ;;  %801 = vmatpush1.bf16.msra.mxu1 %v10107_v24  ;;  %v10383_v23 = vld [vmem:[#allocation2 + $0x30] ss:$8 sps:$4 sm:$0xff]  }
  0xd6   :  { %759 = vmatprep.subr.bf16.mxu0 %v10111_v25  ;;  %802 = vmatprep.subr.bf16.mxu1 %v10113_v26  ;;  %13200 = vst [vmem:[#allocation27_spill] sm:$0xff] %v10383_v23  ;;  %v10386_v24 = vld [vmem:[#allocation2 + $0xb0] ss:$8 sps:$4 sm:$0xff]   ;;  %v10389_v25 = vld [vmem:[#allocation2 + $0x24] ss:$8 sps:$4 sm:$0xff]  }
  0xd7   :  { %13201 = vst [vmem:[#allocation28_spill] sm:$0xff] %v10386_v24  ;;  %v10392_v26 = vld [vmem:[#allocation2 + $0xa4] ss:$8 sps:$4 sm:$0xff]  }
  0xd9   :  { %760 = vmatpush1.bf16.msra.mxu0 %v10115_v27  ;;  %803 = vmatpush1.bf16.msra.mxu1 %v10119_v28  ;;  %v10395_v27 = vld [vmem:[#allocation2 + $0x20] ss:$8 sps:$4 sm:$0xff]  }
  0xda   :  { %761 = vmatprep.subr.bf16.mxu0 %v10121_v29  ;;  %804 = vmatprep.subr.bf16.mxu1 %v10125_v30  ;;  %v10398_v28 = vld [vmem:[#allocation2 + $0xa0] ss:$8 sps:$4 sm:$0xff]   ;;  %v10401_v29 = vld [vmem:[#allocation2 + $0x14] ss:$8 sps:$4 sm:$0xff]  }
  0xdb   :  { %v10404_v30 = vld [vmem:[#allocation2 + $0x94] ss:$8 sps:$4 sm:$0xff]  }
  0xdd   :  { %762 = vmatpush1.bf16.msra.mxu0 %v10127_v31  ;;  %805 = vmatpush1.bf16.msra.mxu1 %v10131_v32  ;;  %v10407_v31 = vld [vmem:[#allocation2 + $0x10] ss:$8 sps:$4 sm:$0xff]  }
  0xde   :  { %835 = vmatprep.subr.bf16.mxu0 %v10135_v33  ;;  %880 = vmatprep.subr.bf16.mxu1 %v10137_v34  ;;  %13202 = vst [vmem:[#allocation29_spill] sm:$0xff] %v10407_v31  ;;  %v10410_v32 = vld [vmem:[#allocation2 + $0x90] ss:$8 sps:$4 sm:$0xff]   ;;  %v10413_v33 = vld [vmem:[#allocation2 + $0x4] ss:$8 sps:$4 sm:$0xff]  }
  0xdf   :  { %13203 = vst [vmem:[#allocation30_spill] sm:$0xff] %v10410_v32  ;;  %v10416_v34 = vld [vmem:[#allocation2 + $0x84] ss:$8 sps:$4 sm:$0xff]  }
  0xe0   :  { %780 = vmatmul.mubr.bf16.vlgmr.msra.gmra.mxu0 %v7524_v58  ;;  %823 = vmatmul.mubr.bf16.vlgmr.msra.gmra.mxu1 %v7541_v60  ;;  %13204 = vst [vmem:[#allocation31_spill] sm:$0xff] %v10416_v34  ;;  %v10486_v58 = vld [vmem:[#allocation2 + $0x1b0] ss:$8 sps:$4 sm:$0xff]   ;;  %v10492_v60 = vld [vmem:[#allocation2 + $0x1a4] ss:$8 sps:$4 sm:$0xff]  }
  0xe1   :  { %836 = vmatpush1.bf16.msra.mxu0 %v10145_v37  ;;  %881 = vmatpush1.bf16.msra.mxu1 %v10149_v38  ;;  %v10419_v37 = vld [vmem:[#allocation2] ss:$8 sps:$4 sm:$0xff]  }
  0xe2   :  { %837 = vmatprep.subr.bf16.mxu0 %v10151_v39  ;;  %882 = vmatprep.subr.bf16.mxu1 %v10155_v40  ;;  %v10422_v38 = vld [vmem:[#allocation2 + $0x80] ss:$8 sps:$4 sm:$0xff]   ;;  %v10425_v39 = vld [vmem:[#allocation2 + $0x174] ss:$8 sps:$4 sm:$0xff]  }
  0xe3   :  { %867 = vmatprep.mubr.bf16.mxu0 %v13193_v36  ;;  %912 = vmatprep.mubr.bf16.mxu1 %v13193_v36  ;;  %13205 = vst [vmem:[#allocation32_spill] sm:$0xff] %v10422_v38  ;;  %v10428_v40 = vld [vmem:[#allocation2 + $0x1f4] ss:$8 sps:$4 sm:$0xff]  }
  0xe4   :  { %13206 = vst [vmem:[#allocation33_spill] sm:$0xff] %v10428_v40 }
  0xe5   :  { %838 = vmatpush1.bf16.msra.mxu0 %v10157_v41  ;;  %883 = vmatpush1.bf16.msra.mxu1 %v10161_v42  ;;  %v10433_v41 = vld [vmem:[#allocation2 + $0x170] ss:$8 sps:$4 sm:$0xff]  }
  0xe6   :  { %839 = vmatprep.subr.bf16.mxu0 %v10165_v43  ;;  %884 = vmatprep.subr.bf16.mxu1 %v10167_v44  ;;  %v10436_v42 = vld [vmem:[#allocation2 + $0x1f0] ss:$8 sps:$4 sm:$0xff]   ;;  %v10439_v43 = vld [vmem:[#allocation2 + $0x164] ss:$8 sps:$4 sm:$0xff]  }
  0xe7   :  { %13207 = vst [vmem:[#allocation34_spill] sm:$0xff] %v10436_v42  ;;  %v10442_v44 = vld [vmem:[#allocation2 + $0x1e4] ss:$8 sps:$4 sm:$0xff]  }
  0xe9   :  { %840 = vmatpush1.bf16.msra.mxu0 %v10171_v45  ;;  %885 = vmatpush1.bf16.msra.mxu1 %v10175_v46  ;;  %v10447_v45 = vld [vmem:[#allocation2 + $0x160] ss:$8 sps:$4 sm:$0xff]  }
  0xea   :  { %841 = vmatprep.subr.bf16.mxu0 %v10177_v47  ;;  %886 = vmatprep.subr.bf16.mxu1 %v10181_v48  ;;  %v10450_v46 = vld [vmem:[#allocation2 + $0x1e0] ss:$8 sps:$4 sm:$0xff]   ;;  %v10453_v47 = vld [vmem:[#allocation2 + $0x154] ss:$8 sps:$4 sm:$0xff]  }
  0xeb   :  { %v10456_v48 = vld [vmem:[#allocation2 + $0x1d4] ss:$8 sps:$4 sm:$0xff]  }
  0xed   :  { %842 = vmatpush1.bf16.msra.mxu0 %v10183_v49  ;;  %887 = vmatpush1.bf16.msra.mxu1 %v10185_v50  ;;  %v10459_v49 = vld [vmem:[#allocation2 + $0x150] ss:$8 sps:$4 sm:$0xff]  }
  0xee   :  { %843 = vmatprep.subr.bf16.mxu0 %v10189_v51  ;;  %888 = vmatprep.subr.bf16.mxu1 %v10191_v52  ;;  %v10462_v50 = vld [vmem:[#allocation2 + $0x1d0] ss:$8 sps:$4 sm:$0xff]   ;;  %v10465_v51 = vld [vmem:[#allocation2 + $0x144] ss:$8 sps:$4 sm:$0xff]  }
  0xef   :  { %v10468_v52 = vld [vmem:[#allocation2 + $0x1c4] ss:$8 sps:$4 sm:$0xff]  }
  0xf1   :  { %844 = vmatpush1.bf16.msra.mxu0 %v10195_v53  ;;  %889 = vmatpush1.bf16.msra.mxu1 %v10197_v54  ;;  %v10471_v53 = vld [vmem:[#allocation2 + $0x140] ss:$8 sps:$4 sm:$0xff]  }
  0xf2   :  { %845 = vmatprep.subr.bf16.mxu0 %v10199_v55  ;;  %890 = vmatprep.subr.bf16.mxu1 %v10201_v56  ;;  %v10474_v54 = vld [vmem:[#allocation2 + $0x1c0] ss:$8 sps:$4 sm:$0xff]   ;;  %v10477_v55 = vld [vmem:[#allocation2 + $0x134] ss:$8 sps:$4 sm:$0xff]  }
  0xf3   :  { %v10480_v56 = vld [vmem:[#allocation2 + $0x1b4] ss:$8 sps:$4 sm:$0xff]  }
  0xf5   :  { %846 = vmatpush1.bf16.msra.mxu0 %v10207_v57  ;;  %891 = vmatpush1.bf16.msra.mxu1 %v13194_v1  ;;  %v10483_v57 = vld [vmem:[#allocation2 + $0x130] ss:$8 sps:$4 sm:$0xff]  }
  0xf6   :  { %847 = vmatprep.subr.bf16.mxu0 %v10211_v59  ;;  %892 = vmatprep.subr.bf16.mxu1 %v13195_v2  ;;  %v10489_v59 = vld [vmem:[#allocation2 + $0x124] ss:$8 sps:$4 sm:$0xff]   ;;  %v10507_v1 = vld [vmem:[#allocation2 + $0x110] ss:$8 sps:$4 sm:$0xff]  }
  0xf7   :  { %13209 = vst [vmem:[#allocation36_spill] sm:$0xff] %v10507_v1  ;;  %v10510_v2 = vld [vmem:[#allocation2 + $0x190] ss:$8 sps:$4 sm:$0xff]  }
  0xf8   :  { %13210 = vst [vmem:[#allocation37_spill] sm:$0xff] %v10510_v2 }
  0xf9   :  { %848 = vmatpush1.bf16.msra.mxu0 %v10219_v61  ;;  %893 = vmatpush1.bf16.msra.mxu1 %v10221_v62  ;;  %v10495_v61 = vld [vmem:[#allocation2 + $0x120] ss:$8 sps:$4 sm:$0xff]  }
  0xfa   :  { %849 = vmatprep.subr.bf16.mxu0 %v10223_v63  ;;  %894 = vmatprep.subr.bf16.mxu1 %v10225_v35  ;;  %v10498_v62 = vld [vmem:[#allocation2 + $0x1a0] ss:$8 sps:$4 sm:$0xff]   ;;  %v10501_v63 = vld [vmem:[#allocation2 + $0x114] ss:$8 sps:$4 sm:$0xff]  }
  0xfb   :  { %v10504_v35 = vld [vmem:[#allocation2 + $0x194] ss:$8 sps:$4 sm:$0xff]  }
  0xfc   :  { %13208 = vst [vmem:[#allocation35_spill] sm:$0xff] %v10504_v35 }
  0xfd   :  { %850 = vmatpush1.bf16.msra.mxu0 %v13196_v5  ;;  %895 = vmatpush1.bf16.msra.mxu1 %v10233_v0  ;;  %v10339_v0 = vld [vmem:[#allocation2 + $0x64] ss:$8 sps:$4 sm:$0xff]   ;;  %v7560_v5 = vld [vmem:[%s12853_s0 + $0x18] sm:$0xf] }
  0xfe   :  { %927 = vmatprep.subr.bf16.mxu0 %v10325_v6  ;;  %970 = vmatprep.subr.bf16.mxu1 %v10328_v7 }
 0x100   :  { %868 = vmatmul.mubr.bf16.vlgmr.msra.gmra.mxu0 %v10316_v3  ;;  %913 = vmatmul.mubr.bf16.vlgmr.msra.gmra.mxu1 %v10321_v4 }
 0x101   :  { %928 = vmatpush1.bf16.msra.mxu0 %v10333_v8  ;;  %971 = vmatpush1.bf16.msra.mxu1 %v10336_v9 }
 0x102   :  { %929 = vmatprep.subr.bf16.mxu0 %v10339_v0  ;;  %972 = vmatprep.subr.bf16.mxu1 %v10342_v10 }
 0x103   :  { %959 = vmatprep.mubr.bf16.mxu0 %v13193_v36  ;;  %1002 = vmatprep.mubr.bf16.mxu1 %v13193_v36 }
 0x105   :  { %930 = vmatpush1.bf16.msra.mxu0 %v10347_v11  ;;  %973 = vmatpush1.bf16.msra.mxu1 %v10350_v12 }
 0x106   :  { %931 = vmatprep.subr.bf16.mxu0 %v10353_v13  ;;  %974 = vmatprep.subr.bf16.mxu1 %v10356_v14 }
 0x109   :  { %932 = vmatpush1.bf16.msra.mxu0 %v10359_v15  ;;  %975 = vmatpush1.bf16.msra.mxu1 %v10362_v16 }
 0x10a   :  { %933 = vmatprep.subr.bf16.mxu0 %v10365_v17  ;;  %976 = vmatprep.subr.bf16.mxu1 %v10368_v18 }
 0x10d   :  { %934 = vmatpush1.bf16.msra.mxu0 %v10371_v19  ;;  %977 = vmatpush1.bf16.msra.mxu1 %v10374_v20 }
 0x10e   :  { %935 = vmatprep.subr.bf16.mxu0 %v10377_v21  ;;  %978 = vmatprep.subr.bf16.mxu1 %v10380_v22 }
 0x111   :  { %936 = vmatpush1.bf16.msra.mxu0 %v10383_v23  ;;  %979 = vmatpush1.bf16.msra.mxu1 %v10386_v24 }
 0x112   :  { %937 = vmatprep.subr.bf16.mxu0 %v10389_v25  ;;  %980 = vmatprep.subr.bf16.mxu1 %v10392_v26 }
 0x115   :  { %938 = vmatpush1.bf16.msra.mxu0 %v10395_v27  ;;  %981 = vmatpush1.bf16.msra.mxu1 %v10398_v28 }
 0x116   :  { %939 = vmatprep.subr.bf16.mxu0 %v10401_v29  ;;  %982 = vmatprep.subr.bf16.mxu1 %v10404_v30 }
 0x119   :  { %940 = vmatpush1.bf16.msra.mxu0 %v10407_v31  ;;  %983 = vmatpush1.bf16.msra.mxu1 %v10410_v32 }
 0x11a   :  { %941 = vmatprep.subr.bf16.mxu0 %v10413_v33  ;;  %984 = vmatprep.subr.bf16.mxu1 %v10416_v34 }
 0x11d   :  { %942 = vmatpush1.bf16.msra.mxu0 %v10419_v37  ;;  %985 = vmatpush1.bf16.msra.mxu1 %v10422_v38 }
 0x11e   :  { %1015 = vmatprep.subr.bf16.mxu0 %v10425_v39  ;;  %1060 = vmatprep.subr.bf16.mxu1 %v10428_v40 }
 0x120   :  { %960 = vmatmul.mubr.bf16.vlgmr.msra.gmra.mxu0 %v10316_v3  ;;  %1003 = vmatmul.mubr.bf16.vlgmr.msra.gmra.mxu1 %v10321_v4  ;;  %v10513_v3 = vld [vmem:[#allocation2 + $0x104] ss:$8 sps:$4 sm:$0xff]  }
 0x121   :  { %1016 = vmatpush1.bf16.msra.mxu0 %v10433_v41  ;;  %1061 = vmatpush1.bf16.msra.mxu1 %v10436_v42  ;;  %v10516_v4 = vld [vmem:[#allocation2 + $0x184] ss:$8 sps:$4 sm:$0xff]  }
 0x122   :  { %1017 = vmatprep.subr.bf16.mxu0 %v10439_v43  ;;  %1062 = vmatprep.subr.bf16.mxu1 %v10442_v44  ;;  %13211 = vst [vmem:[#allocation38_spill] sm:$0xff] %v10516_v4 }
 0x123   :  { %1047 = vmatprep.mubr.bf16.mxu0 %v13193_v36  ;;  %1092 = vmatprep.mubr.bf16.mxu1 %v13193_v36 }
 0x125   :  { %1018 = vmatpush1.bf16.msra.mxu0 %v10447_v45  ;;  %1063 = vmatpush1.bf16.msra.mxu1 %v10450_v46 }
 0x126   :  { %1019 = vmatprep.subr.bf16.mxu0 %v10453_v47  ;;  %1064 = vmatprep.subr.bf16.mxu1 %v10456_v48 }
 0x129   :  { %1020 = vmatpush1.bf16.msra.mxu0 %v10459_v49  ;;  %1065 = vmatpush1.bf16.msra.mxu1 %v10462_v50 }
 0x12a   :  { %1021 = vmatprep.subr.bf16.mxu0 %v10465_v51  ;;  %1066 = vmatprep.subr.bf16.mxu1 %v10468_v52 }
 0x12d   :  { %1022 = vmatpush1.bf16.msra.mxu0 %v10471_v53  ;;  %1067 = vmatpush1.bf16.msra.mxu1 %v10474_v54 }
 0x12e   :  { %1023 = vmatprep.subr.bf16.mxu0 %v10477_v55  ;;  %1068 = vmatprep.subr.bf16.mxu1 %v10480_v56 }
 0x131   :  { %1024 = vmatpush1.bf16.msra.mxu0 %v10483_v57  ;;  %1069 = vmatpush1.bf16.msra.mxu1 %v10486_v58 }
 0x132   :  { %1025 = vmatprep.subr.bf16.mxu0 %v10489_v59  ;;  %1070 = vmatprep.subr.bf16.mxu1 %v10492_v60 }
 0x135   :  { %1026 = vmatpush1.bf16.msra.mxu0 %v10495_v61  ;;  %1071 = vmatpush1.bf16.msra.mxu1 %v10498_v62 }
 0x136   :  { %1027 = vmatprep.subr.bf16.mxu0 %v10501_v63  ;;  %1072 = vmatprep.subr.bf16.mxu1 %v10504_v35  ;;  %v10525_v35 = vld [vmem:[#allocation2 + $0x100] ss:$8 sps:$4 sm:$0xff]  }
 0x137   :  { %13212 = vst [vmem:[#allocation39_spill] sm:$0xff] %v10525_v35 }
 0x139   :  { %1028 = vmatpush1.bf16.msra.mxu0 %v10507_v1  ;;  %1073 = vmatpush1.bf16.msra.mxu1 %v10510_v2  ;;  %v7561_v1 = vld [vmem:[%s12853_s0 + $0x1c] sm:$0xf]  ;;  %v10528_v2 = vld [vmem:[#allocation2 + $0x180] ss:$8 sps:$4 sm:$0xff]  }
 0x13a   :  { %1029 = vmatprep.subr.bf16.mxu0 %v10513_v3  ;;  %1074 = vmatprep.subr.bf16.mxu1 %v10516_v4  ;;  %13213 = vst [vmem:[#allocation40_spill] sm:$0xff] %v10528_v2 }
 0x13d   :  { %1030 = vmatpush1.bf16.msra.mxu0 %v10525_v35  ;;  %1075 = vmatpush1.bf16.msra.mxu1 %v10528_v2 }
 0x13e   :  { %1107 = vmatprep.subr.bf16.mxu0 %v10325_v6  ;;  %1150 = vmatprep.subr.bf16.mxu1 %v10328_v7 }
 0x140   :  { %1048 = vmatmul.mubr.bf16.vlgmr.msra.gmra.mxu0 %v7560_v5  ;;  %1093 = vmatmul.mubr.bf16.vlgmr.msra.gmra.mxu1 %v7561_v1 }
 0x141   :  { %1108 = vmatpush1.bf16.msra.mxu0 %v10333_v8  ;;  %1151 = vmatpush1.bf16.msra.mxu1 %v10336_v9 }
 0x142   :  { %1109 = vmatprep.subr.bf16.mxu0 %v10339_v0  ;;  %1152 = vmatprep.subr.bf16.mxu1 %v10342_v10 }
 0x143   :  { %1139 = vmatprep.mubr.bf16.mxu0 %v13193_v36  ;;  %1182 = vmatprep.mubr.bf16.mxu1 %v13193_v36 }
 0x145   :  { %1110 = vmatpush1.bf16.msra.mxu0 %v10347_v11  ;;  %1153 = vmatpush1.bf16.msra.mxu1 %v10350_v12  ;;  %v167_v12 = vlaneseq }
 0x146   :  { %1111 = vmatprep.subr.bf16.mxu0 %v10353_v13  ;;  %1154 = vmatprep.subr.bf16.mxu1 %v10356_v14 }
 0x149   :  { %1112 = vmatpush1.bf16.msra.mxu0 %v10359_v15  ;;  %1155 = vmatpush1.bf16.msra.mxu1 %v10362_v16 }
 0x14a   :  { %1113 = vmatprep.subr.bf16.mxu0 %v10365_v17  ;;  %1156 = vmatprep.subr.bf16.mxu1 %v10368_v18  ;;  %v10555_v17 = vshrl.u32 %v167_v12, 7 }
 0x14c   :  { %13214 = vst [vmem:[#allocation41_spill] sm:$0xff] %v10555_v17 }
 0x14d   :  { %1114 = vmatpush1.bf16.msra.mxu0 %v10371_v19  ;;  %1157 = vmatpush1.bf16.msra.mxu1 %v10374_v20 }
 0x14e   :  { %1115 = vmatprep.subr.bf16.mxu0 %v10377_v21  ;;  %1158 = vmatprep.subr.bf16.mxu1 %v10380_v22  ;;  %v10562_v22 = vsub.s32 0, %v10555_v17 }
 0x150   :  { %13215 = vst [vmem:[#allocation42_spill] sm:$0xff] %v10562_v22 }
 0x151   :  { %1116 = vmatpush1.bf16.msra.mxu0 %v10383_v23  ;;  %1159 = vmatpush1.bf16.msra.mxu1 %v10386_v24  ;;  %v10565_v23 = vsub.s32 1, %v10555_v17  ;;  %v165_v24 = vld [vmem:[#allocation4] sm:$0x3] }
 0x152   :  { %1117 = vmatprep.subr.bf16.mxu0 %v10389_v25  ;;  %1160 = vmatprep.subr.bf16.mxu1 %v10392_v26  ;;  %v10574_v12 = vrot.slane %v165_v24, %v10562_v22 }
 0x153   :  { %13216 = vst [vmem:[#allocation43_spill] sm:$0xff] %v10565_v23  ;;  %v10579_v17 = vrot.slane %v165_v24, %v10565_v23 }
 0x155   :  { %1118 = vmatpush1.bf16.msra.mxu0 %v10395_v27  ;;  %1161 = vmatpush1.bf16.msra.mxu1 %v10398_v28 }
 0x156   :  { %1119 = vmatprep.subr.bf16.mxu0 %v10401_v29  ;;  %1162 = vmatprep.subr.bf16.mxu1 %v10404_v30 }
 0x159   :  { %1120 = vmatpush1.bf16.msra.mxu0 %v10407_v31  ;;  %1163 = vmatpush1.bf16.msra.mxu1 %v10410_v32 }
 0x15a   :  { %1121 = vmatprep.subr.bf16.mxu0 %v10413_v33  ;;  %1164 = vmatprep.subr.bf16.mxu1 %v10416_v34 }
 0x15d   :  { %1122 = vmatpush1.bf16.msra.mxu0 %v10419_v37  ;;  %1165 = vmatpush1.bf16.msra.mxu1 %v10422_v38 }
 0x15e   :  { %1195 = vmatprep.subr.bf16.mxu0 %v10425_v39  ;;  %1240 = vmatprep.subr.bf16.mxu1 %v10428_v40 }
 0x160   :  { %v308_v31 = vpop.f32.mrf.mxu0  ;;  %v450_v32 = vpop.f32.mrf.mxu1  ;;  %1140 = vmatmul.mubr.bf16.vlgmr.msra.gmra.mxu0 %v7560_v5  ;;  %1183 = vmatmul.mubr.bf16.vlgmr.msra.gmra.mxu1 %v7561_v1 }
 0x161   :  { %v315_v34 = vadd.f32 %v308_v31, %v10574_v12  ;;  %1196 = vmatpush1.bf16.msra.mxu0 %v10433_v41  ;;  %1241 = vmatpush1.bf16.msra.mxu1 %v10436_v42 }
 0x162   :  { %v310_v38 = vpop.f32.mrf.mxu0  ;;  %v452_v22 = vpop.f32.mrf.mxu1  ;;  %1197 = vmatprep.subr.bf16.mxu0 %v10439_v43  ;;  %1242 = vmatprep.subr.bf16.mxu1 %v10442_v44 }
 0x163   :  { %v457_v40 = vadd.f32 %v450_v32, %v315_v34  ;;  %v316_v24 = vadd.f32 %v310_v38, %v10579_v17  ;;  %1227 = vmatprep.mubr.bf16.mxu0 %v13193_v36  ;;  %1272 = vmatprep.mubr.bf16.mxu1 %v13193_v36  ;;  %v13219_v32 = vld [vmem:[#allocation37_spill] sm:$0xff]  ;;  %v7562_v34 = vld [vmem:[%s12853_s0 + $0x20] sm:$0xf]  ;;  %v7563_v38 = vld [vmem:[%s12853_s0 + $0x24] sm:$0xf] }
 0x164   :  { %v312_v1 = vpop.f32.mrf.mxu0  ;;  %v454_v5 = vpop.f32.mrf.mxu1 }
 0x165   :  { %v458_v31 = vadd.f32 %v452_v22, %v316_v24  ;;  %1198 = vmatpush1.bf16.msra.mxu0 %v10447_v45  ;;  %1243 = vmatpush1.bf16.msra.mxu1 %v10450_v46  ;;  %v13217_v22 = vld [vmem:[#allocation35_spill] sm:$0xff] }
 0x166   :  { %v313_v23 = vpop.f32.mrf.mxu0  ;;  %v455_v42 = vpop.f32.mrf.mxu1  ;;  %1199 = vmatprep.subr.bf16.mxu0 %v10453_v47  ;;  %1244 = vmatprep.subr.bf16.mxu1 %v10456_v48 }
 0x167   :  { %v13218_v23 = vld [vmem:[#allocation36_spill] sm:$0xff] }
 0x169   :  { %1200 = vmatpush1.bf16.msra.mxu0 %v10459_v49  ;;  %1245 = vmatpush1.bf16.msra.mxu1 %v10462_v50 }
 0x16a   :  { %1201 = vmatprep.subr.bf16.mxu0 %v10465_v51  ;;  %1246 = vmatprep.subr.bf16.mxu1 %v10468_v52 }
 0x16d   :  { %1202 = vmatpush1.bf16.msra.mxu0 %v10471_v53  ;;  %1247 = vmatpush1.bf16.msra.mxu1 %v10474_v54 }
 0x16e   :  { %1203 = vmatprep.subr.bf16.mxu0 %v10477_v55  ;;  %1248 = vmatprep.subr.bf16.mxu1 %v10480_v56 }
 0x171   :  { %1204 = vmatpush1.bf16.msra.mxu0 %v10483_v57  ;;  %1249 = vmatpush1.bf16.msra.mxu1 %v10486_v58 }
 0x172   :  { %1205 = vmatprep.subr.bf16.mxu0 %v10489_v59  ;;  %1250 = vmatprep.subr.bf16.mxu1 %v10492_v60 }
 0x175   :  { %1206 = vmatpush1.bf16.msra.mxu0 %v10495_v61  ;;  %1251 = vmatpush1.bf16.msra.mxu1 %v10498_v62 }
 0x176   :  { %1207 = vmatprep.subr.bf16.mxu0 %v10501_v63  ;;  %1252 = vmatprep.subr.bf16.mxu1 %v13217_v22 }
 0x179   :  { %1208 = vmatpush1.bf16.msra.mxu0 %v13218_v23  ;;  %1253 = vmatpush1.bf16.msra.mxu1 %v13219_v32 }
 0x17a   :  { %1209 = vmatprep.subr.bf16.mxu0 %v10513_v3  ;;  %1254 = vmatprep.subr.bf16.mxu1 %v10516_v4 }
 0x17d   :  { %1210 = vmatpush1.bf16.msra.mxu0 %v10525_v35  ;;  %1255 = vmatpush1.bf16.msra.mxu1 %v10528_v2 }
 0x17e   :  { %1287 = vmatprep.subr.bf16.mxu0 %v10325_v6  ;;  %1330 = vmatprep.subr.bf16.mxu1 %v10328_v7 }
 0x180   :  { %v592_v42 = vpop.f32.mrf.mxu0  ;;  %v734_v24 = vpop.f32.mrf.mxu1  ;;  %1228 = vmatmul.mubr.bf16.vlgmr.msra.gmra.mxu0 %v7562_v34  ;;  %1273 = vmatmul.mubr.bf16.vlgmr.msra.gmra.mxu1 %v7563_v38 }
 0x181   :  { %v599_v1 = vadd.f32 %v592_v42, %v457_v40  ;;  %1288 = vmatpush1.bf16.msra.mxu0 %v10333_v8  ;;  %1331 = vmatpush1.bf16.msra.mxu1 %v10336_v9  ;;  %v13222_v8 = vld [vmem:[#allocation24_spill] sm:$0xff] }
 0x182   :  { %v594_v5 = vpop.f32.mrf.mxu0  ;;  %v736_v2 = vpop.f32.mrf.mxu1  ;;  %1289 = vmatprep.subr.bf16.mxu0 %v10339_v0  ;;  %1332 = vmatprep.subr.bf16.mxu1 %v10342_v10  ;;  %v13223_v0 = vld [vmem:[#allocation25_spill] sm:$0xff]  ;;  %v13224_v10 = vld [vmem:[#allocation26_spill] sm:$0xff] }
 0x183   :  { %v10627_v35 = vadd.f32 %v734_v24, %v599_v1  ;;  %v600_v6 = vadd.f32 %v594_v5, %v458_v31  ;;  %1319 = vmatprep.mubr.bf16.mxu0 %v13193_v36  ;;  %1362 = vmatprep.mubr.bf16.mxu1 %v13193_v36 }
 0x184   :  { %v596_v7 = vpop.f32.mrf.mxu0  ;;  %v738_v4 = vpop.f32.mrf.mxu1 }
 0x185   :  { %13220 = vst [vmem:[#allocation35_spill] sm:$0xff] %v10627_v35  ;;  %v10631_v40 = vadd.f32 %v736_v2, %v600_v6  ;;  %1290 = vmatpush1.bf16.msra.mxu0 %v10347_v11  ;;  %1333 = vmatpush1.bf16.msra.mxu1 %v13222_v8  ;;  %v13225_v11 = vld [vmem:[#allocation27_spill] sm:$0xff]  ;;  %v13233_v7 = vld [vmem:[#allocation38_spill] sm:$0xff] }
 0x186   :  { %v597_v9 = vpop.f32.mrf.mxu0  ;;  %v739_v42 = vpop.f32.mrf.mxu1  ;;  %1291 = vmatprep.subr.bf16.mxu0 %v10353_v13  ;;  %1334 = vmatprep.subr.bf16.mxu1 %v10356_v14  ;;  %v13226_v13 = vld [vmem:[#allocation28_spill] sm:$0xff]  ;;  %v13227_v14 = vld [vmem:[#allocation29_spill] sm:$0xff]  ;;  %v13234_v8 = vld [vmem:[#allocation39_spill] sm:$0xff] }
 0x187   :  { %13221 = vst [vmem:[#allocation36_spill] sm:$0xff] %v10631_v40  ;;  %v13235_v9 = vld [vmem:[#allocation40_spill] sm:$0xff]  ;;  %v10698_v42 = vld [vmem:[%s12853_s0 + $0x28] sm:$0xf] }
 0x188   :  { %v10731_v40 = vld [vmem:[#allocation2 + $0x60] ss:$8 sps:$4 sm:$0xff]  }
 0x189   :  { %1292 = vmatpush1.bf16.msra.mxu0 %v10359_v15  ;;  %1335 = vmatpush1.bf16.msra.mxu1 %v10362_v16  ;;  %v13228_v15 = vld [vmem:[#allocation30_spill] sm:$0xff]  ;;  %v13229_v16 = vld [vmem:[#allocation31_spill] sm:$0xff] }
 0x18a   :  { %1293 = vmatprep.subr.bf16.mxu0 %v13223_v0  ;;  %1336 = vmatprep.subr.bf16.mxu1 %v10368_v18  ;;  %v13230_v18 = vld [vmem:[#allocation32_spill] sm:$0xff] }
 0x18b   :  { %v10703_v0 = vld [vmem:[%s12853_s0 + $0x2c] sm:$0xf] }
 0x18d   :  { %1294 = vmatpush1.bf16.msra.mxu0 %v10371_v19  ;;  %1337 = vmatpush1.bf16.msra.mxu1 %v10374_v20  ;;  %v13231_v19 = vld [vmem:[#allocation33_spill] sm:$0xff] }
 0x18e   :  { %1295 = vmatprep.subr.bf16.mxu0 %v10377_v21  ;;  %1338 = vmatprep.subr.bf16.mxu1 %v13224_v10  ;;  %v10705_v10 = vld [vmem:[#allocation2 + $0x74] ss:$8 sps:$4 sm:$0xff]  }
 0x191   :  { %1296 = vmatpush1.bf16.msra.mxu0 %v13225_v11  ;;  %1339 = vmatpush1.bf16.msra.mxu1 %v13226_v13  ;;  %v10708_v11 = vld [vmem:[#allocation2 + $0xf4] ss:$8 sps:$4 sm:$0xff]  }
 0x192   :  { %1297 = vmatprep.subr.bf16.mxu0 %v10389_v25  ;;  %1340 = vmatprep.subr.bf16.mxu1 %v10392_v26  ;;  %v13232_v26 = vld [vmem:[#allocation34_spill] sm:$0xff] }
 0x195   :  { %1298 = vmatpush1.bf16.msra.mxu0 %v10395_v27  ;;  %1341 = vmatpush1.bf16.msra.mxu1 %v10398_v28 }
 0x196   :  { %1299 = vmatprep.subr.bf16.mxu0 %v10401_v29  ;;  %1342 = vmatprep.subr.bf16.mxu1 %v10404_v30 }
 0x199   :  { %1300 = vmatpush1.bf16.msra.mxu0 %v13227_v14  ;;  %1343 = vmatpush1.bf16.msra.mxu1 %v13228_v15 }
 0x19a   :  { %1301 = vmatprep.subr.bf16.mxu0 %v10413_v33  ;;  %1344 = vmatprep.subr.bf16.mxu1 %v13229_v16 }
 0x19d   :  { %1302 = vmatpush1.bf16.msra.mxu0 %v10419_v37  ;;  %1345 = vmatpush1.bf16.msra.mxu1 %v13230_v18 }
 0x19e   :  { %1375 = vmatprep.subr.bf16.mxu0 %v10425_v39  ;;  %1420 = vmatprep.subr.bf16.mxu1 %v13231_v19 }
 0x1a0   :  { %v781_v20 = vpop.f32.mrf.mxu0  ;;  %v824_v21 = vpop.f32.mrf.mxu1  ;;  %1320 = vmatmul.mubr.bf16.vlgmr.msra.gmra.mxu0 %v7562_v34  ;;  %1363 = vmatmul.mubr.bf16.vlgmr.msra.gmra.mxu1 %v7563_v38 }
 0x1a1   :  { %v788_v25 = vadd.f32 %v781_v20, %v10574_v12  ;;  %1376 = vmatpush1.bf16.msra.mxu0 %v10433_v41  ;;  %1421 = vmatpush1.bf16.msra.mxu1 %v13232_v26 }
 0x1a2   :  { %v783_v2 = vpop.f32.mrf.mxu0  ;;  %v826_v4 = vpop.f32.mrf.mxu1  ;;  %1377 = vmatprep.subr.bf16.mxu0 %v10439_v43  ;;  %1422 = vmatprep.subr.bf16.mxu1 %v10442_v44 }
 0x1a3   :  { %v831_v31 = vadd.f32 %v824_v21, %v788_v25  ;;  %v789_v24 = vadd.f32 %v783_v2, %v10579_v17  ;;  %1407 = vmatprep.mubr.bf16.mxu0 %v13193_v36  ;;  %1452 = vmatprep.mubr.bf16.mxu1 %v13193_v36  ;;  %v10713_v25 = vld [vmem:[#allocation2 + $0x70] ss:$8 sps:$4 sm:$0xff]  }
 0x1a4   :  { %v785_v34 = vpop.f32.mrf.mxu0  ;;  %v828_v38 = vpop.f32.mrf.mxu1  ;;  %v10716_v2 = vld [vmem:[#allocation2 + $0xf0] ss:$8 sps:$4 sm:$0xff]  }
 0x1a5   :  { %v832_v1 = vadd.f32 %v826_v4, %v789_v24  ;;  %1378 = vmatpush1.bf16.msra.mxu0 %v10447_v45  ;;  %1423 = vmatpush1.bf16.msra.mxu1 %v10450_v46  ;;  %v10719_v34 = vld [vmem:[#allocation2 + $0x64] ss:$8 sps:$4 sm:$0xff]  }
 0x1a6   :  { %v786_v5 = vpop.f32.mrf.mxu0  ;;  %v829_v6 = vpop.f32.mrf.mxu1  ;;  %1379 = vmatprep.subr.bf16.mxu0 %v10453_v47  ;;  %1424 = vmatprep.subr.bf16.mxu1 %v10456_v48  ;;  %13236 = vst [vmem:[#allocation37_spill] sm:$0xff] %v10719_v34  ;;  %v10722_v38 = vld [vmem:[#allocation2 + $0xe4] ss:$8 sps:$4 sm:$0xff]  }
 0x1a7   :  { %13237 = vst [vmem:[#allocation24_spill] sm:$0xff] %v10722_v38 }
 0x1a9   :  { %1380 = vmatpush1.bf16.msra.mxu0 %v10459_v49  ;;  %1425 = vmatpush1.bf16.msra.mxu1 %v10462_v50 }
 0x1aa   :  { %1381 = vmatprep.subr.bf16.mxu0 %v10465_v51  ;;  %1426 = vmatprep.subr.bf16.mxu1 %v10468_v52 }
 0x1ad   :  { %1382 = vmatpush1.bf16.msra.mxu0 %v10471_v53  ;;  %1427 = vmatpush1.bf16.msra.mxu1 %v10474_v54 }
 0x1ae   :  { %1383 = vmatprep.subr.bf16.mxu0 %v10477_v55  ;;  %1428 = vmatprep.subr.bf16.mxu1 %v10480_v56 }
 0x1b1   :  { %1384 = vmatpush1.bf16.msra.mxu0 %v10483_v57  ;;  %1429 = vmatpush1.bf16.msra.mxu1 %v10486_v58 }
 0x1b2   :  { %1385 = vmatprep.subr.bf16.mxu0 %v10489_v59  ;;  %1430 = vmatprep.subr.bf16.mxu1 %v10492_v60 }
 0x1b5   :  { %1386 = vmatpush1.bf16.msra.mxu0 %v10495_v61  ;;  %1431 = vmatpush1.bf16.msra.mxu1 %v10498_v62 }
 0x1b6   :  { %1387 = vmatprep.subr.bf16.mxu0 %v10501_v63  ;;  %1432 = vmatprep.subr.bf16.mxu1 %v13217_v22 }
 0x1b9   :  { %1388 = vmatpush1.bf16.msra.mxu0 %v13218_v23  ;;  %1433 = vmatpush1.bf16.msra.mxu1 %v13219_v32 }
 0x1ba   :  { %1389 = vmatprep.subr.bf16.mxu0 %v10513_v3  ;;  %1434 = vmatprep.subr.bf16.mxu1 %v13233_v7 }
 0x1bd   :  { %1390 = vmatpush1.bf16.msra.mxu0 %v13234_v8  ;;  %1435 = vmatpush1.bf16.msra.mxu1 %v13235_v9 }
 0x1be   :  { %1467 = vmatprep.subr.bf16.mxu0 %v10705_v10  ;;  %1510 = vmatprep.subr.bf16.mxu1 %v10708_v11 }
 0x1c0   :  { %v869_v13 = vpop.f32.mrf.mxu0  ;;  %v914_v20 = vpop.f32.mrf.mxu1  ;;  %1408 = vmatmul.mubr.bf16.vlgmr.msra.gmra.mxu0 %v10698_v42  ;;  %1453 = vmatmul.mubr.bf16.vlgmr.msra.gmra.mxu1 %v10703_v0 }
 0x1c1   :  { %v876_v21 = vadd.f32 %v869_v13, %v831_v31  ;;  %1468 = vmatpush1.bf16.msra.mxu0 %v10713_v25  ;;  %1511 = vmatpush1.bf16.msra.mxu1 %v10716_v2 }
 0x1c2   :  { %v871_v4 = vpop.f32.mrf.mxu0  ;;  %v916_v24 = vpop.f32.mrf.mxu1  ;;  %1469 = vmatprep.subr.bf16.mxu0 %v10719_v34  ;;  %1512 = vmatprep.subr.bf16.mxu1 %v10722_v38  ;;  %v10734_v34 = vld [vmem:[#allocation2 + $0xe0] ss:$8 sps:$4 sm:$0xff]  }
 0x1c3   :  { %v10725_v5 = vadd.f32 %v914_v20, %v876_v21  ;;  %v877_v31 = vadd.f32 %v871_v4, %v832_v1  ;;  %1499 = vmatprep.mubr.bf16.mxu0 %v13193_v36  ;;  %1542 = vmatprep.mubr.bf16.mxu1 %v13193_v36  ;;  %v10737_v21 = vld [vmem:[#allocation2 + $0x54] ss:$8 sps:$4 sm:$0xff]   ;;  %v10743_v4 = vld [vmem:[#allocation2 + $0x50] ss:$8 sps:$4 sm:$0xff]  }
 0x1c4   :  { %v873_v6 = vpop.f32.mrf.mxu0  ;;  %v918_v13 = vpop.f32.mrf.mxu1  ;;  %v10740_v1 = vld [vmem:[#allocation2 + $0xd4] ss:$8 sps:$4 sm:$0xff]  }
 0x1c5   :  { %13238 = vst [vmem:[#allocation25_spill] sm:$0xff] %v10725_v5  ;;  %v10729_v35 = vadd.f32 %v916_v24, %v877_v31  ;;  %1470 = vmatpush1.bf16.msra.mxu0 %v10731_v40  ;;  %1513 = vmatpush1.bf16.msra.mxu1 %v10734_v34  ;;  %v10746_v24 = vld [vmem:[#allocation2 + $0xd0] ss:$8 sps:$4 sm:$0xff]   ;;  %v10749_v31 = vld [vmem:[#allocation2 + $0x44] ss:$8 sps:$4 sm:$0xff]  }
 0x1c6   :  { %v874_v38 = vpop.f32.mrf.mxu0  ;;  %v919_v20 = vpop.f32.mrf.mxu1  ;;  %1471 = vmatprep.subr.bf16.mxu0 %v10737_v21  ;;  %1514 = vmatprep.subr.bf16.mxu1 %v10740_v1  ;;  %v10755_v6 = vld [vmem:[#allocation2 + $0x40] ss:$8 sps:$4 sm:$0xff]   ;;  %v10764_v5 = vld [vmem:[#allocation2 + $0xb4] ss:$8 sps:$4 sm:$0xff]  }
 0x1c7   :  { %13239 = vst [vmem:[#allocation26_spill] sm:$0xff] %v10729_v35  ;;  %v10752_v38 = vld [vmem:[#allocation2 + $0xc4] ss:$8 sps:$4 sm:$0xff]   ;;  %13241 = vst [vmem:[#allocation28_spill] sm:$0xff] %v10755_v6  ;;  %v10758_v13 = vld [vmem:[#allocation2 + $0xc0] ss:$8 sps:$4 sm:$0xff]  }
 0x1c8   :  { %13240 = vst [vmem:[#allocation27_spill] sm:$0xff] %v10752_v38  ;;  %13242 = vst [vmem:[#allocation29_spill] sm:$0xff] %v10758_v13  ;;  %v10761_v20 = vld [vmem:[#allocation2 + $0x34] ss:$8 sps:$4 sm:$0xff]   ;;  %v10767_v35 = vld [vmem:[#allocation2 + $0x30] ss:$8 sps:$4 sm:$0xff]  }
 0x1c9   :  { %1472 = vmatpush1.bf16.msra.mxu0 %v10743_v4  ;;  %1515 = vmatpush1.bf16.msra.mxu1 %v10746_v24 }
 0x1ca   :  { %1473 = vmatprep.subr.bf16.mxu0 %v10749_v31  ;;  %1516 = vmatprep.subr.bf16.mxu1 %v10752_v38  ;;  %v10770_v38 = vld [vmem:[#allocation2 + $0xb0] ss:$8 sps:$4 sm:$0xff]  }
 0x1cd   :  { %1474 = vmatpush1.bf16.msra.mxu0 %v10755_v6  ;;  %1517 = vmatpush1.bf16.msra.mxu1 %v10758_v13  ;;  %v10773_v6 = vld [vmem:[#allocation2 + $0x24] ss:$8 sps:$4 sm:$0xff]  }
 0x1ce   :  { %1475 = vmatprep.subr.bf16.mxu0 %v10761_v20  ;;  %1518 = vmatprep.subr.bf16.mxu1 %v10764_v5  ;;  %v10776_v13 = vld [vmem:[#allocation2 + $0xa4] ss:$8 sps:$4 sm:$0xff]  }
 0x1d1   :  { %1476 = vmatpush1.bf16.msra.mxu0 %v10767_v35  ;;  %1519 = vmatpush1.bf16.msra.mxu1 %v10770_v38 }
 0x1d2   :  { %1477 = vmatprep.subr.bf16.mxu0 %v10773_v6  ;;  %1520 = vmatprep.subr.bf16.mxu1 %v10776_v13 }
 0x1d5   :  { %1478 = vmatpush1.bf16.msra.mxu0 %v10395_v27  ;;  %1521 = vmatpush1.bf16.msra.mxu1 %v10398_v28 }
 0x1d6   :  { %1479 = vmatprep.subr.bf16.mxu0 %v10401_v29  ;;  %1522 = vmatprep.subr.bf16.mxu1 %v10404_v30 }
 0x1d9   :  { %1480 = vmatpush1.bf16.msra.mxu0 %v13227_v14  ;;  %1523 = vmatpush1.bf16.msra.mxu1 %v13228_v15 }
 0x1da   :  { %1481 = vmatprep.subr.bf16.mxu0 %v10413_v33  ;;  %1524 = vmatprep.subr.bf16.mxu1 %v13229_v16 }
 0x1dd   :  { %1482 = vmatpush1.bf16.msra.mxu0 %v10419_v37  ;;  %1525 = vmatpush1.bf16.msra.mxu1 %v13230_v18 }
 0x1de   :  { %1555 = vmatprep.subr.bf16.mxu0 %v10425_v39  ;;  %1600 = vmatprep.subr.bf16.mxu1 %v13231_v19  ;;  %v9512_v19 = vld [vmem:[#allocation2 + $0x10] ss:$8 sps:$4 sm:$0xff]  }
 0x1e0   :  { %v961_v27 = vpop.f32.mrf.mxu0  ;;  %v1004_v28 = vpop.f32.mrf.mxu1  ;;  %1500 = vmatmul.mubr.bf16.vlgmr.msra.gmra.mxu0 %v10698_v42  ;;  %1543 = vmatmul.mubr.bf16.vlgmr.msra.gmra.mxu1 %v10703_v0  ;;  %v9514_v42 = vld [vmem:[#allocation2 + $0x4] ss:$8 sps:$4 sm:$0xff]   ;;  %v9516_v0 = vld [vmem:[#allocation2] ss:$8 sps:$4 sm:$0xff]  }
 0x1e1   :  { %v968_v29 = vadd.f32 %v961_v27, %v10574_v12  ;;  %1556 = vmatpush1.bf16.msra.mxu0 %v10433_v41  ;;  %1601 = vmatpush1.bf16.msra.mxu1 %v13232_v26  ;;  %v9513_v26 = vld [vmem:[#allocation2 + $0x90] ss:$8 sps:$4 sm:$0xff]  }
 0x1e2   :  { %v963_v30 = vpop.f32.mrf.mxu0  ;;  %v1006_v33 = vpop.f32.mrf.mxu1  ;;  %1557 = vmatprep.subr.bf16.mxu0 %v10439_v43  ;;  %1602 = vmatprep.subr.bf16.mxu1 %v10442_v44  ;;  %v10830_v43 = vld [vmem:[%s12853_s0 + $0x30] sm:$0xf]  ;;  %v10835_v44 = vld [vmem:[%s12853_s0 + $0x34] sm:$0xf] }
 0x1e3   :  { %v1011_v37 = vadd.f32 %v1004_v28, %v968_v29  ;;  %v969_v39 = vadd.f32 %v963_v30, %v10579_v17  ;;  %1587 = vmatprep.mubr.bf16.mxu0 %v13193_v36  ;;  %1632 = vmatprep.mubr.bf16.mxu1 %v13193_v36  ;;  %v9524_v29 = vld [vmem:[#allocation2 + $0x160] ss:$8 sps:$4 sm:$0xff]  }
 0x1e4   :  { %v965_v14 = vpop.f32.mrf.mxu0  ;;  %v1008_v15 = vpop.f32.mrf.mxu1  ;;  %v9525_v30 = vld [vmem:[#allocation2 + $0x1e0] ss:$8 sps:$4 sm:$0xff]  }
 0x1e5   :  { %v1012_v16 = vadd.f32 %v1006_v33, %v969_v39  ;;  %1558 = vmatpush1.bf16.msra.mxu0 %v10447_v45  ;;  %1603 = vmatpush1.bf16.msra.mxu1 %v10450_v46  ;;  %v9526_v39 = vld [vmem:[#allocation2 + $0x154] ss:$8 sps:$4 sm:$0xff]   ;;  %v9528_v15 = vld [vmem:[#allocation2 + $0x150] ss:$8 sps:$4 sm:$0xff]  }
 0x1e6   :  { %v966_v41 = vpop.f32.mrf.mxu0  ;;  %v1009_v18 = vpop.f32.mrf.mxu1  ;;  %1559 = vmatprep.subr.bf16.mxu0 %v10453_v47  ;;  %1604 = vmatprep.subr.bf16.mxu1 %v10456_v48  ;;  %v9527_v14 = vld [vmem:[#allocation2 + $0x1d4] ss:$8 sps:$4 sm:$0xff]  }
 0x1e7   :  { %v9530_v41 = vld [vmem:[#allocation2 + $0x144] ss:$8 sps:$4 sm:$0xff]  }
 0x1e8   :  { %v9531_v18 = vld [vmem:[#allocation2 + $0x1c4] ss:$8 sps:$4 sm:$0xff]  }
 0x1e9   :  { %1560 = vmatpush1.bf16.msra.mxu0 %v10459_v49  ;;  %1605 = vmatpush1.bf16.msra.mxu1 %v10462_v50  ;;  %v13243_v50 = vld [vmem:[#allocation37_spill] sm:$0xff] }
 0x1ea   :  { %1561 = vmatprep.subr.bf16.mxu0 %v10465_v51  ;;  %1606 = vmatprep.subr.bf16.mxu1 %v10468_v52  ;;  %v13244_v51 = vld [vmem:[#allocation24_spill] sm:$0xff] }
 0x1ed   :  { %1562 = vmatpush1.bf16.msra.mxu0 %v10471_v53  ;;  %1607 = vmatpush1.bf16.msra.mxu1 %v10474_v54 }
 0x1ee   :  { %1563 = vmatprep.subr.bf16.mxu0 %v10477_v55  ;;  %1608 = vmatprep.subr.bf16.mxu1 %v10480_v56 }
 0x1f1   :  { %1564 = vmatpush1.bf16.msra.mxu0 %v10483_v57  ;;  %1609 = vmatpush1.bf16.msra.mxu1 %v10486_v58 }
 0x1f2   :  { %1565 = vmatprep.subr.bf16.mxu0 %v10489_v59  ;;  %1610 = vmatprep.subr.bf16.mxu1 %v10492_v60  ;;  %v13246_v59 = vld [vmem:[#allocation27_spill] sm:$0xff]  ;;  %v13247_v60 = vld [vmem:[#allocation28_spill] sm:$0xff] }
 0x1f5   :  { %1566 = vmatpush1.bf16.msra.mxu0 %v10495_v61  ;;  %1611 = vmatpush1.bf16.msra.mxu1 %v10498_v62  ;;  %v13248_v61 = vld [vmem:[#allocation29_spill] sm:$0xff]  ;;  %v9508_v62 = vld [vmem:[#allocation2 + $0x20] ss:$8 sps:$4 sm:$0xff]  }
 0x1f6   :  { %1567 = vmatprep.subr.bf16.mxu0 %v10501_v63  ;;  %1612 = vmatprep.subr.bf16.mxu1 %v13217_v22  ;;  %v9509_v63 = vld [vmem:[#allocation2 + $0xa0] ss:$8 sps:$4 sm:$0xff]   ;;  %v9510_v22 = vld [vmem:[#allocation2 + $0x14] ss:$8 sps:$4 sm:$0xff]  }
 0x1f9   :  { %1568 = vmatpush1.bf16.msra.mxu0 %v13218_v23  ;;  %1613 = vmatpush1.bf16.msra.mxu1 %v13219_v32 }
 0x1fa   :  { %1569 = vmatprep.subr.bf16.mxu0 %v10513_v3  ;;  %1614 = vmatprep.subr.bf16.mxu1 %v13233_v7 }
 0x1fd   :  { %1570 = vmatpush1.bf16.msra.mxu0 %v13234_v8  ;;  %1615 = vmatpush1.bf16.msra.mxu1 %v13235_v9 }
 0x1fe   :  { %1647 = vmatprep.subr.bf16.mxu0 %v10705_v10  ;;  %1690 = vmatprep.subr.bf16.mxu1 %v10708_v11  ;;  %v9517_v10 = vld [vmem:[#allocation2 + $0x80] ss:$8 sps:$4 sm:$0xff]   ;;  %v9518_v11 = vld [vmem:[#allocation2 + $0x174] ss:$8 sps:$4 sm:$0xff]  }
 0x200   :  { %v1049_v45 = vpop.f32.mrf.mxu0  ;;  %v1094_v46 = vpop.f32.mrf.mxu1  ;;  %1588 = vmatmul.mubr.bf16.vlgmr.msra.gmra.mxu0 %v10830_v43  ;;  %1633 = vmatmul.mubr.bf16.vlgmr.msra.gmra.mxu1 %v10835_v44 }
 0x201   :  { %v1056_v47 = vadd.f32 %v1049_v45, %v1011_v37  ;;  %1648 = vmatpush1.bf16.msra.mxu0 %v10713_v25  ;;  %1691 = vmatpush1.bf16.msra.mxu1 %v10716_v2  ;;  %v9519_v25 = vld [vmem:[#allocation2 + $0x1f4] ss:$8 sps:$4 sm:$0xff]  }
 0x202   :  { %v1051_v48 = vpop.f32.mrf.mxu0  ;;  %v1096_v49 = vpop.f32.mrf.mxu1  ;;  %1649 = vmatprep.subr.bf16.mxu0 %v13243_v50  ;;  %1692 = vmatprep.subr.bf16.mxu1 %v13244_v51  ;;  %v9534_v45 = vld [vmem:[#allocation2 + $0x134] ss:$8 sps:$4 sm:$0xff]   ;;  %v9539_v50 = vld [vmem:[#allocation2 + $0x1a4] ss:$8 sps:$4 sm:$0xff]   ;;  %v9540_v51 = vld [vmem:[#allocation2 + $0x120] ss:$8 sps:$4 sm:$0xff]  }
 0x203   :  { %v10845_v52 = vadd.f32 %v1094_v46, %v1056_v47  ;;  %v1057_v53 = vadd.f32 %v1051_v48, %v1012_v16  ;;  %1679 = vmatprep.mubr.bf16.mxu0 %v13193_v36  ;;  %1722 = vmatprep.mubr.bf16.mxu1 %v13193_v36  ;;  %v9529_v16 = vld [vmem:[#allocation2 + $0x1d0] ss:$8 sps:$4 sm:$0xff]   ;;  %v9535_v46 = vld [vmem:[#allocation2 + $0x1b4] ss:$8 sps:$4 sm:$0xff]  }
 0x204   :  { %v1053_v54 = vpop.f32.mrf.mxu0  ;;  %v1098_v55 = vpop.f32.mrf.mxu1  ;;  %v9536_v47 = vld [vmem:[#allocation2 + $0x130] ss:$8 sps:$4 sm:$0xff]  }
 0x205   :  { %13245 = vst [vmem:[#allocation30_spill] sm:$0xff] %v10845_v52  ;;  %v10849_v56 = vadd.f32 %v1096_v49, %v1057_v53  ;;  %1650 = vmatpush1.bf16.msra.mxu0 %v10731_v40  ;;  %1693 = vmatpush1.bf16.msra.mxu1 %v10734_v34  ;;  %v9511_v40 = vld [vmem:[#allocation2 + $0x94] ss:$8 sps:$4 sm:$0xff]   ;;  %v9537_v48 = vld [vmem:[#allocation2 + $0x1b0] ss:$8 sps:$4 sm:$0xff]  }
 0x206   :  { %v1054_v57 = vpop.f32.mrf.mxu0  ;;  %v1099_v58 = vpop.f32.mrf.mxu1  ;;  %1651 = vmatprep.subr.bf16.mxu0 %v10737_v21  ;;  %1694 = vmatprep.subr.bf16.mxu1 %v10740_v1  ;;  %v9520_v21 = vld [vmem:[#allocation2 + $0x170] ss:$8 sps:$4 sm:$0xff]   ;;  %v9538_v49 = vld [vmem:[#allocation2 + $0x124] ss:$8 sps:$4 sm:$0xff]   ;;  %v9541_v53 = vld [vmem:[#allocation2 + $0x1a0] ss:$8 sps:$4 sm:$0xff]  }
 0x207   :  { %v9521_v1 = vld [vmem:[#allocation2 + $0x1f0] ss:$8 sps:$4 sm:$0xff]   ;;  %v9542_v54 = vld [vmem:[#allocation2 + $0x114] ss:$8 sps:$4 sm:$0xff]  }
 0x208   :  { %v9543_v55 = vld [vmem:[#allocation2 + $0x194] ss:$8 sps:$4 sm:$0xff]  }
 0x209   :  { %1652 = vmatpush1.bf16.msra.mxu0 %v10743_v4  ;;  %1695 = vmatpush1.bf16.msra.mxu1 %v10746_v24  ;;  %v10881_v57 = vld [vmem:[#allocation6 + $0xac] ss:$12 sps:$4 sm:$0xff]   ;;  %v10883_v58 = vld [vmem:[#allocation6 + $0x170] ss:$12 sps:$4 sm:$0xff]  }
 0x20a   :  { %1653 = vmatprep.subr.bf16.mxu0 %v10749_v31  ;;  %1696 = vmatprep.subr.bf16.mxu1 %v13246_v59  ;;  %v9522_v31 = vld [vmem:[#allocation2 + $0x164] ss:$8 sps:$4 sm:$0xff]   ;;  %13249 = vst [vmem:[#allocation31_spill] sm:$0xff] %v10881_v57  ;;  %13250 = vst [vmem:[#allocation32_spill] sm:$0xff] %v10883_v58 }
 0x20b   :  { %v13251_v59 = vld [vmem:[#allocation36_spill] sm:$0xff]  ;;  %v11075_v52 = vld [vmem:[#allocation6 + $0xdc] ss:$12 sps:$4 sm:$0xff]  }
 0x20c   :  { %13272 = vst [vmem:[#allocation49_spill] sm:$0xff] %v11075_v52 }
 0x20d   :  { %1654 = vmatpush1.bf16.msra.mxu0 %v13247_v60  ;;  %1697 = vmatpush1.bf16.msra.mxu1 %v13248_v61  ;;  %v744_v60 = vmax.f32 %v13251_v59, 0.0  ;;  %v11008_v59 = vld [vmem:[#allocation6 + $0x214] ss:$12 sps:$4 sm:$0xff]  }
 0x20e   :  { %1655 = vmatprep.subr.bf16.mxu0 %v10761_v20  ;;  %1698 = vmatprep.subr.bf16.mxu1 %v10764_v5 }
 0x20f   :  { %v746_v61 = vpack.c.bf16 %v744_v60, %v744_v60 }
 0x211   :  { %1656 = vmatpush1.bf16.msra.mxu0 %v10767_v35  ;;  %1699 = vmatpush1.bf16.msra.mxu1 %v10770_v38  ;;  %v9515_v35 = vld [vmem:[#allocation2 + $0x84] ss:$8 sps:$4 sm:$0xff]  }
 0x212   :  { %1657 = vmatprep.subr.bf16.mxu0 %v10773_v6  ;;  %1700 = vmatprep.subr.bf16.mxu1 %v10776_v13  ;;  %v9523_v38 = vld [vmem:[#allocation2 + $0x1e4] ss:$8 sps:$4 sm:$0xff]  }
 0x215   :  { %1658 = vmatpush1.bf16.msra.mxu0 %v9508_v62  ;;  %1701 = vmatpush1.bf16.msra.mxu1 %v9509_v63 }
 0x216   :  { %1659 = vmatprep.subr.bf16.mxu0 %v9510_v22  ;;  %1702 = vmatprep.subr.bf16.mxu1 %v9511_v40  ;;  %v10906_v40 = vld [vmem:[#allocation6 + $0x90] ss:$12 sps:$4 sm:$0xff]  }
 0x219   :  { %1660 = vmatpush1.bf16.msra.mxu0 %v9512_v19  ;;  %1703 = vmatpush1.bf16.msra.mxu1 %v9513_v26 }
 0x21a   :  { %1661 = vmatprep.subr.bf16.mxu0 %v9514_v42  ;;  %1704 = vmatprep.subr.bf16.mxu1 %v9515_v35  ;;  %v10909_v42 = vld [vmem:[#allocation6 + $0x98] ss:$12 sps:$4 sm:$0xff]   ;;  %v10911_v35 = vld [vmem:[#allocation6 + $0x7c] ss:$12 sps:$4 sm:$0xff]  }
 0x21d   :  { %1662 = vmatpush1.bf16.msra.mxu0 %v9516_v0  ;;  %1705 = vmatpush1.bf16.msra.mxu1 %v9517_v10 }
 0x21e   :  { %1735 = vmatprep.subr.bf16.mxu0 %v9518_v11  ;;  %1780 = vmatprep.subr.bf16.mxu1 %v9519_v25  ;;  %v10918_v11 = vld [vmem:[#allocation6 + $0x140] ss:$12 sps:$4 sm:$0xff]  }
 0x220   :  { %v1141_v2 = vpop.f32.mrf.mxu0  ;;  %v1184_v34 = vpop.f32.mrf.mxu1  ;;  %1680 = vmatmul.mubr.bf16.vlgmr.msra.gmra.mxu0 %v10830_v43  ;;  %1723 = vmatmul.mubr.bf16.vlgmr.msra.gmra.mxu1 %v10835_v44  ;;  %v9532_v43 = vld [vmem:[#allocation2 + $0x140] ss:$8 sps:$4 sm:$0xff]  }
 0x221   :  { %v1148_v5 = vadd.f32 %v1141_v2, %v10574_v12  ;;  %1736 = vmatpush1.bf16.msra.mxu0 %v9520_v21  ;;  %1781 = vmatpush1.bf16.msra.mxu1 %v9521_v1  ;;  %v9533_v44 = vld [vmem:[#allocation2 + $0x1c0] ss:$8 sps:$4 sm:$0xff]  }
 0x222   :  { %v1143_v4 = vpop.f32.mrf.mxu0  ;;  %v1186_v24 = vpop.f32.mrf.mxu1  ;;  %1737 = vmatprep.subr.bf16.mxu0 %v9522_v31  ;;  %1782 = vmatprep.subr.bf16.mxu1 %v9523_v38  ;;  %v10932_v31 = vld [vmem:[#allocation6 + $0x128] ss:$12 sps:$4 sm:$0xff]   ;;  %v10935_v38 = vld [vmem:[#allocation6 + $0x60] ss:$12 sps:$4 sm:$0xff]  }
 0x223   :  { %v10870_v6 = vadd.f32 %v1184_v34, %v1148_v5  ;;  %v1149_v13 = vadd.f32 %v1143_v4, %v10579_v17  ;;  %1767 = vmatprep.mubr.bf16.mxu0 %v13193_v36  ;;  %1812 = vmatprep.mubr.bf16.mxu1 %v13193_v36  ;;  %v10923_v5 = vld [vmem:[#allocation6 + $0x78] ss:$12 sps:$4 sm:$0xff]   ;;  %v10927_v4 = vld [vmem:[#allocation6 + $0x80] ss:$12 sps:$4 sm:$0xff]  }
 0x224   :  { %v1145_v20 = vpop.f32.mrf.mxu0  ;;  %v1188_v27 = vpop.f32.mrf.mxu1  ;;  %v11066_v36 = vld [vmem:[#allocation6 + $0x1b4] ss:$12 sps:$4 sm:$0xff]  }
 0x225   :  { %v10875_v28 = vadd.f32 %v1186_v24, %v1149_v13  ;;  %1738 = vmatpush1.bf16.msra.mxu0 %v9524_v29  ;;  %1783 = vmatpush1.bf16.msra.mxu1 %v9525_v30  ;;  %v10929_v24 = vld [vmem:[#allocation6 + $0x64] ss:$12 sps:$4 sm:$0xff]   ;;  %v10941_v13 = vld [vmem:[#allocation6 + $0x4c] ss:$12 sps:$4 sm:$0xff]   ;;  %v10947_v27 = vld [vmem:[#allocation6 + $0x48] ss:$12 sps:$4 sm:$0xff]  }
 0x226   :  { %v1146_v33 = vpop.f32.mrf.mxu0  ;;  %v1189_v37 = vpop.f32.mrf.mxu1  ;;  %1739 = vmatprep.subr.bf16.mxu0 %v9526_v39  ;;  %1784 = vmatprep.subr.bf16.mxu1 %v9527_v14  ;;  %v10944_v20 = vld [vmem:[#allocation6 + $0x110] ss:$12 sps:$4 sm:$0xff]   ;;  %v10953_v29 = vld [vmem:[#allocation6 + $0x34] ss:$12 sps:$4 sm:$0xff]   ;;  %v10956_v30 = vld [vmem:[#allocation6 + $0xf8] ss:$12 sps:$4 sm:$0xff]  }
 0x227   :  { %v10959_v33 = vld [vmem:[#allocation6 + $0x30] ss:$12 sps:$4 sm:$0xff]   ;;  %v10963_v37 = vld [vmem:[#allocation6 + $0x38] ss:$12 sps:$4 sm:$0xff]   ;;  %v10968_v14 = vld [vmem:[#allocation6 + $0xe0] ss:$12 sps:$4 sm:$0xff]  }
 0x228   :  { %v10965_v39 = vld [vmem:[#allocation6 + $0x1c] ss:$12 sps:$4 sm:$0xff]   ;;  %13269 = vst [vmem:[#allocation46_spill] sm:$0xff] %v11066_v36 }
 0x229   :  { %1740 = vmatpush1.bf16.msra.mxu0 %v9528_v15  ;;  %1785 = vmatpush1.bf16.msra.mxu1 %v9529_v16  ;;  %v10971_v15 = vld [vmem:[#allocation6 + $0x18] ss:$12 sps:$4 sm:$0xff]   ;;  %v10975_v16 = vld [vmem:[#allocation6 + $0x20] ss:$12 sps:$4 sm:$0xff]  }
 0x22a   :  { %1741 = vmatprep.subr.bf16.mxu0 %v9530_v41  ;;  %1786 = vmatprep.subr.bf16.mxu1 %v9531_v18  ;;  %v10977_v41 = vld [vmem:[#allocation6 + $0x4] ss:$12 sps:$4 sm:$0xff]   ;;  %v10980_v18 = vld [vmem:[#allocation6 + $0xc8] ss:$12 sps:$4 sm:$0xff]  }
 0x22d   :  { %1742 = vmatpush1.bf16.msra.mxu0 %v9532_v43  ;;  %1787 = vmatpush1.bf16.msra.mxu1 %v9533_v44  ;;  %v10983_v43 = vld [vmem:[#allocation6] ss:$12 sps:$4 sm:$0xff]   ;;  %v10987_v44 = vld [vmem:[#allocation6 + $0x8] ss:$12 sps:$4 sm:$0xff]  }
 0x22e   :  { %1743 = vmatprep.subr.bf16.mxu0 %v9534_v45  ;;  %1788 = vmatprep.subr.bf16.mxu1 %v9535_v46  ;;  %v10989_v45 = vld [vmem:[#allocation6 + $0x16c] ss:$12 sps:$4 sm:$0xff]   ;;  %v13256_v46 = vld [vmem:[#allocation35_spill] sm:$0xff] }
 0x231   :  { %1744 = vmatpush1.bf16.msra.mxu0 %v9536_v47  ;;  %1789 = vmatpush1.bf16.msra.mxu1 %v9537_v48  ;;  %v743_v47 = vmax.f32 %v13256_v46, 0.0  ;;  %v10993_v48 = vld [vmem:[#allocation6 + $0x22c] ss:$12 sps:$4 sm:$0xff]  }
 0x232   :  { %1745 = vmatprep.subr.bf16.mxu0 %v9538_v49  ;;  %1790 = vmatprep.subr.bf16.mxu1 %v9539_v50  ;;  %v13257_v49 = vld [vmem:[#allocation26_spill] sm:$0xff] }
 0x233   :  { %v924_v50 = vmax.f32 %v13257_v49, 0.0 }
 0x235   :  { %1746 = vmatpush1.bf16.msra.mxu0 %v9540_v51  ;;  %1791 = vmatpush1.bf16.msra.mxu1 %v9541_v53  ;;  %v10997_v51 = vld [vmem:[#allocation6 + $0x168] ss:$12 sps:$4 sm:$0xff]   ;;  %v11010_v60 = vpack.c.bf16 %v924_v50, %v924_v50 }
 0x236   :  { %1747 = vmatprep.subr.bf16.mxu0 %v9542_v54  ;;  %1792 = vmatprep.subr.bf16.mxu1 %v9543_v55  ;;  %v11001_v53 = vld [vmem:[#allocation6 + $0x228] ss:$12 sps:$4 sm:$0xff]   ;;  %v11003_v54 = vpack.c.bf16 %v743_v47, %v743_v47  ;;  %v11033_v47 = vld [vmem:[#allocation6 + $0x138] ss:$12 sps:$4 sm:$0xff]  }
 0x237   :  { %v11006_v55 = vld [vmem:[#allocation6 + $0x154] ss:$12 sps:$4 sm:$0xff]   ;;  %13258 = vst [vmem:[#allocation40_spill] sm:$0xff] %v11033_v47 }
 0x239   :  { %1748 = vmatpush1.bf16.msra.mxu0 %v13218_v23  ;;  %1793 = vmatpush1.bf16.msra.mxu1 %v13219_v32  ;;  %v7568_v23 = vld [vmem:[%s12853_s0 + $0x38] sm:$0xf] }
 0x23a   :  { %1749 = vmatprep.subr.bf16.mxu0 %v10513_v3  ;;  %1794 = vmatprep.subr.bf16.mxu1 %v13233_v7  ;;  %v7569_v3 = vld [vmem:[%s12853_s0 + $0x3c] sm:$0xf]  ;;  %v10894_v32 = vld [vmem:[#allocation6 + $0xa8] ss:$12 sps:$4 sm:$0xff]  }
 0x23b   :  { %13252 = vst [vmem:[#allocation33_spill] sm:$0xff] %v10894_v32  ;;  %v10898_v7 = vld [vmem:[#allocation6 + $0xb0] ss:$12 sps:$4 sm:$0xff]  }
 0x23c   :  { %13253 = vst [vmem:[#allocation34_spill] sm:$0xff] %v10898_v7 }
 0x23d   :  { %1750 = vmatpush1.bf16.msra.mxu0 %v13234_v8  ;;  %1795 = vmatpush1.bf16.msra.mxu1 %v13235_v9  ;;  %v10900_v8 = vld [vmem:[#allocation6 + $0x94] ss:$12 sps:$4 sm:$0xff]   ;;  %v10902_v9 = vld [vmem:[#allocation6 + $0x158] ss:$12 sps:$4 sm:$0xff]  }
 0x23e   :  { %2164 = vmatprep.subr.bf16.mxu0 %v10881_v57  ;;  %8043 = vmatprep.subr.bf16.mxu1 %v10883_v58 }
 0x240   :  { %v1229_v62 = vpop.f32.mrf.mxu0  ;;  %v1274_v63 = vpop.f32.mrf.mxu1  ;;  %1768 = vmatmul.mubr.bf16.vlgmr.msra.gmra.mxu0 %v7568_v23  ;;  %1813 = vmatmul.mubr.bf16.vlgmr.msra.gmra.mxu1 %v7569_v3 }
 0x241   :  { %v1236_v22 = vadd.f32 %v1229_v62, %v10870_v6  ;;  %2165 = vmatpush1.bf16.msra.mxu0 %v10894_v32  ;;  %2196 = vmatprep.mubr.bf16.mxu0 %v746_v61  ;;  %v10939_v6 = vld [vmem:[#allocation6 + $0x68] ss:$12 sps:$4 sm:$0xff]   ;;  %v11015_v62 = vld [vmem:[#allocation6 + $0x150] ss:$12 sps:$4 sm:$0xff]  }
 0x242   :  { %8044 = vmatpush3.bf16.msra.mxu1 %v10898_v7  ;;  %2237 = vmatprep.mubr.bf16.mxu1 %v746_v61  ;;  %v1231_v19 = vpop.f32.mrf.mxu0  ;;  %v1276_v26 = vpop.f32.mrf.mxu1 }
 0x243   :  { %v10913_v0 = vadd.f32 %v1274_v63, %v1236_v22  ;;  %v1237_v10 = vadd.f32 %v1231_v19, %v10875_v28  ;;  %2166 = vmatprep.subr.bf16.mxu0 %v10900_v8  ;;  %8045 = vmatprep.subr.bf16.mxu1 %v10902_v9  ;;  %v10951_v28 = vld [vmem:[#allocation6 + $0x50] ss:$12 sps:$4 sm:$0xff]  }
 0x244   :  { %v1233_v25 = vpop.f32.mrf.mxu0  ;;  %v1278_v2 = vpop.f32.mrf.mxu1  ;;  %v11019_v19 = vld [vmem:[#allocation6 + $0x210] ss:$12 sps:$4 sm:$0xff]  }
 0x245   :  { %13254 = vst [vmem:[#allocation38_spill] sm:$0xff] %v10913_v0  ;;  %v10920_v34 = vadd.f32 %v1276_v26, %v1237_v10  ;;  %2167 = vmatpush1.bf16.msra.mxu0 %v10906_v40  ;;  %v11021_v26 = vld [vmem:[#allocation6 + $0x13c] ss:$12 sps:$4 sm:$0xff]  }
 0x246   :  { %8046 = vmatpush3.bf16.msra.mxu1 %v10909_v42  ;;  %v1234_v21 = vpop.f32.mrf.mxu0  ;;  %v1279_v1 = vpop.f32.mrf.mxu1  ;;  %2168 = vmatprep.subr.bf16.mxu0 %v10911_v35  ;;  %v11028_v2 = vld [vmem:[#allocation6 + $0x1fc] ss:$12 sps:$4 sm:$0xff]  }
 0x247   :  { %13255 = vst [vmem:[#allocation39_spill] sm:$0xff] %v10920_v34  ;;  %8047 = vmatprep.subr.bf16.mxu1 %v10918_v11  ;;  %v11069_v0 = vld [vmem:[#allocation6 + $0xf0] ss:$12 sps:$4 sm:$0xff]  }
 0x248   :  { %13270 = vst [vmem:[#allocation47_spill] sm:$0xff] %v11069_v0  ;;  %v11073_v34 = vld [vmem:[#allocation6 + $0x1b0] ss:$12 sps:$4 sm:$0xff]  }
 0x249   :  { %2169 = vmatpush1.bf16.msra.mxu0 %v10923_v5  ;;  %13271 = vst [vmem:[#allocation48_spill] sm:$0xff] %v11073_v34 }
 0x24a   :  { %8048 = vmatpush3.bf16.msra.mxu1 %v10927_v4  ;;  %2170 = vmatprep.subr.bf16.mxu0 %v10929_v24 }
 0x24b   :  { %8049 = vmatprep.subr.bf16.mxu1 %v10932_v31 }
 0x24d   :  { %2171 = vmatpush1.bf16.msra.mxu0 %v10935_v38 }
 0x24e   :  { %8050 = vmatpush3.bf16.msra.mxu1 %v10939_v6  ;;  %2172 = vmatprep.subr.bf16.mxu0 %v10941_v13 }
 0x24f   :  { %8051 = vmatprep.subr.bf16.mxu1 %v10944_v20 }
 0x251   :  { %2173 = vmatpush1.bf16.msra.mxu0 %v10947_v27 }
 0x252   :  { %8052 = vmatpush3.bf16.msra.mxu1 %v10951_v28  ;;  %2174 = vmatprep.subr.bf16.mxu0 %v10953_v29 }
 0x253   :  { %8053 = vmatprep.subr.bf16.mxu1 %v10956_v30 }
 0x255   :  { %2175 = vmatpush1.bf16.msra.mxu0 %v10959_v33 }
 0x256   :  { %8054 = vmatpush3.bf16.msra.mxu1 %v10963_v37  ;;  %2176 = vmatprep.subr.bf16.mxu0 %v10965_v39 }
 0x257   :  { %8055 = vmatprep.subr.bf16.mxu1 %v10968_v14 }
 0x259   :  { %2177 = vmatpush1.bf16.msra.mxu0 %v10971_v15 }
 0x25a   :  { %8056 = vmatpush3.bf16.msra.mxu1 %v10975_v16  ;;  %2178 = vmatprep.subr.bf16.mxu0 %v10977_v41 }
 0x25b   :  { %8057 = vmatprep.subr.bf16.mxu1 %v10980_v18 }
 0x25d   :  { %2179 = vmatpush1.bf16.msra.mxu0 %v10983_v43 }
 0x25e   :  { %8058 = vmatpush3.bf16.msra.mxu1 %v10987_v44  ;;  %2180 = vmatprep.subr.bf16.mxu0 %v10989_v45 }
 0x25f   :  { %2569 = vmatprep.subr.bf16.mxu1 %v10993_v48 }
 0x260   :  { %v1321_v23 = vpop.f32.mrf.mxu0  ;;  %v1364_v3 = vpop.f32.mrf.mxu1 }
 0x261   :  { %v1328_v61 = vadd.f32 %v1321_v23, %v10574_v12  ;;  %2238 = vmatmul.mubr.bf16.vlgmr.msra.gmra.mxu1 %v11003_v54  ;;  %2181 = vmatpush2.bf16.msra.mxu0 %v10997_v51  ;;  %v11037_v23 = vld [vmem:[#allocation6 + $0x1f8] ss:$12 sps:$4 sm:$0xff]  }
 0x262   :  { %2570 = vmatpush1.bf16.msra.mxu1 %v11001_v53  ;;  %2601 = vmatprep.mubr.bf16.mxu1 %v11010_v60  ;;  %v1323_v63 = vpop.f32.mrf.mxu0  ;;  %v1366_v22 = vpop.f32.mrf.mxu1  ;;  %13259 = vst [vmem:[#allocation37_spill] sm:$0xff] %v11037_v23 }
 0x263   :  { %v11023_v10 = vadd.f32 %v1364_v3, %v1328_v61  ;;  %v1329_v25 = vadd.f32 %v1323_v63, %v10579_v17  ;;  %2182 = vmatprep.subr.bf16.mxu0 %v11006_v55  ;;  %2571 = vmatprep.subr.bf16.mxu1 %v11008_v59  ;;  %v11039_v3 = vld [vmem:[#allocation6 + $0x124] ss:$12 sps:$4 sm:$0xff]   ;;  %v11045_v63 = vld [vmem:[#allocation6 + $0x120] ss:$12 sps:$4 sm:$0xff]  }
 0x264   :  { %v1325_v21 = vpop.f32.mrf.mxu0  ;;  %v1368_v1 = vpop.f32.mrf.mxu1  ;;  %13260 = vst [vmem:[#allocation24_spill] sm:$0xff] %v11039_v3  ;;  %v11042_v61 = vld [vmem:[#allocation6 + $0x1e4] ss:$12 sps:$4 sm:$0xff]   ;;  %13262 = vst [vmem:[#allocation28_spill] sm:$0xff] %v11045_v63 }
 0x265   :  { %v11030_v46 = vadd.f32 %v1366_v22, %v1329_v25  ;;  %2183 = vmatpush2.bf16.msra.mxu0 %v11015_v62  ;;  %13261 = vst [vmem:[#allocation27_spill] sm:$0xff] %v11042_v61  ;;  %v11049_v22 = vld [vmem:[#allocation6 + $0x1e0] ss:$12 sps:$4 sm:$0xff]   ;;  %v11057_v1 = vld [vmem:[#allocation6 + $0x108] ss:$12 sps:$4 sm:$0xff]  }
 0x266   :  { %2572 = vmatpush1.bf16.msra.mxu1 %v11019_v19  ;;  %v1326_v49 = vpop.f32.mrf.mxu0  ;;  %v1369_v50 = vpop.f32.mrf.mxu1  ;;  %2184 = vmatprep.subr.bf16.mxu0 %v11021_v26  ;;  %13263 = vst [vmem:[#allocation29_spill] sm:$0xff] %v11049_v22  ;;  %v11051_v25 = vld [vmem:[#allocation6 + $0x10c] ss:$12 sps:$4 sm:$0xff]   ;;  %13266 = vst [vmem:[#allocation26_spill] sm:$0xff] %v11057_v1 }
 0x267   :  { %2573 = vmatprep.subr.bf16.mxu1 %v11028_v2  ;;  %13264 = vst [vmem:[#allocation36_spill] sm:$0xff] %v11051_v25  ;;  %v11054_v21 = vld [vmem:[#allocation6 + $0x1cc] ss:$12 sps:$4 sm:$0xff]   ;;  %v11061_v49 = vld [vmem:[#allocation6 + $0x1c8] ss:$12 sps:$4 sm:$0xff]  }
 0x268   :  { %13265 = vst [vmem:[#allocation35_spill] sm:$0xff] %v11054_v21  ;;  %13267 = vst [vmem:[#allocation44_spill] sm:$0xff] %v11061_v49  ;;  %v11063_v50 = vld [vmem:[#allocation6 + $0xf4] ss:$12 sps:$4 sm:$0xff]  }
 0x269   :  { %2185 = vmatpush2.bf16.msra.mxu0 %v11033_v47  ;;  %13268 = vst [vmem:[#allocation45_spill] sm:$0xff] %v11063_v50 }
 0x26a   :  { %2574 = vmatpush1.bf16.msra.mxu1 %v11037_v23  ;;  %2186 = vmatprep.subr.bf16.mxu0 %v11039_v3 }
 0x26b   :  { %2575 = vmatprep.subr.bf16.mxu1 %v11042_v61  ;;  %v11126_v61 = vld [vmem:[#allocation6 + $0x2c0] ss:$12 sps:$4 sm:$0xff]  }
 0x26c   :  { %13288 = vst [vmem:[#allocation65_spill] sm:$0xff] %v11126_v61 }
 0x26d   :  { %2187 = vmatpush2.bf16.msra.mxu0 %v11045_v63 }
 0x26e   :  { %2576 = vmatpush1.bf16.msra.mxu1 %v11049_v22  ;;  %2188 = vmatprep.subr.bf16.mxu0 %v11051_v25  ;;  %v11078_v25 = vld [vmem:[#allocation6 + $0x19c] ss:$12 sps:$4 sm:$0xff]  }
 0x26f   :  { %2577 = vmatprep.subr.bf16.mxu1 %v11054_v21  ;;  %13273 = vst [vmem:[#allocation50_spill] sm:$0xff] %v11078_v25  ;;  %v11081_v21 = vld [vmem:[#allocation6 + $0xd8] ss:$12 sps:$4 sm:$0xff]  }
 0x270   :  { %13274 = vst [vmem:[#allocation51_spill] sm:$0xff] %v11081_v21 }
 0x271   :  { %2189 = vmatpush2.bf16.msra.mxu0 %v11057_v1  ;;  %v11085_v1 = vld [vmem:[#allocation6 + $0x198] ss:$12 sps:$4 sm:$0xff]  }
 0x272   :  { %2578 = vmatpush1.bf16.msra.mxu1 %v11061_v49  ;;  %2190 = vmatprep.subr.bf16.mxu0 %v11063_v50  ;;  %13275 = vst [vmem:[#allocation52_spill] sm:$0xff] %v11085_v1  ;;  %v11087_v49 = vld [vmem:[#allocation6 + $0xc4] ss:$12 sps:$4 sm:$0xff]  }
 0x273   :  { %2579 = vmatprep.subr.bf16.mxu1 %v11066_v36  ;;  %13276 = vst [vmem:[#allocation53_spill] sm:$0xff] %v11087_v49  ;;  %v11090_v50 = vld [vmem:[#allocation6 + $0x184] ss:$12 sps:$4 sm:$0xff]   ;;  %v11093_v36 = vld [vmem:[#allocation6 + $0xc0] ss:$12 sps:$4 sm:$0xff]  }
 0x274   :  { %13277 = vst [vmem:[#allocation54_spill] sm:$0xff] %v11090_v50  ;;  %13278 = vst [vmem:[#allocation55_spill] sm:$0xff] %v11093_v36 }
 0x275   :  { %2191 = vmatpush2.bf16.msra.mxu0 %v11069_v0  ;;  %v11097_v0 = vld [vmem:[#allocation6 + $0x180] ss:$12 sps:$4 sm:$0xff]  }
 0x276   :  { %2580 = vmatpush1.bf16.msra.mxu1 %v11073_v34  ;;  %2192 = vmatprep.subr.bf16.mxu0 %v11075_v52  ;;  %13279 = vst [vmem:[#allocation56_spill] sm:$0xff] %v11097_v0  ;;  %v11099_v34 = vld [vmem:[#allocation6 + $0x2f0] ss:$12 sps:$4 sm:$0xff]   ;;  %v11102_v52 = vld [vmem:[#allocation6 + $0x2ec] ss:$12 sps:$4 sm:$0xff]  }
 0x277   :  { %2581 = vmatprep.subr.bf16.mxu1 %v11078_v25  ;;  %13280 = vst [vmem:[#allocation57_spill] sm:$0xff] %v11099_v34  ;;  %13281 = vst [vmem:[#allocation58_spill] sm:$0xff] %v11102_v52  ;;  %v11105_v25 = vld [vmem:[#allocation6 + $0x230] ss:$12 sps:$4 sm:$0xff]  }
 0x278   :  { %13282 = vst [vmem:[#allocation59_spill] sm:$0xff] %v11105_v25 }
 0x279   :  { %2193 = vmatpush2.bf16.msra.mxu0 %v11081_v21  ;;  %v11109_v21 = vld [vmem:[#allocation6 + $0x2e8] ss:$12 sps:$4 sm:$0xff]  }
 0x27a   :  { %2582 = vmatpush1.bf16.msra.mxu1 %v11085_v1  ;;  %2194 = vmatprep.subr.bf16.mxu0 %v11087_v49  ;;  %13283 = vst [vmem:[#allocation60_spill] sm:$0xff] %v11109_v21  ;;  %v11111_v1 = vld [vmem:[#allocation6 + $0x2d8] ss:$12 sps:$4 sm:$0xff]   ;;  %v11114_v49 = vld [vmem:[#allocation6 + $0x2d4] ss:$12 sps:$4 sm:$0xff]  }
 0x27b   :  { %2583 = vmatprep.subr.bf16.mxu1 %v11090_v50  ;;  %13284 = vst [vmem:[#allocation61_spill] sm:$0xff] %v11111_v1  ;;  %13285 = vst [vmem:[#allocation62_spill] sm:$0xff] %v11114_v49 }
 0x27d   :  { %2195 = vmatpush2.bf16.msra.mxu0 %v11093_v36 }
 0x27e   :  { %2584 = vmatpush1.bf16.msra.mxu1 %v11097_v0  ;;  %8065 = vmatprep.subr.bf16.mxu0 %v11099_v34  ;;  %v11120_v0 = vld [vmem:[#allocation6 + $0x218] ss:$12 sps:$4 sm:$0xff]  }
 0x27f   :  { %2585 = vmatprep.subr.bf16.mxu1 %v11102_v52  ;;  %13286 = vst [vmem:[#allocation63_spill] sm:$0xff] %v11120_v0  ;;  %v11124_v52 = vld [vmem:[#allocation6 + $0x2d0] ss:$12 sps:$4 sm:$0xff]  }
 0x280   :  { %v1409_v22 = vpop.f32.mrf.mxu0  ;;  %v1454_v50 = vpop.f32.mrf.mxu1  ;;  %2197 = vmatmul.mubr.bf16.vlgmr.msra.gmra.mxu0 %v11003_v54  ;;  %13287 = vst [vmem:[#allocation64_spill] sm:$0xff] %v11124_v52 }
 0x281   :  { %v1416_v36 = vadd.f32 %v1409_v22, %v11023_v10  ;;  %8066 = vmatpush3.bf16.msra.mxu0 %v11105_v25  ;;  %2642 = vmatprep.mubr.bf16.mxu0 %v11010_v60  ;;  %v11132_v10 = vld [vmem:[#allocation6 + $0x2bc] ss:$12 sps:$4 sm:$0xff]  }
 0x282   :  { %2586 = vmatpush2.bf16.msra.mxu1 %v11109_v21  ;;  %v1411_v34 = vpop.f32.mrf.mxu0  ;;  %v1456_v63 = vpop.f32.mrf.mxu1  ;;  %8067 = vmatprep.subr.bf16.mxu0 %v11111_v1  ;;  %13290 = vst [vmem:[#allocation67_spill] sm:$0xff] %v11132_v10  ;;  %v11137_v21 = vld [vmem:[#allocation6 + $0x200] ss:$12 sps:$4 sm:$0xff]  }
 0x283   :  { %v11128_v3 = vadd.f32 %v1454_v50, %v1416_v36  ;;  %v1417_v54 = vadd.f32 %v1411_v34, %v11030_v46  ;;  %2587 = vmatprep.subr.bf16.mxu1 %v11114_v49  ;;  %13292 = vst [vmem:[#allocation69_spill] sm:$0xff] %v11137_v21  ;;  %v11141_v36 = vld [vmem:[#allocation6 + $0x2b8] ss:$12 sps:$4 sm:$0xff]   ;;  %v11143_v34 = vld [vmem:[#allocation6 + $0x2a8] ss:$12 sps:$4 sm:$0xff]  }
 0x284   :  { %v1413_v22 = vpop.f32.mrf.mxu0  ;;  %v1458_v25 = vpop.f32.mrf.mxu1  ;;  %13293 = vst [vmem:[#allocation70_spill] sm:$0xff] %v11141_v36  ;;  %13294 = vst [vmem:[#allocation71_spill] sm:$0xff] %v11143_v34  ;;  %v11146_v46 = vld [vmem:[#allocation6 + $0x2a4] ss:$12 sps:$4 sm:$0xff]  }
 0x285   :  { %13289 = vst [vmem:[#allocation66_spill] sm:$0xff] %v11128_v3  ;;  %v11134_v23 = vadd.f32 %v1456_v63, %v1417_v54  ;;  %8068 = vmatpush3.bf16.msra.mxu0 %v11120_v0  ;;  %13295 = vst [vmem:[#allocation72_spill] sm:$0xff] %v11146_v46  ;;  %v11149_v63 = vld [vmem:[#allocation6 + $0x1e8] ss:$12 sps:$4 sm:$0xff]   ;;  %v11153_v25 = vld [vmem:[#allocation6 + $0x2a0] ss:$12 sps:$4 sm:$0xff]  }
 0x286   :  { %2588 = vmatpush2.bf16.msra.mxu1 %v11124_v52  ;;  %v1414_v1 = vpop.f32.mrf.mxu0  ;;  %v1459_v47 = vpop.f32.mrf.mxu1  ;;  %8069 = vmatprep.subr.bf16.mxu0 %v11126_v61  ;;  %13296 = vst [vmem:[#allocation73_spill] sm:$0xff] %v11149_v63  ;;  %13297 = vst [vmem:[#allocation74_spill] sm:$0xff] %v11153_v25  ;;  %v11161_v50 = vld [vmem:[#allocation6 + $0x1d0] ss:$12 sps:$4 sm:$0xff]   ;;  %v11165_v54 = vld [vmem:[#allocation6 + $0x288] ss:$12 sps:$4 sm:$0xff]  }
 0x287   :  { %13291 = vst [vmem:[#allocation68_spill] sm:$0xff] %v11134_v23  ;;  %2589 = vmatprep.subr.bf16.mxu1 %v11132_v10  ;;  %v11155_v47 = vld [vmem:[#allocation6 + $0x290] ss:$12 sps:$4 sm:$0xff]   ;;  %v11158_v1 = vld [vmem:[#allocation6 + $0x28c] ss:$12 sps:$4 sm:$0xff]   ;;  %13300 = vst [vmem:[#allocation77_spill] sm:$0xff] %v11161_v50 }
 0x288   :  { %13298 = vst [vmem:[#allocation75_spill] sm:$0xff] %v11155_v47  ;;  %13299 = vst [vmem:[#allocation76_spill] sm:$0xff] %v11158_v1  ;;  %v11167_v22 = vld [vmem:[#allocation6 + $0x278] ss:$12 sps:$4 sm:$0xff]   ;;  %v11170_v3 = vld [vmem:[#allocation6 + $0x274] ss:$12 sps:$4 sm:$0xff]  }
 0x289   :  { %8070 = vmatpush3.bf16.msra.mxu0 %v11137_v21  ;;  %13301 = vst [vmem:[#allocation78_spill] sm:$0xff] %v11165_v54  ;;  %13302 = vst [vmem:[#allocation79_spill] sm:$0xff] %v11167_v22  ;;  %v11173_v23 = vld [vmem:[#allocation6 + $0x1b8] ss:$12 sps:$4 sm:$0xff]  }
 0x28a   :  { %2590 = vmatpush2.bf16.msra.mxu1 %v11141_v36  ;;  %8071 = vmatprep.subr.bf16.mxu0 %v11143_v34  ;;  %13303 = vst [vmem:[#allocation80_spill] sm:$0xff] %v11170_v3  ;;  %13304 = vst [vmem:[#allocation81_spill] sm:$0xff] %v11173_v23 }
 0x28b   :  { %2591 = vmatprep.subr.bf16.mxu1 %v11146_v46  ;;  %v13313_v46 = vld [vmem:[#allocation25_spill] sm:$0xff] }
 0x28d   :  { %8072 = vmatpush3.bf16.msra.mxu0 %v11149_v63  ;;  %v11177_v63 = vld [vmem:[#allocation6 + $0x270] ss:$12 sps:$4 sm:$0xff]  }
 0x28e   :  { %2592 = vmatpush2.bf16.msra.mxu1 %v11153_v25  ;;  %8073 = vmatprep.subr.bf16.mxu0 %v11155_v47  ;;  %13305 = vst [vmem:[#allocation82_spill] sm:$0xff] %v11177_v63  ;;  %v11179_v25 = vld [vmem:[#allocation6 + $0x260] ss:$12 sps:$4 sm:$0xff]   ;;  %v11182_v47 = vld [vmem:[#allocation6 + $0x25c] ss:$12 sps:$4 sm:$0xff]  }
 0x28f   :  { %2593 = vmatprep.subr.bf16.mxu1 %v11158_v1  ;;  %13306 = vst [vmem:[#allocation83_spill] sm:$0xff] %v11179_v25  ;;  %13307 = vst [vmem:[#allocation84_spill] sm:$0xff] %v11182_v47  ;;  %v11185_v1 = vld [vmem:[#allocation6 + $0x1a0] ss:$12 sps:$4 sm:$0xff]  }
 0x290   :  { %13308 = vst [vmem:[#allocation85_spill] sm:$0xff] %v11185_v1 }
 0x291   :  { %8074 = vmatpush3.bf16.msra.mxu0 %v11161_v50  ;;  %v11189_v50 = vld [vmem:[#allocation6 + $0x258] ss:$12 sps:$4 sm:$0xff]  }
 0x292   :  { %2594 = vmatpush2.bf16.msra.mxu1 %v11165_v54  ;;  %8075 = vmatprep.subr.bf16.mxu0 %v11167_v22  ;;  %13309 = vst [vmem:[#allocation86_spill] sm:$0xff] %v11189_v50  ;;  %v11191_v54 = vld [vmem:[#allocation6 + $0x248] ss:$12 sps:$4 sm:$0xff]   ;;  %v11194_v22 = vld [vmem:[#allocation6 + $0x244] ss:$12 sps:$4 sm:$0xff]  }
 0x293   :  { %2595 = vmatprep.subr.bf16.mxu1 %v11170_v3  ;;  %13310 = vst [vmem:[#allocation87_spill] sm:$0xff] %v11191_v54  ;;  %13311 = vst [vmem:[#allocation88_spill] sm:$0xff] %v11194_v22  ;;  %v11197_v3 = vld [vmem:[#allocation6 + $0x188] ss:$12 sps:$4 sm:$0xff]  }
 0x294   :  { %13312 = vst [vmem:[#allocation89_spill] sm:$0xff] %v11197_v3 }
 0x295   :  { %8076 = vmatpush3.bf16.msra.mxu0 %v11173_v23  ;;  %v923_v23 = vmax.f32 %v13313_v46, 0.0 }
 0x296   :  { %2596 = vmatpush2.bf16.msra.mxu1 %v11177_v63  ;;  %8077 = vmatprep.subr.bf16.mxu0 %v11179_v25  ;;  %v11202_v63 = vld [vmem:[#allocation6 + $0x240] ss:$12 sps:$4 sm:$0xff]  }
 0x297   :  { %2597 = vmatprep.subr.bf16.mxu1 %v11182_v47  ;;  %13314 = vst [vmem:[#allocation25_spill] sm:$0xff] %v11202_v63  ;;  %v11206_v25 = vpack.c.bf16 %v923_v23, %v923_v23 }
 0x299   :  { %8078 = vmatpush3.bf16.msra.mxu0 %v11185_v1 }
 0x29a   :  { %2598 = vmatpush2.bf16.msra.mxu1 %v11189_v50  ;;  %8079 = vmatprep.subr.bf16.mxu0 %v11191_v54 }
 0x29b   :  { %2599 = vmatprep.subr.bf16.mxu1 %v11194_v22 }
 0x29d   :  { %8080 = vmatpush3.bf16.msra.mxu0 %v11197_v3 }
 0x29e   :  { %2600 = vmatpush2.bf16.msra.mxu1 %v11202_v63  ;;  %2659 = vmatprep.subr.bf16.mxu0 %v10881_v57 }
 0x29f   :  { %8087 = vmatprep.subr.bf16.mxu1 %v10883_v58 }
 0x2a0   :  { %v1501_v1 = vpop.f32.mrf.mxu0  ;;  %v1544_v46 = vpop.f32.mrf.mxu1  ;;  %2643 = vmatmul.mubr.bf16.vlgmr.msra.gmra.mxu0 %v11206_v25 }
 0x2a1   :  { %v1508_v54 = vadd.f32 %v1501_v1, %v10574_v12  ;;  %2602 = vmatmul.mubr.bf16.vlgmr.msra.gmra.mxu1 %v11206_v25  ;;  %2660 = vmatpush1.bf16.msra.mxu0 %v10894_v32 }
 0x2a2   :  { %2691 = vmatprep.mubr.bf16.mxu0 %v11010_v60  ;;  %8088 = vmatpush3.bf16.msra.mxu1 %v10898_v7  ;;  %v1503_v23 = vpop.f32.mrf.mxu0  ;;  %v1546_v63 = vpop.f32.mrf.mxu1 }
 0x2a3   :  { %v1551_v3 = vadd.f32 %v1544_v46, %v1508_v54  ;;  %2732 = vmatprep.mubr.bf16.mxu1 %v11010_v60  ;;  %v1509_v58 = vadd.f32 %v1503_v23, %v10579_v17  ;;  %2661 = vmatprep.subr.bf16.mxu0 %v10900_v8 }
 0x2a4   :  { %v1505_v57 = vpop.f32.mrf.mxu0  ;;  %v1548_v22 = vpop.f32.mrf.mxu1  ;;  %8089 = vmatprep.subr.bf16.mxu1 %v10902_v9 }
 0x2a5   :  { %v1552_v1 = vadd.f32 %v1546_v63, %v1509_v58  ;;  %2662 = vmatpush1.bf16.msra.mxu0 %v10906_v40  ;;  %v1104_v57 = vmax.f32 %v10849_v56, 0.0 }
 0x2a6   :  { %8090 = vmatpush3.bf16.msra.mxu1 %v10909_v42  ;;  %v1506_v32 = vpop.f32.mrf.mxu0  ;;  %v1549_v7 = vpop.f32.mrf.mxu1  ;;  %2663 = vmatprep.subr.bf16.mxu0 %v10911_v35 }
 0x2a7   :  { %8091 = vmatprep.subr.bf16.mxu1 %v10918_v11  ;;  %v11250_v58 = vpack.c.bf16 %v1104_v57, %v1104_v57 }
 0x2a9   :  { %2664 = vmatpush1.bf16.msra.mxu0 %v10923_v5 }
 0x2aa   :  { %8092 = vmatpush3.bf16.msra.mxu1 %v10927_v4  ;;  %2665 = vmatprep.subr.bf16.mxu0 %v10929_v24 }
 0x2ab   :  { %8093 = vmatprep.subr.bf16.mxu1 %v10932_v31 }
 0x2ad   :  { %2666 = vmatpush1.bf16.msra.mxu0 %v10935_v38 }
 0x2ae   :  { %8094 = vmatpush3.bf16.msra.mxu1 %v10939_v6  ;;  %2667 = vmatprep.subr.bf16.mxu0 %v10941_v13 }
 0x2af   :  { %8095 = vmatprep.subr.bf16.mxu1 %v10944_v20 }
 0x2b1   :  { %2668 = vmatpush1.bf16.msra.mxu0 %v10947_v27 }
 0x2b2   :  { %8096 = vmatpush3.bf16.msra.mxu1 %v10951_v28  ;;  %2669 = vmatprep.subr.bf16.mxu0 %v10953_v29 }
 0x2b3   :  { %8097 = vmatprep.subr.bf16.mxu1 %v10956_v30 }
 0x2b5   :  { %2670 = vmatpush1.bf16.msra.mxu0 %v10959_v33 }
 0x2b6   :  { %8098 = vmatpush3.bf16.msra.mxu1 %v10963_v37  ;;  %2671 = vmatprep.subr.bf16.mxu0 %v10965_v39 }
 0x2b7   :  { %8099 = vmatprep.subr.bf16.mxu1 %v10968_v14 }
 0x2b9   :  { %2672 = vmatpush1.bf16.msra.mxu0 %v10971_v15 }
 0x2ba   :  { %8100 = vmatpush3.bf16.msra.mxu1 %v10975_v16  ;;  %2673 = vmatprep.subr.bf16.mxu0 %v10977_v41 }
 0x2bb   :  { %8101 = vmatprep.subr.bf16.mxu1 %v10980_v18 }
 0x2bd   :  { %2674 = vmatpush1.bf16.msra.mxu0 %v10983_v43 }
 0x2be   :  { %8102 = vmatpush3.bf16.msra.mxu1 %v10987_v44  ;;  %2675 = vmatprep.subr.bf16.mxu0 %v10989_v45 }
 0x2bf   :  { %2743 = vmatprep.subr.bf16.mxu1 %v10993_v48 }
 0x2c0   :  { %v1589_v32 = vpop.f32.mrf.mxu0  ;;  %v1634_v7 = vpop.f32.mrf.mxu1 }
 0x2c1   :  { %v1596_v60 = vadd.f32 %v1589_v32, %v1551_v3  ;;  %2733 = vmatmul.mubr.bf16.vlgmr.msra.gmra.mxu1 %v11206_v25  ;;  %2676 = vmatpush2.bf16.msra.mxu0 %v10997_v51 }
 0x2c2   :  { %2744 = vmatpush1.bf16.msra.mxu1 %v11001_v53  ;;  %2775 = vmatprep.mubr.bf16.mxu1 %v11250_v58  ;;  %v1591_v56 = vpop.f32.mrf.mxu0  ;;  %v1636_v63 = vpop.f32.mrf.mxu1 }
 0x2c3   :  { %v11256_v54 = vadd.f32 %v1634_v7, %v1596_v60  ;;  %v1597_v22 = vadd.f32 %v1591_v56, %v1552_v1  ;;  %2677 = vmatprep.subr.bf16.mxu0 %v11006_v55  ;;  %2745 = vmatprep.subr.bf16.mxu1 %v11008_v59  ;;  %v13317_v7 = vld [vmem:[#allocation40_spill] sm:$0xff]  ;;  %v13318_v1 = vld [vmem:[#allocation37_spill] sm:$0xff]  ;;  %v13320_v56 = vld [vmem:[#allocation27_spill] sm:$0xff] }
 0x2c4   :  { %v1593_v46 = vpop.f32.mrf.mxu0  ;;  %v1638_v23 = vpop.f32.mrf.mxu1  ;;  %v13319_v60 = vld [vmem:[#allocation24_spill] sm:$0xff] }
 0x2c5   :  { %13315 = vst [vmem:[#allocation90_spill] sm:$0xff] %v11256_v54  ;;  %v11260_v3 = vadd.f32 %v1636_v63, %v1597_v22  ;;  %2678 = vmatpush2.bf16.msra.mxu0 %v11015_v62  ;;  %v13321_v63 = vld [vmem:[#allocation28_spill] sm:$0xff]  ;;  %v13322_v22 = vld [vmem:[#allocation29_spill] sm:$0xff]  ;;  %v13324_v23 = vld [vmem:[#allocation35_spill] sm:$0xff] }
 0x2c6   :  { %2746 = vmatpush1.bf16.msra.mxu1 %v11019_v19  ;;  %v1594_v57 = vpop.f32.mrf.mxu0  ;;  %v1639_v32 = vpop.f32.mrf.mxu1  ;;  %2679 = vmatprep.subr.bf16.mxu0 %v11021_v26  ;;  %v13323_v46 = vld [vmem:[#allocation36_spill] sm:$0xff]  ;;  %v13327_v54 = vld [vmem:[#allocation45_spill] sm:$0xff] }
 0x2c7   :  { %13316 = vst [vmem:[#allocation91_spill] sm:$0xff] %v11260_v3  ;;  %2747 = vmatprep.subr.bf16.mxu1 %v11028_v2  ;;  %v13325_v57 = vld [vmem:[#allocation26_spill] sm:$0xff]  ;;  %v13326_v32 = vld [vmem:[#allocation44_spill] sm:$0xff] }
 0x2c8   :  { %v13328_v3 = vld [vmem:[#allocation46_spill] sm:$0xff] }
 0x2c9   :  { %2680 = vmatpush2.bf16.msra.mxu0 %v13317_v7 }
 0x2ca   :  { %2748 = vmatpush1.bf16.msra.mxu1 %v13318_v1  ;;  %2681 = vmatprep.subr.bf16.mxu0 %v13319_v60  ;;  %v13329_v1 = vld [vmem:[#allocation47_spill] sm:$0xff]  ;;  %v13330_v60 = vld [vmem:[#allocation48_spill] sm:$0xff] }
 0x2cb   :  { %2749 = vmatprep.subr.bf16.mxu1 %v13320_v56  ;;  %v13331_v56 = vld [vmem:[#allocation49_spill] sm:$0xff] }
 0x2cd   :  { %2682 = vmatpush2.bf16.msra.mxu0 %v13321_v63  ;;  %v13332_v63 = vld [vmem:[#allocation50_spill] sm:$0xff] }
 0x2ce   :  { %2750 = vmatpush1.bf16.msra.mxu1 %v13322_v22  ;;  %2683 = vmatprep.subr.bf16.mxu0 %v13323_v46  ;;  %v13333_v22 = vld [vmem:[#allocation51_spill] sm:$0xff]  ;;  %v13334_v46 = vld [vmem:[#allocation52_spill] sm:$0xff] }
 0x2cf   :  { %2751 = vmatprep.subr.bf16.mxu1 %v13324_v23  ;;  %v13335_v23 = vld [vmem:[#allocation53_spill] sm:$0xff] }
 0x2d1   :  { %2684 = vmatpush2.bf16.msra.mxu0 %v13325_v57  ;;  %v13336_v57 = vld [vmem:[#allocation54_spill] sm:$0xff] }
 0x2d2   :  { %2752 = vmatpush1.bf16.msra.mxu1 %v13326_v32  ;;  %2685 = vmatprep.subr.bf16.mxu0 %v13327_v54  ;;  %v13337_v32 = vld [vmem:[#allocation55_spill] sm:$0xff]  ;;  %v13338_v54 = vld [vmem:[#allocation56_spill] sm:$0xff] }
 0x2d3   :  { %2753 = vmatprep.subr.bf16.mxu1 %v13328_v3  ;;  %v13339_v3 = vld [vmem:[#allocation57_spill] sm:$0xff] }
 0x2d5   :  { %2686 = vmatpush2.bf16.msra.mxu0 %v13329_v1  ;;  %v13340_v1 = vld [vmem:[#allocation58_spill] sm:$0xff] }
 0x2d6   :  { %2754 = vmatpush1.bf16.msra.mxu1 %v13330_v60  ;;  %2687 = vmatprep.subr.bf16.mxu0 %v13331_v56 }
 0x2d7   :  { %2755 = vmatprep.subr.bf16.mxu1 %v13332_v63  ;;  %v13341_v63 = vld [vmem:[#allocation59_spill] sm:$0xff] }
 0x2d9   :  { %2688 = vmatpush2.bf16.msra.mxu0 %v13333_v22 }
 0x2da   :  { %2756 = vmatpush1.bf16.msra.mxu1 %v13334_v46  ;;  %2689 = vmatprep.subr.bf16.mxu0 %v13335_v23  ;;  %v13342_v23 = vld [vmem:[#allocation60_spill] sm:$0xff]  ;;  %v13343_v46 = vld [vmem:[#allocation61_spill] sm:$0xff] }
 0x2db   :  { %2757 = vmatprep.subr.bf16.mxu1 %v13336_v57 }
 0x2dd   :  { %2690 = vmatpush2.bf16.msra.mxu0 %v13337_v32 }
 0x2de   :  { %2758 = vmatpush1.bf16.msra.mxu1 %v13338_v54  ;;  %8109 = vmatprep.subr.bf16.mxu0 %v13339_v3 }
 0x2df   :  { %2759 = vmatprep.subr.bf16.mxu1 %v13340_v1 }
 0x2e0   :  { %v1681_v60 = vpop.f32.mrf.mxu0  ;;  %v1724_v56 = vpop.f32.mrf.mxu1  ;;  %2692 = vmatmul.mubr.bf16.vlgmr.msra.gmra.mxu0 %v11206_v25 }
 0x2e1   :  { %v1688_v22 = vadd.f32 %v1681_v60, %v10574_v12  ;;  %8110 = vmatpush3.bf16.msra.mxu0 %v13341_v63  ;;  %2816 = vmatprep.mubr.bf16.mxu0 %v11250_v58 }
 0x2e2   :  { %2760 = vmatpush2.bf16.msra.mxu1 %v13342_v23  ;;  %v1683_v57 = vpop.f32.mrf.mxu0  ;;  %v1726_v32 = vpop.f32.mrf.mxu1  ;;  %8111 = vmatprep.subr.bf16.mxu0 %v13343_v46 }
 0x2e3   :  { %v1731_v54 = vadd.f32 %v1724_v56, %v1688_v22  ;;  %v1689_v3 = vadd.f32 %v1683_v57, %v10579_v17  ;;  %2761 = vmatprep.subr.bf16.mxu1 %v11114_v49  ;;  %v13344_v17 = vld [vmem:[#allocation72_spill] sm:$0xff]  ;;  %v13349_v22 = vld [vmem:[#allocation77_spill] sm:$0xff]  ;;  %v13350_v57 = vld [vmem:[#allocation78_spill] sm:$0xff] }
 0x2e4   :  { %v1685_v1 = vpop.f32.mrf.mxu0  ;;  %v1728_v7 = vpop.f32.mrf.mxu1  ;;  %v13348_v56 = vld [vmem:[#allocation76_spill] sm:$0xff] }
 0x2e5   :  { %v1732_v25 = vadd.f32 %v1726_v32, %v1689_v3  ;;  %8112 = vmatpush3.bf16.msra.mxu0 %v11120_v0  ;;  %v13345_v7 = vld [vmem:[#allocation73_spill] sm:$0xff]  ;;  %v13346_v3 = vld [vmem:[#allocation74_spill] sm:$0xff]  ;;  %v13347_v1 = vld [vmem:[#allocation75_spill] sm:$0xff] }
 0x2e6   :  { %2762 = vmatpush2.bf16.msra.mxu1 %v11124_v52  ;;  %v1686_v12 = vpop.f32.mrf.mxu0  ;;  %v1729_v60 = vpop.f32.mrf.mxu1  ;;  %8113 = vmatprep.subr.bf16.mxu0 %v11126_v61  ;;  %v13351_v32 = vld [vmem:[#allocation79_spill] sm:$0xff] }
 0x2e7   :  { %2763 = vmatprep.subr.bf16.mxu1 %v11132_v10  ;;  %v13352_v12 = vld [vmem:[#allocation80_spill] sm:$0xff]  ;;  %v13353_v60 = vld [vmem:[#allocation81_spill] sm:$0xff] }
 0x2e9   :  { %8114 = vmatpush3.bf16.msra.mxu0 %v11137_v21 }
 0x2ea   :  { %2764 = vmatpush2.bf16.msra.mxu1 %v11141_v36  ;;  %8115 = vmatprep.subr.bf16.mxu0 %v11143_v34  ;;  %v13354_v34 = vld [vmem:[#allocation82_spill] sm:$0xff] }
 0x2eb   :  { %2765 = vmatprep.subr.bf16.mxu1 %v13344_v17  ;;  %v13355_v17 = vld [vmem:[#allocation83_spill] sm:$0xff] }
 0x2ed   :  { %8116 = vmatpush3.bf16.msra.mxu0 %v13345_v7 }
 0x2ee   :  { %2766 = vmatpush2.bf16.msra.mxu1 %v13346_v3  ;;  %8117 = vmatprep.subr.bf16.mxu0 %v13347_v1  ;;  %v13356_v3 = vld [vmem:[#allocation85_spill] sm:$0xff]  ;;  %v13357_v1 = vld [vmem:[#allocation30_spill] sm:$0xff] }
 0x2ef   :  { %2767 = vmatprep.subr.bf16.mxu1 %v13348_v56  ;;  %v1103_v56 = vmax.f32 %v13357_v1, 0.0 }
 0x2f1   :  { %8118 = vmatpush3.bf16.msra.mxu0 %v13349_v22  ;;  %v13358_v22 = vld [vmem:[#allocation87_spill] sm:$0xff] }
 0x2f2   :  { %2768 = vmatpush2.bf16.msra.mxu1 %v13350_v57  ;;  %8119 = vmatprep.subr.bf16.mxu0 %v13351_v32  ;;  %v13359_v57 = vld [vmem:[#allocation88_spill] sm:$0xff]  ;;  %v13360_v32 = vld [vmem:[#allocation89_spill] sm:$0xff] }
 0x2f3   :  { %2769 = vmatprep.subr.bf16.mxu1 %v13352_v12  ;;  %v11324_v12 = vpack.c.bf16 %v1103_v56, %v1103_v56 }
 0x2f5   :  { %8120 = vmatpush3.bf16.msra.mxu0 %v13353_v60  ;;  %v13361_v60 = vld [vmem:[#allocation25_spill] sm:$0xff] }
 0x2f6   :  { %2770 = vmatpush2.bf16.msra.mxu1 %v13354_v34  ;;  %8121 = vmatprep.subr.bf16.mxu0 %v13355_v17  ;;  %v13362_v34 = vld [vmem:[#allocation31_spill] sm:$0xff]  ;;  %v13363_v17 = vld [vmem:[#allocation32_spill] sm:$0xff] }
 0x2f7   :  { %2771 = vmatprep.subr.bf16.mxu1 %v11182_v47 }
 0x2f9   :  { %8122 = vmatpush3.bf16.msra.mxu0 %v13356_v3 }
 0x2fa   :  { %2772 = vmatpush2.bf16.msra.mxu1 %v11189_v50  ;;  %8123 = vmatprep.subr.bf16.mxu0 %v13358_v22  ;;  %v13364_v22 = vld [vmem:[#allocation33_spill] sm:$0xff] }
 0x2fb   :  { %2773 = vmatprep.subr.bf16.mxu1 %v13359_v57 }
 0x2fd   :  { %8124 = vmatpush3.bf16.msra.mxu0 %v13360_v32  ;;  %v13365_v32 = vld [vmem:[#allocation34_spill] sm:$0xff] }
 0x2fe   :  { %2774 = vmatpush2.bf16.msra.mxu1 %v13361_v60  ;;  %2833 = vmatprep.subr.bf16.mxu0 %v13362_v34 }
 0x2ff   :  { %8131 = vmatprep.subr.bf16.mxu1 %v13363_v17 }
 0x300   :  { %v1769_v47 = vpop.f32.mrf.mxu0  ;;  %v1814_v3 = vpop.f32.mrf.mxu1  ;;  %2817 = vmatmul.mubr.bf16.vlgmr.msra.gmra.mxu0 %v11324_v12 }
 0x301   :  { %v1776_v1 = vadd.f32 %v1769_v47, %v1731_v54  ;;  %2776 = vmatmul.mubr.bf16.vlgmr.msra.gmra.mxu1 %v11324_v12  ;;  %2834 = vmatpush1.bf16.msra.mxu0 %v13364_v22 }
 0x302   :  { %2865 = vmatprep.mubr.bf16.mxu0 %v11250_v58  ;;  %8132 = vmatpush3.bf16.msra.mxu1 %v13365_v32  ;;  %v1771_v56 = vpop.f32.mrf.mxu0  ;;  %v1816_v57 = vpop.f32.mrf.mxu1  ;;  %v13377_v32 = vld [vmem:[#allocation26_spill] sm:$0xff] }
 0x303   :  { %v11334_v60 = vadd.f32 %v1814_v3, %v1776_v1  ;;  %2906 = vmatprep.mubr.bf16.mxu1 %v11250_v58  ;;  %v1777_v34 = vadd.f32 %v1771_v56, %v1732_v25  ;;  %2835 = vmatprep.subr.bf16.mxu0 %v10900_v8  ;;  %v13368_v8 = vld [vmem:[#allocation39_spill] sm:$0xff]  ;;  %v13373_v58 = vld [vmem:[#allocation28_spill] sm:$0xff]  ;;  %v13374_v25 = vld [vmem:[#allocation29_spill] sm:$0xff] }
 0x304   :  { %v1773_v17 = vpop.f32.mrf.mxu0  ;;  %v1818_v50 = vpop.f32.mrf.mxu1  ;;  %8133 = vmatprep.subr.bf16.mxu1 %v10902_v9  ;;  %v1284_v9 = vmax.f32 %v13368_v8, 0.0  ;;  %v13375_v3 = vld [vmem:[#allocation36_spill] sm:$0xff]  ;;  %v13379_v56 = vld [vmem:[#allocation45_spill] sm:$0xff]  ;;  %v13384_v8 = vld [vmem:[#allocation50_spill] sm:$0xff] }
 0x305   :  { %13366 = vst [vmem:[#allocation30_spill] sm:$0xff] %v11334_v60  ;;  %v11339_v47 = vadd.f32 %v1816_v57, %v1777_v34  ;;  %2836 = vmatpush1.bf16.msra.mxu0 %v10906_v40  ;;  %v13372_v50 = vld [vmem:[#allocation27_spill] sm:$0xff]  ;;  %v13378_v1 = vld [vmem:[#allocation44_spill] sm:$0xff]  ;;  %v13380_v34 = vld [vmem:[#allocation46_spill] sm:$0xff] }
 0x306   :  { %8134 = vmatpush3.bf16.msra.mxu1 %v10909_v42  ;;  %v1774_v54 = vpop.f32.mrf.mxu0  ;;  %v1819_v22 = vpop.f32.mrf.mxu1  ;;  %2837 = vmatprep.subr.bf16.mxu0 %v10911_v35  ;;  %v11370_v40 = vpack.c.bf16 %v1284_v9, %v1284_v9  ;;  %v13376_v57 = vld [vmem:[#allocation35_spill] sm:$0xff]  ;;  %v13390_v60 = vld [vmem:[#allocation56_spill] sm:$0xff] }
 0x307   :  { %13367 = vst [vmem:[#allocation31_spill] sm:$0xff] %v11339_v47  ;;  %8135 = vmatprep.subr.bf16.mxu1 %v10918_v11  ;;  %v13381_v17 = vld [vmem:[#allocation47_spill] sm:$0xff]  ;;  %v13382_v54 = vld [vmem:[#allocation48_spill] sm:$0xff]  ;;  %v13383_v22 = vld [vmem:[#allocation49_spill] sm:$0xff] }
 0x308   :  { %v13385_v9 = vld [vmem:[#allocation51_spill] sm:$0xff]  ;;  %v13391_v47 = vld [vmem:[#allocation57_spill] sm:$0xff] }
 0x309   :  { %2838 = vmatpush1.bf16.msra.mxu0 %v10923_v5 }
 0x30a   :  { %8136 = vmatpush3.bf16.msra.mxu1 %v10927_v4  ;;  %2839 = vmatprep.subr.bf16.mxu0 %v10929_v24  ;;  %v13369_v24 = vld [vmem:[#allocation40_spill] sm:$0xff] }
 0x30b   :  { %8137 = vmatprep.subr.bf16.mxu1 %v10932_v31  ;;  %v13370_v31 = vld [vmem:[#allocation37_spill] sm:$0xff] }
 0x30d   :  { %2840 = vmatpush1.bf16.msra.mxu0 %v10935_v38  ;;  %v13371_v38 = vld [vmem:[#allocation24_spill] sm:$0xff] }
 0x30e   :  { %8138 = vmatpush3.bf16.msra.mxu1 %v10939_v6  ;;  %2841 = vmatprep.subr.bf16.mxu0 %v10941_v13 }
 0x30f   :  { %8139 = vmatprep.subr.bf16.mxu1 %v10944_v20 }
 0x311   :  { %2842 = vmatpush1.bf16.msra.mxu0 %v10947_v27 }
 0x312   :  { %8140 = vmatpush3.bf16.msra.mxu1 %v10951_v28  ;;  %2843 = vmatprep.subr.bf16.mxu0 %v10953_v29 }
 0x313   :  { %8141 = vmatprep.subr.bf16.mxu1 %v10956_v30 }
 0x315   :  { %2844 = vmatpush1.bf16.msra.mxu0 %v10959_v33 }
 0x316   :  { %8142 = vmatpush3.bf16.msra.mxu1 %v10963_v37  ;;  %2845 = vmatprep.subr.bf16.mxu0 %v10965_v39 }
 0x317   :  { %8143 = vmatprep.subr.bf16.mxu1 %v10968_v14 }
 0x319   :  { %2846 = vmatpush1.bf16.msra.mxu0 %v10971_v15 }
 0x31a   :  { %8144 = vmatpush3.bf16.msra.mxu1 %v10975_v16  ;;  %2847 = vmatprep.subr.bf16.mxu0 %v10977_v41 }
 0x31b   :  { %8145 = vmatprep.subr.bf16.mxu1 %v10980_v18 }
 0x31d   :  { %2848 = vmatpush1.bf16.msra.mxu0 %v10983_v43 }
 0x31e   :  { %8146 = vmatpush3.bf16.msra.mxu1 %v10987_v44  ;;  %2849 = vmatprep.subr.bf16.mxu0 %v10989_v45 }
 0x31f   :  { %2917 = vmatprep.subr.bf16.mxu1 %v10993_v48 }
 0x321   :  { %v8059_v42 = vpop.f32.mrf.mxu1  ;;  %2907 = vmatmul.mubr.bf16.vlgmr.msra.gmra.mxu1 %v11324_v12  ;;  %2850 = vmatpush2.bf16.msra.mxu0 %v10997_v51 }
 0x322   :  { %2918 = vmatpush1.bf16.msra.mxu1 %v11001_v53  ;;  %2949 = vmatprep.mubr.bf16.mxu1 %v11370_v40 }
 0x323   :  { %v8060_v35 = vpop.f32.mrf.mxu1  ;;  %2851 = vmatprep.subr.bf16.mxu0 %v11006_v55  ;;  %2919 = vmatprep.subr.bf16.mxu1 %v11008_v59 }
 0x324   :  { %v11378_v11 = vadd.f32 %v8060_v35, %v8059_v42  ;;  %v13386_v42 = vld [vmem:[#allocation52_spill] sm:$0xff]  ;;  %v13387_v35 = vld [vmem:[#allocation53_spill] sm:$0xff] }
 0x325   :  { %v8062_v5 = vpop.f32.mrf.mxu1  ;;  %2852 = vmatpush2.bf16.msra.mxu0 %v11015_v62 }
 0x326   :  { %2920 = vmatpush1.bf16.msra.mxu1 %v11019_v19  ;;  %2853 = vmatprep.subr.bf16.mxu0 %v11021_v26  ;;  %v13388_v5 = vld [vmem:[#allocation54_spill] sm:$0xff] }
 0x327   :  { %v8063_v4 = vpop.f32.mrf.mxu1  ;;  %2921 = vmatprep.subr.bf16.mxu1 %v11028_v2 }
 0x328   :  { %v13389_v4 = vld [vmem:[#allocation55_spill] sm:$0xff] }
 0x329   :  { %2854 = vmatpush2.bf16.msra.mxu0 %v13369_v24 }
 0x32a   :  { %2922 = vmatpush1.bf16.msra.mxu1 %v13370_v31  ;;  %2855 = vmatprep.subr.bf16.mxu0 %v13371_v38 }
 0x32b   :  { %2923 = vmatprep.subr.bf16.mxu1 %v13372_v50 }
 0x32d   :  { %2856 = vmatpush2.bf16.msra.mxu0 %v13373_v58 }
 0x32e   :  { %2924 = vmatpush1.bf16.msra.mxu1 %v13374_v25  ;;  %2857 = vmatprep.subr.bf16.mxu0 %v13375_v3 }
 0x32f   :  { %2925 = vmatprep.subr.bf16.mxu1 %v13376_v57 }
 0x331   :  { %2858 = vmatpush2.bf16.msra.mxu0 %v13377_v32 }
 0x332   :  { %2926 = vmatpush1.bf16.msra.mxu1 %v13378_v1  ;;  %2859 = vmatprep.subr.bf16.mxu0 %v13379_v56 }
 0x333   :  { %2927 = vmatprep.subr.bf16.mxu1 %v13380_v34 }
 0x335   :  { %2860 = vmatpush2.bf16.msra.mxu0 %v13381_v17  ;;  %v13392_v17 = vld [vmem:[#allocation58_spill] sm:$0xff] }
 0x336   :  { %2928 = vmatpush1.bf16.msra.mxu1 %v13382_v54  ;;  %2861 = vmatprep.subr.bf16.mxu0 %v13383_v22 }
 0x337   :  { %2929 = vmatprep.subr.bf16.mxu1 %v13384_v8 }
 0x339   :  { %2862 = vmatpush2.bf16.msra.mxu0 %v13385_v9 }
 0x33a   :  { %2930 = vmatpush1.bf16.msra.mxu1 %v13386_v42  ;;  %2863 = vmatprep.subr.bf16.mxu0 %v13387_v35 }
 0x33b   :  { %2931 = vmatprep.subr.bf16.mxu1 %v13388_v5 }
 0x33d   :  { %2864 = vmatpush2.bf16.msra.mxu0 %v13389_v4 }
 0x33e   :  { %2932 = vmatpush1.bf16.msra.mxu1 %v13390_v60  ;;  %8153 = vmatprep.subr.bf16.mxu0 %v13391_v47 }
 0x33f   :  { %2933 = vmatprep.subr.bf16.mxu1 %v13392_v17 }
 0x340   :  { %v2198_v54 = vpop.f32.mrf.mxu0  ;;  %2866 = vmatmul.mubr.bf16.vlgmr.msra.gmra.mxu0 %v11324_v12  ;;  %v13393_v12 = vld [vmem:[#allocation71_spill] sm:$0xff] }
 0x341   :  { %8154 = vmatpush3.bf16.msra.mxu0 %v13341_v63  ;;  %2990 = vmatprep.mubr.bf16.mxu0 %v11370_v40 }
 0x342   :  { %2934 = vmatpush2.bf16.msra.mxu1 %v13342_v23  ;;  %v2200_v35 = vpop.f32.mrf.mxu0  ;;  %8155 = vmatprep.subr.bf16.mxu0 %v13343_v46  ;;  %v13394_v23 = vld [vmem:[#allocation72_spill] sm:$0xff] }
 0x343   :  { %2935 = vmatprep.subr.bf16.mxu1 %v11114_v49  ;;  %v13408_v49 = vld [vmem:[#allocation86_spill] sm:$0xff] }
 0x344   :  { %v2202_v4 = vpop.f32.mrf.mxu0 }
 0x345   :  { %8156 = vmatpush3.bf16.msra.mxu0 %v11120_v0  ;;  %v13395_v4 = vld [vmem:[#allocation74_spill] sm:$0xff]  ;;  %v13396_v0 = vld [vmem:[#allocation75_spill] sm:$0xff] }
 0x346   :  { %2936 = vmatpush2.bf16.msra.mxu1 %v11124_v52  ;;  %v2203_v17 = vpop.f32.mrf.mxu0  ;;  %8157 = vmatprep.subr.bf16.mxu0 %v11126_v61  ;;  %v13397_v52 = vld [vmem:[#allocation76_spill] sm:$0xff]  ;;  %v13399_v61 = vld [vmem:[#allocation78_spill] sm:$0xff] }
 0x347   :  { %2937 = vmatprep.subr.bf16.mxu1 %v11132_v10  ;;  %v13398_v17 = vld [vmem:[#allocation77_spill] sm:$0xff]  ;;  %v13400_v10 = vld [vmem:[#allocation79_spill] sm:$0xff] }
 0x349   :  { %8158 = vmatpush3.bf16.msra.mxu0 %v11137_v21  ;;  %v13401_v21 = vld [vmem:[#allocation80_spill] sm:$0xff] }
 0x34a   :  { %2938 = vmatpush2.bf16.msra.mxu1 %v11141_v36  ;;  %8159 = vmatprep.subr.bf16.mxu0 %v13393_v12  ;;  %v13402_v36 = vld [vmem:[#allocation81_spill] sm:$0xff]  ;;  %v13403_v12 = vld [vmem:[#allocation82_spill] sm:$0xff] }
 0x34b   :  { %2939 = vmatprep.subr.bf16.mxu1 %v13394_v23  ;;  %v13404_v23 = vld [vmem:[#allocation83_spill] sm:$0xff] }
 0x34d   :  { %8160 = vmatpush3.bf16.msra.mxu0 %v13345_v7  ;;  %v13405_v7 = vld [vmem:[#allocation84_spill] sm:$0xff] }
 0x34e   :  { %2940 = vmatpush2.bf16.msra.mxu1 %v13395_v4  ;;  %8161 = vmatprep.subr.bf16.mxu0 %v13396_v0  ;;  %v13406_v4 = vld [vmem:[#allocation85_spill] sm:$0xff]  ;;  %v13407_v0 = vld [vmem:[#allocation38_spill] sm:$0xff] }
 0x34f   :  { %2941 = vmatprep.subr.bf16.mxu1 %v13397_v52  ;;  %v1283_v52 = vmax.f32 %v13407_v0, 0.0  ;;  %v13417_v0 = vld [vmem:[#allocation25_spill] sm:$0xff] }
 0x351   :  { %8162 = vmatpush3.bf16.msra.mxu0 %v13398_v17  ;;  %v13409_v17 = vld [vmem:[#allocation87_spill] sm:$0xff] }
 0x352   :  { %2942 = vmatpush2.bf16.msra.mxu1 %v13399_v61  ;;  %8163 = vmatprep.subr.bf16.mxu0 %v13400_v10  ;;  %v1827_v61 = vld [vmem:[#allocation7] sm:$0x7]  ;;  %v13410_v10 = vld [vmem:[#allocation41_spill] sm:$0xff] }
 0x353   :  { %2943 = vmatprep.subr.bf16.mxu1 %v13401_v21  ;;  %v13021_v46 = vsub.s32 2, %v13410_v10  ;;  %v13411_v21 = vld [vmem:[#allocation88_spill] sm:$0xff] }
 0x355   :  { %8164 = vmatpush3.bf16.msra.mxu0 %v13402_v36  ;;  %v13412_v36 = vld [vmem:[#allocation42_spill] sm:$0xff] }
 0x356   :  { %2944 = vmatpush2.bf16.msra.mxu1 %v13403_v12  ;;  %8165 = vmatprep.subr.bf16.mxu0 %v13404_v23  ;;  %v11441_v63 = vrot.slane %v1827_v61, %v13412_v36  ;;  %v13414_v12 = vld [vmem:[#allocation89_spill] sm:$0xff]  ;;  %v11444_v23 = vpack.c.bf16 %v1283_v52, %v1283_v52 }
 0x357   :  { %2945 = vmatprep.subr.bf16.mxu1 %v13405_v7  ;;  %v13415_v7 = vld [vmem:[#allocation43_spill] sm:$0xff] }
 0x358   :  { %13413 = vst [vmem:[#allocation32_spill] sm:$0xff] %v11441_v63  ;;  %v2245_v52 = vadd.f32 %v2198_v54, %v11441_v63 }
 0x359   :  { %8166 = vmatpush3.bf16.msra.mxu0 %v13406_v4  ;;  %v11447_v4 = vrot.slane %v1827_v61, %v13415_v7 }
 0x35a   :  { %2946 = vmatpush2.bf16.msra.mxu1 %v13408_v49  ;;  %8167 = vmatprep.subr.bf16.mxu0 %v13409_v17  ;;  %v11450_v49 = vld [vmem:[#allocation6 + $0xac] ss:$12 sps:$4 sm:$0xff]   ;;  %v11455_v17 = vrot.slane %v1827_v61, %v13021_v46  ;;  %v11470_v46 = vld [vmem:[#allocation6 + $0xb0] ss:$12 sps:$4 sm:$0xff]  }
 0x35b   :  { %2947 = vmatprep.subr.bf16.mxu1 %v13411_v21  ;;  %13416 = vst [vmem:[#allocation33_spill] sm:$0xff] %v11447_v4  ;;  %13418 = vst [vmem:[#allocation34_spill] sm:$0xff] %v11450_v49  ;;  %v11457_v21 = vld [vmem:[#allocation6 + $0x170] ss:$12 sps:$4 sm:$0xff]   ;;  %v2246_v10 = vadd.f32 %v2200_v35, %v11447_v4 }
 0x35c   :  { %13419 = vst [vmem:[#allocation39_spill] sm:$0xff] %v11457_v21  ;;  %13421 = vst [vmem:[#allocation37_spill] sm:$0xff] %v11470_v46  ;;  %v2247_v63 = vadd.f32 %v11378_v11, %v11455_v17  ;;  %v11486_v4 = vld [vmem:[#allocation6 + $0x90] ss:$12 sps:$4 sm:$0xff]  }
 0x35d   :  { %8168 = vmatpush3.bf16.msra.mxu0 %v13414_v12  ;;  %v11476_v12 = vld [vmem:[#allocation6 + $0x94] ss:$12 sps:$4 sm:$0xff]   ;;  %v11492_v11 = vld [vmem:[#allocation6 + $0x7c] ss:$12 sps:$4 sm:$0xff]  }
 0x35e   :  { %2948 = vmatpush2.bf16.msra.mxu1 %v13417_v0  ;;  %3007 = vmatprep.subr.bf16.mxu0 %v11450_v49  ;;  %v11463_v0 = vld [vmem:[#allocation6 + $0xa8] ss:$12 sps:$4 sm:$0xff]  }
 0x35f   :  { %8175 = vmatprep.subr.bf16.mxu1 %v11457_v21 }
 0x360   :  { %v8081_v36 = vpop.f32.mrf.mxu0  ;;  %2991 = vmatmul.mubr.bf16.vlgmr.msra.gmra.mxu0 %v11444_v23 }
 0x361   :  { %v2603_v7 = vpop.f32.mrf.mxu1  ;;  %2950 = vmatmul.mubr.bf16.vlgmr.msra.gmra.mxu1 %v11444_v23  ;;  %3008 = vmatpush1.bf16.msra.mxu0 %v11463_v0 }
 0x362   :  { %v11467_v61 = vadd.f32 %v2603_v7, %v2245_v52  ;;  %3039 = vmatprep.mubr.bf16.mxu0 %v11370_v40  ;;  %8176 = vmatpush3.bf16.msra.mxu1 %v11470_v46  ;;  %v8082_v54 = vpop.f32.mrf.mxu0  ;;  %v11481_v52 = vld [vmem:[#allocation6 + $0x158] ss:$12 sps:$4 sm:$0xff]  }
 0x363   :  { %3080 = vmatprep.mubr.bf16.mxu1 %v11370_v40  ;;  %v2605_v21 = vpop.f32.mrf.mxu1  ;;  %v8083_v49 = vadd.f32 %v8082_v54, %v8081_v36  ;;  %3009 = vmatprep.subr.bf16.mxu0 %v11476_v12  ;;  %v11489_v40 = vld [vmem:[#allocation6 + $0x98] ss:$12 sps:$4 sm:$0xff]   ;;  %v11507_v54 = vld [vmem:[#allocation6 + $0x128] ss:$12 sps:$4 sm:$0xff]  }
 0x364   :  { %13420 = vst [vmem:[#allocation40_spill] sm:$0xff] %v11467_v61  ;;  %v11479_v7 = vadd.f32 %v2605_v21, %v2246_v10  ;;  %v8084_v35 = vpop.f32.mrf.mxu0  ;;  %8177 = vmatprep.subr.bf16.mxu1 %v11481_v52  ;;  %v11495_v10 = vld [vmem:[#allocation6 + $0x140] ss:$12 sps:$4 sm:$0xff]  }
 0x365   :  { %v11484_v61 = vadd.f32 %v8083_v49, %v2247_v63  ;;  %v2607_v46 = vpop.f32.mrf.mxu1  ;;  %3010 = vmatpush1.bf16.msra.mxu0 %v11486_v4  ;;  %v11498_v49 = vld [vmem:[#allocation6 + $0x78] ss:$12 sps:$4 sm:$0xff]   ;;  %v11501_v63 = vld [vmem:[#allocation6 + $0x80] ss:$12 sps:$4 sm:$0xff]  }
 0x366   :  { %13422 = vst [vmem:[#allocation24_spill] sm:$0xff] %v11479_v7  ;;  %8178 = vmatpush3.bf16.msra.mxu1 %v11489_v40  ;;  %v8085_v36 = vpop.f32.mrf.mxu0  ;;  %3011 = vmatprep.subr.bf16.mxu0 %v11492_v11  ;;  %v11504_v46 = vld [vmem:[#allocation6 + $0x64] ss:$12 sps:$4 sm:$0xff]   ;;  %v11510_v35 = vld [vmem:[#allocation6 + $0x60] ss:$12 sps:$4 sm:$0xff]  }
 0x367   :  { %13423 = vst [vmem:[#allocation27_spill] sm:$0xff] %v11484_v61  ;;  %v2608_v21 = vpop.f32.mrf.mxu1  ;;  %8179 = vmatprep.subr.bf16.mxu1 %v11495_v10  ;;  %v13459_v36 = vld [vmem:[#allocation89_spill] sm:$0xff]  ;;  %v11765_v61 = vld [vmem:[#allocation6 + $0xdc] ss:$12 sps:$4 sm:$0xff]  }
 0x368   :  { %13477 = vst [vmem:[#allocation51_spill] sm:$0xff] %v11765_v61  ;;  %v11768_v7 = vld [vmem:[#allocation6 + $0x19c] ss:$12 sps:$4 sm:$0xff]  }
 0x369   :  { %3012 = vmatpush1.bf16.msra.mxu0 %v11498_v49  ;;  %13478 = vst [vmem:[#allocation52_spill] sm:$0xff] %v11768_v7 }
 0x36a   :  { %8180 = vmatpush3.bf16.msra.mxu1 %v11501_v63  ;;  %3013 = vmatprep.subr.bf16.mxu0 %v11504_v46 }
 0x36b   :  { %8181 = vmatprep.subr.bf16.mxu1 %v11507_v54 }
 0x36d   :  { %3014 = vmatpush1.bf16.msra.mxu0 %v11510_v35 }
 0x36e   :  { %8182 = vmatpush3.bf16.msra.mxu1 %v10939_v6  ;;  %3015 = vmatprep.subr.bf16.mxu0 %v10941_v13  ;;  %v13424_v6 = vld [vmem:[#allocation68_spill] sm:$0xff] }
 0x36f   :  { %8183 = vmatprep.subr.bf16.mxu1 %v10944_v20  ;;  %v1464_v13 = vmax.f32 %v13424_v6, 0.0  ;;  %v13460_v6 = vld [vmem:[#allocation25_spill] sm:$0xff] }
 0x371   :  { %3016 = vmatpush1.bf16.msra.mxu0 %v10947_v27  ;;  %v11533_v20 = vpack.c.bf16 %v1464_v13, %v1464_v13  ;;  %v13461_v13 = vld [vmem:[#allocation34_spill] sm:$0xff] }
 0x372   :  { %8184 = vmatpush3.bf16.msra.mxu1 %v10951_v28  ;;  %3017 = vmatprep.subr.bf16.mxu0 %v10953_v29 }
 0x373   :  { %8185 = vmatprep.subr.bf16.mxu1 %v10956_v30 }
 0x375   :  { %3018 = vmatpush1.bf16.msra.mxu0 %v10959_v33 }
 0x376   :  { %8186 = vmatpush3.bf16.msra.mxu1 %v10963_v37  ;;  %3019 = vmatprep.subr.bf16.mxu0 %v10965_v39  ;;  %v13425_v37 = vld [vmem:[#allocation47_spill] sm:$0xff]  ;;  %v13426_v39 = vld [vmem:[#allocation48_spill] sm:$0xff] }
 0x377   :  { %8187 = vmatprep.subr.bf16.mxu1 %v10968_v14  ;;  %v13427_v14 = vld [vmem:[#allocation53_spill] sm:$0xff] }
 0x379   :  { %3020 = vmatpush1.bf16.msra.mxu0 %v10971_v15  ;;  %v13428_v15 = vld [vmem:[#allocation55_spill] sm:$0xff] }
 0x37a   :  { %8188 = vmatpush3.bf16.msra.mxu1 %v10975_v16  ;;  %3021 = vmatprep.subr.bf16.mxu0 %v10977_v41  ;;  %v13429_v16 = vld [vmem:[#allocation58_spill] sm:$0xff] }
 0x37b   :  { %8189 = vmatprep.subr.bf16.mxu1 %v10980_v18  ;;  %v13430_v18 = vld [vmem:[#allocation59_spill] sm:$0xff] }
 0x37d   :  { %3022 = vmatpush1.bf16.msra.mxu0 %v10983_v43  ;;  %v13431_v43 = vld [vmem:[#allocation60_spill] sm:$0xff] }
 0x37e   :  { %8190 = vmatpush3.bf16.msra.mxu1 %v10987_v44  ;;  %3023 = vmatprep.subr.bf16.mxu0 %v10989_v45  ;;  %v13432_v45 = vld [vmem:[#allocation61_spill] sm:$0xff] }
 0x37f   :  { %3091 = vmatprep.subr.bf16.mxu1 %v10993_v48  ;;  %v13433_v48 = vld [vmem:[#allocation62_spill] sm:$0xff] }
 0x381   :  { %v8103_v27 = vpop.f32.mrf.mxu1  ;;  %3081 = vmatmul.mubr.bf16.vlgmr.msra.gmra.mxu1 %v11444_v23  ;;  %3024 = vmatpush2.bf16.msra.mxu0 %v10997_v51 }
 0x382   :  { %3092 = vmatpush1.bf16.msra.mxu1 %v11001_v53  ;;  %3123 = vmatprep.mubr.bf16.mxu1 %v11533_v20  ;;  %v13434_v53 = vld [vmem:[#allocation63_spill] sm:$0xff] }
 0x383   :  { %v8104_v28 = vpop.f32.mrf.mxu1  ;;  %3025 = vmatprep.subr.bf16.mxu0 %v11006_v55  ;;  %3093 = vmatprep.subr.bf16.mxu1 %v11008_v59  ;;  %v13435_v55 = vld [vmem:[#allocation64_spill] sm:$0xff] }
 0x384   :  { %v11541_v29 = vadd.f32 %v8104_v28, %v8103_v27  ;;  %v13462_v27 = vld [vmem:[#allocation39_spill] sm:$0xff]  ;;  %v13463_v28 = vld [vmem:[#allocation32_spill] sm:$0xff] }
 0x385   :  { %v8106_v30 = vpop.f32.mrf.mxu1  ;;  %3026 = vmatpush2.bf16.msra.mxu0 %v11015_v62  ;;  %v13436_v62 = vld [vmem:[#allocation65_spill] sm:$0xff] }
 0x386   :  { %3094 = vmatpush1.bf16.msra.mxu1 %v11019_v19  ;;  %3027 = vmatprep.subr.bf16.mxu0 %v11021_v26  ;;  %v13437_v19 = vld [vmem:[#allocation67_spill] sm:$0xff]  ;;  %v13438_v26 = vld [vmem:[#allocation69_spill] sm:$0xff] }
 0x387   :  { %v8107_v33 = vpop.f32.mrf.mxu1  ;;  %3095 = vmatprep.subr.bf16.mxu1 %v11028_v2  ;;  %v13439_v2 = vld [vmem:[#allocation70_spill] sm:$0xff] }
 0x389   :  { %3028 = vmatpush2.bf16.msra.mxu0 %v13369_v24  ;;  %v13443_v24 = vld [vmem:[#allocation74_spill] sm:$0xff] }
 0x38a   :  { %3096 = vmatpush1.bf16.msra.mxu1 %v13370_v31  ;;  %3029 = vmatprep.subr.bf16.mxu0 %v13371_v38  ;;  %v13444_v31 = vld [vmem:[#allocation75_spill] sm:$0xff]  ;;  %v13445_v38 = vld [vmem:[#allocation76_spill] sm:$0xff] }
 0x38b   :  { %3097 = vmatprep.subr.bf16.mxu1 %v13372_v50  ;;  %v13446_v50 = vld [vmem:[#allocation77_spill] sm:$0xff] }
 0x38d   :  { %3030 = vmatpush2.bf16.msra.mxu0 %v13373_v58  ;;  %v13447_v58 = vld [vmem:[#allocation78_spill] sm:$0xff] }
 0x38e   :  { %3098 = vmatpush1.bf16.msra.mxu1 %v13374_v25  ;;  %3031 = vmatprep.subr.bf16.mxu0 %v13375_v3  ;;  %v13448_v25 = vld [vmem:[#allocation79_spill] sm:$0xff]  ;;  %v13449_v3 = vld [vmem:[#allocation80_spill] sm:$0xff] }
 0x38f   :  { %3099 = vmatprep.subr.bf16.mxu1 %v13376_v57  ;;  %v13450_v57 = vld [vmem:[#allocation81_spill] sm:$0xff] }
 0x391   :  { %3032 = vmatpush2.bf16.msra.mxu0 %v13377_v32  ;;  %v13451_v32 = vld [vmem:[#allocation82_spill] sm:$0xff] }
 0x392   :  { %3100 = vmatpush1.bf16.msra.mxu1 %v13378_v1  ;;  %3033 = vmatprep.subr.bf16.mxu0 %v13379_v56  ;;  %v13452_v1 = vld [vmem:[#allocation83_spill] sm:$0xff]  ;;  %v13453_v56 = vld [vmem:[#allocation84_spill] sm:$0xff] }
 0x393   :  { %3101 = vmatprep.subr.bf16.mxu1 %v13380_v34  ;;  %v13454_v34 = vld [vmem:[#allocation85_spill] sm:$0xff] }
 0x395   :  { %3034 = vmatpush2.bf16.msra.mxu0 %v13425_v37 }
 0x396   :  { %3102 = vmatpush1.bf16.msra.mxu1 %v13426_v39  ;;  %3035 = vmatprep.subr.bf16.mxu0 %v13383_v22  ;;  %v13455_v22 = vld [vmem:[#allocation66_spill] sm:$0xff]  ;;  %v13464_v39 = vld [vmem:[#allocation33_spill] sm:$0xff] }
 0x397   :  { %3103 = vmatprep.subr.bf16.mxu1 %v13384_v8  ;;  %v1463_v8 = vmax.f32 %v13455_v22, 0.0 }
 0x399   :  { %3036 = vmatpush2.bf16.msra.mxu0 %v13385_v9  ;;  %v13456_v9 = vld [vmem:[#allocation86_spill] sm:$0xff]  ;;  %v11603_v21 = vpack.c.bf16 %v1463_v8, %v1463_v8 }
 0x39a   :  { %3104 = vmatpush1.bf16.msra.mxu1 %v13386_v42  ;;  %3037 = vmatprep.subr.bf16.mxu0 %v13427_v14  ;;  %v13457_v42 = vld [vmem:[#allocation87_spill] sm:$0xff] }
 0x39b   :  { %3105 = vmatprep.subr.bf16.mxu1 %v13388_v5  ;;  %v13458_v5 = vld [vmem:[#allocation88_spill] sm:$0xff] }
 0x39d   :  { %3038 = vmatpush2.bf16.msra.mxu0 %v13428_v15 }
 0x39e   :  { %3106 = vmatpush1.bf16.msra.mxu1 %v13390_v60  ;;  %8197 = vmatprep.subr.bf16.mxu0 %v13391_v47  ;;  %v13441_v60 = vld [vmem:[#allocation72_spill] sm:$0xff]  ;;  %v13442_v47 = vld [vmem:[#allocation73_spill] sm:$0xff] }
 0x39f   :  { %3107 = vmatprep.subr.bf16.mxu1 %v13429_v16  ;;  %v13466_v16 = vld [vmem:[#allocation37_spill] sm:$0xff] }
 0x3a0   :  { %v2693_v41 = vpop.f32.mrf.mxu0  ;;  %3040 = vmatmul.mubr.bf16.vlgmr.msra.gmra.mxu0 %v11444_v23  ;;  %v13440_v23 = vld [vmem:[#allocation71_spill] sm:$0xff] }
 0x3a1   :  { %8198 = vmatpush3.bf16.msra.mxu0 %v13430_v18  ;;  %3164 = vmatprep.mubr.bf16.mxu0 %v11533_v20  ;;  %v2740_v30 = vadd.f32 %v2693_v41, %v13463_v28  ;;  %v2742_v41 = vadd.f32 %v11541_v29, %v11455_v17  ;;  %v11635_v29 = vld [vmem:[#allocation6 + $0x68] ss:$12 sps:$4 sm:$0xff]  }
 0x3a2   :  { %3108 = vmatpush2.bf16.msra.mxu1 %v13431_v43  ;;  %v2695_v44 = vpop.f32.mrf.mxu0  ;;  %8199 = vmatprep.subr.bf16.mxu0 %v13432_v45 }
 0x3a3   :  { %3109 = vmatprep.subr.bf16.mxu1 %v13433_v48  ;;  %v2741_v14 = vadd.f32 %v2695_v44, %v13464_v39 }
 0x3a4   :  { %v2697_v51 = vpop.f32.mrf.mxu0 }
 0x3a5   :  { %8200 = vmatpush3.bf16.msra.mxu0 %v13434_v53 }
 0x3a6   :  { %3110 = vmatpush2.bf16.msra.mxu1 %v13435_v55  ;;  %v2698_v59 = vpop.f32.mrf.mxu0  ;;  %8201 = vmatprep.subr.bf16.mxu0 %v13436_v62  ;;  %v11641_v62 = vld [vmem:[#allocation6 + $0x110] ss:$12 sps:$4 sm:$0xff]  }
 0x3a7   :  { %3111 = vmatprep.subr.bf16.mxu1 %v13437_v19  ;;  %v11638_v59 = vld [vmem:[#allocation6 + $0x4c] ss:$12 sps:$4 sm:$0xff]   ;;  %v11644_v19 = vld [vmem:[#allocation6 + $0x48] ss:$12 sps:$4 sm:$0xff]  }
 0x3a9   :  { %8202 = vmatpush3.bf16.msra.mxu0 %v13438_v26  ;;  %v11647_v26 = vld [vmem:[#allocation6 + $0x50] ss:$12 sps:$4 sm:$0xff]  }
 0x3aa   :  { %3112 = vmatpush2.bf16.msra.mxu1 %v13439_v2  ;;  %8203 = vmatprep.subr.bf16.mxu0 %v13440_v23  ;;  %v11650_v2 = vld [vmem:[#allocation6 + $0x34] ss:$12 sps:$4 sm:$0xff]   ;;  %v11653_v23 = vld [vmem:[#allocation6 + $0xf8] ss:$12 sps:$4 sm:$0xff]  }
 0x3ab   :  { %3113 = vmatprep.subr.bf16.mxu1 %v13441_v60  ;;  %v11656_v60 = vld [vmem:[#allocation6 + $0x30] ss:$12 sps:$4 sm:$0xff]  }
 0x3ad   :  { %8204 = vmatpush3.bf16.msra.mxu0 %v13442_v47  ;;  %v11659_v47 = vld [vmem:[#allocation6 + $0x38] ss:$12 sps:$4 sm:$0xff]  }
 0x3ae   :  { %3114 = vmatpush2.bf16.msra.mxu1 %v13443_v24  ;;  %8205 = vmatprep.subr.bf16.mxu0 %v13444_v31  ;;  %v11662_v24 = vld [vmem:[#allocation6 + $0x1c] ss:$12 sps:$4 sm:$0xff]   ;;  %v11665_v31 = vld [vmem:[#allocation6 + $0xe0] ss:$12 sps:$4 sm:$0xff]  }
 0x3af   :  { %3115 = vmatprep.subr.bf16.mxu1 %v13445_v38  ;;  %v11668_v38 = vld [vmem:[#allocation6 + $0x18] ss:$12 sps:$4 sm:$0xff]  }
 0x3b1   :  { %8206 = vmatpush3.bf16.msra.mxu0 %v13446_v50  ;;  %v11671_v50 = vld [vmem:[#allocation6 + $0x20] ss:$12 sps:$4 sm:$0xff]  }
 0x3b2   :  { %3116 = vmatpush2.bf16.msra.mxu1 %v13447_v58  ;;  %8207 = vmatprep.subr.bf16.mxu0 %v13448_v25  ;;  %v11674_v58 = vld [vmem:[#allocation6 + $0x4] ss:$12 sps:$4 sm:$0xff]   ;;  %v11677_v25 = vld [vmem:[#allocation6 + $0xc8] ss:$12 sps:$4 sm:$0xff]  }
 0x3b3   :  { %3117 = vmatprep.subr.bf16.mxu1 %v13449_v3  ;;  %v13469_v3 = vld [vmem:[#allocation91_spill] sm:$0xff] }
 0x3b5   :  { %8208 = vmatpush3.bf16.msra.mxu0 %v13450_v57  ;;  %v1644_v57 = vmax.f32 %v13469_v3, 0.0  ;;  %v11738_v3 = vld [vmem:[#allocation6 + $0x1e0] ss:$12 sps:$4 sm:$0xff]  }
 0x3b6   :  { %3118 = vmatpush2.bf16.msra.mxu1 %v13451_v32  ;;  %8209 = vmatprep.subr.bf16.mxu0 %v13452_v1  ;;  %v11681_v32 = vld [vmem:[#allocation6] ss:$12 sps:$4 sm:$0xff]   ;;  %v11684_v1 = vld [vmem:[#allocation6 + $0x8] ss:$12 sps:$4 sm:$0xff]  }
 0x3b7   :  { %3119 = vmatprep.subr.bf16.mxu1 %v13453_v56  ;;  %v11687_v56 = vld [vmem:[#allocation6 + $0x16c] ss:$12 sps:$4 sm:$0xff]   ;;  %v11693_v22 = vpack.c.bf16 %v1644_v57, %v1644_v57 }
 0x3b8   :  { %v11741_v57 = vld [vmem:[#allocation6 + $0x10c] ss:$12 sps:$4 sm:$0xff]  }
 0x3b9   :  { %8210 = vmatpush3.bf16.msra.mxu0 %v13454_v34  ;;  %v11690_v34 = vld [vmem:[#allocation6 + $0x22c] ss:$12 sps:$4 sm:$0xff]  }
 0x3ba   :  { %3120 = vmatpush2.bf16.msra.mxu1 %v13456_v9  ;;  %8211 = vmatprep.subr.bf16.mxu0 %v13457_v42  ;;  %v11696_v9 = vld [vmem:[#allocation6 + $0x168] ss:$12 sps:$4 sm:$0xff]  }
 0x3bb   :  { %3121 = vmatprep.subr.bf16.mxu1 %v13458_v5  ;;  %v11699_v42 = vld [vmem:[#allocation6 + $0x228] ss:$12 sps:$4 sm:$0xff]  }
 0x3bd   :  { %8212 = vmatpush3.bf16.msra.mxu0 %v13459_v36  ;;  %v11703_v36 = vld [vmem:[#allocation6 + $0x154] ss:$12 sps:$4 sm:$0xff]  }
 0x3be   :  { %3122 = vmatpush2.bf16.msra.mxu1 %v13460_v6  ;;  %3181 = vmatprep.subr.bf16.mxu0 %v13461_v13  ;;  %v11706_v6 = vld [vmem:[#allocation6 + $0x214] ss:$12 sps:$4 sm:$0xff]  }
 0x3bf   :  { %8219 = vmatprep.subr.bf16.mxu1 %v13462_v27 }
 0x3c0   :  { %v8125_v33 = vpop.f32.mrf.mxu0  ;;  %3165 = vmatmul.mubr.bf16.vlgmr.msra.gmra.mxu0 %v11603_v21 }
 0x3c1   :  { %v2777_v37 = vpop.f32.mrf.mxu1  ;;  %3124 = vmatmul.mubr.bf16.vlgmr.msra.gmra.mxu1 %v11603_v21  ;;  %3182 = vmatpush1.bf16.msra.mxu0 %v11463_v0 }
 0x3c2   :  { %v11613_v15 = vadd.f32 %v2777_v37, %v2740_v30  ;;  %3213 = vmatprep.mubr.bf16.mxu0 %v11533_v20  ;;  %8220 = vmatpush3.bf16.msra.mxu1 %v13466_v16  ;;  %v8126_v18 = vpop.f32.mrf.mxu0  ;;  %v11711_v37 = vld [vmem:[#allocation6 + $0x150] ss:$12 sps:$4 sm:$0xff]  }
 0x3c3   :  { %3254 = vmatprep.mubr.bf16.mxu1 %v11533_v20  ;;  %v2779_v43 = vpop.f32.mrf.mxu1  ;;  %v8127_v45 = vadd.f32 %v8126_v18, %v8125_v33  ;;  %3183 = vmatprep.subr.bf16.mxu0 %v11476_v12  ;;  %v11717_v18 = vld [vmem:[#allocation6 + $0x13c] ss:$12 sps:$4 sm:$0xff]  }
 0x3c4   :  { %13465 = vst [vmem:[#allocation28_spill] sm:$0xff] %v11613_v15  ;;  %v11621_v48 = vadd.f32 %v2779_v43, %v2741_v14  ;;  %v8128_v51 = vpop.f32.mrf.mxu0  ;;  %8221 = vmatprep.subr.bf16.mxu1 %v11481_v52  ;;  %v11714_v14 = vld [vmem:[#allocation6 + $0x210] ss:$12 sps:$4 sm:$0xff]   ;;  %v11756_v15 = vld [vmem:[#allocation6 + $0x1b4] ss:$12 sps:$4 sm:$0xff]  }
 0x3c5   :  { %v11624_v44 = vadd.f32 %v8127_v45, %v2742_v41  ;;  %v2781_v53 = vpop.f32.mrf.mxu1  ;;  %3184 = vmatpush1.bf16.msra.mxu0 %v11486_v4  ;;  %v11720_v43 = vld [vmem:[#allocation6 + $0x1fc] ss:$12 sps:$4 sm:$0xff]   ;;  %v11723_v45 = vld [vmem:[#allocation6 + $0x138] ss:$12 sps:$4 sm:$0xff]   ;;  %13474 = vst [vmem:[#allocation46_spill] sm:$0xff] %v11756_v15 }
 0x3c6   :  { %13467 = vst [vmem:[#allocation29_spill] sm:$0xff] %v11621_v48  ;;  %8222 = vmatpush3.bf16.msra.mxu1 %v11489_v40  ;;  %v8129_v55 = vpop.f32.mrf.mxu0  ;;  %3185 = vmatprep.subr.bf16.mxu0 %v11492_v11  ;;  %v11726_v51 = vld [vmem:[#allocation6 + $0x1f8] ss:$12 sps:$4 sm:$0xff]   ;;  %v11762_v48 = vld [vmem:[#allocation6 + $0x1b0] ss:$12 sps:$4 sm:$0xff]  }
 0x3c7   :  { %13468 = vst [vmem:[#allocation36_spill] sm:$0xff] %v11624_v44  ;;  %v2782_v20 = vpop.f32.mrf.mxu1  ;;  %8223 = vmatprep.subr.bf16.mxu1 %v11495_v10  ;;  %v11729_v53 = vld [vmem:[#allocation6 + $0x124] ss:$12 sps:$4 sm:$0xff]   ;;  %13476 = vst [vmem:[#allocation50_spill] sm:$0xff] %v11762_v48 }
 0x3c8   :  { %v11732_v55 = vld [vmem:[#allocation6 + $0x1e4] ss:$12 sps:$4 sm:$0xff]   ;;  %v11735_v20 = vld [vmem:[#allocation6 + $0x120] ss:$12 sps:$4 sm:$0xff]  }
 0x3c9   :  { %3186 = vmatpush1.bf16.msra.mxu0 %v11498_v49  ;;  %v11759_v44 = vld [vmem:[#allocation6 + $0xf0] ss:$12 sps:$4 sm:$0xff]  }
 0x3ca   :  { %8224 = vmatpush3.bf16.msra.mxu1 %v11501_v63  ;;  %3187 = vmatprep.subr.bf16.mxu0 %v11504_v46  ;;  %13475 = vst [vmem:[#allocation49_spill] sm:$0xff] %v11759_v44 }
 0x3cb   :  { %8225 = vmatprep.subr.bf16.mxu1 %v11507_v54 }
 0x3cd   :  { %3188 = vmatpush1.bf16.msra.mxu0 %v11510_v35 }
 0x3ce   :  { %8226 = vmatpush3.bf16.msra.mxu1 %v11635_v29  ;;  %3189 = vmatprep.subr.bf16.mxu0 %v11638_v59 }
 0x3cf   :  { %8227 = vmatprep.subr.bf16.mxu1 %v11641_v62 }
 0x3d1   :  { %3190 = vmatpush1.bf16.msra.mxu0 %v11644_v19 }
 0x3d2   :  { %8228 = vmatpush3.bf16.msra.mxu1 %v11647_v26  ;;  %3191 = vmatprep.subr.bf16.mxu0 %v11650_v2 }
 0x3d3   :  { %8229 = vmatprep.subr.bf16.mxu1 %v11653_v23 }
 0x3d5   :  { %3192 = vmatpush1.bf16.msra.mxu0 %v11656_v60 }
 0x3d6   :  { %8230 = vmatpush3.bf16.msra.mxu1 %v11659_v47  ;;  %3193 = vmatprep.subr.bf16.mxu0 %v11662_v24 }
 0x3d7   :  { %8231 = vmatprep.subr.bf16.mxu1 %v11665_v31 }
 0x3d9   :  { %3194 = vmatpush1.bf16.msra.mxu0 %v11668_v38 }
 0x3da   :  { %8232 = vmatpush3.bf16.msra.mxu1 %v11671_v50  ;;  %3195 = vmatprep.subr.bf16.mxu0 %v11674_v58 }
 0x3db   :  { %8233 = vmatprep.subr.bf16.mxu1 %v11677_v25 }
 0x3dd   :  { %3196 = vmatpush1.bf16.msra.mxu0 %v11681_v32 }
 0x3de   :  { %8234 = vmatpush3.bf16.msra.mxu1 %v11684_v1  ;;  %3197 = vmatprep.subr.bf16.mxu0 %v11687_v56 }
 0x3df   :  { %3265 = vmatprep.subr.bf16.mxu1 %v11690_v34 }
 0x3e1   :  { %v8147_v8 = vpop.f32.mrf.mxu1  ;;  %3255 = vmatmul.mubr.bf16.vlgmr.msra.gmra.mxu1 %v11603_v21  ;;  %3198 = vmatpush2.bf16.msra.mxu0 %v11696_v9 }
 0x3e2   :  { %3266 = vmatpush1.bf16.msra.mxu1 %v11699_v42  ;;  %3297 = vmatprep.mubr.bf16.mxu1 %v11693_v22 }
 0x3e3   :  { %v8148_v5 = vpop.f32.mrf.mxu1  ;;  %3199 = vmatprep.subr.bf16.mxu0 %v11703_v36  ;;  %3267 = vmatprep.subr.bf16.mxu1 %v11706_v6 }
 0x3e4   :  { %v11709_v30 = vadd.f32 %v8148_v5, %v8147_v8  ;;  %v11744_v8 = vld [vmem:[#allocation6 + $0x1cc] ss:$12 sps:$4 sm:$0xff]   ;;  %v11747_v5 = vld [vmem:[#allocation6 + $0x108] ss:$12 sps:$4 sm:$0xff]  }
 0x3e5   :  { %v8150_v33 = vpop.f32.mrf.mxu1  ;;  %3200 = vmatpush2.bf16.msra.mxu0 %v11711_v37  ;;  %13470 = vst [vmem:[#allocation35_spill] sm:$0xff] %v11744_v8  ;;  %13471 = vst [vmem:[#allocation26_spill] sm:$0xff] %v11747_v5 }
 0x3e6   :  { %3268 = vmatpush1.bf16.msra.mxu1 %v11714_v14  ;;  %3201 = vmatprep.subr.bf16.mxu0 %v11717_v18  ;;  %v11750_v33 = vld [vmem:[#allocation6 + $0x1c8] ss:$12 sps:$4 sm:$0xff]  }
 0x3e7   :  { %v8151_v41 = vpop.f32.mrf.mxu1  ;;  %3269 = vmatprep.subr.bf16.mxu1 %v11720_v43  ;;  %13472 = vst [vmem:[#allocation44_spill] sm:$0xff] %v11750_v33 }
 0x3e8   :  { %v11753_v41 = vld [vmem:[#allocation6 + $0xf4] ss:$12 sps:$4 sm:$0xff]  }
 0x3e9   :  { %3202 = vmatpush2.bf16.msra.mxu0 %v11723_v45  ;;  %13473 = vst [vmem:[#allocation45_spill] sm:$0xff] %v11753_v41 }
 0x3ea   :  { %3270 = vmatpush1.bf16.msra.mxu1 %v11726_v51  ;;  %3203 = vmatprep.subr.bf16.mxu0 %v11729_v53 }
 0x3eb   :  { %3271 = vmatprep.subr.bf16.mxu1 %v11732_v55 }
 0x3ed   :  { %3204 = vmatpush2.bf16.msra.mxu0 %v11735_v20 }
 0x3ee   :  { %3272 = vmatpush1.bf16.msra.mxu1 %v11738_v3  ;;  %3205 = vmatprep.subr.bf16.mxu0 %v11741_v57 }
 0x3ef   :  { %3273 = vmatprep.subr.bf16.mxu1 %v11744_v8  ;;  %v11822_v8 = vld [vmem:[#allocation6 + $0x2bc] ss:$12 sps:$4 sm:$0xff]  }
 0x3f0   :  { %13494 = vst [vmem:[#allocation64_spill] sm:$0xff] %v11822_v8 }
 0x3f1   :  { %3206 = vmatpush2.bf16.msra.mxu0 %v11747_v5  ;;  %v11819_v5 = vld [vmem:[#allocation6 + $0x2c0] ss:$12 sps:$4 sm:$0xff]  }
 0x3f2   :  { %3274 = vmatpush1.bf16.msra.mxu1 %v11750_v33  ;;  %3207 = vmatprep.subr.bf16.mxu0 %v11753_v41  ;;  %v11771_v41 = vld [vmem:[#allocation6 + $0xd8] ss:$12 sps:$4 sm:$0xff]   ;;  %13493 = vst [vmem:[#allocation63_spill] sm:$0xff] %v11819_v5 }
 0x3f3   :  { %3275 = vmatprep.subr.bf16.mxu1 %v11756_v15  ;;  %13479 = vst [vmem:[#allocation54_spill] sm:$0xff] %v11771_v41  ;;  %v11774_v15 = vld [vmem:[#allocation6 + $0x198] ss:$12 sps:$4 sm:$0xff]  }
 0x3f4   :  { %13480 = vst [vmem:[#allocation56_spill] sm:$0xff] %v11774_v15  ;;  %v11813_v33 = vld [vmem:[#allocation6 + $0x218] ss:$12 sps:$4 sm:$0xff]  }
 0x3f5   :  { %3208 = vmatpush2.bf16.msra.mxu0 %v11759_v44  ;;  %v11777_v44 = vld [vmem:[#allocation6 + $0xc4] ss:$12 sps:$4 sm:$0xff]   ;;  %13491 = vst [vmem:[#allocation61_spill] sm:$0xff] %v11813_v33 }
 0x3f6   :  { %3276 = vmatpush1.bf16.msra.mxu1 %v11762_v48  ;;  %3209 = vmatprep.subr.bf16.mxu0 %v11765_v61  ;;  %13481 = vst [vmem:[#allocation57_spill] sm:$0xff] %v11777_v44  ;;  %v11780_v48 = vld [vmem:[#allocation6 + $0x184] ss:$12 sps:$4 sm:$0xff]   ;;  %v11783_v61 = vld [vmem:[#allocation6 + $0xc0] ss:$12 sps:$4 sm:$0xff]  }
 0x3f7   :  { %3277 = vmatprep.subr.bf16.mxu1 %v11768_v7  ;;  %13482 = vst [vmem:[#allocation38_spill] sm:$0xff] %v11780_v48  ;;  %13483 = vst [vmem:[#allocation68_spill] sm:$0xff] %v11783_v61  ;;  %v11786_v7 = vld [vmem:[#allocation6 + $0x180] ss:$12 sps:$4 sm:$0xff]  }
 0x3f8   :  { %13484 = vst [vmem:[#allocation47_spill] sm:$0xff] %v11786_v7 }
 0x3f9   :  { %3210 = vmatpush2.bf16.msra.mxu0 %v11771_v41  ;;  %v11789_v41 = vld [vmem:[#allocation6 + $0x2f0] ss:$12 sps:$4 sm:$0xff]  }
 0x3fa   :  { %3278 = vmatpush1.bf16.msra.mxu1 %v11774_v15  ;;  %3211 = vmatprep.subr.bf16.mxu0 %v11777_v44  ;;  %13485 = vst [vmem:[#allocation48_spill] sm:$0xff] %v11789_v41  ;;  %v11792_v15 = vld [vmem:[#allocation6 + $0x2ec] ss:$12 sps:$4 sm:$0xff]  }
 0x3fb   :  { %3279 = vmatprep.subr.bf16.mxu1 %v11780_v48  ;;  %13486 = vst [vmem:[#allocation53_spill] sm:$0xff] %v11792_v15  ;;  %v11798_v48 = vld [vmem:[#allocation6 + $0x230] ss:$12 sps:$4 sm:$0xff]  }
 0x3fc   :  { %13487 = vst [vmem:[#allocation55_spill] sm:$0xff] %v11798_v48 }
 0x3fd   :  { %3212 = vmatpush2.bf16.msra.mxu0 %v11783_v61  ;;  %v11802_v61 = vld [vmem:[#allocation6 + $0x2e8] ss:$12 sps:$4 sm:$0xff]  }
 0x3fe   :  { %3280 = vmatpush1.bf16.msra.mxu1 %v11786_v7  ;;  %8241 = vmatprep.subr.bf16.mxu0 %v11789_v41  ;;  %13488 = vst [vmem:[#allocation58_spill] sm:$0xff] %v11802_v61  ;;  %v11807_v41 = vld [vmem:[#allocation6 + $0x2d8] ss:$12 sps:$4 sm:$0xff]  }
 0x3ff   :  { %3281 = vmatprep.subr.bf16.mxu1 %v11792_v15  ;;  %13489 = vst [vmem:[#allocation59_spill] sm:$0xff] %v11807_v41  ;;  %v11810_v15 = vld [vmem:[#allocation6 + $0x2d4] ss:$12 sps:$4 sm:$0xff]  }
 0x400   :  { %v11795_v44 = vpop.f32.mrf.mxu0  ;;  %3214 = vmatmul.mubr.bf16.vlgmr.msra.gmra.mxu0 %v11603_v21  ;;  %13490 = vst [vmem:[#allocation60_spill] sm:$0xff] %v11810_v15 }
 0x401   :  { %8242 = vmatpush3.bf16.msra.mxu0 %v11798_v48  ;;  %3338 = vmatprep.mubr.bf16.mxu0 %v11693_v22  ;;  %v11816_v48 = vld [vmem:[#allocation6 + $0x2d0] ss:$12 sps:$4 sm:$0xff]  }
 0x402   :  { %3282 = vmatpush2.bf16.msra.mxu1 %v11802_v61  ;;  %v11805_v7 = vpop.f32.mrf.mxu0  ;;  %8243 = vmatprep.subr.bf16.mxu0 %v11807_v41  ;;  %13492 = vst [vmem:[#allocation62_spill] sm:$0xff] %v11816_v48  ;;  %v11825_v41 = vld [vmem:[#allocation6 + $0x200] ss:$12 sps:$4 sm:$0xff]  }
 0x403   :  { %3283 = vmatprep.subr.bf16.mxu1 %v11810_v15  ;;  %13495 = vst [vmem:[#allocation65_spill] sm:$0xff] %v11825_v41  ;;  %v11877_v15 = vld [vmem:[#allocation6 + $0x258] ss:$12 sps:$4 sm:$0xff]  }
 0x404   :  { %v2871_v21 = vpop.f32.mrf.mxu0 }
 0x405   :  { %8244 = vmatpush3.bf16.msra.mxu0 %v11813_v33  ;;  %v11828_v21 = vld [vmem:[#allocation6 + $0x2b8] ss:$12 sps:$4 sm:$0xff]   ;;  %v11831_v33 = vld [vmem:[#allocation6 + $0x2a8] ss:$12 sps:$4 sm:$0xff]  }
 0x406   :  { %3284 = vmatpush2.bf16.msra.mxu1 %v11816_v48  ;;  %v2872_v61 = vpop.f32.mrf.mxu0  ;;  %8245 = vmatprep.subr.bf16.mxu0 %v11819_v5  ;;  %13496 = vst [vmem:[#allocation67_spill] sm:$0xff] %v11828_v21  ;;  %13497 = vst [vmem:[#allocation69_spill] sm:$0xff] %v11831_v33  ;;  %v11837_v5 = vld [vmem:[#allocation6 + $0x1e8] ss:$12 sps:$4 sm:$0xff]  }
 0x407   :  { %3285 = vmatprep.subr.bf16.mxu1 %v11822_v8  ;;  %v11834_v61 = vld [vmem:[#allocation6 + $0x2a4] ss:$12 sps:$4 sm:$0xff]   ;;  %13499 = vst [vmem:[#allocation71_spill] sm:$0xff] %v11837_v5  ;;  %v11840_v8 = vld [vmem:[#allocation6 + $0x2a0] ss:$12 sps:$4 sm:$0xff]  }
 0x408   :  { %13498 = vst [vmem:[#allocation70_spill] sm:$0xff] %v11834_v61  ;;  %13500 = vst [vmem:[#allocation72_spill] sm:$0xff] %v11840_v8 }
 0x409   :  { %8246 = vmatpush3.bf16.msra.mxu0 %v11825_v41  ;;  %v11843_v41 = vld [vmem:[#allocation6 + $0x290] ss:$12 sps:$4 sm:$0xff]  }
 0x40a   :  { %3286 = vmatpush2.bf16.msra.mxu1 %v11828_v21  ;;  %8247 = vmatprep.subr.bf16.mxu0 %v11831_v33  ;;  %13501 = vst [vmem:[#allocation73_spill] sm:$0xff] %v11843_v41  ;;  %v11846_v21 = vld [vmem:[#allocation6 + $0x28c] ss:$12 sps:$4 sm:$0xff]   ;;  %v11849_v33 = vld [vmem:[#allocation6 + $0x1d0] ss:$12 sps:$4 sm:$0xff]  }
 0x40b   :  { %3287 = vmatprep.subr.bf16.mxu1 %v11834_v61  ;;  %13502 = vst [vmem:[#allocation74_spill] sm:$0xff] %v11846_v21  ;;  %13503 = vst [vmem:[#allocation75_spill] sm:$0xff] %v11849_v33  ;;  %v11852_v61 = vld [vmem:[#allocation6 + $0x288] ss:$12 sps:$4 sm:$0xff]  }
 0x40c   :  { %13504 = vst [vmem:[#allocation76_spill] sm:$0xff] %v11852_v61 }
 0x40d   :  { %8248 = vmatpush3.bf16.msra.mxu0 %v11837_v5  ;;  %v11855_v5 = vld [vmem:[#allocation6 + $0x278] ss:$12 sps:$4 sm:$0xff]  }
 0x40e   :  { %3288 = vmatpush2.bf16.msra.mxu1 %v11840_v8  ;;  %8249 = vmatprep.subr.bf16.mxu0 %v11843_v41  ;;  %13505 = vst [vmem:[#allocation77_spill] sm:$0xff] %v11855_v5  ;;  %v11858_v8 = vld [vmem:[#allocation6 + $0x274] ss:$12 sps:$4 sm:$0xff]   ;;  %v11861_v41 = vld [vmem:[#allocation6 + $0x1b8] ss:$12 sps:$4 sm:$0xff]  }
 0x40f   :  { %3289 = vmatprep.subr.bf16.mxu1 %v11846_v21  ;;  %13506 = vst [vmem:[#allocation78_spill] sm:$0xff] %v11858_v8  ;;  %13507 = vst [vmem:[#allocation79_spill] sm:$0xff] %v11861_v41  ;;  %v11864_v21 = vld [vmem:[#allocation6 + $0x270] ss:$12 sps:$4 sm:$0xff]  }
 0x410   :  { %13508 = vst [vmem:[#allocation80_spill] sm:$0xff] %v11864_v21 }
 0x411   :  { %8250 = vmatpush3.bf16.msra.mxu0 %v11849_v33  ;;  %v11867_v33 = vld [vmem:[#allocation6 + $0x260] ss:$12 sps:$4 sm:$0xff]  }
 0x412   :  { %3290 = vmatpush2.bf16.msra.mxu1 %v11852_v61  ;;  %8251 = vmatprep.subr.bf16.mxu0 %v11855_v5  ;;  %13509 = vst [vmem:[#allocation81_spill] sm:$0xff] %v11867_v33  ;;  %v11870_v61 = vld [vmem:[#allocation6 + $0x25c] ss:$12 sps:$4 sm:$0xff]   ;;  %v11873_v5 = vld [vmem:[#allocation6 + $0x1a0] ss:$12 sps:$4 sm:$0xff]  }
 0x413   :  { %3291 = vmatprep.subr.bf16.mxu1 %v11858_v8  ;;  %13510 = vst [vmem:[#allocation82_spill] sm:$0xff] %v11870_v61  ;;  %13511 = vst [vmem:[#allocation83_spill] sm:$0xff] %v11873_v5  ;;  %v13512_v8 = vld [vmem:[#allocation90_spill] sm:$0xff] }
 0x414   :  { %v1643_v48 = vmax.f32 %v13512_v8, 0.0  ;;  %v2914_v8 = vadd.f32 %v11795_v44, %v13463_v28 }
 0x415   :  { %8252 = vmatpush3.bf16.msra.mxu0 %v11861_v41  ;;  %v11880_v41 = vld [vmem:[#allocation6 + $0x248] ss:$12 sps:$4 sm:$0xff]  }
 0x416   :  { %3292 = vmatpush2.bf16.msra.mxu1 %v11864_v21  ;;  %8253 = vmatprep.subr.bf16.mxu0 %v11867_v33  ;;  %13513 = vst [vmem:[#allocation84_spill] sm:$0xff] %v11880_v41  ;;  %v11883_v21 = vld [vmem:[#allocation6 + $0x244] ss:$12 sps:$4 sm:$0xff]   ;;  %v11886_v33 = vld [vmem:[#allocation6 + $0x188] ss:$12 sps:$4 sm:$0xff]  }
 0x417   :  { %3293 = vmatprep.subr.bf16.mxu1 %v11870_v61  ;;  %13514 = vst [vmem:[#allocation85_spill] sm:$0xff] %v11883_v21  ;;  %13515 = vst [vmem:[#allocation66_spill] sm:$0xff] %v11886_v33  ;;  %v11889_v61 = vpack.c.bf16 %v1643_v48, %v1643_v48  ;;  %v2915_v48 = vadd.f32 %v11805_v7, %v13464_v39 }
 0x419   :  { %8254 = vmatpush3.bf16.msra.mxu0 %v11873_v5  ;;  %v11891_v5 = vld [vmem:[#allocation6 + $0x240] ss:$12 sps:$4 sm:$0xff]  }
 0x41a   :  { %3294 = vmatpush2.bf16.msra.mxu1 %v11877_v15  ;;  %8255 = vmatprep.subr.bf16.mxu0 %v11880_v41  ;;  %13516 = vst [vmem:[#allocation86_spill] sm:$0xff] %v11891_v5 }
 0x41b   :  { %3295 = vmatprep.subr.bf16.mxu1 %v11883_v21 }
 0x41d   :  { %8256 = vmatpush3.bf16.msra.mxu0 %v11886_v33 }
 0x41e   :  { %3296 = vmatpush2.bf16.msra.mxu1 %v11891_v5  ;;  %3355 = vmatprep.subr.bf16.mxu0 %v13461_v13 }
 0x41f   :  { %8263 = vmatprep.subr.bf16.mxu1 %v13462_v27  ;;  %v2916_v27 = vadd.f32 %v11709_v30, %v11455_v17  ;;  %v13544_v30 = vld [vmem:[#allocation63_spill] sm:$0xff] }
 0x420   :  { %v8169_v41 = vpop.f32.mrf.mxu0  ;;  %3339 = vmatmul.mubr.bf16.vlgmr.msra.gmra.mxu0 %v11889_v61 }
 0x421   :  { %v2951_v21 = vpop.f32.mrf.mxu1  ;;  %3298 = vmatmul.mubr.bf16.vlgmr.msra.gmra.mxu1 %v11889_v61  ;;  %3356 = vmatpush1.bf16.msra.mxu0 %v11463_v0 }
 0x422   :  { %v11903_v33 = vadd.f32 %v2951_v21, %v2914_v8  ;;  %3387 = vmatprep.mubr.bf16.mxu0 %v11693_v22  ;;  %8264 = vmatpush3.bf16.msra.mxu1 %v13466_v16  ;;  %v8170_v13 = vpop.f32.mrf.mxu0  ;;  %v13559_v8 = vld [vmem:[#allocation80_spill] sm:$0xff] }
 0x423   :  { %3428 = vmatprep.mubr.bf16.mxu1 %v11693_v22  ;;  %v2953_v44 = vpop.f32.mrf.mxu1  ;;  %v8171_v28 = vadd.f32 %v8170_v13, %v8169_v41  ;;  %3357 = vmatprep.subr.bf16.mxu0 %v11476_v12  ;;  %v13520_v12 = vld [vmem:[#allocation31_spill] sm:$0xff]  ;;  %v13557_v41 = vld [vmem:[#allocation78_spill] sm:$0xff] }
 0x424   :  { %13517 = vst [vmem:[#allocation87_spill] sm:$0xff] %v11903_v33  ;;  %v11911_v0 = vadd.f32 %v2953_v44, %v2915_v48  ;;  %v8172_v5 = vpop.f32.mrf.mxu0  ;;  %8265 = vmatprep.subr.bf16.mxu1 %v11481_v52  ;;  %v13560_v48 = vld [vmem:[#allocation81_spill] sm:$0xff]  ;;  %v13561_v13 = vld [vmem:[#allocation82_spill] sm:$0xff] }
 0x425   :  { %v11914_v7 = vadd.f32 %v8171_v28, %v2916_v27  ;;  %v2955_v21 = vpop.f32.mrf.mxu1  ;;  %3358 = vmatpush1.bf16.msra.mxu0 %v11486_v4  ;;  %v1824_v4 = vmax.f32 %v13520_v12, 0.0  ;;  %v13524_v28 = vld [vmem:[#allocation45_spill] sm:$0xff]  ;;  %v13562_v27 = vld [vmem:[#allocation83_spill] sm:$0xff]  ;;  %v13563_v44 = vld [vmem:[#allocation30_spill] sm:$0xff] }
 0x426   :  { %13518 = vst [vmem:[#allocation88_spill] sm:$0xff] %v11911_v0  ;;  %8266 = vmatpush3.bf16.msra.mxu1 %v11489_v40  ;;  %v8173_v16 = vpop.f32.mrf.mxu0  ;;  %3359 = vmatprep.subr.bf16.mxu0 %v11492_v11  ;;  %v13556_v5 = vld [vmem:[#allocation77_spill] sm:$0xff]  ;;  %v1823_v21 = vmax.f32 %v13563_v44, 0.0  ;;  %v12120_v44 = vld [vmem:[#allocation9 + $0x16c] ss:$12 sps:$4 sm:$0xff]  }
 0x427   :  { %13519 = vst [vmem:[#allocation89_spill] sm:$0xff] %v11914_v7  ;;  %v2956_v22 = vpop.f32.mrf.mxu1  ;;  %8267 = vmatprep.subr.bf16.mxu1 %v11495_v10  ;;  %v1826_v52 = vpack.c.bf16 %v1824_v4, %v1824_v4  ;;  %v13564_v16 = vld [vmem:[#allocation84_spill] sm:$0xff]  ;;  %v13565_v12 = vld [vmem:[#allocation85_spill] sm:$0xff]  ;;  %v12197_v33 = vld [vmem:[#allocation9 + $0x38] ss:$12 sps:$4 sm:$0xff]  }
 0x428   :  { %v12009_v22 = vld [vmem:[#allocation9 + $0xac] ss:$12 sps:$4 sm:$0xff]   ;;  %v12199_v7 = vld [vmem:[#allocation9 + $0xdc] ss:$12 sps:$4 sm:$0xff]  }
 0x429   :  { %3360 = vmatpush1.bf16.msra.mxu0 %v11498_v49  ;;  %v12012_v4 = vld [vmem:[#allocation9 + $0x22c] ss:$12 sps:$4 sm:$0xff]  }
 0x42a   :  { %8268 = vmatpush3.bf16.msra.mxu1 %v11501_v63  ;;  %3361 = vmatprep.subr.bf16.mxu0 %v11504_v46  ;;  %v13521_v46 = vld [vmem:[#allocation35_spill] sm:$0xff] }
 0x42b   :  { %8269 = vmatprep.subr.bf16.mxu1 %v11507_v54  ;;  %v13522_v54 = vld [vmem:[#allocation26_spill] sm:$0xff]  ;;  %v12202_v0 = vld [vmem:[#allocation9 + $0xe0] ss:$12 sps:$4 sm:$0xff]  }
 0x42d   :  { %3362 = vmatpush1.bf16.msra.mxu0 %v11510_v35  ;;  %v13523_v35 = vld [vmem:[#allocation44_spill] sm:$0xff] }
 0x42e   :  { %8270 = vmatpush3.bf16.msra.mxu1 %v11635_v29  ;;  %3363 = vmatprep.subr.bf16.mxu0 %v11638_v59  ;;  %v13525_v29 = vld [vmem:[#allocation46_spill] sm:$0xff]  ;;  %v13526_v59 = vld [vmem:[#allocation49_spill] sm:$0xff] }
 0x42f   :  { %8271 = vmatprep.subr.bf16.mxu1 %v11641_v62  ;;  %v13527_v62 = vld [vmem:[#allocation50_spill] sm:$0xff] }
 0x431   :  { %3364 = vmatpush1.bf16.msra.mxu0 %v11644_v19  ;;  %v13528_v19 = vld [vmem:[#allocation51_spill] sm:$0xff] }
 0x432   :  { %8272 = vmatpush3.bf16.msra.mxu1 %v11647_v26  ;;  %3365 = vmatprep.subr.bf16.mxu0 %v11650_v2  ;;  %v13529_v26 = vld [vmem:[#allocation52_spill] sm:$0xff]  ;;  %v13530_v2 = vld [vmem:[#allocation54_spill] sm:$0xff] }
 0x433   :  { %8273 = vmatprep.subr.bf16.mxu1 %v11653_v23  ;;  %v13531_v23 = vld [vmem:[#allocation56_spill] sm:$0xff] }
 0x435   :  { %3366 = vmatpush1.bf16.msra.mxu0 %v11656_v60  ;;  %v13532_v60 = vld [vmem:[#allocation57_spill] sm:$0xff] }
 0x436   :  { %8274 = vmatpush3.bf16.msra.mxu1 %v11659_v47  ;;  %3367 = vmatprep.subr.bf16.mxu0 %v11662_v24  ;;  %v13533_v47 = vld [vmem:[#allocation38_spill] sm:$0xff]  ;;  %v13534_v24 = vld [vmem:[#allocation68_spill] sm:$0xff] }
 0x437   :  { %8275 = vmatprep.subr.bf16.mxu1 %v11665_v31  ;;  %v13535_v31 = vld [vmem:[#allocation47_spill] sm:$0xff] }
 0x439   :  { %3368 = vmatpush1.bf16.msra.mxu0 %v11668_v38  ;;  %v13536_v38 = vld [vmem:[#allocation48_spill] sm:$0xff] }
 0x43a   :  { %8276 = vmatpush3.bf16.msra.mxu1 %v11671_v50  ;;  %3369 = vmatprep.subr.bf16.mxu0 %v11674_v58  ;;  %v13537_v50 = vld [vmem:[#allocation53_spill] sm:$0xff] }
 0x43b   :  { %8277 = vmatprep.subr.bf16.mxu1 %v11677_v25  ;;  %v13538_v25 = vld [vmem:[#allocation55_spill] sm:$0xff] }
 0x43d   :  { %3370 = vmatpush1.bf16.msra.mxu0 %v11681_v32  ;;  %v13539_v32 = vld [vmem:[#allocation58_spill] sm:$0xff] }
 0x43e   :  { %8278 = vmatpush3.bf16.msra.mxu1 %v11684_v1  ;;  %3371 = vmatprep.subr.bf16.mxu0 %v11687_v56  ;;  %v13540_v56 = vld [vmem:[#allocation59_spill] sm:$0xff] }
 0x43f   :  { %3439 = vmatprep.subr.bf16.mxu1 %v11690_v34  ;;  %v13541_v34 = vld [vmem:[#allocation60_spill] sm:$0xff] }
 0x440   :  { %13599 = vst [vmem:[#allocation60_spill] sm:$0xff] %v12120_v44 }
 0x441   :  { %v8191_v40 = vpop.f32.mrf.mxu1  ;;  %3429 = vmatmul.mubr.bf16.vlgmr.msra.gmra.mxu1 %v11889_v61  ;;  %3372 = vmatpush2.bf16.msra.mxu0 %v11696_v9 }
 0x442   :  { %3440 = vmatpush1.bf16.msra.mxu1 %v11699_v42  ;;  %3471 = vmatprep.mubr.bf16.mxu1 %v1826_v52  ;;  %v13542_v42 = vld [vmem:[#allocation61_spill] sm:$0xff] }
 0x443   :  { %v8192_v11 = vpop.f32.mrf.mxu1  ;;  %3373 = vmatprep.subr.bf16.mxu0 %v11703_v36  ;;  %3441 = vmatprep.subr.bf16.mxu1 %v11706_v6  ;;  %v13543_v36 = vld [vmem:[#allocation62_spill] sm:$0xff] }
 0x444   :  { %v11950_v10 = vadd.f32 %v8192_v11, %v8191_v40  ;;  %v13567_v11 = vld [vmem:[#allocation66_spill] sm:$0xff] }
 0x445   :  { %v8194_v49 = vpop.f32.mrf.mxu1  ;;  %3374 = vmatpush2.bf16.msra.mxu0 %v11711_v37  ;;  %v13545_v37 = vld [vmem:[#allocation64_spill] sm:$0xff] }
 0x446   :  { %3442 = vmatpush1.bf16.msra.mxu1 %v11714_v14  ;;  %3375 = vmatprep.subr.bf16.mxu0 %v11717_v18  ;;  %v13546_v14 = vld [vmem:[#allocation65_spill] sm:$0xff]  ;;  %v13547_v18 = vld [vmem:[#allocation67_spill] sm:$0xff] }
 0x447   :  { %v8195_v63 = vpop.f32.mrf.mxu1  ;;  %3443 = vmatprep.subr.bf16.mxu1 %v11720_v43  ;;  %v13548_v43 = vld [vmem:[#allocation69_spill] sm:$0xff] }
 0x448   :  { %v12016_v49 = vld [vmem:[#allocation9 + $0xa8] ss:$12 sps:$4 sm:$0xff]   ;;  %v1825_v63 = vpack.c.bf16 %v1823_v21, %v1823_v21  ;;  %v13600_v21 = vld [vmem:[#allocation27_spill] sm:$0xff] }
 0x449   :  { %3376 = vmatpush2.bf16.msra.mxu0 %v11723_v45  ;;  %v13549_v45 = vld [vmem:[#allocation70_spill] sm:$0xff]  ;;  %13568 = vst [vmem:[#allocation25_spill] sm:$0xff] %v12016_v49 }
 0x44a   :  { %3444 = vmatpush1.bf16.msra.mxu1 %v11726_v51  ;;  %3377 = vmatprep.subr.bf16.mxu0 %v11729_v53  ;;  %v13550_v51 = vld [vmem:[#allocation71_spill] sm:$0xff]  ;;  %v13551_v53 = vld [vmem:[#allocation72_spill] sm:$0xff] }
 0x44b   :  { %3445 = vmatprep.subr.bf16.mxu1 %v11732_v55  ;;  %v13552_v55 = vld [vmem:[#allocation73_spill] sm:$0xff] }
 0x44d   :  { %3378 = vmatpush2.bf16.msra.mxu0 %v11735_v20  ;;  %v13553_v20 = vld [vmem:[#allocation74_spill] sm:$0xff] }
 0x44e   :  { %3446 = vmatpush1.bf16.msra.mxu1 %v11738_v3  ;;  %3379 = vmatprep.subr.bf16.mxu0 %v11741_v57  ;;  %v13554_v3 = vld [vmem:[#allocation75_spill] sm:$0xff]  ;;  %v13555_v57 = vld [vmem:[#allocation76_spill] sm:$0xff] }
 0x44f   :  { %3447 = vmatprep.subr.bf16.mxu1 %v13521_v46  ;;  %v13569_v46 = vld [vmem:[#allocation86_spill] sm:$0xff]  ;;  %13613 = vst [vmem:[#allocation75_spill] sm:$0xff] %v12197_v33  ;;  %13614 = vst [vmem:[#allocation76_spill] sm:$0xff] %v12202_v0 }
 0x451   :  { %3380 = vmatpush2.bf16.msra.mxu0 %v13522_v54  ;;  %v12023_v54 = vld [vmem:[#allocation9 + $0x94] ss:$12 sps:$4 sm:$0xff]  }
 0x452   :  { %3448 = vmatpush1.bf16.msra.mxu1 %v13523_v35  ;;  %3381 = vmatprep.subr.bf16.mxu0 %v13524_v28  ;;  %v12025_v35 = vld [vmem:[#allocation9 + $0x214] ss:$12 sps:$4 sm:$0xff]  }
 0x453   :  { %3449 = vmatprep.subr.bf16.mxu1 %v13525_v29  ;;  %13571 = vst [vmem:[#allocation39_spill] sm:$0xff] %v12025_v35  ;;  %v13572_v29 = vld [vmem:[#allocation32_spill] sm:$0xff] }
 0x455   :  { %3382 = vmatpush2.bf16.msra.mxu0 %v13526_v59 }
 0x456   :  { %3450 = vmatpush1.bf16.msra.mxu1 %v13527_v62  ;;  %3383 = vmatprep.subr.bf16.mxu0 %v13528_v19 }
 0x457   :  { %3451 = vmatprep.subr.bf16.mxu1 %v13529_v26  ;;  %v12031_v26 = vld [vmem:[#allocation9 + $0x90] ss:$12 sps:$4 sm:$0xff]  }
 0x459   :  { %3384 = vmatpush2.bf16.msra.mxu0 %v13530_v2 }
 0x45a   :  { %3452 = vmatpush1.bf16.msra.mxu1 %v13531_v23  ;;  %3385 = vmatprep.subr.bf16.mxu0 %v13532_v60 }
 0x45b   :  { %3453 = vmatprep.subr.bf16.mxu1 %v13533_v47  ;;  %v12038_v47 = vld [vmem:[#allocation9 + $0x210] ss:$12 sps:$4 sm:$0xff]  }
 0x45c   :  { %13574 = vst [vmem:[#allocation37_spill] sm:$0xff] %v12038_v47 }
 0x45d   :  { %3386 = vmatpush2.bf16.msra.mxu0 %v13534_v24  ;;  %v12040_v24 = vld [vmem:[#allocation9 + $0x7c] ss:$12 sps:$4 sm:$0xff]  }
 0x45e   :  { %3454 = vmatpush1.bf16.msra.mxu1 %v13535_v31  ;;  %8285 = vmatprep.subr.bf16.mxu0 %v13536_v38  ;;  %v3090_v31 = vadd.f32 %v11950_v10, %v11455_v17 }
 0x45f   :  { %3455 = vmatprep.subr.bf16.mxu1 %v13537_v50 }
 0x460   :  { %v3041_v58 = vpop.f32.mrf.mxu0  ;;  %3388 = vmatmul.mubr.bf16.vlgmr.msra.gmra.mxu0 %v11889_v61  ;;  %v13558_v61 = vld [vmem:[#allocation79_spill] sm:$0xff] }
 0x461   :  { %8286 = vmatpush3.bf16.msra.mxu0 %v13538_v25  ;;  %3512 = vmatprep.mubr.bf16.mxu0 %v1826_v52  ;;  %v13566_v52 = vld [vmem:[#allocation24_spill] sm:$0xff]  ;;  %v3088_v59 = vadd.f32 %v3041_v58, %v13572_v29 }
 0x462   :  { %3456 = vmatpush2.bf16.msra.mxu1 %v13539_v32  ;;  %v3043_v1 = vpop.f32.mrf.mxu0  ;;  %8287 = vmatprep.subr.bf16.mxu0 %v13540_v56  ;;  %v2654_v40 = vmax.f32 %v13566_v52, 0.0  ;;  %v12046_v58 = vld [vmem:[#allocation9 + $0x1fc] ss:$12 sps:$4 sm:$0xff]  }
 0x463   :  { %3457 = vmatprep.subr.bf16.mxu1 %v13541_v34  ;;  %v3089_v2 = vadd.f32 %v3043_v1, %v13464_v39  ;;  %13575 = vst [vmem:[#allocation91_spill] sm:$0xff] %v12046_v58  ;;  %v13577_v1 = vmov 0   ;;  %v12127_v52 = vld [vmem:[#allocation9 + $0x168] ss:$12 sps:$4 sm:$0xff]  }
 0x464   :  { %v3045_v9 = vpop.f32.mrf.mxu0  ;;  %v12027_v28 = vpack.c.bf16 %v2654_v40, %v2654_v40  ;;  %13602 = vst [vmem:[#allocation62_spill] sm:$0xff] %v12127_v52  ;;  %v12131_v40 = vld [vmem:[#allocation9 + $0xb0] ss:$12 sps:$4 sm:$0xff]  }
 0x465   :  { %8288 = vmatpush3.bf16.msra.mxu0 %v13542_v42  ;;  %v12054_v9 = vld [vmem:[#allocation9 + $0x78] ss:$12 sps:$4 sm:$0xff]   ;;  %13603 = vst [vmem:[#allocation63_spill] sm:$0xff] %v12131_v40 }
 0x466   :  { %3458 = vmatpush2.bf16.msra.mxu1 %v13543_v36  ;;  %v3046_v6 = vpop.f32.mrf.mxu0  ;;  %8289 = vmatprep.subr.bf16.mxu0 %v13544_v30  ;;  %v12058_v42 = vld [vmem:[#allocation9 + $0x1f8] ss:$12 sps:$4 sm:$0xff]  }
 0x467   :  { %3459 = vmatprep.subr.bf16.mxu1 %v13545_v37  ;;  %13579 = vst [vmem:[#allocation35_spill] sm:$0xff] %v12058_v42  ;;  %v12060_v36 = vld [vmem:[#allocation9 + $0x64] ss:$12 sps:$4 sm:$0xff]   ;;  %v12066_v37 = vld [vmem:[#allocation9 + $0x60] ss:$12 sps:$4 sm:$0xff]  }
 0x468   :  { %13580 = vst [vmem:[#allocation26_spill] sm:$0xff] %v12060_v36  ;;  %v12063_v30 = vld [vmem:[#allocation9 + $0x1e4] ss:$12 sps:$4 sm:$0xff]  }
 0x469   :  { %8290 = vmatpush3.bf16.msra.mxu0 %v13546_v14  ;;  %13581 = vst [vmem:[#allocation44_spill] sm:$0xff] %v12063_v30  ;;  %v12070_v14 = vld [vmem:[#allocation9 + $0x1e0] ss:$12 sps:$4 sm:$0xff]  }
 0x46a   :  { %3460 = vmatpush2.bf16.msra.mxu1 %v13547_v18  ;;  %8291 = vmatprep.subr.bf16.mxu0 %v13548_v43  ;;  %13582 = vst [vmem:[#allocation45_spill] sm:$0xff] %v12070_v14  ;;  %v12072_v18 = vld [vmem:[#allocation9 + $0x4c] ss:$12 sps:$4 sm:$0xff]  }
 0x46b   :  { %3461 = vmatprep.subr.bf16.mxu1 %v13549_v45  ;;  %13583 = vst [vmem:[#allocation46_spill] sm:$0xff] %v12072_v18  ;;  %v12075_v43 = vld [vmem:[#allocation9 + $0x1cc] ss:$12 sps:$4 sm:$0xff]   ;;  %v12078_v45 = vld [vmem:[#allocation9 + $0x48] ss:$12 sps:$4 sm:$0xff]  }
 0x46c   :  { %13584 = vst [vmem:[#allocation49_spill] sm:$0xff] %v12075_v43  ;;  %13585 = vst [vmem:[#allocation50_spill] sm:$0xff] %v12078_v45 }
 0x46d   :  { %8292 = vmatpush3.bf16.msra.mxu0 %v13550_v51  ;;  %v12082_v51 = vld [vmem:[#allocation9 + $0x1c8] ss:$12 sps:$4 sm:$0xff]  }
 0x46e   :  { %3462 = vmatpush2.bf16.msra.mxu1 %v13551_v53  ;;  %8293 = vmatprep.subr.bf16.mxu0 %v13552_v55  ;;  %13586 = vst [vmem:[#allocation51_spill] sm:$0xff] %v12082_v51  ;;  %v12084_v53 = vld [vmem:[#allocation9 + $0x34] ss:$12 sps:$4 sm:$0xff]  }
 0x46f   :  { %3463 = vmatprep.subr.bf16.mxu1 %v13553_v20  ;;  %13587 = vst [vmem:[#allocation52_spill] sm:$0xff] %v12084_v53  ;;  %v12087_v55 = vld [vmem:[#allocation9 + $0x1b4] ss:$12 sps:$4 sm:$0xff]   ;;  %v12090_v20 = vld [vmem:[#allocation9 + $0x30] ss:$12 sps:$4 sm:$0xff]  }
 0x470   :  { %13588 = vst [vmem:[#allocation54_spill] sm:$0xff] %v12087_v55  ;;  %13589 = vst [vmem:[#allocation56_spill] sm:$0xff] %v12090_v20 }
 0x471   :  { %8294 = vmatpush3.bf16.msra.mxu0 %v13554_v3  ;;  %v12094_v3 = vld [vmem:[#allocation9 + $0x1b0] ss:$12 sps:$4 sm:$0xff]  }
 0x472   :  { %3464 = vmatpush2.bf16.msra.mxu1 %v13555_v57  ;;  %8295 = vmatprep.subr.bf16.mxu0 %v13556_v5  ;;  %13590 = vst [vmem:[#allocation57_spill] sm:$0xff] %v12094_v3  ;;  %v12096_v57 = vld [vmem:[#allocation9 + $0x1c] ss:$12 sps:$4 sm:$0xff]  }
 0x473   :  { %3465 = vmatprep.subr.bf16.mxu1 %v13557_v41  ;;  %13591 = vst [vmem:[#allocation38_spill] sm:$0xff] %v12096_v57  ;;  %v12099_v5 = vld [vmem:[#allocation9 + $0x19c] ss:$12 sps:$4 sm:$0xff]   ;;  %v12102_v41 = vld [vmem:[#allocation9 + $0x18] ss:$12 sps:$4 sm:$0xff]  }
 0x474   :  { %13592 = vst [vmem:[#allocation68_spill] sm:$0xff] %v12099_v5  ;;  %13593 = vst [vmem:[#allocation47_spill] sm:$0xff] %v12102_v41 }
 0x475   :  { %8296 = vmatpush3.bf16.msra.mxu0 %v13558_v61  ;;  %v12106_v61 = vld [vmem:[#allocation9 + $0x198] ss:$12 sps:$4 sm:$0xff]  }
 0x476   :  { %3466 = vmatpush2.bf16.msra.mxu1 %v13559_v8  ;;  %8297 = vmatprep.subr.bf16.mxu0 %v13560_v48  ;;  %13594 = vst [vmem:[#allocation48_spill] sm:$0xff] %v12106_v61  ;;  %v12108_v8 = vld [vmem:[#allocation9 + $0x4] ss:$12 sps:$4 sm:$0xff]  }
 0x477   :  { %3467 = vmatprep.subr.bf16.mxu1 %v13561_v13  ;;  %13595 = vst [vmem:[#allocation53_spill] sm:$0xff] %v12108_v8  ;;  %v12111_v48 = vld [vmem:[#allocation9 + $0x184] ss:$12 sps:$4 sm:$0xff]   ;;  %v12114_v13 = vld [vmem:[#allocation9] ss:$12 sps:$4 sm:$0xff]  }
 0x478   :  { %13596 = vst [vmem:[#allocation55_spill] sm:$0xff] %v12111_v48  ;;  %13597 = vst [vmem:[#allocation58_spill] sm:$0xff] %v12114_v13 }
 0x479   :  { %8298 = vmatpush3.bf16.msra.mxu0 %v13562_v27  ;;  %v12118_v27 = vld [vmem:[#allocation9 + $0x180] ss:$12 sps:$4 sm:$0xff]  }
 0x47a   :  { %3468 = vmatpush2.bf16.msra.mxu1 %v11877_v15  ;;  %8299 = vmatprep.subr.bf16.mxu0 %v13564_v16  ;;  %v12020_v15 = vld [vmem:[#allocation9 + $0x228] ss:$12 sps:$4 sm:$0xff]   ;;  %13598 = vst [vmem:[#allocation59_spill] sm:$0xff] %v12118_v27  ;;  %v2655_v16 = vmax.f32 %v13600_v21, 0.0  ;;  %v12169_v21 = vld [vmem:[#allocation9 + $0x120] ss:$12 sps:$4 sm:$0xff]  }
 0x47b   :  { %3469 = vmatprep.subr.bf16.mxu1 %v13565_v12  ;;  %13570 = vst [vmem:[#allocation34_spill] sm:$0xff] %v12020_v15  ;;  %v12124_v12 = vld [vmem:[#allocation9 + $0x170] ss:$12 sps:$4 sm:$0xff]  }
 0x47c   :  { %13601 = vst [vmem:[#allocation61_spill] sm:$0xff] %v12124_v12 }
 0x47d   :  { %8300 = vmatpush3.bf16.msra.mxu0 %v13567_v11  ;;  %v12133_v11 = vpack.c.bf16 %v2655_v16, %v2655_v16  ;;  %v12173_v16 = vld [vmem:[#allocation9 + $0x68] ss:$12 sps:$4 sm:$0xff]  }
 0x47e   :  { %3470 = vmatpush2.bf16.msra.mxu1 %v13569_v46  ;;  %4026 = vmatprep.subr.bf16.mxu0 %v12009_v22  ;;  %v12138_v46 = vld [vmem:[#allocation9 + $0x158] ss:$12 sps:$4 sm:$0xff]   ;;  %13609 = vst [vmem:[#allocation71_spill] sm:$0xff] %v12173_v16 }
 0x47f   :  { %4067 = vmatprep.subr.bf16.mxu1 %v12012_v4  ;;  %13604 = vst [vmem:[#allocation64_spill] sm:$0xff] %v12138_v46 }
 0x480   :  { %v8213_v62 = vpop.f32.mrf.mxu0  ;;  %3513 = vmatmul.mubr.bf16.vlgmr.msra.gmra.mxu0 %v1825_v63 }
 0x481   :  { %v3125_v19 = vpop.f32.mrf.mxu1  ;;  %3472 = vmatmul.mubr.bf16.vlgmr.msra.gmra.mxu1 %v1825_v63  ;;  %4027 = vmatpush1.bf16.msra.mxu0 %v12016_v49  ;;  %v12136_v63 = vld [vmem:[#allocation9 + $0x154] ss:$12 sps:$4 sm:$0xff]  }
 0x482   :  { %v12034_v23 = vadd.f32 %v3125_v19, %v3088_v59  ;;  %4058 = vmatprep.mubr.bf16.mxu0 %v12027_v28  ;;  %4068 = vmatpush1.bf16.msra.mxu1 %v12020_v15  ;;  %v8214_v60 = vpop.f32.mrf.mxu0  ;;  %v12146_v19 = vld [vmem:[#allocation9 + $0x98] ss:$12 sps:$4 sm:$0xff]  }
 0x483   :  { %v3127_v38 = vpop.f32.mrf.mxu1  ;;  %v8215_v50 = vadd.f32 %v8214_v60, %v8213_v62  ;;  %4028 = vmatprep.subr.bf16.mxu0 %v12023_v54  ;;  %4069 = vmatprep.subr.bf16.mxu1 %v12025_v35  ;;  %v12142_v62 = vld [vmem:[#allocation9 + $0x150] ss:$12 sps:$4 sm:$0xff]   ;;  %13605 = vst [vmem:[#allocation65_spill] sm:$0xff] %v12146_v19 }
 0x484   :  { %13573 = vst [vmem:[#allocation33_spill] sm:$0xff] %v12034_v23  ;;  %v12048_v25 = vadd.f32 %v3127_v38, %v3089_v2  ;;  %v8216_v32 = vpop.f32.mrf.mxu0  ;;  %4099 = vmatprep.mubr.bf16.mxu1 %v13577_v1  ;;  %v12148_v2 = vld [vmem:[#allocation9 + $0x13c] ss:$12 sps:$4 sm:$0xff]   ;;  %v12187_v23 = vld [vmem:[#allocation9 + $0xf4] ss:$12 sps:$4 sm:$0xff]  }
 0x485   :  { %v12051_v56 = vadd.f32 %v8215_v50, %v3090_v31  ;;  %v3129_v34 = vpop.f32.mrf.mxu1  ;;  %4029 = vmatpush1.bf16.msra.mxu0 %v12031_v26  ;;  %v12152_v31 = vld [vmem:[#allocation9 + $0x140] ss:$12 sps:$4 sm:$0xff]   ;;  %v12157_v32 = vld [vmem:[#allocation9 + $0x138] ss:$12 sps:$4 sm:$0xff]  }
 0x486   :  { %13576 = vst [vmem:[#allocation90_spill] sm:$0xff] %v12048_v25  ;;  %4070 = vmatpush1.bf16.msra.mxu1 %v12038_v47  ;;  %v8217_v10 = vpop.f32.mrf.mxu0  ;;  %4030 = vmatprep.subr.bf16.mxu0 %v12040_v24  ;;  %13606 = vst [vmem:[#allocation67_spill] sm:$0xff] %v12152_v31  ;;  %v12163_v34 = vld [vmem:[#allocation9 + $0x124] ss:$12 sps:$4 sm:$0xff]  }
 0x487   :  { %13578 = vst [vmem:[#allocation31_spill] sm:$0xff] %v12051_v56  ;;  %v3130_v6 = vpop.f32.mrf.mxu1  ;;  %4071 = vmatprep.subr.bf16.mxu1 %v12046_v58  ;;  %v12190_v56 = vld [vmem:[#allocation9 + $0xf8] ss:$12 sps:$4 sm:$0xff]   ;;  %v12193_v25 = vld [vmem:[#allocation9 + $0xf0] ss:$12 sps:$4 sm:$0xff]  }
 0x488   :  { %v12166_v6 = vld [vmem:[#allocation9 + $0x128] ss:$12 sps:$4 sm:$0xff]   ;;  %13612 = vst [vmem:[#allocation74_spill] sm:$0xff] %v12190_v56 }
 0x489   :  { %4031 = vmatpush1.bf16.msra.mxu0 %v12054_v9  ;;  %13608 = vst [vmem:[#allocation70_spill] sm:$0xff] %v12166_v6 }
 0x48a   :  { %4072 = vmatpush1.bf16.msra.mxu1 %v12058_v42  ;;  %4032 = vmatprep.subr.bf16.mxu0 %v12060_v36 }
 0x48b   :  { %4073 = vmatprep.subr.bf16.mxu1 %v12063_v30 }
 0x48d   :  { %4033 = vmatpush1.bf16.msra.mxu0 %v12066_v37 }
 0x48e   :  { %4074 = vmatpush1.bf16.msra.mxu1 %v12070_v14  ;;  %4034 = vmatprep.subr.bf16.mxu0 %v12072_v18 }
 0x48f   :  { %4075 = vmatprep.subr.bf16.mxu1 %v12075_v43 }
 0x491   :  { %4035 = vmatpush1.bf16.msra.mxu0 %v12078_v45 }
 0x492   :  { %4076 = vmatpush1.bf16.msra.mxu1 %v12082_v51  ;;  %4036 = vmatprep.subr.bf16.mxu0 %v12084_v53 }
 0x493   :  { %4077 = vmatprep.subr.bf16.mxu1 %v12087_v55 }
 0x495   :  { %4037 = vmatpush1.bf16.msra.mxu0 %v12090_v20 }
 0x496   :  { %4078 = vmatpush1.bf16.msra.mxu1 %v12094_v3  ;;  %4038 = vmatprep.subr.bf16.mxu0 %v12096_v57 }
 0x497   :  { %4079 = vmatprep.subr.bf16.mxu1 %v12099_v5 }
 0x499   :  { %4039 = vmatpush1.bf16.msra.mxu0 %v12102_v41 }
 0x49a   :  { %4080 = vmatpush1.bf16.msra.mxu1 %v12106_v61  ;;  %4040 = vmatprep.subr.bf16.mxu0 %v12108_v8 }
 0x49b   :  { %4081 = vmatprep.subr.bf16.mxu1 %v12111_v48 }
 0x49d   :  { %4041 = vmatpush1.bf16.msra.mxu0 %v12114_v13 }
 0x49e   :  { %4082 = vmatpush1.bf16.msra.mxu1 %v12118_v27  ;;  %4042 = vmatprep.subr.bf16.mxu0 %v12120_v44 }
 0x49f   :  { %8307 = vmatprep.subr.bf16.mxu1 %v12124_v12  ;;  %v13121_v12 = vmov 0.0  }
 0x4a1   :  { %v8235_v59 = vpop.f32.mrf.mxu1  ;;  %4100 = vmatmul.mubr.bf16.vlgmr.msra.gmra.mxu1 %v12133_v11  ;;  %4043 = vmatpush2.bf16.msra.mxu0 %v12127_v52 }
 0x4a2   :  { %8308 = vmatpush3.bf16.msra.mxu1 %v12131_v40  ;;  %4140 = vmatprep.mubr.bf16.mxu1 %v12027_v28  ;;  %v12161_v28 = vld [vmem:[#allocation9 + $0x80] ss:$12 sps:$4 sm:$0xff]  }
 0x4a3   :  { %v8236_v60 = vpop.f32.mrf.mxu1  ;;  %4044 = vmatprep.subr.bf16.mxu0 %v12136_v63  ;;  %8309 = vmatprep.subr.bf16.mxu1 %v12138_v46  ;;  %13607 = vst [vmem:[#allocation69_spill] sm:$0xff] %v12161_v28 }
 0x4a4   :  { %v12154_v38 = vadd.f32 %v8236_v60, %v8235_v59  ;;  %v12175_v59 = vld [vmem:[#allocation9 + $0x10c] ss:$12 sps:$4 sm:$0xff]   ;;  %v12178_v60 = vld [vmem:[#allocation9 + $0x110] ss:$12 sps:$4 sm:$0xff]  }
 0x4a5   :  { %v8238_v50 = vpop.f32.mrf.mxu1  ;;  %4045 = vmatpush2.bf16.msra.mxu0 %v12142_v62  ;;  %13610 = vst [vmem:[#allocation72_spill] sm:$0xff] %v12178_v60 }
 0x4a6   :  { %8310 = vmatpush3.bf16.msra.mxu1 %v12146_v19  ;;  %4046 = vmatprep.subr.bf16.mxu0 %v12148_v2  ;;  %v12181_v50 = vld [vmem:[#allocation9 + $0x108] ss:$12 sps:$4 sm:$0xff]  }
 0x4a7   :  { %v8239_v10 = vpop.f32.mrf.mxu1  ;;  %8311 = vmatprep.subr.bf16.mxu1 %v12152_v31  ;;  %v13620_v19 = vld [vmem:[#allocation29_spill] sm:$0xff] }
 0x4a8   :  { %v12185_v10 = vld [vmem:[#allocation9 + $0x50] ss:$12 sps:$4 sm:$0xff]   ;;  %v2828_v46 = vmax.f32 %v13620_v19, 0.0  ;;  %v12235_v19 = vld [vmem:[#allocation9 + $0x218] ss:$12 sps:$4 sm:$0xff]  }
 0x4a9   :  { %4047 = vmatpush2.bf16.msra.mxu0 %v12157_v32  ;;  %13611 = vst [vmem:[#allocation73_spill] sm:$0xff] %v12185_v10  ;;  %13622 = vst [vmem:[#allocation82_spill] sm:$0xff] %v12235_v19 }
 0x4aa   :  { %8312 = vmatpush3.bf16.msra.mxu1 %v12161_v28  ;;  %4048 = vmatprep.subr.bf16.mxu0 %v12163_v34  ;;  %v13618_v28 = vld [vmem:[#allocation40_spill] sm:$0xff] }
 0x4ab   :  { %8313 = vmatprep.subr.bf16.mxu1 %v12166_v6  ;;  %v12214_v6 = vld [vmem:[#allocation9 + $0xc8] ss:$12 sps:$4 sm:$0xff]   ;;  %v2653_v31 = vmax.f32 %v13618_v28, 0.0  ;;  %v12232_v28 = vpack.c.bf16 %v2828_v46, %v2828_v46 }
 0x4ad   :  { %4049 = vmatpush2.bf16.msra.mxu0 %v12169_v21  ;;  %v2656_v40 = vpack.c.bf16 %v2653_v31, %v2653_v31 }
 0x4ae   :  { %8314 = vmatpush3.bf16.msra.mxu1 %v12173_v16  ;;  %4050 = vmatprep.subr.bf16.mxu0 %v12175_v59  ;;  %v12209_v16 = vld [vmem:[#allocation9 + $0x20] ss:$12 sps:$4 sm:$0xff]  }
 0x4af   :  { %8315 = vmatprep.subr.bf16.mxu1 %v12178_v60  ;;  %v12205_v60 = vld [vmem:[#allocation9 + $0xd8] ss:$12 sps:$4 sm:$0xff]   ;;  %13615 = vst [vmem:[#allocation77_spill] sm:$0xff] %v12209_v16 }
 0x4b1   :  { %4051 = vmatpush2.bf16.msra.mxu0 %v12181_v50 }
 0x4b2   :  { %8316 = vmatpush3.bf16.msra.mxu1 %v12185_v10  ;;  %4052 = vmatprep.subr.bf16.mxu0 %v12187_v23  ;;  %v12211_v10 = vld [vmem:[#allocation9 + $0xc4] ss:$12 sps:$4 sm:$0xff]  }
 0x4b3   :  { %8317 = vmatprep.subr.bf16.mxu1 %v12190_v56  ;;  %13616 = vst [vmem:[#allocation78_spill] sm:$0xff] %v12211_v10  ;;  %v12217_v56 = vld [vmem:[#allocation9 + $0xc0] ss:$12 sps:$4 sm:$0xff]  }
 0x4b4   :  { %13617 = vst [vmem:[#allocation79_spill] sm:$0xff] %v12217_v56 }
 0x4b5   :  { %4053 = vmatpush2.bf16.msra.mxu0 %v12193_v25 }
 0x4b6   :  { %8318 = vmatpush3.bf16.msra.mxu1 %v12197_v33  ;;  %4054 = vmatprep.subr.bf16.mxu0 %v12199_v7  ;;  %v12222_v33 = vld [vmem:[#allocation9 + $0x8] ss:$12 sps:$4 sm:$0xff]  }
 0x4b7   :  { %8319 = vmatprep.subr.bf16.mxu1 %v12202_v0  ;;  %13619 = vst [vmem:[#allocation80_spill] sm:$0xff] %v12222_v33  ;;  %v12227_v0 = vld [vmem:[#allocation9 + $0x230] ss:$12 sps:$4 sm:$0xff]  }
 0x4b8   :  { %13621 = vst [vmem:[#allocation81_spill] sm:$0xff] %v12227_v0 }
 0x4b9   :  { %4055 = vmatpush2.bf16.msra.mxu0 %v12205_v60 }
 0x4ba   :  { %8320 = vmatpush3.bf16.msra.mxu1 %v12209_v16  ;;  %4056 = vmatprep.subr.bf16.mxu0 %v12211_v10 }
 0x4bb   :  { %8321 = vmatprep.subr.bf16.mxu1 %v12214_v6 }
 0x4bd   :  { %4057 = vmatpush2.bf16.msra.mxu0 %v12217_v56 }
 0x4be   :  { %8322 = vmatpush3.bf16.msra.mxu1 %v12222_v33  ;;  %8515 = vmatprep.subr.bf16.mxu0 %v13121_v12 }
 0x4bf   :  { %4197 = vmatprep.subr.bf16.mxu1 %v12009_v22 }
 0x4c0   :  { %v3215_v16 = vpop.f32.mrf.mxu0  ;;  %4059 = vmatmul.mubr.bf16.vlgmr.msra.gmra.mxu0 %v2656_v40 }
 0x4c1   :  { %4141 = vmatmul.mubr.bf16.vlgmr.msra.gmra.mxu1 %v2656_v40  ;;  %8516 = vmatpush3.bf16.msra.mxu0 %v12227_v0  ;;  %v12244_v40 = vld [vmem:[#allocation9 + $0x200] ss:$12 sps:$4 sm:$0xff]  }
 0x4c2   :  { %4198 = vmatpush1.bf16.msra.mxu1 %v12016_v49  ;;  %4229 = vmatprep.mubr.bf16.mxu1 %v12232_v28  ;;  %v3217_v31 = vpop.f32.mrf.mxu0  ;;  %13623 = vst [vmem:[#allocation83_spill] sm:$0xff] %v12244_v40  ;;  %v12250_v49 = vld [vmem:[#allocation9 + $0x1e8] ss:$12 sps:$4 sm:$0xff]  }
 0x4c3   :  { %8517 = vmatprep.subr.bf16.mxu0 %v13121_v12  ;;  %4199 = vmatprep.subr.bf16.mxu1 %v12023_v54  ;;  %13624 = vst [vmem:[#allocation30_spill] sm:$0xff] %v12250_v49 }
 0x4c4   :  { %v3219_v33 = vpop.f32.mrf.mxu0  ;;  %8531 = vmatprep.mubr.msk.bf16.mxu0 %vm9942_vm0, %v13121_v12 }
 0x4c5   :  { %8518 = vmatpush3.bf16.msra.mxu0 %v12235_v19  ;;  %v12256_v33 = vld [vmem:[#allocation9 + $0x1d0] ss:$12 sps:$4 sm:$0xff]  }
 0x4c6   :  { %4200 = vmatpush1.bf16.msra.mxu1 %v12031_v26  ;;  %v3220_v46 = vpop.f32.mrf.mxu0  ;;  %8519 = vmatprep.subr.bf16.mxu0 %v13121_v12  ;;  %13625 = vst [vmem:[#allocation84_spill] sm:$0xff] %v12256_v33 }
 0x4c7   :  { %4201 = vmatprep.subr.bf16.mxu1 %v12040_v24  ;;  %v12262_v46 = vld [vmem:[#allocation9 + $0x1b8] ss:$12 sps:$4 sm:$0xff]  }
 0x4c8   :  { %13626 = vst [vmem:[#allocation85_spill] sm:$0xff] %v12262_v46 }
 0x4c9   :  { %8520 = vmatpush3.bf16.msra.mxu0 %v12244_v40 }
 0x4ca   :  { %4202 = vmatpush1.bf16.msra.mxu1 %v12054_v9  ;;  %8521 = vmatprep.subr.bf16.mxu0 %v13121_v12 }
 0x4cb   :  { %4203 = vmatprep.subr.bf16.mxu1 %v12060_v36  ;;  %v12268_v36 = vld [vmem:[#allocation9 + $0x1a0] ss:$12 sps:$4 sm:$0xff]  }
 0x4cc   :  { %13627 = vst [vmem:[#allocation24_spill] sm:$0xff] %v12268_v36 }
 0x4cd   :  { %8522 = vmatpush3.bf16.msra.mxu0 %v12250_v49 }
 0x4ce   :  { %4204 = vmatpush1.bf16.msra.mxu1 %v12066_v37  ;;  %8523 = vmatprep.subr.bf16.mxu0 %v13121_v12 }
 0x4cf   :  { %4205 = vmatprep.subr.bf16.mxu1 %v12072_v18  ;;  %v12274_v18 = vld [vmem:[#allocation9 + $0x188] ss:$12 sps:$4 sm:$0xff]  }
 0x4d0   :  { %13628 = vst [vmem:[#allocation66_spill] sm:$0xff] %v12274_v18 }
 0x4d1   :  { %8524 = vmatpush3.bf16.msra.mxu0 %v12256_v33 }
 0x4d2   :  { %4206 = vmatpush1.bf16.msra.mxu1 %v12078_v45  ;;  %8525 = vmatprep.subr.bf16.mxu0 %v13121_v12 }
 0x4d3   :  { %4207 = vmatprep.subr.bf16.mxu1 %v12084_v53 }
 0x4d5   :  { %8526 = vmatpush3.bf16.msra.mxu0 %v12262_v46 }
 0x4d6   :  { %4208 = vmatpush1.bf16.msra.mxu1 %v12090_v20  ;;  %8527 = vmatprep.subr.bf16.mxu0 %v13121_v12 }
 0x4d7   :  { %4209 = vmatprep.subr.bf16.mxu1 %v12096_v57  ;;  %v3262_v57 = vadd.f32 %v3215_v16, %v13572_v29  ;;  %v3264_v16 = vadd.f32 %v12154_v38, %v11455_v17 }
 0x4d9   :  { %8528 = vmatpush3.bf16.msra.mxu0 %v12268_v36 }
 0x4da   :  { %4210 = vmatpush1.bf16.msra.mxu1 %v12102_v41  ;;  %8529 = vmatprep.subr.bf16.mxu0 %v13121_v12  ;;  %v3263_v12 = vadd.f32 %v3217_v31, %v13464_v39 }
 0x4db   :  { %4211 = vmatprep.subr.bf16.mxu1 %v12108_v8 }
 0x4dd   :  { %8530 = vmatpush3.bf16.msra.mxu0 %v12274_v18 }
 0x4de   :  { %4212 = vmatpush1.bf16.msra.mxu1 %v12114_v13  ;;  %4238 = vmatprep.subr.bf16.mxu0 %v12012_v4 }
 0x4df   :  { %4213 = vmatprep.subr.bf16.mxu1 %v12120_v44 }
 0x4e0   :  { %v8257_v20 = vpop.f32.mrf.mxu0  ;;  %8532 = vmatmul.mubr.bf16.vlgmr.msra.gmra.mxu0 %v12133_v11 }
 0x4e1   :  { %v3299_v53 = vpop.f32.mrf.mxu1  ;;  %4239 = vmatpush1.bf16.msra.mxu0 %v12020_v15  ;;  %4270 = vmatprep.mubr.bf16.mxu0 %v13577_v1 }
 0x4e2   :  { %v12288_v8 = vadd.f32 %v3299_v53, %v3262_v57  ;;  %4214 = vmatpush2.bf16.msra.mxu1 %v12127_v52  ;;  %v8258_v13 = vpop.f32.mrf.mxu0  ;;  %4240 = vmatprep.subr.bf16.mxu0 %v12025_v35 }
 0x4e3   :  { %v3301_v29 = vpop.f32.mrf.mxu1  ;;  %v8259_v44 = vadd.f32 %v8258_v13, %v8257_v20  ;;  %4215 = vmatprep.subr.bf16.mxu1 %v12136_v63 }
 0x4e4   :  { %13629 = vst [vmem:[#allocation86_spill] sm:$0xff] %v12288_v8  ;;  %v12295_v11 = vadd.f32 %v3301_v29, %v3263_v12  ;;  %v8260_v41 = vpop.f32.mrf.mxu0  ;;  %v13632_v29 = vld [vmem:[#allocation36_spill] sm:$0xff]  ;;  %v13634_v12 = vld [vmem:[#allocation61_spill] sm:$0xff]  ;;  %v13639_v8 = vld [vmem:[#allocation67_spill] sm:$0xff] }
 0x4e5   :  { %v12297_v45 = vadd.f32 %v8259_v44, %v3264_v16  ;;  %v3303_v31 = vpop.f32.mrf.mxu1  ;;  %4241 = vmatpush1.bf16.msra.mxu0 %v12038_v47  ;;  %v2829_v20 = vmax.f32 %v13632_v29, 0.0  ;;  %v13633_v41 = vld [vmem:[#allocation28_spill] sm:$0xff]  ;;  %v13635_v16 = vmov 0.0  }
 0x4e6   :  { %13630 = vst [vmem:[#allocation27_spill] sm:$0xff] %v12295_v11  ;;  %4216 = vmatpush2.bf16.msra.mxu1 %v12142_v62  ;;  %v8261_v53 = vpop.f32.mrf.mxu0  ;;  %4242 = vmatprep.subr.bf16.mxu0 %v12046_v58  ;;  %v2827_v13 = vmax.f32 %v13633_v41, 0.0  ;;  %v13637_v29 = vld [vmem:[#allocation64_spill] sm:$0xff]  ;;  %v13641_v11 = vld [vmem:[#allocation70_spill] sm:$0xff] }
 0x4e7   :  { %13631 = vst [vmem:[#allocation40_spill] sm:$0xff] %v12297_v45  ;;  %v3304_v57 = vpop.f32.mrf.mxu1  ;;  %4217 = vmatprep.subr.bf16.mxu1 %v12148_v2  ;;  %v2832_v44 = vpack.c.bf16 %v2829_v20, %v2829_v20  ;;  %v13636_v53 = vld [vmem:[#allocation63_spill] sm:$0xff]  ;;  %v13640_v45 = vld [vmem:[#allocation69_spill] sm:$0xff] }
 0x4e8   :  { %v2830_v38 = vpack.c.bf16 %v2827_v13, %v2827_v13  ;;  %v13638_v13 = vld [vmem:[#allocation65_spill] sm:$0xff] }
 0x4e9   :  { %4243 = vmatpush1.bf16.msra.mxu0 %v12058_v42 }
 0x4ea   :  { %4218 = vmatpush2.bf16.msra.mxu1 %v12157_v32  ;;  %4244 = vmatprep.subr.bf16.mxu0 %v12063_v30 }
 0x4eb   :  { %4219 = vmatprep.subr.bf16.mxu1 %v12163_v34 }
 0x4ed   :  { %4245 = vmatpush1.bf16.msra.mxu0 %v12070_v14 }
 0x4ee   :  { %4220 = vmatpush2.bf16.msra.mxu1 %v12169_v21  ;;  %4246 = vmatprep.subr.bf16.mxu0 %v12075_v43 }
 0x4ef   :  { %4221 = vmatprep.subr.bf16.mxu1 %v12175_v59 }
 0x4f1   :  { %4247 = vmatpush1.bf16.msra.mxu0 %v12082_v51 }
 0x4f2   :  { %4222 = vmatpush2.bf16.msra.mxu1 %v12181_v50  ;;  %4248 = vmatprep.subr.bf16.mxu0 %v12087_v55 }
 0x4f3   :  { %4223 = vmatprep.subr.bf16.mxu1 %v12187_v23 }
 0x4f5   :  { %4249 = vmatpush1.bf16.msra.mxu0 %v12094_v3 }
 0x4f6   :  { %4224 = vmatpush2.bf16.msra.mxu1 %v12193_v25  ;;  %4250 = vmatprep.subr.bf16.mxu0 %v12099_v5 }
 0x4f7   :  { %4225 = vmatprep.subr.bf16.mxu1 %v12199_v7 }
 0x4f9   :  { %4251 = vmatpush1.bf16.msra.mxu0 %v12106_v61 }
 0x4fa   :  { %4226 = vmatpush2.bf16.msra.mxu1 %v12205_v60  ;;  %4252 = vmatprep.subr.bf16.mxu0 %v12111_v48 }
 0x4fb   :  { %4227 = vmatprep.subr.bf16.mxu1 %v12211_v10 }
 0x4fd   :  { %4253 = vmatpush1.bf16.msra.mxu0 %v12118_v27 }
 0x4fe   :  { %4228 = vmatpush2.bf16.msra.mxu1 %v12217_v56  ;;  %8338 = vmatprep.subr.bf16.mxu0 %v13634_v12  ;;  %v13650_v56 = vld [vmem:[#allocation80_spill] sm:$0xff] }
 0x4ff   :  { %8535 = vmatprep.subr.bf16.mxu1 %v13635_v16 }
 0x500   :  { %4271 = vmatmul.mubr.bf16.vlgmr.msra.gmra.mxu0 %v2832_v44 }
 0x501   :  { %v8279_v31 = vpop.f32.mrf.mxu1  ;;  %4230 = vmatmul.mubr.bf16.vlgmr.msra.gmra.mxu1 %v2830_v38  ;;  %8339 = vmatpush3.bf16.msra.mxu0 %v13636_v53 }
 0x502   :  { %4311 = vmatprep.mubr.bf16.mxu0 %v12232_v28  ;;  %8536 = vmatpush3.bf16.msra.mxu1 %v12227_v0 }
 0x503   :  { %v8280_v57 = vpop.f32.mrf.mxu1  ;;  %8340 = vmatprep.subr.bf16.mxu0 %v13637_v29  ;;  %8537 = vmatprep.subr.bf16.mxu1 %v13635_v16 }
 0x504   :  { %v12334_v20 = vadd.f32 %v8280_v57, %v8279_v31  ;;  %8551 = vmatprep.mubr.msk.bf16.mxu1 %vm9942_vm0, %v13635_v16  ;;  %v13642_v31 = vld [vmem:[#allocation71_spill] sm:$0xff]  ;;  %v13643_v57 = vld [vmem:[#allocation72_spill] sm:$0xff] }
 0x505   :  { %v8282_v41 = vpop.f32.mrf.mxu1  ;;  %8341 = vmatpush3.bf16.msra.mxu0 %v13638_v13 }
 0x506   :  { %8538 = vmatpush3.bf16.msra.mxu1 %v12235_v19  ;;  %8342 = vmatprep.subr.bf16.mxu0 %v13639_v8  ;;  %v13644_v41 = vld [vmem:[#allocation73_spill] sm:$0xff]  ;;  %v13647_v19 = vld [vmem:[#allocation76_spill] sm:$0xff] }
 0x507   :  { %v8283_v28 = vpop.f32.mrf.mxu1  ;;  %8539 = vmatprep.subr.bf16.mxu1 %v13635_v16 }
 0x508   :  { %v13645_v28 = vld [vmem:[#allocation74_spill] sm:$0xff] }
 0x509   :  { %8343 = vmatpush3.bf16.msra.mxu0 %v13640_v45 }
 0x50a   :  { %8540 = vmatpush3.bf16.msra.mxu1 %v12244_v40  ;;  %8344 = vmatprep.subr.bf16.mxu0 %v13641_v11  ;;  %v13646_v40 = vld [vmem:[#allocation75_spill] sm:$0xff] }
 0x50b   :  { %8541 = vmatprep.subr.bf16.mxu1 %v13635_v16 }
 0x50d   :  { %8345 = vmatpush3.bf16.msra.mxu0 %v13642_v31 }
 0x50e   :  { %8542 = vmatpush3.bf16.msra.mxu1 %v12250_v49  ;;  %8346 = vmatprep.subr.bf16.mxu0 %v13643_v57  ;;  %v13648_v49 = vld [vmem:[#allocation77_spill] sm:$0xff] }
 0x50f   :  { %8543 = vmatprep.subr.bf16.mxu1 %v13635_v16 }
 0x511   :  { %8347 = vmatpush3.bf16.msra.mxu0 %v13644_v41 }
 0x512   :  { %8544 = vmatpush3.bf16.msra.mxu1 %v12256_v33  ;;  %8348 = vmatprep.subr.bf16.mxu0 %v13645_v28  ;;  %v13649_v33 = vld [vmem:[#allocation88_spill] sm:$0xff] }
 0x513   :  { %8545 = vmatprep.subr.bf16.mxu1 %v13635_v16  ;;  %v3002_v0 = vmax.f32 %v13649_v33, 0.0 }
 0x515   :  { %8349 = vmatpush3.bf16.msra.mxu0 %v13646_v40 }
 0x516   :  { %8546 = vmatpush3.bf16.msra.mxu1 %v12262_v46  ;;  %8350 = vmatprep.subr.bf16.mxu0 %v13647_v19  ;;  %v3005_v46 = vpack.c.bf16 %v3002_v0, %v3002_v0 }
 0x517   :  { %8547 = vmatprep.subr.bf16.mxu1 %v13635_v16 }
 0x519   :  { %8351 = vmatpush3.bf16.msra.mxu0 %v13648_v49  ;;  %v13651_v49 = vld [vmem:[#allocation25_spill] sm:$0xff] }
 0x51a   :  { %8548 = vmatpush3.bf16.msra.mxu1 %v12268_v36  ;;  %8352 = vmatprep.subr.bf16.mxu0 %v12214_v6 }
 0x51b   :  { %8549 = vmatprep.subr.bf16.mxu1 %v13635_v16 }
 0x51d   :  { %8353 = vmatpush3.bf16.msra.mxu0 %v13650_v56 }
 0x51e   :  { %8550 = vmatpush3.bf16.msra.mxu1 %v12274_v18  ;;  %4368 = vmatprep.subr.bf16.mxu0 %v12009_v22 }
 0x51f   :  { %4409 = vmatprep.subr.bf16.mxu1 %v12012_v4 }
 0x520   :  { %v3389_v10 = vpop.f32.mrf.mxu0  ;;  %4312 = vmatmul.mubr.bf16.vlgmr.msra.gmra.mxu0 %v2830_v38  ;;  %v13653_v38 = vld [vmem:[#allocation46_spill] sm:$0xff] }
 0x521   :  { %8552 = vmatmul.mubr.bf16.vlgmr.msra.gmra.mxu1 %v2832_v44  ;;  %4369 = vmatpush1.bf16.msra.mxu0 %v13651_v49  ;;  %v13652_v44 = vld [vmem:[#allocation26_spill] sm:$0xff] }
 0x522   :  { %4400 = vmatprep.mubr.bf16.mxu0 %v3005_v46  ;;  %4410 = vmatpush1.bf16.msra.mxu1 %v12020_v15  ;;  %v3391_v36 = vpop.f32.mrf.mxu0 }
 0x523   :  { %4370 = vmatprep.subr.bf16.mxu0 %v12023_v54  ;;  %4411 = vmatprep.subr.bf16.mxu1 %v12025_v35 }
 0x524   :  { %v3393_v33 = vpop.f32.mrf.mxu0  ;;  %4441 = vmatprep.mubr.bf16.mxu1 %v13577_v1 }
 0x525   :  { %4371 = vmatpush1.bf16.msra.mxu0 %v12031_v26  ;;  %v13654_v33 = vld [vmem:[#allocation50_spill] sm:$0xff] }
 0x526   :  { %4412 = vmatpush1.bf16.msra.mxu1 %v12038_v47  ;;  %v3394_v0 = vpop.f32.mrf.mxu0  ;;  %4372 = vmatprep.subr.bf16.mxu0 %v12040_v24  ;;  %v13661_v47 = vld [vmem:[#allocation58_spill] sm:$0xff] }
 0x527   :  { %4413 = vmatprep.subr.bf16.mxu1 %v12046_v58  ;;  %v13655_v0 = vld [vmem:[#allocation52_spill] sm:$0xff]  ;;  %v13660_v58 = vld [vmem:[#allocation89_spill] sm:$0xff] }
 0x529   :  { %4373 = vmatpush1.bf16.msra.mxu0 %v12054_v9 }
 0x52a   :  { %4414 = vmatpush1.bf16.msra.mxu1 %v12058_v42  ;;  %4374 = vmatprep.subr.bf16.mxu0 %v13652_v44  ;;  %v13656_v42 = vld [vmem:[#allocation56_spill] sm:$0xff] }
 0x52b   :  { %4415 = vmatprep.subr.bf16.mxu1 %v12063_v30  ;;  %v13657_v30 = vld [vmem:[#allocation38_spill] sm:$0xff] }
 0x52d   :  { %4375 = vmatpush1.bf16.msra.mxu0 %v12066_v37 }
 0x52e   :  { %4416 = vmatpush1.bf16.msra.mxu1 %v12070_v14  ;;  %4376 = vmatprep.subr.bf16.mxu0 %v13653_v38  ;;  %v13658_v14 = vld [vmem:[#allocation47_spill] sm:$0xff] }
 0x52f   :  { %4417 = vmatprep.subr.bf16.mxu1 %v12075_v43  ;;  %v13659_v43 = vld [vmem:[#allocation53_spill] sm:$0xff] }
 0x531   :  { %4377 = vmatpush1.bf16.msra.mxu0 %v13654_v33 }
 0x532   :  { %4418 = vmatpush1.bf16.msra.mxu1 %v12082_v51  ;;  %4378 = vmatprep.subr.bf16.mxu0 %v13655_v0  ;;  %v3003_v51 = vmax.f32 %v13660_v58, 0.0  ;;  %v3437_v58 = vadd.f32 %v3391_v36, %v13464_v39  ;;  %v13668_v36 = vld [vmem:[#allocation77_spill] sm:$0xff] }
 0x533   :  { %4419 = vmatprep.subr.bf16.mxu1 %v12087_v55  ;;  %v13662_v55 = vld [vmem:[#allocation60_spill] sm:$0xff] }
 0x535   :  { %4379 = vmatpush1.bf16.msra.mxu0 %v13656_v42 }
 0x536   :  { %4420 = vmatpush1.bf16.msra.mxu1 %v12094_v3  ;;  %4380 = vmatprep.subr.bf16.mxu0 %v13657_v30  ;;  %v12400_v3 = vpack.c.bf16 %v3003_v51, %v3003_v51  ;;  %v3438_v51 = vadd.f32 %v12334_v20, %v11455_v17 }
 0x537   :  { %4421 = vmatprep.subr.bf16.mxu1 %v12099_v5  ;;  %v13663_v5 = vld [vmem:[#allocation32_spill] sm:$0xff] }
 0x538   :  { %v3436_v35 = vadd.f32 %v3389_v10, %v13663_v5 }
 0x539   :  { %4381 = vmatpush1.bf16.msra.mxu0 %v13658_v14 }
 0x53a   :  { %4422 = vmatpush1.bf16.msra.mxu1 %v12106_v61  ;;  %4382 = vmatprep.subr.bf16.mxu0 %v13659_v43 }
 0x53b   :  { %4423 = vmatprep.subr.bf16.mxu1 %v12111_v48 }
 0x53d   :  { %4383 = vmatpush1.bf16.msra.mxu0 %v13661_v47 }
 0x53e   :  { %4424 = vmatpush1.bf16.msra.mxu1 %v12118_v27  ;;  %4384 = vmatprep.subr.bf16.mxu0 %v13662_v55 }
 0x53f   :  { %8369 = vmatprep.subr.bf16.mxu1 %v13634_v12 }
 0x540   :  { %v8301_v1 = vpop.f32.mrf.mxu0 }
 0x541   :  { %v3473_v61 = vpop.f32.mrf.mxu1  ;;  %4442 = vmatmul.mubr.bf16.vlgmr.msra.gmra.mxu1 %v12400_v3  ;;  %4385 = vmatpush2.bf16.msra.mxu0 %v12127_v52 }
 0x542   :  { %v12407_v48 = vadd.f32 %v3473_v61, %v3436_v35  ;;  %8370 = vmatpush3.bf16.msra.mxu1 %v13636_v53  ;;  %4482 = vmatprep.mubr.bf16.mxu1 %v3005_v46  ;;  %v8302_v27 = vpop.f32.mrf.mxu0  ;;  %v13669_v61 = vld [vmem:[#allocation78_spill] sm:$0xff] }
 0x543   :  { %v3475_v12 = vpop.f32.mrf.mxu1  ;;  %v8303_v15 = vadd.f32 %v8302_v27, %v8301_v1  ;;  %4386 = vmatprep.subr.bf16.mxu0 %v12136_v63  ;;  %8371 = vmatprep.subr.bf16.mxu1 %v13637_v29  ;;  %v13670_v27 = vld [vmem:[#allocation90_spill] sm:$0xff] }
 0x544   :  { %13664 = vst [vmem:[#allocation29_spill] sm:$0xff] %v12407_v48  ;;  %v12414_v5 = vadd.f32 %v3475_v12, %v3437_v58  ;;  %v8304_v10 = vpop.f32.mrf.mxu0  ;;  %v3176_v46 = vmax.f32 %v13670_v27, 0.0  ;;  %v13671_v12 = vld [vmem:[#allocation79_spill] sm:$0xff] }
 0x545   :  { %v12416_v52 = vadd.f32 %v8303_v15, %v3438_v51  ;;  %v3477_v39 = vpop.f32.mrf.mxu1  ;;  %4387 = vmatpush2.bf16.msra.mxu0 %v12142_v62  ;;  %v13667_v15 = vld [vmem:[#allocation87_spill] sm:$0xff]  ;;  %v13672_v10 = vld [vmem:[#allocation81_spill] sm:$0xff] }
 0x546   :  { %13665 = vst [vmem:[#allocation36_spill] sm:$0xff] %v12414_v5  ;;  %8372 = vmatpush3.bf16.msra.mxu1 %v13638_v13  ;;  %v8305_v35 = vpop.f32.mrf.mxu0  ;;  %4388 = vmatprep.subr.bf16.mxu0 %v12148_v2  ;;  %v3001_v1 = vmax.f32 %v13667_v15, 0.0  ;;  %v12448_v58 = vpack.c.bf16 %v3176_v46, %v3176_v46  ;;  %v13681_v15 = vmov 0   ;;  %v13683_v46 = vld [vmem:[#allocation39_spill] sm:$0xff] }
 0x547   :  { %13666 = vst [vmem:[#allocation28_spill] sm:$0xff] %v12416_v52  ;;  %v3478_v17 = vpop.f32.mrf.mxu1  ;;  %8373 = vmatprep.subr.bf16.mxu1 %v13639_v8  ;;  %v13673_v35 = vld [vmem:[#allocation82_spill] sm:$0xff]  ;;  %v13687_v48 = vld [vmem:[#allocation35_spill] sm:$0xff] }
 0x548   :  { %v3004_v20 = vpack.c.bf16 %v3001_v1, %v3001_v1  ;;  %v13682_v1 = vld [vmem:[#allocation62_spill] sm:$0xff] }
 0x549   :  { %4389 = vmatpush2.bf16.msra.mxu0 %v12157_v32 }
 0x54a   :  { %8374 = vmatpush3.bf16.msra.mxu1 %v13640_v45  ;;  %4390 = vmatprep.subr.bf16.mxu0 %v12163_v34 }
 0x54b   :  { %8375 = vmatprep.subr.bf16.mxu1 %v13641_v11 }
 0x54d   :  { %4391 = vmatpush2.bf16.msra.mxu0 %v12169_v21 }
 0x54e   :  { %8376 = vmatpush3.bf16.msra.mxu1 %v13642_v31  ;;  %4392 = vmatprep.subr.bf16.mxu0 %v12175_v59 }
 0x54f   :  { %8377 = vmatprep.subr.bf16.mxu1 %v13643_v57 }
 0x551   :  { %4393 = vmatpush2.bf16.msra.mxu0 %v12181_v50 }
 0x552   :  { %8378 = vmatpush3.bf16.msra.mxu1 %v13644_v41  ;;  %4394 = vmatprep.subr.bf16.mxu0 %v12187_v23 }
 0x553   :  { %8379 = vmatprep.subr.bf16.mxu1 %v13645_v28 }
 0x555   :  { %4395 = vmatpush2.bf16.msra.mxu0 %v12193_v25 }
 0x556   :  { %8380 = vmatpush3.bf16.msra.mxu1 %v13646_v40  ;;  %4396 = vmatprep.subr.bf16.mxu0 %v12199_v7 }
 0x557   :  { %8381 = vmatprep.subr.bf16.mxu1 %v13647_v19 }
 0x559   :  { %4397 = vmatpush2.bf16.msra.mxu0 %v12205_v60 }
 0x55a   :  { %8382 = vmatpush3.bf16.msra.mxu1 %v13668_v36  ;;  %4398 = vmatprep.subr.bf16.mxu0 %v13669_v61 }
 0x55b   :  { %8383 = vmatprep.subr.bf16.mxu1 %v12214_v6 }
 0x55d   :  { %4399 = vmatpush2.bf16.msra.mxu0 %v13671_v12 }
 0x55e   :  { %8384 = vmatpush3.bf16.msra.mxu1 %v13650_v56  ;;  %8555 = vmatprep.subr.bf16.mxu0 %v13635_v16 }
 0x55f   :  { %4539 = vmatprep.subr.bf16.mxu1 %v12009_v22 }
 0x560   :  { %4401 = vmatmul.mubr.bf16.vlgmr.msra.gmra.mxu0 %v3004_v20 }
 0x561   :  { %v4101_v51 = vpop.f32.mrf.mxu1  ;;  %4483 = vmatmul.mubr.bf16.vlgmr.msra.gmra.mxu1 %v3004_v20  ;;  %8556 = vmatpush3.bf16.msra.mxu0 %v13672_v10 }
 0x562   :  { %4540 = vmatpush1.bf16.msra.mxu1 %v13651_v49  ;;  %4571 = vmatprep.mubr.bf16.mxu1 %v12448_v58  ;;  %v13674_v49 = vld [vmem:[#allocation83_spill] sm:$0xff] }
 0x563   :  { %v4103_v39 = vpop.f32.mrf.mxu1  ;;  %8557 = vmatprep.subr.bf16.mxu0 %v13635_v16  ;;  %4541 = vmatprep.subr.bf16.mxu1 %v12023_v54  ;;  %v13675_v54 = vld [vmem:[#allocation30_spill] sm:$0xff] }
 0x564   :  { %8571 = vmatprep.mubr.msk.bf16.mxu0 %vm9942_vm0, %v13635_v16 }
 0x565   :  { %v4105_v22 = vpop.f32.mrf.mxu1  ;;  %8558 = vmatpush3.bf16.msra.mxu0 %v13673_v35 }
 0x566   :  { %4542 = vmatpush1.bf16.msra.mxu1 %v12031_v26  ;;  %8559 = vmatprep.subr.bf16.mxu0 %v13635_v16  ;;  %v13676_v26 = vld [vmem:[#allocation84_spill] sm:$0xff] }
 0x567   :  { %v4106_v17 = vpop.f32.mrf.mxu1  ;;  %4543 = vmatprep.subr.bf16.mxu1 %v12040_v24  ;;  %v13677_v24 = vld [vmem:[#allocation85_spill] sm:$0xff] }
 0x569   :  { %8560 = vmatpush3.bf16.msra.mxu0 %v13674_v49 }
 0x56a   :  { %4544 = vmatpush1.bf16.msra.mxu1 %v12054_v9  ;;  %8561 = vmatprep.subr.bf16.mxu0 %v13635_v16  ;;  %v13678_v9 = vld [vmem:[#allocation24_spill] sm:$0xff] }
 0x56b   :  { %4545 = vmatprep.subr.bf16.mxu1 %v13652_v44 }
 0x56d   :  { %8562 = vmatpush3.bf16.msra.mxu0 %v13675_v54 }
 0x56e   :  { %4546 = vmatpush1.bf16.msra.mxu1 %v12066_v37  ;;  %8563 = vmatprep.subr.bf16.mxu0 %v13635_v16 }
 0x56f   :  { %4547 = vmatprep.subr.bf16.mxu1 %v13653_v38 }
 0x571   :  { %8564 = vmatpush3.bf16.msra.mxu0 %v13676_v26 }
 0x572   :  { %4548 = vmatpush1.bf16.msra.mxu1 %v13654_v33  ;;  %8565 = vmatprep.subr.bf16.mxu0 %v13635_v16  ;;  %v13680_v33 = vld [vmem:[#allocation34_spill] sm:$0xff] }
 0x573   :  { %4549 = vmatprep.subr.bf16.mxu1 %v13655_v0 }
 0x575   :  { %8566 = vmatpush3.bf16.msra.mxu0 %v13677_v24 }
 0x576   :  { %4550 = vmatpush1.bf16.msra.mxu1 %v13656_v42  ;;  %8567 = vmatprep.subr.bf16.mxu0 %v13635_v16 }
 0x577   :  { %4551 = vmatprep.subr.bf16.mxu1 %v13657_v30 }
 0x579   :  { %8568 = vmatpush3.bf16.msra.mxu0 %v13678_v9 }
 0x57a   :  { %4552 = vmatpush1.bf16.msra.mxu1 %v13658_v14  ;;  %8569 = vmatprep.subr.bf16.mxu0 %v13635_v16 }
 0x57b   :  { %4553 = vmatprep.subr.bf16.mxu1 %v13659_v43 }
 0x57d   :  { %8570 = vmatpush3.bf16.msra.mxu0 %v12274_v18 }
 0x57e   :  { %4554 = vmatpush1.bf16.msra.mxu1 %v13661_v47  ;;  %4580 = vmatprep.subr.bf16.mxu0 %v12012_v4 }
 0x57f   :  { %4555 = vmatprep.subr.bf16.mxu1 %v13662_v55 }
 0x580   :  { %v4060_v37 = vpop.f32.mrf.mxu0  ;;  %8572 = vmatmul.mubr.bf16.vlgmr.msra.gmra.mxu0 %v12400_v3 }
 0x581   :  { %v12486_v44 = vadd.f32 %v4101_v51, %v4060_v37  ;;  %v8323_v38 = vpop.f32.mrf.mxu1  ;;  %4581 = vmatpush1.bf16.msra.mxu0 %v13680_v33  ;;  %4612 = vmatprep.mubr.bf16.mxu0 %v13681_v15  ;;  %v13685_v51 = vld [vmem:[#allocation37_spill] sm:$0xff]  ;;  %v13686_v33 = vld [vmem:[#allocation91_spill] sm:$0xff] }
 0x582   :  { %4556 = vmatpush2.bf16.msra.mxu1 %v13682_v1  ;;  %v4062_v27 = vpop.f32.mrf.mxu0  ;;  %4582 = vmatprep.subr.bf16.mxu0 %v13683_v46  ;;  %v13691_v46 = vld [vmem:[#allocation51_spill] sm:$0xff] }
 0x583   :  { %13679 = vst [vmem:[#allocation63_spill] sm:$0xff] %v12486_v44  ;;  %v12492_v20 = vadd.f32 %v4103_v39, %v4062_v27  ;;  %v8324_v4 = vpop.f32.mrf.mxu1  ;;  %4557 = vmatprep.subr.bf16.mxu1 %v12136_v63  ;;  %v13688_v39 = vld [vmem:[#allocation44_spill] sm:$0xff]  ;;  %v13690_v27 = vld [vmem:[#allocation49_spill] sm:$0xff] }
 0x584   :  { %v8325_v22 = vadd.f32 %v8324_v4, %v8323_v38  ;;  %v4064_v17 = vpop.f32.mrf.mxu0  ;;  %v13689_v38 = vld [vmem:[#allocation45_spill] sm:$0xff]  ;;  %v13694_v4 = vld [vmem:[#allocation68_spill] sm:$0xff] }
 0x585   :  { %13684 = vst [vmem:[#allocation64_spill] sm:$0xff] %v12492_v20  ;;  %v8326_v3 = vpop.f32.mrf.mxu1  ;;  %4583 = vmatpush1.bf16.msra.mxu0 %v13685_v51  ;;  %v13695_v17 = vld [vmem:[#allocation48_spill] sm:$0xff]  ;;  %v13700_v20 = vld [vmem:[#allocation61_spill] sm:$0xff] }
 0x586   :  { %4558 = vmatpush2.bf16.msra.mxu1 %v12142_v62  ;;  %v4065_v37 = vpop.f32.mrf.mxu0  ;;  %4584 = vmatprep.subr.bf16.mxu0 %v13686_v33  ;;  %v13696_v3 = vld [vmem:[#allocation31_spill] sm:$0xff]  ;;  %v13698_v33 = vld [vmem:[#allocation33_spill] sm:$0xff] }
 0x587   :  { %v8327_v44 = vpop.f32.mrf.mxu1  ;;  %4559 = vmatprep.subr.bf16.mxu1 %v12148_v2  ;;  %v3177_v51 = vmax.f32 %v13696_v3, 0.0  ;;  %v13697_v37 = vld [vmem:[#allocation55_spill] sm:$0xff] }
 0x588   :  { %v13692_v44 = vld [vmem:[#allocation54_spill] sm:$0xff] }
 0x589   :  { %4585 = vmatpush1.bf16.msra.mxu0 %v13687_v48  ;;  %v13693_v48 = vld [vmem:[#allocation57_spill] sm:$0xff] }
 0x58a   :  { %4560 = vmatpush2.bf16.msra.mxu1 %v12157_v32  ;;  %4586 = vmatprep.subr.bf16.mxu0 %v13688_v39  ;;  %v3175_v39 = vmax.f32 %v13698_v33, 0.0 }
 0x58b   :  { %4561 = vmatprep.subr.bf16.mxu1 %v12163_v34 }
 0x58c   :  { %v3178_v52 = vpack.c.bf16 %v3175_v39, %v3175_v39  ;;  %v12561_v39 = vld [vmem:[#allocation9 + $0xac] ss:$12 sps:$4 sm:$0xff]  }
 0x58d   :  { %4587 = vmatpush1.bf16.msra.mxu0 %v13689_v38  ;;  %v13699_v38 = vld [vmem:[#allocation59_spill] sm:$0xff] }
 0x58e   :  { %4562 = vmatpush2.bf16.msra.mxu1 %v12169_v21  ;;  %4588 = vmatprep.subr.bf16.mxu0 %v13690_v27  ;;  %v3180_v27 = vpack.c.bf16 %v3177_v51, %v3177_v51 }
 0x58f   :  { %4563 = vmatprep.subr.bf16.mxu1 %v12175_v59 }
 0x591   :  { %4589 = vmatpush1.bf16.msra.mxu0 %v13691_v46 }
 0x592   :  { %4564 = vmatpush2.bf16.msra.mxu1 %v12181_v50  ;;  %4590 = vmatprep.subr.bf16.mxu0 %v13692_v44 }
 0x593   :  { %4565 = vmatprep.subr.bf16.mxu1 %v12187_v23 }
 0x595   :  { %4591 = vmatpush1.bf16.msra.mxu0 %v13693_v48 }
 0x596   :  { %4566 = vmatpush2.bf16.msra.mxu1 %v12193_v25  ;;  %4592 = vmatprep.subr.bf16.mxu0 %v13694_v4 }
 0x597   :  { %4567 = vmatprep.subr.bf16.mxu1 %v12199_v7 }
 0x599   :  { %4593 = vmatpush1.bf16.msra.mxu0 %v13695_v17 }
 0x59a   :  { %4568 = vmatpush2.bf16.msra.mxu1 %v12205_v60  ;;  %4594 = vmatprep.subr.bf16.mxu0 %v13697_v37 }
 0x59b   :  { %4569 = vmatprep.subr.bf16.mxu1 %v13669_v61 }
 0x59d   :  { %4595 = vmatpush1.bf16.msra.mxu0 %v13699_v38 }
 0x59e   :  { %4570 = vmatpush2.bf16.msra.mxu1 %v13671_v12  ;;  %8400 = vmatprep.subr.bf16.mxu0 %v13700_v20 }
 0x59f   :  { %8575 = vmatprep.subr.bf16.mxu1 %v13635_v16 }
 0x5a0   :  { %v4182_v5 = vpop.f32.mrf.mxu0  ;;  %4613 = vmatmul.mubr.bf16.vlgmr.msra.gmra.mxu0 %v3180_v27 }
 0x5a1   :  { %v12525_v3 = vadd.f32 %v8325_v22, %v4182_v5  ;;  %4572 = vmatmul.mubr.bf16.vlgmr.msra.gmra.mxu1 %v3178_v52  ;;  %8401 = vmatpush3.bf16.msra.mxu0 %v13636_v53 }
 0x5a2   :  { %4653 = vmatprep.mubr.bf16.mxu0 %v12448_v58  ;;  %8576 = vmatpush3.bf16.msra.mxu1 %v13672_v10  ;;  %v8533_v33 = vpop.f32.mrf.mxu0  ;;  %v13702_v58 = vld [vmem:[#allocation27_spill] sm:$0xff] }
 0x5a3   :  { %13701 = vst [vmem:[#allocation65_spill] sm:$0xff] %v12525_v3  ;;  %8402 = vmatprep.subr.bf16.mxu0 %v13637_v29  ;;  %8577 = vmatprep.subr.bf16.mxu1 %v13635_v16  ;;  %v3350_v22 = vmax.f32 %v13702_v58, 0.0  ;;  %v12564_v33 = vld [vmem:[#allocation9 + $0x22c] ss:$12 sps:$4 sm:$0xff]  }
 0x5a4   :  { %v4185_v51 = vpop.f32.mrf.mxu0  ;;  %8591 = vmatprep.mubr.msk.bf16.mxu1 %vm9942_vm0, %v13635_v16  ;;  %13703 = vst [vmem:[#allocation67_spill] sm:$0xff] %v12564_v33 }
 0x5a5   :  { %8403 = vmatpush3.bf16.msra.mxu0 %v13638_v13  ;;  %v12567_v51 = vpack.c.bf16 %v3350_v22, %v3350_v22  ;;  %v12578_v22 = vld [vmem:[#allocation9 + $0x94] ss:$12 sps:$4 sm:$0xff]  }
 0x5a6   :  { %8578 = vmatpush3.bf16.msra.mxu1 %v13673_v35  ;;  %v8534_v5 = vpop.f32.mrf.mxu0  ;;  %8404 = vmatprep.subr.bf16.mxu0 %v13639_v8 }
 0x5a7   :  { %8579 = vmatprep.subr.bf16.mxu1 %v13635_v16 }
 0x5a9   :  { %8405 = vmatpush3.bf16.msra.mxu0 %v13640_v45 }
 0x5aa   :  { %8580 = vmatpush3.bf16.msra.mxu1 %v13674_v49  ;;  %8406 = vmatprep.subr.bf16.mxu0 %v13641_v11 }
 0x5ab   :  { %8581 = vmatprep.subr.bf16.mxu1 %v13635_v16 }
 0x5ad   :  { %8407 = vmatpush3.bf16.msra.mxu0 %v13642_v31 }
 0x5ae   :  { %8582 = vmatpush3.bf16.msra.mxu1 %v13675_v54  ;;  %8408 = vmatprep.subr.bf16.mxu0 %v13643_v57  ;;  %v12593_v54 = vld [vmem:[#allocation9 + $0x7c] ss:$12 sps:$4 sm:$0xff]  }
 0x5af   :  { %8583 = vmatprep.subr.bf16.mxu1 %v13635_v16 }
 0x5b1   :  { %8409 = vmatpush3.bf16.msra.mxu0 %v13644_v41 }
 0x5b2   :  { %8584 = vmatpush3.bf16.msra.mxu1 %v13676_v26  ;;  %8410 = vmatprep.subr.bf16.mxu0 %v13645_v28 }
 0x5b3   :  { %8585 = vmatprep.subr.bf16.mxu1 %v13635_v16 }
 0x5b5   :  { %8411 = vmatpush3.bf16.msra.mxu0 %v13646_v40 }
 0x5b6   :  { %8586 = vmatpush3.bf16.msra.mxu1 %v13677_v24  ;;  %8412 = vmatprep.subr.bf16.mxu0 %v13647_v19 }
 0x5b7   :  { %8587 = vmatprep.subr.bf16.mxu1 %v13635_v16 }
 0x5b9   :  { %8413 = vmatpush3.bf16.msra.mxu0 %v13668_v36 }
 0x5ba   :  { %8588 = vmatpush3.bf16.msra.mxu1 %v13678_v9  ;;  %8414 = vmatprep.subr.bf16.mxu0 %v12214_v6  ;;  %v12569_v9 = vld [vmem:[#allocation9 + $0xa8] ss:$12 sps:$4 sm:$0xff]  }
 0x5bb   :  { %8589 = vmatprep.subr.bf16.mxu1 %v13635_v16 }
 0x5bd   :  { %8415 = vmatpush3.bf16.msra.mxu0 %v13650_v56 }
 0x5be   :  { %8590 = vmatpush3.bf16.msra.mxu1 %v12274_v18  ;;  %4710 = vmatprep.subr.bf16.mxu0 %v12561_v39  ;;  %v12575_v18 = vld [vmem:[#allocation9 + $0x228] ss:$12 sps:$4 sm:$0xff]  }
 0x5bf   :  { %4751 = vmatprep.subr.bf16.mxu1 %v12564_v33  ;;  %13705 = vst [vmem:[#allocation70_spill] sm:$0xff] %v12575_v18 }
 0x5c0   :  { %v4272_v5 = vpop.f32.mrf.mxu0  ;;  %4654 = vmatmul.mubr.bf16.vlgmr.msra.gmra.mxu0 %v3178_v52  ;;  %v12581_v52 = vld [vmem:[#allocation9 + $0x214] ss:$12 sps:$4 sm:$0xff]  }
 0x5c1   :  { %v4231_v3 = vpop.f32.mrf.mxu1  ;;  %8592 = vmatmul.mubr.bf16.vlgmr.msra.gmra.mxu1 %v3180_v27  ;;  %4711 = vmatpush1.bf16.msra.mxu0 %v12569_v9  ;;  %13706 = vst [vmem:[#allocation71_spill] sm:$0xff] %v12581_v52 }
 0x5c2   :  { %v12572_v58 = vadd.f32 %v4272_v5, %v4231_v3  ;;  %4742 = vmatprep.mubr.bf16.mxu0 %v12567_v51  ;;  %4752 = vmatpush1.bf16.msra.mxu1 %v12575_v18  ;;  %v4274_v24 = vpop.f32.mrf.mxu0  ;;  %v12590_v18 = vld [vmem:[#allocation9 + $0x210] ss:$12 sps:$4 sm:$0xff]  }
 0x5c3   :  { %v4233_v33 = vpop.f32.mrf.mxu1  ;;  %4712 = vmatprep.subr.bf16.mxu0 %v12578_v22  ;;  %4753 = vmatprep.subr.bf16.mxu1 %v12581_v52  ;;  %13708 = vst [vmem:[#allocation73_spill] sm:$0xff] %v12590_v18 }
 0x5c4   :  { %13704 = vst [vmem:[#allocation69_spill] sm:$0xff] %v12572_v58  ;;  %v12584_v27 = vadd.f32 %v4274_v24, %v4233_v33  ;;  %v4276_v3 = vpop.f32.mrf.mxu0  ;;  %4783 = vmatprep.mubr.bf16.mxu1 %v13681_v15  ;;  %v12587_v58 = vld [vmem:[#allocation9 + $0x90] ss:$12 sps:$4 sm:$0xff]   ;;  %v12599_v33 = vld [vmem:[#allocation9 + $0x78] ss:$12 sps:$4 sm:$0xff]  }
 0x5c5   :  { %v4235_v5 = vpop.f32.mrf.mxu1  ;;  %4713 = vmatpush1.bf16.msra.mxu0 %v12587_v58  ;;  %v12596_v24 = vld [vmem:[#allocation9 + $0x1fc] ss:$12 sps:$4 sm:$0xff]   ;;  %v12602_v3 = vld [vmem:[#allocation9 + $0x1f8] ss:$12 sps:$4 sm:$0xff]  }
 0x5c6   :  { %13707 = vst [vmem:[#allocation72_spill] sm:$0xff] %v12584_v27  ;;  %4754 = vmatpush1.bf16.msra.mxu1 %v12590_v18  ;;  %v4277_v26 = vpop.f32.mrf.mxu0  ;;  %4714 = vmatprep.subr.bf16.mxu0 %v12593_v54  ;;  %13709 = vst [vmem:[#allocation74_spill] sm:$0xff] %v12596_v24  ;;  %v12605_v5 = vld [vmem:[#allocation9 + $0x64] ss:$12 sps:$4 sm:$0xff]   ;;  %v12614_v27 = vld [vmem:[#allocation9 + $0x1e0] ss:$12 sps:$4 sm:$0xff]  }
 0x5c7   :  { %v4236_v52 = vpop.f32.mrf.mxu1  ;;  %4755 = vmatprep.subr.bf16.mxu1 %v12596_v24  ;;  %13710 = vst [vmem:[#allocation75_spill] sm:$0xff] %v12602_v3  ;;  %v12608_v26 = vld [vmem:[#allocation9 + $0x1e4] ss:$12 sps:$4 sm:$0xff]   ;;  %v12617_v24 = vld [vmem:[#allocation9 + $0x4c] ss:$12 sps:$4 sm:$0xff]  }
 0x5c8   :  { %v12611_v52 = vld [vmem:[#allocation9 + $0x60] ss:$12 sps:$4 sm:$0xff]   ;;  %v12623_v18 = vld [vmem:[#allocation9 + $0x48] ss:$12 sps:$4 sm:$0xff]  }
 0x5c9   :  { %4715 = vmatpush1.bf16.msra.mxu0 %v12599_v33 }
 0x5ca   :  { %4756 = vmatpush1.bf16.msra.mxu1 %v12602_v3  ;;  %4716 = vmatprep.subr.bf16.mxu0 %v12605_v5  ;;  %v12620_v3 = vld [vmem:[#allocation9 + $0x1cc] ss:$12 sps:$4 sm:$0xff]  }
 0x5cb   :  { %4757 = vmatprep.subr.bf16.mxu1 %v12608_v26  ;;  %13711 = vst [vmem:[#allocation76_spill] sm:$0xff] %v12620_v3 }
 0x5cd   :  { %4717 = vmatpush1.bf16.msra.mxu0 %v12611_v52 }
 0x5ce   :  { %4758 = vmatpush1.bf16.msra.mxu1 %v12614_v27  ;;  %4718 = vmatprep.subr.bf16.mxu0 %v12617_v24 }
 0x5cf   :  { %4759 = vmatprep.subr.bf16.mxu1 %v12620_v3  ;;  %v13712_v3 = vld [vmem:[#allocation40_spill] sm:$0xff] }
 0x5d1   :  { %4719 = vmatpush1.bf16.msra.mxu0 %v12623_v18 }
 0x5d2   :  { %4760 = vmatpush1.bf16.msra.mxu1 %v13691_v46  ;;  %4720 = vmatprep.subr.bf16.mxu0 %v13655_v0  ;;  %v3351_v46 = vmax.f32 %v13712_v3, 0.0  ;;  %v9672_v3 = vld [vmem:[#allocation9 + $0x120] ss:$12 sps:$4 sm:$0xff]  }
 0x5d3   :  { %4761 = vmatprep.subr.bf16.mxu1 %v13692_v44 }
 0x5d5   :  { %4721 = vmatpush1.bf16.msra.mxu0 %v13656_v42  ;;  %v12641_v42 = vpack.c.bf16 %v3351_v46, %v3351_v46  ;;  %v9674_v46 = vld [vmem:[#allocation9 + $0x1c8] ss:$12 sps:$4 sm:$0xff]  }
 0x5d6   :  { %4762 = vmatpush1.bf16.msra.mxu1 %v13693_v48  ;;  %4722 = vmatprep.subr.bf16.mxu0 %v13657_v30 }
 0x5d7   :  { %4763 = vmatprep.subr.bf16.mxu1 %v13694_v4 }
 0x5d9   :  { %4723 = vmatpush1.bf16.msra.mxu0 %v13658_v14 }
 0x5da   :  { %4764 = vmatpush1.bf16.msra.mxu1 %v13695_v17  ;;  %4724 = vmatprep.subr.bf16.mxu0 %v13659_v43  ;;  %v13723_v17 = vld [vmem:[#allocation73_spill] sm:$0xff] }
 0x5db   :  { %4765 = vmatprep.subr.bf16.mxu1 %v13697_v37  ;;  %v9668_v37 = vld [vmem:[#allocation9 + $0x150] ss:$12 sps:$4 sm:$0xff]  }
 0x5dd   :  { %4725 = vmatpush1.bf16.msra.mxu0 %v13661_v47 }
 0x5de   :  { %4766 = vmatpush1.bf16.msra.mxu1 %v13699_v38  ;;  %4726 = vmatprep.subr.bf16.mxu0 %v13662_v55 }
 0x5df   :  { %8431 = vmatprep.subr.bf16.mxu1 %v13700_v20 }
 0x5e0   :  { %v8354_v30 = vpop.f32.mrf.mxu0 }
 0x5e1   :  { %v4353_v14 = vpop.f32.mrf.mxu1  ;;  %4784 = vmatmul.mubr.bf16.vlgmr.msra.gmra.mxu1 %v12641_v42  ;;  %4727 = vmatpush2.bf16.msra.mxu0 %v13682_v1 }
 0x5e2   :  { %8432 = vmatpush3.bf16.msra.mxu1 %v13636_v53  ;;  %4824 = vmatprep.mubr.bf16.mxu1 %v12567_v51  ;;  %v8355_v43 = vpop.f32.mrf.mxu0 }
 0x5e3   :  { %v8356_v47 = vadd.f32 %v8355_v43, %v8354_v30  ;;  %v8553_v0 = vpop.f32.mrf.mxu1  ;;  %4728 = vmatprep.subr.bf16.mxu0 %v12136_v63  ;;  %8433 = vmatprep.subr.bf16.mxu1 %v13637_v29  ;;  %v9664_v29 = vld [vmem:[#allocation9] ss:$12 sps:$4 sm:$0xff]   ;;  %v9678_v43 = vld [vmem:[#allocation9 + $0x1b0] ss:$12 sps:$4 sm:$0xff]  }
 0x5e4   :  { %v8357_v55 = vpop.f32.mrf.mxu0  ;;  %v9676_v30 = vld [vmem:[#allocation9 + $0x1b4] ss:$12 sps:$4 sm:$0xff]   ;;  %v9682_v0 = vld [vmem:[#allocation9 + $0x198] ss:$12 sps:$4 sm:$0xff]  }
 0x5e5   :  { %v12650_v44 = vadd.f32 %v8356_v47, %v4353_v14  ;;  %v4356_v20 = vpop.f32.mrf.mxu1  ;;  %4729 = vmatpush2.bf16.msra.mxu0 %v12142_v62  ;;  %v9677_v14 = vld [vmem:[#allocation9 + $0xf4] ss:$12 sps:$4 sm:$0xff]   ;;  %v9680_v47 = vld [vmem:[#allocation9 + $0x19c] ss:$12 sps:$4 sm:$0xff]  }
 0x5e6   :  { %8434 = vmatpush3.bf16.msra.mxu1 %v13638_v13  ;;  %v8358_v1 = vpop.f32.mrf.mxu0  ;;  %4730 = vmatprep.subr.bf16.mxu0 %v12148_v2  ;;  %v13720_v13 = vld [vmem:[#allocation67_spill] sm:$0xff]  ;;  %v13727_v55 = vld [vmem:[#allocation28_spill] sm:$0xff] }
 0x5e7   :  { %v8554_v53 = vpop.f32.mrf.mxu1  ;;  %8435 = vmatprep.subr.bf16.mxu1 %v13639_v8  ;;  %v3525_v20 = vmax.f32 %v13727_v55, 0.0  ;;  %v9683_v1 = vld [vmem:[#allocation9 + $0xd8] ss:$12 sps:$4 sm:$0xff]  }
 0x5e8   :  { %v9684_v53 = vld [vmem:[#allocation9 + $0x184] ss:$12 sps:$4 sm:$0xff]  }
 0x5e9   :  { %4731 = vmatpush2.bf16.msra.mxu0 %v12157_v32 }
 0x5ea   :  { %8436 = vmatpush3.bf16.msra.mxu1 %v13640_v45  ;;  %4732 = vmatprep.subr.bf16.mxu0 %v12163_v34  ;;  %v13713_v45 = vld [vmem:[#allocation86_spill] sm:$0xff] }
 0x5eb   :  { %8437 = vmatprep.subr.bf16.mxu1 %v13641_v11  ;;  %v3349_v8 = vmax.f32 %v13713_v45, 0.0  ;;  %v13715_v34 = vld [vmem:[#allocation30_spill] sm:$0xff]  ;;  %v9663_v11 = vld [vmem:[#allocation9 + $0x4] ss:$12 sps:$4 sm:$0xff]  }
 0x5ec   :  { %v13728_v45 = vld [vmem:[#allocation29_spill] sm:$0xff] }
 0x5ed   :  { %4733 = vmatpush2.bf16.msra.mxu0 %v12169_v21  ;;  %v9659_v21 = vld [vmem:[#allocation9 + $0x34] ss:$12 sps:$4 sm:$0xff]  }
 0x5ee   :  { %8438 = vmatpush3.bf16.msra.mxu1 %v13642_v31  ;;  %4734 = vmatprep.subr.bf16.mxu0 %v12175_v59  ;;  %v13717_v59 = vld [vmem:[#allocation85_spill] sm:$0xff]  ;;  %v9665_v31 = vld [vmem:[#allocation9 + $0x16c] ss:$12 sps:$4 sm:$0xff]  }
 0x5ef   :  { %8439 = vmatprep.subr.bf16.mxu1 %v13643_v57 }
 0x5f1   :  { %4735 = vmatpush2.bf16.msra.mxu0 %v12181_v50  ;;  %v9661_v50 = vld [vmem:[#allocation9 + $0x1c] ss:$12 sps:$4 sm:$0xff]  }
 0x5f2   :  { %8440 = vmatpush3.bf16.msra.mxu1 %v13644_v41  ;;  %4736 = vmatprep.subr.bf16.mxu0 %v12187_v23  ;;  %v13714_v23 = vld [vmem:[#allocation36_spill] sm:$0xff] }
 0x5f3   :  { %8441 = vmatprep.subr.bf16.mxu1 %v13645_v28  ;;  %v3524_v63 = vmax.f32 %v13714_v23, 0.0  ;;  %v9685_v23 = vld [vmem:[#allocation9 + $0xc4] ss:$12 sps:$4 sm:$0xff]  }
 0x5f5   :  { %4737 = vmatpush2.bf16.msra.mxu0 %v12193_v25  ;;  %v3352_v25 = vpack.c.bf16 %v3349_v8, %v3349_v8  ;;  %v3523_v8 = vmax.f32 %v13728_v45, 0.0 }
 0x5f6   :  { %8442 = vmatpush3.bf16.msra.mxu1 %v13646_v40  ;;  %4738 = vmatprep.subr.bf16.mxu0 %v12199_v7  ;;  %v12682_v7 = vpack.c.bf16 %v3524_v63, %v3524_v63  ;;  %v9662_v40 = vld [vmem:[#allocation9 + $0x18] ss:$12 sps:$4 sm:$0xff]   ;;  %v9686_v63 = vld [vmem:[#allocation9 + $0x180] ss:$12 sps:$4 sm:$0xff]  }
 0x5f7   :  { %8443 = vmatprep.subr.bf16.mxu1 %v13647_v19  ;;  %v13718_v19 = vld [vmem:[#allocation24_spill] sm:$0xff] }
 0x5f9   :  { %4739 = vmatpush2.bf16.msra.mxu0 %v12205_v60  ;;  %v9660_v60 = vld [vmem:[#allocation9 + $0x30] ss:$12 sps:$4 sm:$0xff]  }
 0x5fa   :  { %8444 = vmatpush3.bf16.msra.mxu1 %v13668_v36  ;;  %4740 = vmatprep.subr.bf16.mxu0 %v13669_v61  ;;  %v13721_v36 = vld [vmem:[#allocation70_spill] sm:$0xff]  ;;  %v9666_v61 = vld [vmem:[#allocation9 + $0x168] ss:$12 sps:$4 sm:$0xff]  }
 0x5fb   :  { %8445 = vmatprep.subr.bf16.mxu1 %v12214_v6  ;;  %v13716_v6 = vld [vmem:[#allocation84_spill] sm:$0xff] }
 0x5fd   :  { %4741 = vmatpush2.bf16.msra.mxu0 %v13671_v12 }
 0x5fe   :  { %8446 = vmatpush3.bf16.msra.mxu1 %v13650_v56  ;;  %8595 = vmatprep.subr.bf16.mxu0 %v13635_v16 }
 0x5ff   :  { %4881 = vmatprep.subr.bf16.mxu1 %v12561_v39  ;;  %v13724_v39 = vld [vmem:[#allocation74_spill] sm:$0xff] }
 0x600   :  { %4743 = vmatmul.mubr.bf16.vlgmr.msra.gmra.mxu0 %v3352_v25 }
 0x601   :  { %v4443_v62 = vpop.f32.mrf.mxu1  ;;  %4825 = vmatmul.mubr.bf16.vlgmr.msra.gmra.mxu1 %v3352_v25  ;;  %8596 = vmatpush3.bf16.msra.mxu0 %v13672_v10  ;;  %v13722_v10 = vld [vmem:[#allocation71_spill] sm:$0xff]  ;;  %v12728_v25 = vpack.c.bf16 %v3525_v20, %v3525_v20 }
 0x602   :  { %4882 = vmatpush1.bf16.msra.mxu1 %v12569_v9  ;;  %4913 = vmatprep.mubr.bf16.mxu1 %v12682_v7  ;;  %v8991_v20 = vld [vmem:[#allocation12 + $0x154] ss:$8 sps:$4 sm:$0xff]  }
 0x603   :  { %v4445_v2 = vpop.f32.mrf.mxu1  ;;  %8597 = vmatprep.subr.bf16.mxu0 %v13635_v16  ;;  %4883 = vmatprep.subr.bf16.mxu1 %v12578_v22  ;;  %v13725_v22 = vld [vmem:[#allocation75_spill] sm:$0xff] }
 0x604   :  { %8611 = vmatprep.mubr.msk.bf16.mxu0 %vm9942_vm0, %v13635_v16 }
 0x605   :  { %v4447_v56 = vpop.f32.mrf.mxu1  ;;  %8598 = vmatpush3.bf16.msra.mxu0 %v13673_v35 }
 0x606   :  { %4884 = vmatpush1.bf16.msra.mxu1 %v12587_v58  ;;  %8599 = vmatprep.subr.bf16.mxu0 %v13635_v16  ;;  %v9669_v58 = vld [vmem:[#allocation9 + $0x13c] ss:$12 sps:$4 sm:$0xff]   ;;  %v12730_v56 = vpack.c.bf16 %v3523_v8, %v3523_v8 }
 0x607   :  { %v4448_v32 = vpop.f32.mrf.mxu1  ;;  %4885 = vmatprep.subr.bf16.mxu1 %v12593_v54  ;;  %v9667_v54 = vld [vmem:[#allocation9 + $0x154] ss:$12 sps:$4 sm:$0xff]  }
 0x608   :  { %v8986_v8 = vld [vmem:[#allocation12 + $0x50] ss:$8 sps:$4 sm:$0xff]  }
 0x609   :  { %8600 = vmatpush3.bf16.msra.mxu0 %v13674_v49 }
 0x60a   :  { %4886 = vmatpush1.bf16.msra.mxu1 %v12599_v33  ;;  %8601 = vmatprep.subr.bf16.mxu0 %v13635_v16  ;;  %v9671_v33 = vld [vmem:[#allocation9 + $0x124] ss:$12 sps:$4 sm:$0xff]  }
 0x60b   :  { %4887 = vmatprep.subr.bf16.mxu1 %v12605_v5  ;;  %v13726_v5 = vld [vmem:[#allocation76_spill] sm:$0xff] }
 0x60d   :  { %8602 = vmatpush3.bf16.msra.mxu0 %v13715_v34 }
 0x60e   :  { %4888 = vmatpush1.bf16.msra.mxu1 %v12611_v52  ;;  %8603 = vmatprep.subr.bf16.mxu0 %v13635_v16  ;;  %v9673_v52 = vld [vmem:[#allocation9 + $0x10c] ss:$12 sps:$4 sm:$0xff]  }
 0x60f   :  { %4889 = vmatprep.subr.bf16.mxu1 %v12617_v24  ;;  %v9670_v24 = vld [vmem:[#allocation9 + $0x138] ss:$12 sps:$4 sm:$0xff]  }
 0x611   :  { %8604 = vmatpush3.bf16.msra.mxu0 %v13716_v6  ;;  %v9689_v6 = vld [vmem:[#allocation9 + $0xb0] ss:$12 sps:$4 sm:$0xff]  }
 0x612   :  { %4890 = vmatpush1.bf16.msra.mxu1 %v12623_v18  ;;  %8605 = vmatprep.subr.bf16.mxu0 %v13635_v16  ;;  %v13719_v18 = vld [vmem:[#allocation66_spill] sm:$0xff] }
 0x613   :  { %4891 = vmatprep.subr.bf16.mxu1 %v9659_v21  ;;  %v9690_v21 = vld [vmem:[#allocation9 + $0x230] ss:$12 sps:$4 sm:$0xff]  }
 0x615   :  { %8606 = vmatpush3.bf16.msra.mxu0 %v13717_v59 }
 0x616   :  { %4892 = vmatpush1.bf16.msra.mxu1 %v9660_v60  ;;  %8607 = vmatprep.subr.bf16.mxu0 %v13635_v16  ;;  %v9691_v60 = vld [vmem:[#allocation9 + $0x158] ss:$12 sps:$4 sm:$0xff]  }
 0x617   :  { %4893 = vmatprep.subr.bf16.mxu1 %v9661_v50 }
 0x619   :  { %8608 = vmatpush3.bf16.msra.mxu0 %v13718_v19  ;;  %v9692_v19 = vld [vmem:[#allocation9 + $0x98] ss:$12 sps:$4 sm:$0xff]  }
 0x61a   :  { %4894 = vmatpush1.bf16.msra.mxu1 %v9662_v40  ;;  %8609 = vmatprep.subr.bf16.mxu0 %v13635_v16  ;;  %v9693_v40 = vld [vmem:[#allocation9 + $0x218] ss:$12 sps:$4 sm:$0xff]  }
 0x61b   :  { %4895 = vmatprep.subr.bf16.mxu1 %v9663_v11 }
 0x61d   :  { %8610 = vmatpush3.bf16.msra.mxu0 %v13719_v18  ;;  %v9694_v18 = vld [vmem:[#allocation9 + $0x140] ss:$12 sps:$4 sm:$0xff]  }
 0x61e   :  { %4896 = vmatpush1.bf16.msra.mxu1 %v9664_v29  ;;  %4922 = vmatprep.subr.bf16.mxu0 %v13720_v13  ;;  %v9696_v29 = vld [vmem:[#allocation9 + $0x200] ss:$12 sps:$4 sm:$0xff]   ;;  %v9697_v13 = vld [vmem:[#allocation9 + $0x128] ss:$12 sps:$4 sm:$0xff]  }
 0x61f   :  { %4897 = vmatprep.subr.bf16.mxu1 %v9665_v31  ;;  %v9698_v31 = vld [vmem:[#allocation9 + $0x68] ss:$12 sps:$4 sm:$0xff]  }
 0x620   :  { %v4402_v57 = vpop.f32.mrf.mxu0  ;;  %8612 = vmatmul.mubr.bf16.vlgmr.msra.gmra.mxu0 %v12641_v42  ;;  %v9675_v42 = vld [vmem:[#allocation9 + $0x108] ss:$12 sps:$4 sm:$0xff]  }
 0x621   :  { %v12713_v41 = vadd.f32 %v4443_v62, %v4402_v57  ;;  %v8385_v28 = vpop.f32.mrf.mxu1  ;;  %4923 = vmatpush1.bf16.msra.mxu0 %v13721_v36  ;;  %4954 = vmatprep.mubr.bf16.mxu0 %v13681_v15  ;;  %v9687_v62 = vld [vmem:[#allocation9 + $0xc0] ss:$12 sps:$4 sm:$0xff]   ;;  %v9699_v57 = vld [vmem:[#allocation9 + $0x1e8] ss:$12 sps:$4 sm:$0xff]   ;;  %v9701_v36 = vld [vmem:[#allocation9 + $0x50] ss:$12 sps:$4 sm:$0xff]  }
 0x622   :  { %4898 = vmatpush2.bf16.msra.mxu1 %v9666_v61  ;;  %v4404_v12 = vpop.f32.mrf.mxu0  ;;  %4924 = vmatprep.subr.bf16.mxu0 %v13722_v10  ;;  %v9702_v61 = vld [vmem:[#allocation9 + $0x1d0] ss:$12 sps:$4 sm:$0xff]   ;;  %v12744_v10 = vld [vmem:[#allocation10] sm:$0x7] }
 0x623   :  { %v12718_v35 = vadd.f32 %v4445_v2, %v4404_v12  ;;  %v8386_v49 = vpop.f32.mrf.mxu1  ;;  %4899 = vmatprep.subr.bf16.mxu1 %v9667_v54  ;;  %v9688_v2 = vld [vmem:[#allocation9 + $0x170] ss:$12 sps:$4 sm:$0xff]   ;;  %v9703_v12 = vld [vmem:[#allocation9 + $0xf8] ss:$12 sps:$4 sm:$0xff]  }
 0x624   :  { %v8387_v9 = vadd.f32 %v8386_v49, %v8385_v28  ;;  %v4406_v48 = vpop.f32.mrf.mxu0  ;;  %v9700_v28 = vld [vmem:[#allocation9 + $0x110] ss:$12 sps:$4 sm:$0xff]   ;;  %v13729_v49 = vld [vmem:[#allocation43_spill] sm:$0xff] }
 0x625   :  { %v8388_v4 = vpop.f32.mrf.mxu1  ;;  %4925 = vmatpush1.bf16.msra.mxu0 %v13723_v17  ;;  %v12749_v54 = vrot.slane %v12744_v10, %v13729_v49  ;;  %v9705_v48 = vld [vmem:[#allocation9 + $0x1b8] ss:$12 sps:$4 sm:$0xff]   ;;  %v13730_v17 = vld [vmem:[#allocation64_spill] sm:$0xff] }
 0x626   :  { %4900 = vmatpush2.bf16.msra.mxu1 %v9668_v37  ;;  %v4407_v38 = vpop.f32.mrf.mxu0  ;;  %4926 = vmatprep.subr.bf16.mxu0 %v13724_v39  ;;  %v9706_v4 = vld [vmem:[#allocation9 + $0xe0] ss:$12 sps:$4 sm:$0xff]  }
 0x627   :  { %v8389_v51 = vpop.f32.mrf.mxu1  ;;  %4901 = vmatprep.subr.bf16.mxu1 %v9669_v58  ;;  %v4189_v37 = vadd.f32 %v13730_v17, %v12749_v54  ;;  %v9707_v38 = vld [vmem:[#allocation9 + $0x20] ss:$12 sps:$4 sm:$0xff]  }
 0x628   :  { %v9708_v39 = vld [vmem:[#allocation9 + $0x1a0] ss:$12 sps:$4 sm:$0xff]   ;;  %v9709_v51 = vld [vmem:[#allocation9 + $0xc8] ss:$12 sps:$4 sm:$0xff]  }
 0x629   :  { %4927 = vmatpush1.bf16.msra.mxu0 %v13725_v22  ;;  %v8976_v58 = vld [vmem:[#allocation12 + $0x74] ss:$8 sps:$4 sm:$0xff]   ;;  %v9016_v17 = vld [vmem:[#allocation12] ss:$8 sps:$4 sm:$0xff]  }
 0x62a   :  { %4902 = vmatpush2.bf16.msra.mxu1 %v9670_v24  ;;  %4928 = vmatprep.subr.bf16.mxu0 %v12608_v26  ;;  %v9679_v26 = vld [vmem:[#allocation9 + $0xf0] ss:$12 sps:$4 sm:$0xff]   ;;  %v8979_v22 = vld [vmem:[#allocation12 + $0x174] ss:$8 sps:$4 sm:$0xff]   ;;  %v4192_v24 = vmax.f32 %v4189_v37, 0.0 }
 0x62b   :  { %4903 = vmatprep.subr.bf16.mxu1 %v9671_v33  ;;  %v9710_v33 = vld [vmem:[#allocation9 + $0x8] ss:$12 sps:$4 sm:$0xff]   ;;  %v9019_v37 = vld [vmem:[#allocation12 + $0x100] ss:$8 sps:$4 sm:$0xff]  }
 0x62d   :  { %4929 = vmatpush1.bf16.msra.mxu0 %v12614_v27  ;;  %v9681_v27 = vld [vmem:[#allocation9 + $0xdc] ss:$12 sps:$4 sm:$0xff]  }
 0x62e   :  { %4904 = vmatpush2.bf16.msra.mxu1 %v9672_v3  ;;  %4930 = vmatprep.subr.bf16.mxu0 %v13726_v5  ;;  %v8974_v3 = vld [vmem:[#allocation12 + $0x70] ss:$8 sps:$4 sm:$0xff]  }
 0x62f   :  { %4905 = vmatprep.subr.bf16.mxu1 %v9673_v52  ;;  %v9711_v5 = vld [vmem:[#allocation9 + $0x188] ss:$12 sps:$4 sm:$0xff]  }
 0x630   :  { %v8977_v52 = vld [vmem:[#allocation12 + $0x170] ss:$8 sps:$4 sm:$0xff]  }
 0x631   :  { %4931 = vmatpush1.bf16.msra.mxu0 %v9674_v46  ;;  %v8982_v46 = vld [vmem:[#allocation12 + $0x64] ss:$8 sps:$4 sm:$0xff]  }
 0x632   :  { %4906 = vmatpush2.bf16.msra.mxu1 %v9675_v42  ;;  %4932 = vmatprep.subr.bf16.mxu0 %v9676_v30  ;;  %v8985_v42 = vld [vmem:[#allocation12 + $0x164] ss:$8 sps:$4 sm:$0xff]   ;;  %v4195_v30 = vpack.c.bf16 %v4192_v24, %v4192_v24  ;;  %v9025_v24 = vld [vmem:[#allocation12 + $0x1f0] ss:$8 sps:$4 sm:$0xff]  }
 0x633   :  { %4907 = vmatprep.subr.bf16.mxu1 %v9677_v14 }
 0x635   :  { %4933 = vmatpush1.bf16.msra.mxu0 %v9678_v43 }
 0x636   :  { %4908 = vmatpush2.bf16.msra.mxu1 %v9679_v26  ;;  %4934 = vmatprep.subr.bf16.mxu0 %v9680_v47 }
 0x637   :  { %4909 = vmatprep.subr.bf16.mxu1 %v9681_v27  ;;  %v8983_v27 = vld [vmem:[#allocation12 + $0x160] ss:$8 sps:$4 sm:$0xff]  }
 0x639   :  { %4935 = vmatpush1.bf16.msra.mxu0 %v9682_v0  ;;  %v8988_v0 = vld [vmem:[#allocation12 + $0x54] ss:$8 sps:$4 sm:$0xff]  }
 0x63a   :  { %4910 = vmatpush2.bf16.msra.mxu1 %v9683_v1  ;;  %4936 = vmatprep.subr.bf16.mxu0 %v9684_v53 }
 0x63b   :  { %4911 = vmatprep.subr.bf16.mxu1 %v9685_v23 }
 0x63d   :  { %4937 = vmatpush1.bf16.msra.mxu0 %v9686_v63  ;;  %v8989_v63 = vld [vmem:[#allocation12 + $0x150] ss:$8 sps:$4 sm:$0xff]  }
 0x63e   :  { %4912 = vmatpush2.bf16.msra.mxu1 %v9687_v62  ;;  %8462 = vmatprep.subr.bf16.mxu0 %v9688_v2  ;;  %v8997_v2 = vld [vmem:[#allocation12 + $0x144] ss:$8 sps:$4 sm:$0xff]  }
 0x63f   :  { %8615 = vmatprep.subr.bf16.mxu1 %v13635_v16 }
 0x640   :  { %v4524_v32 = vpop.f32.mrf.mxu0  ;;  %4955 = vmatmul.mubr.bf16.vlgmr.msra.gmra.mxu0 %v12728_v25 }
 0x641   :  { %v12734_v34 = vadd.f32 %v8387_v9, %v4524_v32  ;;  %4914 = vmatmul.mubr.bf16.vlgmr.msra.gmra.mxu1 %v12730_v56  ;;  %8463 = vmatpush3.bf16.msra.mxu0 %v9689_v6  ;;  %v9704_v9 = vld [vmem:[#allocation9 + $0x38] ss:$12 sps:$4 sm:$0xff]  }
 0x642   :  { %4995 = vmatprep.mubr.bf16.mxu0 %v12682_v7  ;;  %8616 = vmatpush3.bf16.msra.mxu1 %v9690_v21  ;;  %v8573_v59 = vpop.f32.mrf.mxu0  ;;  %v9695_v7 = vld [vmem:[#allocation9 + $0x80] ss:$12 sps:$4 sm:$0xff]  }
 0x643   :  { %8464 = vmatprep.subr.bf16.mxu0 %v9691_v60  ;;  %8617 = vmatprep.subr.bf16.mxu1 %v13635_v16  ;;  %v8995_v32 = vld [vmem:[#allocation12 + $0x140] ss:$8 sps:$4 sm:$0xff]   ;;  %v9000_v6 = vld [vmem:[#allocation12 + $0x34] ss:$8 sps:$4 sm:$0xff]   ;;  %v8998_v59 = vld [vmem:[#allocation12 + $0x30] ss:$8 sps:$4 sm:$0xff]  }
 0x644   :  { %v4527_v50 = vpop.f32.mrf.mxu0  ;;  %8631 = vmatprep.mubr.msk.bf16.mxu1 %vm9942_vm0, %v13635_v16  ;;  %v9003_v21 = vld [vmem:[#allocation12 + $0x134] ss:$8 sps:$4 sm:$0xff]   ;;  %v9001_v60 = vld [vmem:[#allocation12 + $0x130] ss:$8 sps:$4 sm:$0xff]  }
 0x645   :  { %8465 = vmatpush3.bf16.msra.mxu0 %v9692_v19  ;;  %v9006_v50 = vld [vmem:[#allocation12 + $0x24] ss:$8 sps:$4 sm:$0xff]  }
 0x646   :  { %8618 = vmatpush3.bf16.msra.mxu1 %v9693_v40  ;;  %v8574_v11 = vpop.f32.mrf.mxu0  ;;  %8466 = vmatprep.subr.bf16.mxu0 %v9694_v18  ;;  %v9009_v19 = vld [vmem:[#allocation12 + $0x124] ss:$8 sps:$4 sm:$0xff]   ;;  %v9004_v40 = vld [vmem:[#allocation12 + $0x20] ss:$8 sps:$4 sm:$0xff]   ;;  %v9012_v18 = vld [vmem:[#allocation12 + $0x14] ss:$8 sps:$4 sm:$0xff]  }
 0x647   :  { %8619 = vmatprep.subr.bf16.mxu1 %v13635_v16  ;;  %v9007_v11 = vld [vmem:[#allocation12 + $0x120] ss:$8 sps:$4 sm:$0xff]  }
 0x649   :  { %8467 = vmatpush3.bf16.msra.mxu0 %v9695_v7  ;;  %v13731_v7 = vld [vmem:[#allocation41_spill] sm:$0xff] }
 0x64a   :  { %8620 = vmatpush3.bf16.msra.mxu1 %v9696_v29  ;;  %8468 = vmatprep.subr.bf16.mxu0 %v9697_v13  ;;  %v13732_v29 = vsub.s32 2, %v13731_v7  ;;  %v9060_v7 = vld [vmem:[#allocation12 + $0x94] ss:$8 sps:$4 sm:$0xff]  }
 0x64b   :  { %8621 = vmatprep.subr.bf16.mxu1 %v13635_v16 }
 0x64c   :  { %v12765_v13 = vrot.slane %v12744_v10, %v13732_v29  ;;  %v9063_v29 = vld [vmem:[#allocation12 + $0x194] ss:$8 sps:$4 sm:$0xff]  }
 0x64d   :  { %8469 = vmatpush3.bf16.msra.mxu0 %v9698_v31  ;;  %v9015_v31 = vld [vmem:[#allocation12 + $0x114] ss:$8 sps:$4 sm:$0xff]  }
 0x64e   :  { %8622 = vmatpush3.bf16.msra.mxu1 %v9699_v57  ;;  %8470 = vmatprep.subr.bf16.mxu0 %v9700_v28  ;;  %v9010_v57 = vld [vmem:[#allocation12 + $0x10] ss:$8 sps:$4 sm:$0xff]  }
 0x64f   :  { %8623 = vmatprep.subr.bf16.mxu1 %v13635_v16  ;;  %v9013_v28 = vld [vmem:[#allocation12 + $0x110] ss:$8 sps:$4 sm:$0xff]  }
 0x651   :  { %8471 = vmatpush3.bf16.msra.mxu0 %v9701_v36  ;;  %v9018_v36 = vld [vmem:[#allocation12 + $0x4] ss:$8 sps:$4 sm:$0xff]  }
 0x652   :  { %8624 = vmatpush3.bf16.msra.mxu1 %v9702_v61  ;;  %8472 = vmatprep.subr.bf16.mxu0 %v9703_v12  ;;  %v13733_v61 = vld [vmem:[#allocation65_spill] sm:$0xff] }
 0x653   :  { %8625 = vmatprep.subr.bf16.mxu1 %v13635_v16  ;;  %v4190_v12 = vadd.f32 %v13733_v61, %v12765_v13  ;;  %v9066_v61 = vld [vmem:[#allocation12 + $0x84] ss:$8 sps:$4 sm:$0xff]  }
 0x655   :  { %8473 = vmatpush3.bf16.msra.mxu0 %v9704_v9  ;;  %v9021_v9 = vld [vmem:[#allocation12 + $0x104] ss:$8 sps:$4 sm:$0xff]  }
 0x656   :  { %8626 = vmatpush3.bf16.msra.mxu1 %v9705_v48  ;;  %8474 = vmatprep.subr.bf16.mxu0 %v9706_v4  ;;  %v13734_v48 = vld [vmem:[#allocation72_spill] sm:$0xff] }
 0x657   :  { %8627 = vmatprep.subr.bf16.mxu1 %v13635_v16  ;;  %v4360_v4 = vadd.f32 %v13734_v48, %v12749_v54  ;;  %v9067_v48 = vld [vmem:[#allocation12 + $0x180] ss:$8 sps:$4 sm:$0xff]  }
 0x659   :  { %8475 = vmatpush3.bf16.msra.mxu0 %v9707_v38  ;;  %v9024_v38 = vld [vmem:[#allocation12 + $0xf4] ss:$8 sps:$4 sm:$0xff]  }
 0x65a   :  { %8628 = vmatpush3.bf16.msra.mxu1 %v9708_v39  ;;  %8476 = vmatprep.subr.bf16.mxu0 %v9709_v51  ;;  %v4193_v39 = vmax.f32 %v4190_v12, 0.0  ;;  %v9027_v51 = vld [vmem:[#allocation12 + $0x1f4] ss:$8 sps:$4 sm:$0xff]   ;;  %v9069_v12 = vld [vmem:[#allocation12 + $0x184] ss:$8 sps:$4 sm:$0xff]  }
 0x65b   :  { %8629 = vmatprep.subr.bf16.mxu1 %v13635_v16  ;;  %v8980_v16 = vld [vmem:[#allocation12 + $0x60] ss:$8 sps:$4 sm:$0xff]  }
 0x65d   :  { %8477 = vmatpush3.bf16.msra.mxu0 %v9710_v33  ;;  %v4196_v33 = vpack.c.bf16 %v4193_v39, %v4193_v39  ;;  %v9070_v39 = vld [vmem:[#allocation12 + $0x270] ss:$8 sps:$4 sm:$0xff]  }
 0x65e   :  { %8630 = vmatpush3.bf16.msra.mxu1 %v9711_v5  ;;  %5352 = vmatprep.subr.bf16.mxu0 %v8976_v58  ;;  %v4363_v58 = vmax.f32 %v4360_v4, 0.0  ;;  %v9033_v5 = vld [vmem:[#allocation12 + $0x1e4] ss:$8 sps:$4 sm:$0xff]   ;;  %v9075_v4 = vld [vmem:[#allocation12 + $0x2f4] ss:$8 sps:$4 sm:$0xff]  }
 0x65f   :  { %5393 = vmatprep.subr.bf16.mxu1 %v8979_v22  ;;  %v9022_v22 = vld [vmem:[#allocation12 + $0xf0] ss:$8 sps:$4 sm:$0xff]  }
 0x660   :  { %v4614_v14 = vpop.f32.mrf.mxu0  ;;  %4996 = vmatmul.mubr.bf16.vlgmr.msra.gmra.mxu0 %v12730_v56  ;;  %v8992_v56 = vld [vmem:[#allocation12 + $0x40] ss:$8 sps:$4 sm:$0xff]  }
 0x661   :  { %v4573_v43 = vpop.f32.mrf.mxu1  ;;  %8632 = vmatmul.mubr.bf16.vlgmr.msra.gmra.mxu1 %v12728_v25  ;;  %5353 = vmatpush1.bf16.msra.mxu0 %v8974_v3  ;;  %v8994_v25 = vld [vmem:[#allocation12 + $0x44] ss:$8 sps:$4 sm:$0xff]  }
 0x662   :  { %v12757_v26 = vadd.f32 %v4614_v14, %v4573_v43  ;;  %5384 = vmatprep.mubr.bf16.mxu0 %v4195_v30  ;;  %5394 = vmatpush1.bf16.msra.mxu1 %v8977_v52  ;;  %v4616_v47 = vpop.f32.mrf.mxu0  ;;  %v9030_v3 = vld [vmem:[#allocation12 + $0xe4] ss:$8 sps:$4 sm:$0xff]   ;;  %v4366_v52 = vpack.c.bf16 %v4363_v58, %v4363_v58  ;;  %v9028_v30 = vld [vmem:[#allocation12 + $0xe0] ss:$8 sps:$4 sm:$0xff]  }
 0x663   :  { %v4575_v55 = vpop.f32.mrf.mxu1  ;;  %5354 = vmatprep.subr.bf16.mxu0 %v8982_v46  ;;  %5395 = vmatprep.subr.bf16.mxu1 %v8985_v42  ;;  %v9031_v43 = vld [vmem:[#allocation12 + $0x1e0] ss:$8 sps:$4 sm:$0xff]   ;;  %v9078_v58 = vld [vmem:[#allocation12 + $0x264] ss:$8 sps:$4 sm:$0xff]  }
 0x664   :  { %v12759_v1 = vadd.f32 %v4616_v47, %v4575_v55  ;;  %v4618_v53 = vpop.f32.mrf.mxu0  ;;  %5425 = vmatprep.mubr.bf16.mxu1 %v13681_v15 }
 0x665   :  { %v4577_v45 = vpop.f32.mrf.mxu1  ;;  %5355 = vmatpush1.bf16.msra.mxu0 %v8980_v16  ;;  %v9036_v16 = vld [vmem:[#allocation12 + $0xd4] ss:$8 sps:$4 sm:$0xff]  }
 0x666   :  { %5396 = vmatpush1.bf16.msra.mxu1 %v8983_v27  ;;  %v4619_v23 = vpop.f32.mrf.mxu0  ;;  %5356 = vmatprep.subr.bf16.mxu0 %v8988_v0  ;;  %v9039_v0 = vld [vmem:[#allocation12 + $0x1d4] ss:$8 sps:$4 sm:$0xff]   ;;  %v9034_v45 = vld [vmem:[#allocation12 + $0xd0] ss:$8 sps:$4 sm:$0xff]  }
 0x667   :  { %v4578_v62 = vpop.f32.mrf.mxu1  ;;  %5397 = vmatprep.subr.bf16.mxu1 %v8991_v20  ;;  %v9037_v23 = vld [vmem:[#allocation12 + $0x1d0] ss:$8 sps:$4 sm:$0xff]  }
 0x668   :  { %v9045_v62 = vld [vmem:[#allocation12 + $0x1c4] ss:$8 sps:$4 sm:$0xff]  }
 0x669   :  { %5357 = vmatpush1.bf16.msra.mxu0 %v8986_v8 }
 0x66a   :  { %5398 = vmatpush1.bf16.msra.mxu1 %v8989_v63  ;;  %5358 = vmatprep.subr.bf16.mxu0 %v8994_v25  ;;  %v9042_v63 = vld [vmem:[#allocation12 + $0xc4] ss:$8 sps:$4 sm:$0xff]  }
 0x66b   :  { %5399 = vmatprep.subr.bf16.mxu1 %v8997_v2  ;;  %v9040_v2 = vld [vmem:[#allocation12 + $0xc0] ss:$8 sps:$4 sm:$0xff]  }
 0x66d   :  { %5359 = vmatpush1.bf16.msra.mxu0 %v8992_v56  ;;  %v9043_v56 = vld [vmem:[#allocation12 + $0x1c0] ss:$8 sps:$4 sm:$0xff]  }
 0x66e   :  { %5400 = vmatpush1.bf16.msra.mxu1 %v8995_v32  ;;  %5360 = vmatprep.subr.bf16.mxu0 %v9000_v6  ;;  %v9048_v32 = vld [vmem:[#allocation12 + $0xb4] ss:$8 sps:$4 sm:$0xff]  }
 0x66f   :  { %5401 = vmatprep.subr.bf16.mxu1 %v9003_v21  ;;  %v9051_v6 = vld [vmem:[#allocation12 + $0x1b4] ss:$8 sps:$4 sm:$0xff]   ;;  %v9046_v21 = vld [vmem:[#allocation12 + $0xb0] ss:$8 sps:$4 sm:$0xff]  }
 0x671   :  { %5361 = vmatpush1.bf16.msra.mxu0 %v8998_v59  ;;  %v9049_v59 = vld [vmem:[#allocation12 + $0x1b0] ss:$8 sps:$4 sm:$0xff]  }
 0x672   :  { %5402 = vmatpush1.bf16.msra.mxu1 %v9001_v60  ;;  %5362 = vmatprep.subr.bf16.mxu0 %v9006_v50  ;;  %v9054_v60 = vld [vmem:[#allocation12 + $0xa4] ss:$8 sps:$4 sm:$0xff]  }
 0x673   :  { %5403 = vmatprep.subr.bf16.mxu1 %v9009_v19  ;;  %v9057_v50 = vld [vmem:[#allocation12 + $0x1a4] ss:$8 sps:$4 sm:$0xff]   ;;  %v9052_v19 = vld [vmem:[#allocation12 + $0xa0] ss:$8 sps:$4 sm:$0xff]  }
 0x675   :  { %5363 = vmatpush1.bf16.msra.mxu0 %v9004_v40  ;;  %v13735_v40 = vld [vmem:[#allocation42_spill] sm:$0xff] }
 0x676   :  { %5404 = vmatpush1.bf16.msra.mxu1 %v9007_v11  ;;  %5364 = vmatprep.subr.bf16.mxu0 %v9012_v18  ;;  %v12775_v11 = vrot.slane %v12744_v10, %v13735_v40  ;;  %v9055_v18 = vld [vmem:[#allocation12 + $0x1a0] ss:$8 sps:$4 sm:$0xff]  }
 0x677   :  { %5405 = vmatprep.subr.bf16.mxu1 %v9015_v31  ;;  %v9058_v31 = vld [vmem:[#allocation12 + $0x90] ss:$8 sps:$4 sm:$0xff]   ;;  %v9064_v10 = vld [vmem:[#allocation12 + $0x80] ss:$8 sps:$4 sm:$0xff]  }
 0x679   :  { %5365 = vmatpush1.bf16.msra.mxu0 %v9010_v57  ;;  %v13736_v57 = vld [vmem:[#allocation63_spill] sm:$0xff] }
 0x67a   :  { %5406 = vmatpush1.bf16.msra.mxu1 %v9013_v28  ;;  %5366 = vmatprep.subr.bf16.mxu0 %v9018_v36  ;;  %v4188_v28 = vadd.f32 %v13736_v57, %v12775_v11  ;;  %v9061_v36 = vld [vmem:[#allocation12 + $0x190] ss:$8 sps:$4 sm:$0xff]   ;;  %v9123_v57 = vld [vmem:[#allocation12 + $0x474] ss:$8 sps:$4 sm:$0xff]  }
 0x67b   :  { %5407 = vmatprep.subr.bf16.mxu1 %v9021_v9 }
 0x67c   :  { %v4191_v9 = vmax.f32 %v4188_v28, 0.0 }
 0x67d   :  { %5367 = vmatpush1.bf16.msra.mxu0 %v9016_v17  ;;  %v9072_v17 = vld [vmem:[#allocation12 + $0x274] ss:$8 sps:$4 sm:$0xff]  }
 0x67e   :  { %5408 = vmatpush1.bf16.msra.mxu1 %v9019_v37  ;;  %5368 = vmatprep.subr.bf16.mxu0 %v9024_v38  ;;  %v9073_v37 = vld [vmem:[#allocation12 + $0x2f0] ss:$8 sps:$4 sm:$0xff]   ;;  %v4194_v38 = vpack.c.bf16 %v4191_v9, %v4191_v9  ;;  %v9129_v9 = vld [vmem:[#allocation12 + $0x464] ss:$8 sps:$4 sm:$0xff]  }
 0x67f   :  { %5725 = vmatprep.subr.bf16.mxu1 %v9027_v51  ;;  %v9081_v51 = vld [vmem:[#allocation12 + $0x2e4] ss:$8 sps:$4 sm:$0xff]  }
 0x680   :  { %v8416_v46 = vpop.f32.mrf.mxu0 }
 0x681   :  { %v4695_v42 = vpop.f32.mrf.mxu1  ;;  %5426 = vmatmul.mubr.bf16.vlgmr.msra.gmra.mxu1 %v4196_v33  ;;  %5369 = vmatpush2.bf16.msra.mxu0 %v9022_v22  ;;  %v9076_v33 = vld [vmem:[#allocation12 + $0x260] ss:$8 sps:$4 sm:$0xff]  }
 0x682   :  { %5726 = vmatpush1.bf16.msra.mxu1 %v9025_v24  ;;  %5757 = vmatprep.mubr.bf16.mxu1 %v4366_v52  ;;  %v8417_v14 = vpop.f32.mrf.mxu0  ;;  %v9079_v24 = vld [vmem:[#allocation12 + $0x2e0] ss:$8 sps:$4 sm:$0xff]   ;;  %v9084_v52 = vld [vmem:[#allocation12 + $0x254] ss:$8 sps:$4 sm:$0xff]  }
 0x683   :  { %v8418_v47 = vadd.f32 %v8417_v14, %v8416_v46  ;;  %v8593_v27 = vpop.f32.mrf.mxu1  ;;  %5370 = vmatprep.subr.bf16.mxu0 %v9030_v3  ;;  %5727 = vmatprep.subr.bf16.mxu1 %v9033_v5  ;;  %v9087_v3 = vld [vmem:[#allocation12 + $0x2d4] ss:$8 sps:$4 sm:$0xff]   ;;  %v9093_v14 = vld [vmem:[#allocation12 + $0x2c4] ss:$8 sps:$4 sm:$0xff]  }
 0x684   :  { %v8419_v55 = vpop.f32.mrf.mxu0  ;;  %v9088_v27 = vld [vmem:[#allocation12 + $0x240] ss:$8 sps:$4 sm:$0xff]  }
 0x685   :  { %v12771_v20 = vadd.f32 %v8418_v47, %v4695_v42  ;;  %v4698_v53 = vpop.f32.mrf.mxu1  ;;  %5371 = vmatpush2.bf16.msra.mxu0 %v9028_v30  ;;  %v9085_v42 = vld [vmem:[#allocation12 + $0x2d0] ss:$8 sps:$4 sm:$0xff]   ;;  %v9091_v47 = vld [vmem:[#allocation12 + $0x2c0] ss:$8 sps:$4 sm:$0xff]   ;;  %v9096_v55 = vld [vmem:[#allocation12 + $0x234] ss:$8 sps:$4 sm:$0xff]  }
 0x686   :  { %5728 = vmatpush1.bf16.msra.mxu1 %v9031_v43  ;;  %v8420_v8 = vpop.f32.mrf.mxu0  ;;  %5372 = vmatprep.subr.bf16.mxu0 %v9036_v16  ;;  %v9082_v30 = vld [vmem:[#allocation12 + $0x250] ss:$8 sps:$4 sm:$0xff]   ;;  %v9090_v16 = vld [vmem:[#allocation12 + $0x244] ss:$8 sps:$4 sm:$0xff]  }
 0x687   :  { %v8594_v25 = vpop.f32.mrf.mxu1  ;;  %5729 = vmatprep.subr.bf16.mxu1 %v9039_v0  ;;  %v9099_v0 = vld [vmem:[#allocation12 + $0x2b4] ss:$8 sps:$4 sm:$0xff]   ;;  %v9097_v53 = vld [vmem:[#allocation12 + $0x2b0] ss:$8 sps:$4 sm:$0xff]   ;;  %v9105_v8 = vld [vmem:[#allocation12 + $0x2a4] ss:$8 sps:$4 sm:$0xff]  }
 0x688   :  { %v9100_v25 = vld [vmem:[#allocation12 + $0x220] ss:$8 sps:$4 sm:$0xff]  }
 0x689   :  { %5373 = vmatpush2.bf16.msra.mxu0 %v9034_v45  ;;  %v9094_v45 = vld [vmem:[#allocation12 + $0x230] ss:$8 sps:$4 sm:$0xff]  }
 0x68a   :  { %5730 = vmatpush1.bf16.msra.mxu1 %v9037_v23  ;;  %5374 = vmatprep.subr.bf16.mxu0 %v9042_v63  ;;  %v9102_v23 = vld [vmem:[#allocation12 + $0x224] ss:$8 sps:$4 sm:$0xff]   ;;  %v9103_v63 = vld [vmem:[#allocation12 + $0x2a0] ss:$8 sps:$4 sm:$0xff]  }
 0x68b   :  { %5731 = vmatprep.subr.bf16.mxu1 %v9045_v62  ;;  %v9111_v62 = vld [vmem:[#allocation12 + $0x294] ss:$8 sps:$4 sm:$0xff]  }
 0x68d   :  { %5375 = vmatpush2.bf16.msra.mxu0 %v9040_v2  ;;  %v9108_v2 = vld [vmem:[#allocation12 + $0x214] ss:$8 sps:$4 sm:$0xff]  }
 0x68e   :  { %5732 = vmatpush1.bf16.msra.mxu1 %v9043_v56  ;;  %5376 = vmatprep.subr.bf16.mxu0 %v9048_v32  ;;  %v9109_v56 = vld [vmem:[#allocation12 + $0x290] ss:$8 sps:$4 sm:$0xff]   ;;  %v4361_v32 = vadd.f32 %v12650_v44, %v12765_v13 }
 0x68f   :  { %5733 = vmatprep.subr.bf16.mxu1 %v9051_v6  ;;  %v9106_v6 = vld [vmem:[#allocation12 + $0x210] ss:$8 sps:$4 sm:$0xff]  }
 0x691   :  { %5377 = vmatpush2.bf16.msra.mxu0 %v9046_v21  ;;  %v9117_v21 = vld [vmem:[#allocation12 + $0x284] ss:$8 sps:$4 sm:$0xff]  }
 0x692   :  { %5734 = vmatpush1.bf16.msra.mxu1 %v9049_v59  ;;  %5378 = vmatprep.subr.bf16.mxu0 %v9054_v60  ;;  %v13737_v59 = vld [vmem:[#allocation69_spill] sm:$0xff] }
 0x693   :  { %5735 = vmatprep.subr.bf16.mxu1 %v9057_v50  ;;  %v4359_v60 = vadd.f32 %v13737_v59, %v12775_v11  ;;  %v9114_v50 = vld [vmem:[#allocation12 + $0x204] ss:$8 sps:$4 sm:$0xff]  }
 0x694   :  { %v9165_v59 = vld [vmem:[#allocation12 + $0x404] ss:$8 sps:$4 sm:$0xff]  }
 0x695   :  { %5379 = vmatpush2.bf16.msra.mxu0 %v9052_v19  ;;  %v4531_v19 = vadd.f32 %v12718_v35, %v12749_v54  ;;  %v4362_v44 = vmax.f32 %v4359_v60, 0.0  ;;  %v9126_v35 = vld [vmem:[#allocation12 + $0x364] ss:$8 sps:$4 sm:$0xff]   ;;  %v4702_v60 = vadd.f32 %v12759_v1, %v12749_v54 }
 0x696   :  { %5736 = vmatpush1.bf16.msra.mxu1 %v9055_v18  ;;  %5380 = vmatprep.subr.bf16.mxu0 %v9060_v7  ;;  %v9115_v18 = vld [vmem:[#allocation12 + $0x280] ss:$8 sps:$4 sm:$0xff]   ;;  %v4364_v7 = vmax.f32 %v4361_v32, 0.0  ;;  %v9157_v32 = vld [vmem:[#allocation12 + $0x410] ss:$8 sps:$4 sm:$0xff]  }
 0x697   :  { %5737 = vmatprep.subr.bf16.mxu1 %v9063_v29  ;;  %v9112_v29 = vld [vmem:[#allocation12 + $0x200] ss:$8 sps:$4 sm:$0xff]   ;;  %v4534_v28 = vmax.f32 %v4531_v19, 0.0 }
 0x698   :  { %v9163_v19 = vld [vmem:[#allocation12 + $0x400] ss:$8 sps:$4 sm:$0xff]  }
 0x699   :  { %5381 = vmatpush2.bf16.msra.mxu0 %v9058_v31  ;;  %v9120_v31 = vld [vmem:[#allocation12 + $0x374] ss:$8 sps:$4 sm:$0xff]  }
 0x69a   :  { %5738 = vmatpush1.bf16.msra.mxu1 %v9061_v36  ;;  %5382 = vmatprep.subr.bf16.mxu0 %v9066_v61  ;;  %v9118_v36 = vld [vmem:[#allocation12 + $0x370] ss:$8 sps:$4 sm:$0xff]   ;;  %v4367_v61 = vpack.c.bf16 %v4364_v7, %v4364_v7 }
 0x69b   :  { %5739 = vmatprep.subr.bf16.mxu1 %v9069_v12  ;;  %v9121_v12 = vld [vmem:[#allocation12 + $0x470] ss:$8 sps:$4 sm:$0xff]  }
 0x69d   :  { %5383 = vmatpush2.bf16.msra.mxu0 %v9064_v10  ;;  %v4365_v10 = vpack.c.bf16 %v4362_v44, %v4362_v44  ;;  %v9166_v44 = vld [vmem:[#allocation12 + $0x3f0] ss:$8 sps:$4 sm:$0xff]  }
 0x69e   :  { %5740 = vmatpush1.bf16.msra.mxu1 %v9067_v48  ;;  %5766 = vmatprep.subr.bf16.mxu0 %v9075_v4  ;;  %v4537_v48 = vpack.c.bf16 %v4534_v28, %v4534_v28  ;;  %v9174_v28 = vld [vmem:[#allocation12 + $0x3e4] ss:$8 sps:$4 sm:$0xff]  }
 0x69f   :  { %5741 = vmatprep.subr.bf16.mxu1 %v9072_v17 }
 0x6a0   :  { %5385 = vmatmul.mubr.bf16.vlgmr.msra.gmra.mxu0 %v4194_v38  ;;  %v9124_v38 = vld [vmem:[#allocation12 + $0x360] ss:$8 sps:$4 sm:$0xff]  }
 0x6a1   :  { %v12779_v22 = vpop.f32.mrf.mxu1  ;;  %5767 = vmatpush1.bf16.msra.mxu0 %v9073_v37  ;;  %5798 = vmatprep.mubr.bf16.mxu0 %v13681_v15 }
 0x6a2   :  { %5742 = vmatpush2.bf16.msra.mxu1 %v9070_v39  ;;  %5768 = vmatprep.subr.bf16.mxu0 %v9081_v51  ;;  %v9127_v51 = vld [vmem:[#allocation12 + $0x460] ss:$8 sps:$4 sm:$0xff]  }
 0x6a3   :  { %v12782_v5 = vpop.f32.mrf.mxu1  ;;  %5743 = vmatprep.subr.bf16.mxu1 %v9078_v58  ;;  %v9132_v58 = vld [vmem:[#allocation12 + $0x354] ss:$8 sps:$4 sm:$0xff]  }
 0x6a5   :  { %v4789_v46 = vpop.f32.mrf.mxu1  ;;  %5769 = vmatpush1.bf16.msra.mxu0 %v9079_v24 }
 0x6a6   :  { %5744 = vmatpush2.bf16.msra.mxu1 %v9076_v33  ;;  %5770 = vmatprep.subr.bf16.mxu0 %v9087_v3  ;;  %v9135_v3 = vld [vmem:[#allocation12 + $0x454] ss:$8 sps:$4 sm:$0xff]  }
 0x6a7   :  { %v4790_v43 = vpop.f32.mrf.mxu1  ;;  %5745 = vmatprep.subr.bf16.mxu1 %v9084_v52 }
 0x6a8   :  { %v9138_v43 = vld [vmem:[#allocation12 + $0x344] ss:$8 sps:$4 sm:$0xff]  }
 0x6a9   :  { %5771 = vmatpush1.bf16.msra.mxu0 %v9085_v42  ;;  %v9130_v42 = vld [vmem:[#allocation12 + $0x350] ss:$8 sps:$4 sm:$0xff]  }
 0x6aa   :  { %5746 = vmatpush2.bf16.msra.mxu1 %v9082_v30  ;;  %5772 = vmatprep.subr.bf16.mxu0 %v9093_v14  ;;  %v9133_v14 = vld [vmem:[#allocation12 + $0x450] ss:$8 sps:$4 sm:$0xff]  }
 0x6ab   :  { %5747 = vmatprep.subr.bf16.mxu1 %v9090_v16 }
 0x6ad   :  { %5773 = vmatpush1.bf16.msra.mxu0 %v9091_v47  ;;  %v9136_v47 = vld [vmem:[#allocation12 + $0x340] ss:$8 sps:$4 sm:$0xff]  }
 0x6ae   :  { %5748 = vmatpush2.bf16.msra.mxu1 %v9088_v27  ;;  %5774 = vmatprep.subr.bf16.mxu0 %v9099_v0  ;;  %v9139_v27 = vld [vmem:[#allocation12 + $0x440] ss:$8 sps:$4 sm:$0xff]   ;;  %v9144_v0 = vld [vmem:[#allocation12 + $0x334] ss:$8 sps:$4 sm:$0xff]  }
 0x6af   :  { %5749 = vmatprep.subr.bf16.mxu1 %v9096_v55  ;;  %v9147_v55 = vld [vmem:[#allocation12 + $0x434] ss:$8 sps:$4 sm:$0xff]  }
 0x6b1   :  { %5775 = vmatpush1.bf16.msra.mxu0 %v9097_v53  ;;  %v9142_v53 = vld [vmem:[#allocation12 + $0x330] ss:$8 sps:$4 sm:$0xff]  }
 0x6b2   :  { %5750 = vmatpush2.bf16.msra.mxu1 %v9094_v45  ;;  %5776 = vmatprep.subr.bf16.mxu0 %v9105_v8  ;;  %v9145_v45 = vld [vmem:[#allocation12 + $0x430] ss:$8 sps:$4 sm:$0xff]   ;;  %v9150_v8 = vld [vmem:[#allocation12 + $0x324] ss:$8 sps:$4 sm:$0xff]  }
 0x6b3   :  { %5751 = vmatprep.subr.bf16.mxu1 %v9102_v23  ;;  %v9153_v23 = vld [vmem:[#allocation12 + $0x424] ss:$8 sps:$4 sm:$0xff]  }
 0x6b5   :  { %5777 = vmatpush1.bf16.msra.mxu0 %v9103_v63  ;;  %v9148_v63 = vld [vmem:[#allocation12 + $0x320] ss:$8 sps:$4 sm:$0xff]  }
 0x6b6   :  { %5752 = vmatpush2.bf16.msra.mxu1 %v9100_v25  ;;  %5778 = vmatprep.subr.bf16.mxu0 %v9111_v62  ;;  %v9151_v25 = vld [vmem:[#allocation12 + $0x420] ss:$8 sps:$4 sm:$0xff]   ;;  %v9156_v62 = vld [vmem:[#allocation12 + $0x314] ss:$8 sps:$4 sm:$0xff]  }
 0x6b7   :  { %5753 = vmatprep.subr.bf16.mxu1 %v9108_v2  ;;  %v9159_v2 = vld [vmem:[#allocation12 + $0x414] ss:$8 sps:$4 sm:$0xff]  }
 0x6b9   :  { %5779 = vmatpush1.bf16.msra.mxu0 %v9109_v56  ;;  %v9154_v56 = vld [vmem:[#allocation12 + $0x310] ss:$8 sps:$4 sm:$0xff]  }
 0x6ba   :  { %5754 = vmatpush2.bf16.msra.mxu1 %v9106_v6  ;;  %5780 = vmatprep.subr.bf16.mxu0 %v9117_v21  ;;  %v9162_v6 = vld [vmem:[#allocation12 + $0x304] ss:$8 sps:$4 sm:$0xff]   ;;  %v4532_v21 = vadd.f32 %v12734_v34, %v12765_v13  ;;  %v9169_v34 = vld [vmem:[#allocation12 + $0x4f0] ss:$8 sps:$4 sm:$0xff]  }
 0x6bb   :  { %5755 = vmatprep.subr.bf16.mxu1 %v9114_v50  ;;  %v9160_v50 = vld [vmem:[#allocation12 + $0x300] ss:$8 sps:$4 sm:$0xff]  }
 0x6bc   :  { %v4535_v7 = vmax.f32 %v4532_v21, 0.0  ;;  %v9222_v21 = vld [vmem:[#allocation12 + $0x564] ss:$8 sps:$4 sm:$0xff]  }
 0x6bd   :  { %5781 = vmatpush1.bf16.msra.mxu0 %v9115_v18  ;;  %v9168_v18 = vld [vmem:[#allocation12 + $0x3f4] ss:$8 sps:$4 sm:$0xff]  }
 0x6be   :  { %5756 = vmatpush2.bf16.msra.mxu1 %v9112_v29  ;;  %6098 = vmatprep.subr.bf16.mxu0 %v9120_v31  ;;  %v9171_v29 = vld [vmem:[#allocation12 + $0x4f4] ss:$8 sps:$4 sm:$0xff]   ;;  %v4705_v31 = vmax.f32 %v4702_v60, 0.0 }
 0x6bf   :  { %6139 = vmatprep.subr.bf16.mxu1 %v9123_v57  ;;  %v4538_v57 = vpack.c.bf16 %v4535_v7, %v4535_v7  ;;  %v9220_v7 = vld [vmem:[#allocation12 + $0x560] ss:$8 sps:$4 sm:$0xff]  }
 0x6c0   :  { %v4744_v4 = vpop.f32.mrf.mxu0  ;;  %5799 = vmatmul.mubr.bf16.vlgmr.msra.gmra.mxu0 %v4367_v61  ;;  %v4708_v1 = vpack.c.bf16 %v4705_v31, %v4705_v31 }
 0x6c1   :  { %v12791_v17 = vadd.f32 %v12779_v22, %v4744_v4  ;;  %v8447_v37 = vpop.f32.mrf.mxu1  ;;  %5758 = vmatmul.mubr.bf16.vlgmr.msra.gmra.mxu1 %v4365_v10  ;;  %6099 = vmatpush1.bf16.msra.mxu0 %v9118_v36  ;;  %v9177_v36 = vld [vmem:[#allocation12 + $0x4e4] ss:$8 sps:$4 sm:$0xff]   ;;  %v9172_v10 = vld [vmem:[#allocation12 + $0x3e0] ss:$8 sps:$4 sm:$0xff]   ;;  %v9183_v4 = vld [vmem:[#allocation12 + $0x4d4] ss:$8 sps:$4 sm:$0xff]  }
 0x6c2   :  { %6130 = vmatprep.mubr.bf16.mxu0 %v4537_v48  ;;  %6140 = vmatpush1.bf16.msra.mxu1 %v9121_v12  ;;  %v4746_v39 = vpop.f32.mrf.mxu0  ;;  %v9180_v48 = vld [vmem:[#allocation12 + $0x3d4] ss:$8 sps:$4 sm:$0xff]  }
 0x6c3   :  { %v12794_v24 = vadd.f32 %v12782_v5, %v4746_v39  ;;  %v8448_v33 = vpop.f32.mrf.mxu1  ;;  %6100 = vmatprep.subr.bf16.mxu0 %v9126_v35  ;;  %6141 = vmatprep.subr.bf16.mxu1 %v9129_v9  ;;  %v9141_v5 = vld [vmem:[#allocation12 + $0x444] ss:$8 sps:$4 sm:$0xff]   ;;  %v9175_v9 = vld [vmem:[#allocation12 + $0x4e0] ss:$8 sps:$4 sm:$0xff]  }
 0x6c4   :  { %v12796_v52 = vadd.f32 %v8448_v33, %v8447_v37  ;;  %v4748_v22 = vpop.f32.mrf.mxu0  ;;  %6171 = vmatprep.mubr.bf16.mxu1 %v13681_v15  ;;  %v9189_v33 = vld [vmem:[#allocation12 + $0x4c4] ss:$8 sps:$4 sm:$0xff]  }
 0x6c5   :  { %v8450_v46 = vpop.f32.mrf.mxu1  ;;  %6101 = vmatpush1.bf16.msra.mxu0 %v9124_v38  ;;  %v9178_v38 = vld [vmem:[#allocation12 + $0x3d0] ss:$8 sps:$4 sm:$0xff]   ;;  %v9192_v22 = vld [vmem:[#allocation12 + $0x3b4] ss:$8 sps:$4 sm:$0xff]  }
 0x6c6   :  { %6142 = vmatpush1.bf16.msra.mxu1 %v9127_v51  ;;  %v4749_v30 = vpop.f32.mrf.mxu0  ;;  %6102 = vmatprep.subr.bf16.mxu0 %v9132_v58  ;;  %v9181_v51 = vld [vmem:[#allocation12 + $0x4d0] ss:$8 sps:$4 sm:$0xff]   ;;  %v9186_v58 = vld [vmem:[#allocation12 + $0x3c4] ss:$8 sps:$4 sm:$0xff]   ;;  %v9195_v46 = vld [vmem:[#allocation12 + $0x4b4] ss:$8 sps:$4 sm:$0xff]  }
 0x6c7   :  { %v8451_v16 = vpop.f32.mrf.mxu1  ;;  %6143 = vmatprep.subr.bf16.mxu1 %v9135_v3  ;;  %v9184_v3 = vld [vmem:[#allocation12 + $0x3c0] ss:$8 sps:$4 sm:$0xff]   ;;  %v9193_v30 = vld [vmem:[#allocation12 + $0x4b0] ss:$8 sps:$4 sm:$0xff]  }
 0x6c8   :  { %v9196_v16 = vld [vmem:[#allocation12 + $0x3a0] ss:$8 sps:$4 sm:$0xff]  }
 0x6c9   :  { %6103 = vmatpush1.bf16.msra.mxu0 %v9130_v42  ;;  %v9190_v42 = vld [vmem:[#allocation12 + $0x3b0] ss:$8 sps:$4 sm:$0xff]  }
 0x6ca   :  { %6144 = vmatpush1.bf16.msra.mxu1 %v9133_v14  ;;  %6104 = vmatprep.subr.bf16.mxu0 %v9138_v43  ;;  %v9198_v14 = vld [vmem:[#allocation12 + $0x3a4] ss:$8 sps:$4 sm:$0xff]  }
 0x6cb   :  { %6145 = vmatprep.subr.bf16.mxu1 %v9141_v5  ;;  %v9201_v43 = vld [vmem:[#allocation12 + $0x4a4] ss:$8 sps:$4 sm:$0xff]   ;;  %v9199_v5 = vld [vmem:[#allocation12 + $0x4a0] ss:$8 sps:$4 sm:$0xff]  }
 0x6cd   :  { %6105 = vmatpush1.bf16.msra.mxu0 %v9136_v47  ;;  %v9204_v47 = vld [vmem:[#allocation12 + $0x394] ss:$8 sps:$4 sm:$0xff]  }
 0x6ce   :  { %6146 = vmatpush1.bf16.msra.mxu1 %v9139_v27  ;;  %6106 = vmatprep.subr.bf16.mxu0 %v9144_v0  ;;  %v9207_v27 = vld [vmem:[#allocation12 + $0x494] ss:$8 sps:$4 sm:$0xff]   ;;  %v9202_v0 = vld [vmem:[#allocation12 + $0x390] ss:$8 sps:$4 sm:$0xff]  }
 0x6cf   :  { %6147 = vmatprep.subr.bf16.mxu1 %v9147_v55  ;;  %v4530_v55 = vadd.f32 %v12713_v41, %v12775_v11  ;;  %v9214_v41 = vld [vmem:[#allocation12 + $0x570] ss:$8 sps:$4 sm:$0xff]  }
 0x6d1   :  { %6107 = vmatpush1.bf16.msra.mxu0 %v9142_v53  ;;  %v9205_v53 = vld [vmem:[#allocation12 + $0x490] ss:$8 sps:$4 sm:$0xff]  }
 0x6d2   :  { %6148 = vmatpush1.bf16.msra.mxu1 %v9145_v45  ;;  %6108 = vmatprep.subr.bf16.mxu0 %v9150_v8  ;;  %v9210_v45 = vld [vmem:[#allocation12 + $0x384] ss:$8 sps:$4 sm:$0xff]  }
 0x6d3   :  { %6149 = vmatprep.subr.bf16.mxu1 %v9153_v23  ;;  %v9213_v8 = vld [vmem:[#allocation12 + $0x484] ss:$8 sps:$4 sm:$0xff]   ;;  %v9208_v23 = vld [vmem:[#allocation12 + $0x380] ss:$8 sps:$4 sm:$0xff]  }
 0x6d5   :  { %6109 = vmatpush1.bf16.msra.mxu0 %v9148_v63  ;;  %v4533_v63 = vmax.f32 %v4530_v55, 0.0  ;;  %v9264_v55 = vld [vmem:[#allocation12 + $0x674] ss:$8 sps:$4 sm:$0xff]  }
 0x6d6   :  { %6150 = vmatpush1.bf16.msra.mxu1 %v9151_v25  ;;  %6110 = vmatprep.subr.bf16.mxu0 %v9156_v62  ;;  %v9211_v25 = vld [vmem:[#allocation12 + $0x480] ss:$8 sps:$4 sm:$0xff]   ;;  %v9219_v62 = vld [vmem:[#allocation12 + $0x5f4] ss:$8 sps:$4 sm:$0xff]  }
 0x6d7   :  { %6151 = vmatprep.subr.bf16.mxu1 %v9159_v2  ;;  %v9216_v2 = vld [vmem:[#allocation12 + $0x574] ss:$8 sps:$4 sm:$0xff]  }
 0x6d9   :  { %6111 = vmatpush1.bf16.msra.mxu0 %v9154_v56  ;;  %v9217_v56 = vld [vmem:[#allocation12 + $0x5f0] ss:$8 sps:$4 sm:$0xff]  }
 0x6da   :  { %6152 = vmatpush1.bf16.msra.mxu1 %v9157_v32  ;;  %6112 = vmatprep.subr.bf16.mxu0 %v9162_v6  ;;  %v4536_v32 = vpack.c.bf16 %v4533_v63, %v4533_v63  ;;  %v9225_v6 = vld [vmem:[#allocation12 + $0x5e4] ss:$8 sps:$4 sm:$0xff]  }
 0x6db   :  { %6153 = vmatprep.subr.bf16.mxu1 %v9165_v59 }
 0x6dd   :  { %6113 = vmatpush1.bf16.msra.mxu0 %v9160_v50  ;;  %v9223_v50 = vld [vmem:[#allocation12 + $0x5e0] ss:$8 sps:$4 sm:$0xff]  }
 0x6de   :  { %6154 = vmatpush1.bf16.msra.mxu1 %v9163_v19  ;;  %6114 = vmatprep.subr.bf16.mxu0 %v9168_v18 }
 0x6df   :  { %6471 = vmatprep.subr.bf16.mxu1 %v9171_v29  ;;  %v9231_v29 = vld [vmem:[#allocation12 + $0x5d4] ss:$8 sps:$4 sm:$0xff]  }
 0x6e0   :  { %v4866_v61 = vpop.f32.mrf.mxu0 }
 0x6e1   :  { %v12804_v12 = vadd.f32 %v12796_v52, %v4866_v61  ;;  %6172 = vmatmul.mubr.bf16.vlgmr.msra.gmra.mxu1 %v4538_v57  ;;  %6115 = vmatpush2.bf16.msra.mxu0 %v9166_v44  ;;  %v9187_v52 = vld [vmem:[#allocation12 + $0x4c0] ss:$8 sps:$4 sm:$0xff]   ;;  %v9228_v44 = vld [vmem:[#allocation12 + $0x554] ss:$8 sps:$4 sm:$0xff]   ;;  %v9237_v61 = vld [vmem:[#allocation12 + $0x5c4] ss:$8 sps:$4 sm:$0xff]  }
 0x6e2   :  { %6472 = vmatpush1.bf16.msra.mxu1 %v9169_v34  ;;  %6503 = vmatprep.mubr.bf16.mxu1 %v4708_v1  ;;  %v8613_v35 = vpop.f32.mrf.mxu0  ;;  %v9226_v1 = vld [vmem:[#allocation12 + $0x550] ss:$8 sps:$4 sm:$0xff]  }
 0x6e3   :  { %6116 = vmatprep.subr.bf16.mxu0 %v9174_v28  ;;  %6473 = vmatprep.subr.bf16.mxu1 %v9177_v36  ;;  %v9229_v28 = vld [vmem:[#allocation12 + $0x5d0] ss:$8 sps:$4 sm:$0xff]   ;;  %v9234_v35 = vld [vmem:[#allocation12 + $0x544] ss:$8 sps:$4 sm:$0xff]  }
 0x6e4   :  { %v4869_v37 = vpop.f32.mrf.mxu0 }
 0x6e5   :  { %6117 = vmatpush2.bf16.msra.mxu0 %v9172_v10  ;;  %v9240_v37 = vld [vmem:[#allocation12 + $0x534] ss:$8 sps:$4 sm:$0xff]  }
 0x6e6   :  { %6474 = vmatpush1.bf16.msra.mxu1 %v9175_v9  ;;  %v8614_v39 = vpop.f32.mrf.mxu0  ;;  %6118 = vmatprep.subr.bf16.mxu0 %v9180_v48  ;;  %v9235_v9 = vld [vmem:[#allocation12 + $0x5c0] ss:$8 sps:$4 sm:$0xff]  }
 0x6e7   :  { %6475 = vmatprep.subr.bf16.mxu1 %v9183_v4  ;;  %v9232_v48 = vld [vmem:[#allocation12 + $0x540] ss:$8 sps:$4 sm:$0xff]   ;;  %v9243_v4 = vld [vmem:[#allocation12 + $0x5b4] ss:$8 sps:$4 sm:$0xff]   ;;  %v9238_v39 = vld [vmem:[#allocation12 + $0x530] ss:$8 sps:$4 sm:$0xff]  }
 0x6e9   :  { %6119 = vmatpush2.bf16.msra.mxu0 %v9178_v38  ;;  %v9241_v38 = vld [vmem:[#allocation12 + $0x5b0] ss:$8 sps:$4 sm:$0xff]  }
 0x6ea   :  { %6476 = vmatpush1.bf16.msra.mxu1 %v9181_v51  ;;  %6120 = vmatprep.subr.bf16.mxu0 %v9186_v58  ;;  %v9249_v51 = vld [vmem:[#allocation12 + $0x5a4] ss:$8 sps:$4 sm:$0xff]  }
 0x6eb   :  { %6477 = vmatprep.subr.bf16.mxu1 %v9189_v33  ;;  %v9246_v58 = vld [vmem:[#allocation12 + $0x524] ss:$8 sps:$4 sm:$0xff]   ;;  %v9247_v33 = vld [vmem:[#allocation12 + $0x5a0] ss:$8 sps:$4 sm:$0xff]  }
 0x6ed   :  { %6121 = vmatpush2.bf16.msra.mxu0 %v9184_v3  ;;  %v9244_v3 = vld [vmem:[#allocation12 + $0x520] ss:$8 sps:$4 sm:$0xff]  }
 0x6ee   :  { %6478 = vmatpush1.bf16.msra.mxu1 %v9187_v52  ;;  %6122 = vmatprep.subr.bf16.mxu0 %v9192_v22  ;;  %v9255_v52 = vld [vmem:[#allocation12 + $0x594] ss:$8 sps:$4 sm:$0xff]  }
 0x6ef   :  { %6479 = vmatprep.subr.bf16.mxu1 %v9195_v46  ;;  %v9252_v22 = vld [vmem:[#allocation12 + $0x514] ss:$8 sps:$4 sm:$0xff]   ;;  %v9253_v46 = vld [vmem:[#allocation12 + $0x590] ss:$8 sps:$4 sm:$0xff]  }
 0x6f1   :  { %6123 = vmatpush2.bf16.msra.mxu0 %v9190_v42  ;;  %v4703_v42 = vadd.f32 %v12771_v20, %v12765_v13 }
 0x6f2   :  { %6480 = vmatpush1.bf16.msra.mxu1 %v9193_v30  ;;  %6124 = vmatprep.subr.bf16.mxu0 %v9198_v14  ;;  %v9250_v30 = vld [vmem:[#allocation12 + $0x510] ss:$8 sps:$4 sm:$0xff]   ;;  %v9261_v14 = vld [vmem:[#allocation12 + $0x584] ss:$8 sps:$4 sm:$0xff]  }
 0x6f3   :  { %6481 = vmatprep.subr.bf16.mxu1 %v9201_v43  ;;  %v4701_v43 = vadd.f32 %v12757_v26, %v12775_v11  ;;  %v9265_v26 = vld [vmem:[#allocation12 + $0x770] ss:$8 sps:$4 sm:$0xff]  }
 0x6f5   :  { %6125 = vmatpush2.bf16.msra.mxu0 %v9196_v16  ;;  %v9258_v16 = vld [vmem:[#allocation12 + $0x504] ss:$8 sps:$4 sm:$0xff]   ;;  %v4704_v20 = vmax.f32 %v4701_v43, 0.0 }
 0x6f6   :  { %6482 = vmatpush1.bf16.msra.mxu1 %v9199_v5  ;;  %6126 = vmatprep.subr.bf16.mxu0 %v9204_v47  ;;  %v4873_v5 = vadd.f32 %v12794_v24, %v12749_v54  ;;  %v9259_v47 = vld [vmem:[#allocation12 + $0x580] ss:$8 sps:$4 sm:$0xff]   ;;  %v9270_v24 = vld [vmem:[#allocation12 + $0x664] ss:$8 sps:$4 sm:$0xff]  }
 0x6f7   :  { %6483 = vmatprep.subr.bf16.mxu1 %v9207_v27  ;;  %v4706_v27 = vmax.f32 %v4703_v42, 0.0  ;;  %v4707_v63 = vpack.c.bf16 %v4704_v20, %v4704_v20  ;;  %v9306_v42 = vld [vmem:[#allocation12 + $0x604] ss:$8 sps:$4 sm:$0xff]  }
 0x6f8   :  { %v9318_v20 = vld [vmem:[#allocation12 + $0x6e4] ss:$8 sps:$4 sm:$0xff]  }
 0x6f9   :  { %6127 = vmatpush2.bf16.msra.mxu0 %v9202_v0  ;;  %v9256_v0 = vld [vmem:[#allocation12 + $0x500] ss:$8 sps:$4 sm:$0xff]  }
 0x6fa   :  { %6484 = vmatpush1.bf16.msra.mxu1 %v9205_v53  ;;  %6128 = vmatprep.subr.bf16.mxu0 %v9210_v45  ;;  %v9267_v53 = vld [vmem:[#allocation12 + $0x774] ss:$8 sps:$4 sm:$0xff]   ;;  %v4876_v45 = vmax.f32 %v4873_v5, 0.0  ;;  %v9307_v5 = vld [vmem:[#allocation12 + $0x700] ss:$8 sps:$4 sm:$0xff]  }
 0x6fb   :  { %6485 = vmatprep.subr.bf16.mxu1 %v9213_v8  ;;  %v9262_v8 = vld [vmem:[#allocation12 + $0x670] ss:$8 sps:$4 sm:$0xff]  }
 0x6fd   :  { %6129 = vmatpush2.bf16.msra.mxu0 %v9208_v23  ;;  %v4709_v23 = vpack.c.bf16 %v4706_v27, %v4706_v27 }
 0x6fe   :  { %6486 = vmatpush1.bf16.msra.mxu1 %v9211_v25  ;;  %6512 = vmatprep.subr.bf16.mxu0 %v9219_v62  ;;  %v9273_v25 = vld [vmem:[#allocation12 + $0x764] ss:$8 sps:$4 sm:$0xff]   ;;  %v4879_v62 = vpack.c.bf16 %v4876_v45, %v4876_v45 }
 0x6ff   :  { %6487 = vmatprep.subr.bf16.mxu1 %v9216_v2 }
 0x700   :  { %v4956_v59 = vpop.f32.mrf.mxu0  ;;  %6131 = vmatmul.mubr.bf16.vlgmr.msra.gmra.mxu0 %v4536_v32  ;;  %v9268_v32 = vld [vmem:[#allocation12 + $0x660] ss:$8 sps:$4 sm:$0xff]  }
 0x701   :  { %v4915_v60 = vpop.f32.mrf.mxu1  ;;  %6513 = vmatpush1.bf16.msra.mxu0 %v9217_v56  ;;  %6544 = vmatprep.mubr.bf16.mxu0 %v13681_v15 }
 0x702   :  { %v12809_v19 = vadd.f32 %v4956_v59, %v4915_v60  ;;  %6488 = vmatpush2.bf16.msra.mxu1 %v9214_v41  ;;  %v12811_v18 = vpop.f32.mrf.mxu0  ;;  %6514 = vmatprep.subr.bf16.mxu0 %v9225_v6  ;;  %v9271_v6 = vld [vmem:[#allocation12 + $0x760] ss:$8 sps:$4 sm:$0xff]  }
 0x703   :  { %v12813_v31 = vpop.f32.mrf.mxu1  ;;  %6489 = vmatprep.subr.bf16.mxu1 %v9222_v21  ;;  %v9276_v21 = vld [vmem:[#allocation12 + $0x654] ss:$8 sps:$4 sm:$0xff]  }
 0x704   :  { %v4960_v34 = vpop.f32.mrf.mxu0 }
 0x705   :  { %v4919_v57 = vpop.f32.mrf.mxu1  ;;  %6515 = vmatpush1.bf16.msra.mxu0 %v9223_v50  ;;  %v9279_v50 = vld [vmem:[#allocation12 + $0x754] ss:$8 sps:$4 sm:$0xff]   ;;  %v9274_v34 = vld [vmem:[#allocation12 + $0x650] ss:$8 sps:$4 sm:$0xff]  }
 0x706   :  { %6490 = vmatpush2.bf16.msra.mxu1 %v9220_v7  ;;  %v4961_v36 = vpop.f32.mrf.mxu0  ;;  %6516 = vmatprep.subr.bf16.mxu0 %v9231_v29 }
 0x707   :  { %v4920_v10 = vpop.f32.mrf.mxu1  ;;  %6491 = vmatprep.subr.bf16.mxu1 %v9228_v44  ;;  %v9282_v36 = vld [vmem:[#allocation12 + $0x644] ss:$8 sps:$4 sm:$0xff]  }
 0x708   :  { %v9280_v10 = vld [vmem:[#allocation12 + $0x640] ss:$8 sps:$4 sm:$0xff]  }
 0x709   :  { %6517 = vmatpush1.bf16.msra.mxu0 %v9229_v28  ;;  %v9277_v28 = vld [vmem:[#allocation12 + $0x750] ss:$8 sps:$4 sm:$0xff]  }
 0x70a   :  { %6492 = vmatpush2.bf16.msra.mxu1 %v9226_v1  ;;  %6518 = vmatprep.subr.bf16.mxu0 %v9237_v61  ;;  %v9285_v61 = vld [vmem:[#allocation12 + $0x744] ss:$8 sps:$4 sm:$0xff]  }
 0x70b   :  { %6493 = vmatprep.subr.bf16.mxu1 %v9234_v35  ;;  %v9283_v35 = vld [vmem:[#allocation12 + $0x740] ss:$8 sps:$4 sm:$0xff]  }
 0x70d   :  { %6519 = vmatpush1.bf16.msra.mxu0 %v9235_v9  ;;  %v9288_v9 = vld [vmem:[#allocation12 + $0x634] ss:$8 sps:$4 sm:$0xff]  }
 0x70e   :  { %6494 = vmatpush2.bf16.msra.mxu1 %v9232_v48  ;;  %6520 = vmatprep.subr.bf16.mxu0 %v9243_v4  ;;  %v9291_v48 = vld [vmem:[#allocation12 + $0x734] ss:$8 sps:$4 sm:$0xff]   ;;  %v9286_v4 = vld [vmem:[#allocation12 + $0x630] ss:$8 sps:$4 sm:$0xff]  }
 0x70f   :  { %6495 = vmatprep.subr.bf16.mxu1 %v9240_v37  ;;  %v9289_v37 = vld [vmem:[#allocation12 + $0x730] ss:$8 sps:$4 sm:$0xff]  }
 0x711   :  { %6521 = vmatpush1.bf16.msra.mxu0 %v9241_v38  ;;  %v9294_v38 = vld [vmem:[#allocation12 + $0x624] ss:$8 sps:$4 sm:$0xff]  }
 0x712   :  { %6496 = vmatpush2.bf16.msra.mxu1 %v9238_v39  ;;  %6522 = vmatprep.subr.bf16.mxu0 %v9249_v51  ;;  %v9297_v39 = vld [vmem:[#allocation12 + $0x724] ss:$8 sps:$4 sm:$0xff]   ;;  %v9292_v51 = vld [vmem:[#allocation12 + $0x620] ss:$8 sps:$4 sm:$0xff]  }
 0x713   :  { %6497 = vmatprep.subr.bf16.mxu1 %v9246_v58  ;;  %v9295_v58 = vld [vmem:[#allocation12 + $0x720] ss:$8 sps:$4 sm:$0xff]  }
 0x715   :  { %6523 = vmatpush1.bf16.msra.mxu0 %v9247_v33  ;;  %v9300_v33 = vld [vmem:[#allocation12 + $0x614] ss:$8 sps:$4 sm:$0xff]  }
 0x716   :  { %6498 = vmatpush2.bf16.msra.mxu1 %v9244_v3  ;;  %6524 = vmatprep.subr.bf16.mxu0 %v9255_v52  ;;  %v9303_v3 = vld [vmem:[#allocation12 + $0x714] ss:$8 sps:$4 sm:$0xff]   ;;  %v4959_v52 = vadd.f32 %v12811_v18, %v12813_v31 }
 0x717   :  { %6499 = vmatprep.subr.bf16.mxu1 %v9252_v22  ;;  %v9298_v22 = vld [vmem:[#allocation12 + $0x610] ss:$8 sps:$4 sm:$0xff]   ;;  %v9315_v31 = vld [vmem:[#allocation12 + $0x7f4] ss:$8 sps:$4 sm:$0xff]  }
 0x718   :  { %v5044_v43 = vadd.f32 %v4959_v52, %v12749_v54  ;;  %v9366_v52 = vld [vmem:[#allocation12 + $0x864] ss:$8 sps:$4 sm:$0xff]  }
 0x719   :  { %6525 = vmatpush1.bf16.msra.mxu0 %v9253_v46  ;;  %v9301_v46 = vld [vmem:[#allocation12 + $0x710] ss:$8 sps:$4 sm:$0xff]  }
 0x71a   :  { %6500 = vmatpush2.bf16.msra.mxu1 %v9250_v30  ;;  %6526 = vmatprep.subr.bf16.mxu0 %v9261_v14  ;;  %v4874_v30 = vadd.f32 %v12804_v12, %v12765_v13  ;;  %v9309_v14 = vld [vmem:[#allocation12 + $0x704] ss:$8 sps:$4 sm:$0xff]   ;;  %v5047_v27 = vmax.f32 %v5044_v43, 0.0  ;;  %v9375_v43 = vld [vmem:[#allocation12 + $0x8d4] ss:$8 sps:$4 sm:$0xff]  }
 0x71b   :  { %6501 = vmatprep.subr.bf16.mxu1 %v9258_v16  ;;  %v9304_v16 = vld [vmem:[#allocation12 + $0x600] ss:$8 sps:$4 sm:$0xff]  }
 0x71c   :  { %v4877_v18 = vmax.f32 %v4874_v30, 0.0  ;;  %v5050_v54 = vpack.c.bf16 %v5047_v27, %v5047_v27  ;;  %v9370_v27 = vld [vmem:[#allocation12 + $0x850] ss:$8 sps:$4 sm:$0xff]  }
 0x71d   :  { %6527 = vmatpush1.bf16.msra.mxu0 %v9259_v47  ;;  %v9312_v47 = vld [vmem:[#allocation12 + $0x6f4] ss:$8 sps:$4 sm:$0xff]  }
 0x71e   :  { %6502 = vmatpush2.bf16.msra.mxu1 %v9256_v0  ;;  %6844 = vmatprep.subr.bf16.mxu0 %v9264_v55  ;;  %v9310_v0 = vld [vmem:[#allocation12 + $0x6f0] ss:$8 sps:$4 sm:$0xff]   ;;  %v4880_v12 = vpack.c.bf16 %v4877_v18, %v4877_v18 }
 0x71f   :  { %6885 = vmatprep.subr.bf16.mxu1 %v9267_v53  ;;  %v9313_v55 = vld [vmem:[#allocation12 + $0x7f0] ss:$8 sps:$4 sm:$0xff]   ;;  %v9321_v53 = vld [vmem:[#allocation12 + $0x7e4] ss:$8 sps:$4 sm:$0xff]  }
 0x720   :  { %v8478_v2 = vpop.f32.mrf.mxu0  ;;  %6545 = vmatmul.mubr.bf16.vlgmr.msra.gmra.mxu0 %v4709_v23  ;;  %v9319_v23 = vld [vmem:[#allocation12 + $0x7e0] ss:$8 sps:$4 sm:$0xff]   ;;  %v9373_v18 = vld [vmem:[#allocation12 + $0x8d0] ss:$8 sps:$4 sm:$0xff]  }
 0x721   :  { %v5037_v56 = vpop.f32.mrf.mxu1  ;;  %6504 = vmatmul.mubr.bf16.vlgmr.msra.gmra.mxu1 %v4707_v63  ;;  %6845 = vmatpush1.bf16.msra.mxu0 %v9262_v8  ;;  %v9316_v8 = vld [vmem:[#allocation12 + $0x6e0] ss:$8 sps:$4 sm:$0xff]  }
 0x722   :  { %6876 = vmatprep.mubr.bf16.mxu0 %v4879_v62  ;;  %6886 = vmatpush1.bf16.msra.mxu1 %v9265_v26  ;;  %v8479_v41 = vpop.f32.mrf.mxu0  ;;  %v9324_v26 = vld [vmem:[#allocation12 + $0x6d4] ss:$8 sps:$4 sm:$0xff]   ;;  %v9322_v62 = vld [vmem:[#allocation12 + $0x6d0] ss:$8 sps:$4 sm:$0xff]  }
 0x723   :  { %v8480_v59 = vadd.f32 %v8479_v41, %v8478_v2  ;;  %v8633_v60 = vpop.f32.mrf.mxu1  ;;  %6846 = vmatprep.subr.bf16.mxu0 %v9270_v24  ;;  %6887 = vmatprep.subr.bf16.mxu1 %v9273_v25  ;;  %v9327_v24 = vld [vmem:[#allocation12 + $0x7d4] ss:$8 sps:$4 sm:$0xff]   ;;  %v9325_v2 = vld [vmem:[#allocation12 + $0x7d0] ss:$8 sps:$4 sm:$0xff]   ;;  %v9333_v41 = vld [vmem:[#allocation12 + $0x7c4] ss:$8 sps:$4 sm:$0xff]  }
 0x724   :  { %v8481_v7 = vpop.f32.mrf.mxu0  ;;  %6917 = vmatprep.mubr.bf16.mxu1 %v13681_v15  ;;  %v9339_v60 = vld [vmem:[#allocation12 + $0x7b4] ss:$8 sps:$4 sm:$0xff]  }
 0x725   :  { %v12822_v29 = vadd.f32 %v8480_v59, %v5037_v56  ;;  %v5040_v44 = vpop.f32.mrf.mxu1  ;;  %6847 = vmatpush1.bf16.msra.mxu0 %v9268_v32  ;;  %v9330_v56 = vld [vmem:[#allocation12 + $0x6c4] ss:$8 sps:$4 sm:$0xff]   ;;  %v9336_v59 = vld [vmem:[#allocation12 + $0x6b4] ss:$8 sps:$4 sm:$0xff]   ;;  %v9337_v7 = vld [vmem:[#allocation12 + $0x7b0] ss:$8 sps:$4 sm:$0xff]  }
 0x726   :  { %6888 = vmatpush1.bf16.msra.mxu1 %v9271_v6  ;;  %v8482_v57 = vpop.f32.mrf.mxu0  ;;  %6848 = vmatprep.subr.bf16.mxu0 %v9276_v21  ;;  %v9328_v6 = vld [vmem:[#allocation12 + $0x6c0] ss:$8 sps:$4 sm:$0xff]   ;;  %v9342_v44 = vld [vmem:[#allocation12 + $0x6a4] ss:$8 sps:$4 sm:$0xff]  }
 0x727   :  { %v8634_v1 = vpop.f32.mrf.mxu1  ;;  %6889 = vmatprep.subr.bf16.mxu1 %v9279_v50  ;;  %v9331_v21 = vld [vmem:[#allocation12 + $0x7c0] ss:$8 sps:$4 sm:$0xff]   ;;  %v9334_v50 = vld [vmem:[#allocation12 + $0x6b0] ss:$8 sps:$4 sm:$0xff]  }
 0x728   :  { %v9340_v57 = vld [vmem:[#allocation12 + $0x6a0] ss:$8 sps:$4 sm:$0xff]   ;;  %v9351_v1 = vld [vmem:[#allocation12 + $0x794] ss:$8 sps:$4 sm:$0xff]  }
 0x729   :  { %6849 = vmatpush1.bf16.msra.mxu0 %v9274_v34  ;;  %v9345_v34 = vld [vmem:[#allocation12 + $0x7a4] ss:$8 sps:$4 sm:$0xff]  }
 0x72a   :  { %6890 = vmatpush1.bf16.msra.mxu1 %v9277_v28  ;;  %6850 = vmatprep.subr.bf16.mxu0 %v9282_v36  ;;  %v9343_v28 = vld [vmem:[#allocation12 + $0x7a0] ss:$8 sps:$4 sm:$0xff]   ;;  %v9348_v36 = vld [vmem:[#allocation12 + $0x694] ss:$8 sps:$4 sm:$0xff]  }
 0x72b   :  { %6891 = vmatprep.subr.bf16.mxu1 %v9285_v61  ;;  %v9346_v61 = vld [vmem:[#allocation12 + $0x690] ss:$8 sps:$4 sm:$0xff]  }
 0x72d   :  { %6851 = vmatpush1.bf16.msra.mxu0 %v9280_v10  ;;  %v4872_v10 = vadd.f32 %v12791_v17, %v12775_v11  ;;  %v9358_v17 = vld [vmem:[#allocation12 + $0x870] ss:$8 sps:$4 sm:$0xff]  }
 0x72e   :  { %6892 = vmatpush1.bf16.msra.mxu1 %v9283_v35  ;;  %6852 = vmatprep.subr.bf16.mxu0 %v9288_v9  ;;  %v9349_v35 = vld [vmem:[#allocation12 + $0x790] ss:$8 sps:$4 sm:$0xff]   ;;  %v9354_v9 = vld [vmem:[#allocation12 + $0x684] ss:$8 sps:$4 sm:$0xff]  }
 0x72f   :  { %6893 = vmatprep.subr.bf16.mxu1 %v9291_v48  ;;  %v9357_v48 = vld [vmem:[#allocation12 + $0x784] ss:$8 sps:$4 sm:$0xff]  }
 0x731   :  { %6853 = vmatpush1.bf16.msra.mxu0 %v9286_v4  ;;  %v9352_v4 = vld [vmem:[#allocation12 + $0x680] ss:$8 sps:$4 sm:$0xff]  }
 0x732   :  { %6894 = vmatpush1.bf16.msra.mxu1 %v9289_v37  ;;  %6854 = vmatprep.subr.bf16.mxu0 %v9294_v38  ;;  %v4875_v37 = vmax.f32 %v4872_v10, 0.0  ;;  %v9355_v38 = vld [vmem:[#allocation12 + $0x780] ss:$8 sps:$4 sm:$0xff]  }
 0x733   :  { %6895 = vmatprep.subr.bf16.mxu1 %v9297_v39  ;;  %v9363_v39 = vld [vmem:[#allocation12 + $0x8f4] ss:$8 sps:$4 sm:$0xff]  }
 0x735   :  { %6855 = vmatpush1.bf16.msra.mxu0 %v9292_v51  ;;  %v9360_v51 = vld [vmem:[#allocation12 + $0x874] ss:$8 sps:$4 sm:$0xff]  }
 0x736   :  { %6896 = vmatpush1.bf16.msra.mxu1 %v9295_v58  ;;  %6856 = vmatprep.subr.bf16.mxu0 %v9300_v33  ;;  %v9361_v58 = vld [vmem:[#allocation12 + $0x8f0] ss:$8 sps:$4 sm:$0xff]   ;;  %v4878_v33 = vpack.c.bf16 %v4875_v37, %v4875_v37 }
 0x737   :  { %6897 = vmatprep.subr.bf16.mxu1 %v9303_v3  ;;  %v9369_v3 = vld [vmem:[#allocation12 + $0x8e4] ss:$8 sps:$4 sm:$0xff]  }
 0x739   :  { %6857 = vmatpush1.bf16.msra.mxu0 %v9298_v22 }
 0x73a   :  { %6898 = vmatpush1.bf16.msra.mxu1 %v9301_v46  ;;  %6858 = vmatprep.subr.bf16.mxu0 %v9306_v42  ;;  %v9367_v42 = vld [vmem:[#allocation12 + $0x8e0] ss:$8 sps:$4 sm:$0xff]  }
 0x73b   :  { %6899 = vmatprep.subr.bf16.mxu1 %v9309_v14  ;;  %v9364_v14 = vld [vmem:[#allocation12 + $0x860] ss:$8 sps:$4 sm:$0xff]  }
 0x73d   :  { %6859 = vmatpush1.bf16.msra.mxu0 %v9304_v16 }
 0x73e   :  { %6900 = vmatpush1.bf16.msra.mxu1 %v9307_v5  ;;  %6860 = vmatprep.subr.bf16.mxu0 %v9312_v47  ;;  %v9372_v5 = vld [vmem:[#allocation12 + $0x854] ss:$8 sps:$4 sm:$0xff]  }
 0x73f   :  { %7217 = vmatprep.subr.bf16.mxu1 %v9315_v31 }
 0x741   :  { %v12829_v45 = vpop.f32.mrf.mxu1  ;;  %6918 = vmatmul.mubr.bf16.vlgmr.msra.gmra.mxu1 %v4880_v12  ;;  %6861 = vmatpush2.bf16.msra.mxu0 %v9310_v0  ;;  %v9381_v0 = vld [vmem:[#allocation12 + $0x8c4] ss:$8 sps:$4 sm:$0xff]   ;;  %v9376_v12 = vld [vmem:[#allocation12 + $0x840] ss:$8 sps:$4 sm:$0xff]  }
 0x742   :  { %7218 = vmatpush1.bf16.msra.mxu1 %v9313_v55  ;;  %7249 = vmatprep.mubr.bf16.mxu1 %v5050_v54  ;;  %v9379_v55 = vld [vmem:[#allocation12 + $0x8c0] ss:$8 sps:$4 sm:$0xff]   ;;  %v9385_v54 = vld [vmem:[#allocation12 + $0x8b0] ss:$8 sps:$4 sm:$0xff]  }
 0x743   :  { %v12831_v63 = vpop.f32.mrf.mxu1  ;;  %6862 = vmatprep.subr.bf16.mxu0 %v9318_v20  ;;  %7219 = vmatprep.subr.bf16.mxu1 %v9321_v53  ;;  %v9387_v20 = vld [vmem:[#allocation12 + $0x8b4] ss:$8 sps:$4 sm:$0xff]  }
 0x744   :  { %v9384_v53 = vld [vmem:[#allocation12 + $0x834] ss:$8 sps:$4 sm:$0xff]  }
 0x745   :  { %v5431_v25 = vpop.f32.mrf.mxu1  ;;  %6863 = vmatpush2.bf16.msra.mxu0 %v9316_v8  ;;  %v9393_v8 = vld [vmem:[#allocation12 + $0x8a4] ss:$8 sps:$4 sm:$0xff]  }
 0x746   :  { %7220 = vmatpush1.bf16.msra.mxu1 %v9319_v23  ;;  %6864 = vmatprep.subr.bf16.mxu0 %v9324_v26  ;;  %v9390_v23 = vld [vmem:[#allocation12 + $0x824] ss:$8 sps:$4 sm:$0xff]   ;;  %v9391_v26 = vld [vmem:[#allocation12 + $0x8a0] ss:$8 sps:$4 sm:$0xff]   ;;  %v9396_v25 = vld [vmem:[#allocation12 + $0x814] ss:$8 sps:$4 sm:$0xff]  }
 0x747   :  { %v5432_v32 = vpop.f32.mrf.mxu1  ;;  %7221 = vmatprep.subr.bf16.mxu1 %v9327_v24  ;;  %v9399_v24 = vld [vmem:[#allocation12 + $0x894] ss:$8 sps:$4 sm:$0xff]  }
 0x748   :  { %v9405_v32 = vld [vmem:[#allocation12 + $0x884] ss:$8 sps:$4 sm:$0xff]  }
 0x749   :  { %6865 = vmatpush2.bf16.msra.mxu0 %v9322_v62  ;;  %v9397_v62 = vld [vmem:[#allocation12 + $0x890] ss:$8 sps:$4 sm:$0xff]  }
 0x74a   :  { %7222 = vmatpush1.bf16.msra.mxu1 %v9325_v2  ;;  %6866 = vmatprep.subr.bf16.mxu0 %v9330_v56  ;;  %v5045_v2 = vadd.f32 %v12822_v29, %v12765_v13  ;;  %v9394_v56 = vld [vmem:[#allocation12 + $0x810] ss:$8 sps:$4 sm:$0xff]  }
 0x74b   :  { %7223 = vmatprep.subr.bf16.mxu1 %v9333_v41  ;;  %v5043_v41 = vadd.f32 %v12809_v19, %v12775_v11 }
 0x74d   :  { %6867 = vmatpush2.bf16.msra.mxu0 %v9328_v6  ;;  %v9402_v6 = vld [vmem:[#allocation12 + $0x804] ss:$8 sps:$4 sm:$0xff]  }
 0x74e   :  { %7224 = vmatpush1.bf16.msra.mxu1 %v9331_v21  ;;  %6868 = vmatprep.subr.bf16.mxu0 %v9336_v59  ;;  %v9403_v21 = vld [vmem:[#allocation12 + $0x880] ss:$8 sps:$4 sm:$0xff]   ;;  %v5048_v59 = vmax.f32 %v5045_v2, 0.0 }
 0x74f   :  { %7225 = vmatprep.subr.bf16.mxu1 %v9339_v60  ;;  %v9400_v60 = vld [vmem:[#allocation12 + $0x800] ss:$8 sps:$4 sm:$0xff]  }
 0x750   :  { %v5051_v13 = vpack.c.bf16 %v5048_v59, %v5048_v59 }
 0x751   :  { %6869 = vmatpush2.bf16.msra.mxu0 %v9334_v50  ;;  %v5046_v50 = vmax.f32 %v5043_v41, 0.0 }
 0x752   :  { %7226 = vmatpush1.bf16.msra.mxu1 %v9337_v7  ;;  %6870 = vmatprep.subr.bf16.mxu0 %v9342_v44  ;;  %v5052_v7 = vld [vmem:[#allocation13] sm:$0x3] }
 0x753   :  { %7227 = vmatprep.subr.bf16.mxu1 %v9345_v34  ;;  %v5057_v29 = vrot.slane %v5052_v7, %v13735_v40  ;;  %v5049_v44 = vpack.c.bf16 %v5046_v50, %v5046_v50  ;;  %v5061_v34 = vrot.slane %v5052_v7, %v13729_v49 }
 0x755   :  { %6871 = vmatpush2.bf16.msra.mxu0 %v9340_v57 }
 0x756   :  { %7228 = vmatpush1.bf16.msra.mxu1 %v9343_v28  ;;  %6872 = vmatprep.subr.bf16.mxu0 %v9348_v36 }
 0x757   :  { %7229 = vmatprep.subr.bf16.mxu1 %v9351_v1 }
 0x759   :  { %6873 = vmatpush2.bf16.msra.mxu0 %v9346_v61 }
 0x75a   :  { %7230 = vmatpush1.bf16.msra.mxu1 %v9349_v35  ;;  %6874 = vmatprep.subr.bf16.mxu0 %v9354_v9 }
 0x75b   :  { %7231 = vmatprep.subr.bf16.mxu1 %v9357_v48 }
 0x75d   :  { %6875 = vmatpush2.bf16.msra.mxu0 %v9352_v4 }
 0x75e   :  { %7232 = vmatpush1.bf16.msra.mxu1 %v9355_v38  ;;  %7258 = vmatprep.subr.bf16.mxu0 %v9363_v39 }
 0x75f   :  { %7233 = vmatprep.subr.bf16.mxu1 %v9360_v51  ;;  %v9406_v51 = vld [vmem:[#allocation15 + $0x78] sm:$0xff]  }
 0x760   :  { %v5386_v22 = vpop.f32.mrf.mxu0  ;;  %6877 = vmatmul.mubr.bf16.vlgmr.msra.gmra.mxu0 %v4878_v33  ;;  %v9408_v33 = vld [vmem:[#allocation15 + $0x70] sm:$0xff]  }
 0x761   :  { %v12836_v46 = vadd.f32 %v12829_v45, %v5386_v22  ;;  %7259 = vmatpush1.bf16.msra.mxu0 %v9361_v58  ;;  %7290 = vmatprep.mubr.bf16.mxu0 %v13681_v15  ;;  %v9378_v15 = vld [vmem:[#allocation12 + $0x844] ss:$8 sps:$4 sm:$0xff]   ;;  %v9382_v45 = vld [vmem:[#allocation12 + $0x830] ss:$8 sps:$4 sm:$0xff]  }
 0x762   :  { %7234 = vmatpush2.bf16.msra.mxu1 %v9358_v17  ;;  %v5388_v30 = vpop.f32.mrf.mxu0  ;;  %7260 = vmatprep.subr.bf16.mxu0 %v9369_v3  ;;  %v9407_v58 = vld [vmem:[#allocation15 + $0x38] sm:$0xff]   ;;  %v9409_v3 = vld [vmem:[#allocation15 + $0x30] sm:$0xff]   ;;  %v9411_v22 = vld [vmem:[#allocation15 + $0x28] sm:$0xff]  }
 0x763   :  { %v12840_v16 = vadd.f32 %v12831_v63, %v5388_v30  ;;  %7235 = vmatprep.subr.bf16.mxu1 %v9366_v52  ;;  %v9388_v63 = vld [vmem:[#allocation12 + $0x820] ss:$8 sps:$4 sm:$0xff]   ;;  %v5434_v57 = vadd.f32 %v12836_v46, %v5057_v29 }
 0x764   :  { %v5390_v47 = vpop.f32.mrf.mxu0  ;;  %v9410_v52 = vld [vmem:[#allocation15 + $0x68] sm:$0xff]   ;;  %v9412_v46 = vld [vmem:[#allocation15 + $0x60] sm:$0xff]   ;;  %v9414_v30 = vld [vmem:[#allocation15 + $0x58] sm:$0xff]  }
 0x765   :  { %7261 = vmatpush1.bf16.msra.mxu0 %v9367_v42  ;;  %v5435_v61 = vadd.f32 %v12840_v16, %v5061_v34  ;;  %v9413_v42 = vld [vmem:[#allocation15 + $0x20] sm:$0xff]   ;;  %v9416_v16 = vld [vmem:[#allocation15 + $0x50] sm:$0xff]  }
 0x766   :  { %7236 = vmatpush2.bf16.msra.mxu1 %v9364_v14  ;;  %v5391_v31 = vpop.f32.mrf.mxu0  ;;  %7262 = vmatprep.subr.bf16.mxu0 %v9375_v43  ;;  %v9415_v14 = vld [vmem:[#allocation15 + $0x18] sm:$0xff]   ;;  %v9417_v47 = vld [vmem:[#allocation15 + $0x10] sm:$0xff]  }
 0x767   :  { %7237 = vmatprep.subr.bf16.mxu1 %v9372_v5 }
 0x769   :  { %7263 = vmatpush1.bf16.msra.mxu0 %v9373_v18 }
 0x76a   :  { %7238 = vmatpush2.bf16.msra.mxu1 %v9370_v27  ;;  %7264 = vmatprep.subr.bf16.mxu0 %v9381_v0 }
 0x76b   :  { %7239 = vmatprep.subr.bf16.mxu1 %v9378_v15  ;;  %v9418_v15 = vld [vmem:[#allocation15 + $0x48] sm:$0xff]  }
 0x76d   :  { %7265 = vmatpush1.bf16.msra.mxu0 %v9379_v55 }
 0x76e   :  { %7240 = vmatpush2.bf16.msra.mxu1 %v9376_v12  ;;  %7266 = vmatprep.subr.bf16.mxu0 %v9387_v20  ;;  %v9419_v12 = vld [vmem:[#allocation15 + $0x8] sm:$0xff]  }
 0x76f   :  { %7241 = vmatprep.subr.bf16.mxu1 %v9384_v53  ;;  %v9420_v53 = vld [vmem:[#allocation15 + $0x40] sm:$0xff]  }
 0x771   :  { %7267 = vmatpush1.bf16.msra.mxu0 %v9385_v54  ;;  %v9421_v54 = vld [vmem:[#allocation15] sm:$0xff]  }
 0x772   :  { %7242 = vmatpush2.bf16.msra.mxu1 %v9382_v45  ;;  %7268 = vmatprep.subr.bf16.mxu0 %v9393_v8 }
 0x773   :  { %7243 = vmatprep.subr.bf16.mxu1 %v9390_v23 }
 0x775   :  { %7269 = vmatpush1.bf16.msra.mxu0 %v9391_v26 }
 0x776   :  { %7244 = vmatpush2.bf16.msra.mxu1 %v9388_v63  ;;  %7270 = vmatprep.subr.bf16.mxu0 %v9399_v24 }
 0x777   :  { %7245 = vmatprep.subr.bf16.mxu1 %v9396_v25 }
 0x779   :  { %7271 = vmatpush1.bf16.msra.mxu0 %v9397_v62 }
 0x77a   :  { %7246 = vmatpush2.bf16.msra.mxu1 %v9394_v56  ;;  %7272 = vmatprep.subr.bf16.mxu0 %v9405_v32 }
 0x77b   :  { %7247 = vmatprep.subr.bf16.mxu1 %v9402_v6 }
 0x77d   :  { %7273 = vmatpush1.bf16.msra.mxu0 %v9403_v21 }
 0x77e   :  { %7248 = vmatpush2.bf16.msra.mxu1 %v9400_v60  ;;  %8493 = vmatprep.subr.bf16.mxu0 %v9406_v51 }
 0x780   :  { %v5800_v11 = vpop.f32.mrf.mxu0  ;;  %7291 = vmatmul.mubr.bf16.vlgmr.msra.gmra.mxu0 %v5051_v13 }
 0x781   :  { %v5759_v19 = vpop.f32.mrf.mxu1  ;;  %7250 = vmatmul.mubr.bf16.vlgmr.msra.gmra.mxu1 %v5049_v44  ;;  %8494 = vmatpush3.bf16.msra.mxu0 %v9407_v58 }
 0x782   :  { %v5801_v28 = vadd.f32 %v5800_v11, %v5759_v19  ;;  %v5802_v36 = vpop.f32.mrf.mxu0  ;;  %8495 = vmatprep.subr.bf16.mxu0 %v9408_v33  ;;  %v8026_v33 = vld [vmem:[#allocation16] ss:$0 sm:$0xff] }
 0x783   :  { %v5761_v1 = vpop.f32.mrf.mxu1 }
 0x784   :  { %v5807_v10 = vadd.f32 %v5801_v28, %v5434_v57  ;;  %v5803_v35 = vadd.f32 %v5802_v36, %v5761_v1  ;;  %v5804_v9 = vpop.f32.mrf.mxu0 }
 0x785   :  { %v5763_v48 = vpop.f32.mrf.mxu1  ;;  %8496 = vmatpush3.bf16.msra.mxu0 %v9409_v3 }
 0x786   :  { %v5808_v40 = vadd.f32 %v5803_v35, %v5435_v61  ;;  %v5805_v4 = vpop.f32.mrf.mxu0  ;;  %8497 = vmatprep.subr.bf16.mxu0 %v9410_v52 }
 0x787   :  { %v5764_v37 = vpop.f32.mrf.mxu1 }
 0x789   :  { %8498 = vmatpush3.bf16.msra.mxu0 %v9411_v22 }
 0x78a   :  { %8499 = vmatprep.subr.bf16.mxu0 %v9412_v46 }
 0x78d   :  { %8500 = vmatpush3.bf16.msra.mxu0 %v9413_v42 }
 0x78e   :  { %8501 = vmatprep.subr.bf16.mxu0 %v9414_v30 }
 0x791   :  { %8502 = vmatpush3.bf16.msra.mxu0 %v9415_v14 }
 0x792   :  { %8503 = vmatprep.subr.bf16.mxu0 %v9416_v16 }
 0x795   :  { %8504 = vmatpush3.bf16.msra.mxu0 %v9417_v47 }
 0x796   :  { %8505 = vmatprep.subr.bf16.mxu0 %v9418_v15 }
 0x799   :  { %8506 = vmatpush3.bf16.msra.mxu0 %v9419_v12 }
 0x79a   :  { %8507 = vmatprep.subr.bf16.mxu0 %v9420_v53 }
 0x79d   :  { %8508 = vmatpush3.bf16.msra.mxu0 %v9421_v54 }
 0x7a1   :  { %v6173_v38 = vpop.f32.mrf.mxu1 }
 0x7a3   :  { %v6175_v49 = vpop.f32.mrf.mxu1 }
 0x7a5   :  { %v6177_v39 = vpop.f32.mrf.mxu1 }
 0x7a7   :  { %v6178_v17 = vpop.f32.mrf.mxu1 }
 0x7c0   :  { %v6132_v43 = vpop.f32.mrf.mxu0 }
 0x7c1   :  { %v6174_v5 = vadd.f32 %v6173_v38, %v6132_v43 }
 0x7c2   :  { %v6134_v18 = vpop.f32.mrf.mxu0 }
 0x7c3   :  { %v6180_v31 = vadd.f32 %v6174_v5, %v5807_v10  ;;  %v6176_v27 = vadd.f32 %v6175_v49, %v6134_v18 }
 0x7c4   :  { %v6136_v0 = vpop.f32.mrf.mxu0 }
 0x7c5   :  { %v6181_v55 = vadd.f32 %v6176_v27, %v5808_v40 }
 0x7c6   :  { %v6137_v20 = vpop.f32.mrf.mxu0 }
 0x7e0   :  { %v6546_v45 = vpop.f32.mrf.mxu0 }
 0x7e1   :  { %v6505_v8 = vpop.f32.mrf.mxu1 }
 0x7e2   :  { %v6547_v23 = vadd.f32 %v6546_v45, %v6505_v8  ;;  %v6548_v26 = vpop.f32.mrf.mxu0 }
 0x7e3   :  { %v6507_v63 = vpop.f32.mrf.mxu1 }
 0x7e4   :  { %v6553_v24 = vadd.f32 %v6547_v23, %v6180_v31  ;;  %v6549_v25 = vadd.f32 %v6548_v26, %v6507_v63  ;;  %v6550_v62 = vpop.f32.mrf.mxu0 }
 0x7e5   :  { %v6509_v2 = vpop.f32.mrf.mxu1 }
 0x7e6   :  { %v6554_v56 = vadd.f32 %v6549_v25, %v6181_v55  ;;  %v6551_v32 = vpop.f32.mrf.mxu0 }
 0x7e7   :  { %v6510_v41 = vpop.f32.mrf.mxu1 }
 0x801   :  { %v6919_v6 = vpop.f32.mrf.mxu1 }
 0x803   :  { %v6921_v21 = vpop.f32.mrf.mxu1 }
 0x805   :  { %v6923_v59 = vpop.f32.mrf.mxu1 }
 0x807   :  { %v6924_v60 = vpop.f32.mrf.mxu1 }
 0x820   :  { %v6878_v50 = vpop.f32.mrf.mxu0 }
 0x821   :  { %v6920_v7 = vadd.f32 %v6919_v6, %v6878_v50 }
 0x822   :  { %v6880_v13 = vpop.f32.mrf.mxu0 }
 0x823   :  { %v6926_v29 = vadd.f32 %v6920_v7, %v6553_v24  ;;  %v6922_v11 = vadd.f32 %v6921_v21, %v6880_v13 }
 0x824   :  { %v6882_v44 = vpop.f32.mrf.mxu0 }
 0x825   :  { %v6927_v61 = vadd.f32 %v6922_v11, %v6554_v56 }
 0x826   :  { %v6883_v34 = vpop.f32.mrf.mxu0 }
 0x840   :  { %v7292_v19 = vpop.f32.mrf.mxu0 }
 0x841   :  { %v7251_v57 = vpop.f32.mrf.mxu1 }
 0x842   :  { %v7293_v28 = vadd.f32 %v7292_v19, %v7251_v57  ;;  %v7294_v36 = vpop.f32.mrf.mxu0 }
 0x843   :  { %v7253_v1 = vpop.f32.mrf.mxu1 }
 0x844   :  { %v7299_v10 = vadd.f32 %v7293_v28, %v6926_v29  ;;  %v7295_v35 = vadd.f32 %v7294_v36, %v7253_v1  ;;  %v7296_v9 = vpop.f32.mrf.mxu0 }
 0x845   :  { %v7255_v48 = vpop.f32.mrf.mxu1 }
 0x846   :  { %v7300_v40 = vadd.f32 %v7295_v35, %v6927_v61  ;;  %v7297_v4 = vpop.f32.mrf.mxu0  ;;  %v7301_v37 = vmax.f32 %v7299_v10, 0.0 }
 0x847   :  { %v7256_v38 = vpop.f32.mrf.mxu1 }
 0x848   :  { %v7302_v49 = vmax.f32 %v7300_v40, 0.0  ;;  %v7303_v51 = vpack.c.bf16 %v7301_v37, %v7301_v37 }
 0x84a   :  { %v7304_v39 = vpack.c.bf16 %v7302_v49, %v7302_v49 }
 0x84c   :  { %7472 = vmatprep.mubr.bf16.mxu0 %v7304_v39 }
 0x84d   :  { %7473 = vmatmul.mubr.bf16.vlgmr.msra.gmra.mxu0 %v7303_v51 }
 0x90d   :  { %v8509_v58 = vpop.f32.mrf.mxu0 }
 0x90f   :  { %v8510_v17 = vpop.f32.mrf.mxu0 }
 0x910   :  { %v8511_v3 = vadd.f32 %v8510_v17, %v8509_v58 }
 0x911   :  { %v8512_v52 = vpop.f32.mrf.mxu0 }
 0x912   :  { %v7475_v22 = vadd.f32 %v8511_v3, %v8026_v33 }
 0x913   :  { %v8513_v46 = vpop.f32.mrf.mxu0 }
 0x914   :  { %7480 = vst [vmem:[%s12864_s11] sm:$0xff] %v7475_v22 }
 0x915   :  { %7485 = vsyncpa [#allocation3], 1 }
 0x916   :  { %7486 = vsyncpa [#allocation5], 1 }
 0x917   :  { %7487 = vsyncpa [#allocation8], 1 }
 0x918   :  { %7488 = vsyncpa [#allocation11], 1 }
 0x919   :  { %7489 = vsyncpa [#allocation14], 1 }
 0x91a   :  { %7490 = vsyncpa [#allocation17], 1 }

</bundles_post_ra>
